<compile_context>
chip_gen: v7x
topology: tpu7x:2x2x1
jax: 0.10.0
libtpu: 0.0.40
codegen_flags: <defaults>
</compile_context>

<pallas_src>
import functools

import jax
import jax.numpy as jnp
from jax.experimental import pallas as pl
from jax.experimental.pallas import tpu as pltpu


# ---------------------------------------------------------------------------
# Fused Pallas kernel: dense layers + all GAT layers + output GAT layer
# ---------------------------------------------------------------------------

def _fused_forward_kernel(*refs, n_dense, gat_specs, use_bf16_exp):
    """refs = [adj_mask, x, (Wd, bd)*n_dense, (W_feat, W_attn, bias)*n_gat, out].

    gat_specs: static tuple of (num_heads, f_out, apply_relu) per GAT layer.
    """
    it = iter(refs)
    adj_ref = next(it)                               # (N, N) int8: nonzero iff edge u -> v
    x_ref = next(it)                                 # (N, F0) f32 node features
    dense_refs = [(next(it), next(it)) for _ in range(n_dense)]
    gat_refs = [(next(it), next(it), next(it)) for _ in range(len(gat_specs))]
    out_ref = next(it)

    n = adj_ref.shape[0]
    # Additive attention mask built ONCE inside the kernel (VPU filler, no HBM cost).
    adj_bias = jnp.where(adj_ref[...].astype(jnp.float32) > 0.0,
                         jnp.float32(0.0), jnp.float32(-1e30))        # (N, N)

    x = x_ref[...]

    # ---- initial dense layers: ReLU(x @ Wt + b) -------------------------------
    for w_ref, b_ref in dense_refs:                  # Wt: (F_in, F_out) bf16
        y = jnp.dot(x.astype(jnp.bfloat16), w_ref[...],
                    preferred_element_type=jnp.float32) + b_ref[...]
        x = jnp.maximum(y, 0.0)

    ones_col = jnp.ones((n, 1), jnp.bfloat16)        # shared softmax-denominator column

    # ---- GAT layers ------------------------------------------------------------
    for (wf_ref, wa_ref, b_ref), (heads, f_out, apply_relu) in zip(gat_refs, gat_specs):
        x_bf = x.astype(jnp.bfloat16)
        # Two lane-aligned MXU matmuls: head features and [el | er] attention scores.
        feat_cat = jnp.dot(x_bf, wf_ref[...],
                           preferred_element_type=jnp.float32)        # (N, H*F_out)
        scores = jnp.dot(x_bf, wa_ref[...],
                         preferred_element_type=jnp.float32)          # (N, 2H)
        feat_cat_bf = feat_cat.astype(jnp.bfloat16)  # cast once per layer (hoisted)
        el_all = scores[:, :heads]                   # (N, H) source scores
        er_all = scores[:, heads:2 * heads]          # (N, H) dest scores
        el_t = el_all.T                              # ONE (N,H)->(H,N) XLU transpose/layer

        aggs = []
        for h in range(heads):
            er = er_all[:, h:h + 1]                  # (N, 1)
            el_row = el_t[h:h + 1, :]                # (1, N)
            e = er + el_row                          # e[v, u] = er[v] + el[u]
            e = jnp.where(e > 0, e, 0.2 * e)         # LeakyReLU(0.2)
            e = e + adj_bias                         # single additive mask
            m = jnp.max(e, axis=-1, keepdims=True)
            z = e - m
            if use_bf16_exp:
                # v6e/v7x: bf16 EUP exp; masked entries (~ -1e30) still underflow to 0.
                p = jnp.exp(z.astype(jnp.bfloat16))
            else:
                p = jnp.exp(z).astype(jnp.bfloat16)
            # Fold the denominator into the aggregation matmul: p @ [feat_h | 1].
            feat_aug = jnp.concatenate(
                [feat_cat_bf[:, h * f_out:(h + 1) * f_out], ones_col], axis=-1)
            aggs.append(jnp.dot(p, feat_aug,
                                preferred_element_type=jnp.float32))  # (N, F_out + 1)

        denom = jnp.concatenate([a[:, f_out:f_out + 1] for a in aggs], axis=-1)  # (N, H)
        inv = pl.reciprocal(denom, approx=True)      # ONE EUP reciprocal per layer
        outs = [aggs[h][:, :f_out] * inv[:, h:h + 1] for h in range(heads)]
        y = outs[0] if heads == 1 else jnp.concatenate(outs, axis=-1)
        y = y + b_ref[...]                           # (N, H*F_out), bias f32
        if apply_relu:
            y = jnp.maximum(y, 0.0)
        x = y

    out_ref[...] = x                                 # (N, out_dim)


def _full_spec(shape):
    nd = len(shape)
    return pl.BlockSpec(shape, lambda *_: (0,) * nd)


def _device_kind():
    try:
        return jax.devices()[0].device_kind.lower()
    except Exception:
        return ""


def uncertainty_gat_forward(params, adj_mask, feat):
    """Runs the fused forward pass.  adj_mask[v, u] != 0 iff edge u -> v."""
    n = feat.shape[0]

    dense = params["dense"]                          # [(Wt bf16, b f32), ...]
    gats = list(params["gat"]) + [params["out"]]     # [(W_feat, W_attn, bias, H, F_out)]
    gat_specs = tuple(
        (heads, f_out, i < len(gats) - 1)            # ReLU on all but the output layer
        for i, (_, _, _, heads, f_out) in enumerate(gats)
    )

    operands = [adj_mask.astype(jnp.int8), feat.astype(jnp.float32)]
    for w, b in dense:
        operands += [w, b]
    for w_feat, w_attn, bias, _, _ in gats:
        operands += [w_feat, w_attn, bias]

    out_dim = gats[-1][3] * gats[-1][4]

    kind = _device_kind()
    use_bf16_exp = ("v6" in kind) or ("v7" in kind)          # not on v5e (no bf16 EUP)
    vmem_limit = (48 if "v7" in kind else 64) * 1024 * 1024  # v7x has 64 MiB physical

    kernel = functools.partial(_fused_forward_kernel, n_dense=len(dense),
                               gat_specs=gat_specs, use_bf16_exp=use_bf16_exp)
    return pl.pallas_call(
        kernel,
        out_shape=jax.ShapeDtypeStruct((n, out_dim), jnp.float32),
        in_specs=[_full_spec(a.shape) for a in operands],
        out_specs=_full_spec((n, out_dim)),
        compiler_params=pltpu.CompilerParams(vmem_limit_bytes=vmem_limit),
    )(*operands)


# ---------------------------------------------------------------------------
# Parameter construction (PyTorch/DGL layout) and packing for the kernel
# ---------------------------------------------------------------------------

def _init_linear(key, d_out, d_in):
    k1, k2 = jax.random.split(key)
    scale = (2.0 / (d_in + d_out)) ** 0.5
    w = scale * jax.random.normal(k1, (d_out, d_in), jnp.float32)   # torch Linear layout
    b = 0.01 * jax.random.normal(k2, (d_out,), jnp.float32)
    return w, b


def _init_gat(key, f_in, f_out, heads):
    k1, k2, k3, k4 = jax.random.split(key, 4)
    scale = (2.0 / (f_in + f_out)) ** 0.5
    w = scale * jax.random.normal(k1, (heads, f_out, f_in), jnp.float32)   # fc weight / head
    al = 0.1 * jax.random.normal(k2, (heads, f_out), jnp.float32)          # attn_l
    ar = 0.1 * jax.random.normal(k3, (heads, f_out), jnp.float32)          # attn_r
    b = 0.01 * jax.random.normal(k4, (heads, f_out), jnp.float32)          # bias / head
    return w, al, ar, b


def _pack_linear(w, b):
    # pre-transpose to (F_in, F_out) and pre-cast to bf16; bias stays f32 (1, F_out)
    return w.T.astype(jnp.bfloat16), b.reshape(1, -1)


def _pack_gat(w, al, ar, b):
    heads, f_out, f_in = w.shape
    # feat slab: [W_0^T | ... | W_{H-1}^T]  (F_in, H*F_out), lane-dense, bf16
    w_feat = jnp.transpose(w, (2, 0, 1)).reshape(f_in, heads * f_out).astype(jnp.bfloat16)
    # attention slab: [W^T a_l | W^T a_r]   (F_in, 2H), bf16 (kept separate from feat)
    w_el = jnp.einsum("hoi,ho->ih", w, al)                            # (F_in, H)
    w_er = jnp.einsum("hoi,ho->ih", w, ar)                            # (F_in, H)
    w_attn = jnp.concatenate([w_el, w_er], axis=1).astype(jnp.bfloat16)
    bias = b.reshape(1, heads * f_out)                                # f32
    return w_feat, w_attn, bias, heads, f_out


def build_params(key, in_dim, initial_dense_layers, heads, gat_dims, out_dim):
    raw = {"dense": [], "gat": []}
    d = in_dim
    for dim in initial_dense_layers:
        key, sub = jax.random.split(key)
        raw["dense"].append(_init_linear(sub, dim, d))
        d = dim
    last_d, last_h = d, 1
    for gd, h in zip(gat_dims, heads):
        key, sub = jax.random.split(key)
        raw["gat"].append(_init_gat(sub, last_d * last_h, gd, h))
        last_d, last_h = gd, h
    key, sub = jax.random.split(key)
    raw["out"] = _init_gat(sub, last_d * last_h, out_dim, 1)

    packed = {
        "dense": [_pack_linear(w, b) for (w, b) in raw["dense"]],
        "gat": [_pack_gat(*g) for g in raw["gat"]],
        "out": _pack_gat(*raw["out"]),
    }
    return packed, raw


# ---------------------------------------------------------------------------
# Pure-JAX reference (f32, DGL GATConv math) for a tolerance check
# ---------------------------------------------------------------------------

def reference_forward(raw, adj_mask, feat):
    def gat_layer(x, w, al, ar, b, relu):
        heads = w.shape[0]
        outs = []
        for h in range(heads):
            feat_h = x @ w[h].T
            el = feat_h @ al[h][:, None]
            er = feat_h @ ar[h][:, None]
            e = er + el.T
            e = jnp.where(e > 0, e, 0.2 * e)
            e = jnp.where(adj_mask > 0, e, -jnp.inf)
            alpha = jax.nn.softmax(e, axis=-1)
            outs.append(alpha @ feat_h + b[h])
        y = jnp.concatenate(outs, axis=-1)
        return jnp.maximum(y, 0.0) if relu else y

    x = feat
    for w, b in raw["dense"]:
        x = jnp.maximum(x @ w.T + b, 0.0)
    for (w, al, ar, b) in raw["gat"]:
        x = gat_layer(x, w, al, ar, b, True)
    w, al, ar, b = raw["out"]
    return gat_layer(x, w, al, ar, b, False)


# TODO(synk): dropout (feat_drop / attn_drop) is a no-op here (p=0.0 / eval mode);
# the optional nn.Embedding branch (num_embeddings=None) is not exercised.


if __name__ == "__main__":
    N = 128            # number of graph nodes
    IN_DIM = 32
    INITIAL_DENSE = [64]
    HEADS = [4, 4]
    GAT_DIMS = [32, 32]
    OUT_DIM = 1

    root = jax.random.PRNGKey(0)
    k_feat, k_adj, k_params = jax.random.split(root, 3)

    feat = jax.random.normal(k_feat, (N, IN_DIM), jnp.float32)

    # random sparse-ish graph with self-loops (guarantees in-degree >= 1)
    adj = jax.random.uniform(k_adj, (N, N)) < 0.1
    adj = jnp.logical_or(adj, jnp.eye(N, dtype=bool))        # adj[v, u] = edge u -> v
    adj_mask = adj.astype(jnp.int8)                          # int8 mask fed to the kernel

    params, raw = build_params(k_params, IN_DIM, INITIAL_DENSE, HEADS, GAT_DIMS, OUT_DIM)

    out = uncertainty_gat_forward(params, adj_mask, feat)
    out = jax.block_until_ready(out)
    assert out.shape == (N, OUT_DIM), out.shape
    assert bool(jnp.all(jnp.isfinite(out)))

    # tolerance check vs f32 reference (kernel uses bf16 matmuls, bf16 exp on
    # v6e/v7x, and approx reciprocal)
    ref = reference_forward(raw, adj_mask, feat)
    scale = float(jnp.maximum(1.0, jnp.max(jnp.abs(ref))))
    max_err = float(jnp.max(jnp.abs(out - ref))) / scale
    assert max_err < 0.05, f"max relative-to-scale error {max_err}"

    print("KERNEL_OK")
</pallas_src>

<mosaic_0001>
module attributes {stable_mosaic.version = 11 : i64} {
  func.func @_fused_forward_kernel(%arg0: memref<128x128xi8, #tpu.memory_space<vmem>>, %arg1: memref<128x32xf32, #tpu.memory_space<vmem>>, %arg2: memref<32x64xbf16, #tpu.memory_space<vmem>>, %arg3: memref<1x64xf32, #tpu.memory_space<vmem>>, %arg4: memref<64x128xbf16, #tpu.memory_space<vmem>>, %arg5: memref<64x8xbf16, #tpu.memory_space<vmem>>, %arg6: memref<1x128xf32, #tpu.memory_space<vmem>>, %arg7: memref<128x128xbf16, #tpu.memory_space<vmem>>, %arg8: memref<128x8xbf16, #tpu.memory_space<vmem>>, %arg9: memref<1x128xf32, #tpu.memory_space<vmem>>, %arg10: memref<128x1xbf16, #tpu.memory_space<vmem>>, %arg11: memref<128x2xbf16, #tpu.memory_space<vmem>>, %arg12: memref<1x1xf32, #tpu.memory_space<vmem>>, %arg13: memref<128x1xf32, #tpu.memory_space<vmem>>) attributes {dimension_semantics = [], scalar_prefetch = 0 : i64, scratch_operands = 0 : i64, tpu.core_type = #tpu.core_type<tc>} {
    %c0 = arith.constant 0 : index
    %c0_0 = arith.constant 0 : index
    %0 = vector.load %arg0[%c0, %c0_0] : memref<128x128xi8, #tpu.memory_space<vmem>>, vector<128x128xi8>
    %1 = arith.sitofp %0 : vector<128x128xi8> to vector<128x128xf32>
    %cst = arith.constant 0.000000e+00 : f32
    %2 = vector.broadcast %cst : f32 to vector<128x128xf32>
    %3 = arith.cmpf ogt, %1, %2 : vector<128x128xf32>
    %cst_1 = arith.constant 0.000000e+00 : f32
    %cst_2 = arith.constant -1.000000e+30 : f32
    %4 = vector.broadcast %cst_1 : f32 to vector<128x128xf32>
    %5 = vector.broadcast %cst_2 : f32 to vector<128x128xf32>
    %6 = arith.select %3, %4, %5 : vector<128x128xi1>, vector<128x128xf32>
    %c0_3 = arith.constant 0 : index
    %c0_4 = arith.constant 0 : index
    %7 = vector.load %arg1[%c0_3, %c0_4] : memref<128x32xf32, #tpu.memory_space<vmem>>, vector<128x32xf32>
    %8 = arith.truncf %7 : vector<128x32xf32> to vector<128x32xbf16>
    %c0_5 = arith.constant 0 : index
    %c0_6 = arith.constant 0 : index
    %9 = vector.load %arg2[%c0_5, %c0_6] : memref<32x64xbf16, #tpu.memory_space<vmem>>, vector<32x64xbf16>
    %cst_7 = arith.constant dense<0.000000e+00> : vector<128x64xf32>
    %10 = tpu.matmul %8, %9, %cst_7 {dimension_numbers = #tpu.dot_dimension_numbers<[1], [0], [0], [1], [0, 0, 1, 1], [], []>} : vector<128x32xbf16>, vector<32x64xbf16>, vector<128x64xf32> -> vector<128x64xf32>
    %c0_8 = arith.constant 0 : index
    %c0_9 = arith.constant 0 : index
    %11 = vector.load %arg3[%c0_8, %c0_9] : memref<1x64xf32, #tpu.memory_space<vmem>>, vector<1x64xf32>
    %12 = vector.broadcast %11 : vector<1x64xf32> to vector<128x64xf32>
    %13 = arith.addf %10, %12 : vector<128x64xf32>
    %cst_10 = arith.constant 0.000000e+00 : f32
    %14 = vector.broadcast %cst_10 : f32 to vector<128x64xf32>
    %15 = arith.maximumf %13, %14 : vector<128x64xf32>
    %cst_11 = arith.constant 1.000000e+00 : bf16
    %16 = vector.broadcast %cst_11 : bf16 to vector<128x1xbf16>
    %17 = arith.truncf %15 : vector<128x64xf32> to vector<128x64xbf16>
    %c0_12 = arith.constant 0 : index
    %c0_13 = arith.constant 0 : index
    %18 = vector.load %arg4[%c0_12, %c0_13] : memref<64x128xbf16, #tpu.memory_space<vmem>>, vector<64x128xbf16>
    %cst_14 = arith.constant dense<0.000000e+00> : vector<128x128xf32>
    %19 = tpu.matmul %17, %18, %cst_14 {dimension_numbers = #tpu.dot_dimension_numbers<[1], [0], [0], [1], [0, 0, 1, 1], [], []>} : vector<128x64xbf16>, vector<64x128xbf16>, vector<128x128xf32> -> vector<128x128xf32>
    %c0_15 = arith.constant 0 : index
    %c0_16 = arith.constant 0 : index
    %20 = vector.load %arg5[%c0_15, %c0_16] : memref<64x8xbf16, #tpu.memory_space<vmem>>, vector<64x8xbf16>
    %cst_17 = arith.constant dense<0.000000e+00> : vector<128x8xf32>
    %21 = tpu.matmul %17, %20, %cst_17 {dimension_numbers = #tpu.dot_dimension_numbers<[1], [0], [0], [1], [0, 0, 1, 1], [], []>} : vector<128x64xbf16>, vector<64x8xbf16>, vector<128x8xf32> -> vector<128x8xf32>
    %22 = arith.truncf %19 : vector<128x128xf32> to vector<128x128xbf16>
    %23 = vector.extract_strided_slice %21 {offsets = [0, 0], sizes = [128, 4], strides = [1, 1]} : vector<128x8xf32> to vector<128x4xf32>
    %24 = vector.extract_strided_slice %21 {offsets = [0, 4], sizes = [128, 4], strides = [1, 1]} : vector<128x8xf32> to vector<128x4xf32>
    %25 = tpu.transpose %23, [1, 0] : vector<128x4xf32> -> vector<4x128xf32>
    %26 = vector.extract_strided_slice %24 {offsets = [0, 0], sizes = [128, 1], strides = [1, 1]} : vector<128x4xf32> to vector<128x1xf32>
    %27 = vector.extract_strided_slice %25 {offsets = [0, 0], sizes = [1, 128], strides = [1, 1]} : vector<4x128xf32> to vector<1x128xf32>
    %28 = vector.broadcast %26 : vector<128x1xf32> to vector<128x128xf32>
    %29 = vector.broadcast %27 : vector<1x128xf32> to vector<128x128xf32>
    %30 = arith.addf %28, %29 : vector<128x128xf32>
    %cst_18 = arith.constant 0.000000e+00 : f32
    %31 = vector.broadcast %cst_18 : f32 to vector<128x128xf32>
    %32 = arith.cmpf ogt, %30, %31 : vector<128x128xf32>
    %cst_19 = arith.constant 2.000000e-01 : f32
    %33 = vector.broadcast %cst_19 : f32 to vector<128x128xf32>
    %34 = arith.mulf %33, %30 : vector<128x128xf32>
    %35 = arith.select %32, %30, %34 : vector<128x128xi1>, vector<128x128xf32>
    %36 = arith.addf %35, %6 : vector<128x128xf32>
    %cst_20 = arith.constant dense<0xFF800000> : vector<128xf32>
    %37 = vector.multi_reduction <maximumf>, %36, %cst_20 [1] : vector<128x128xf32> to vector<128xf32>
    %38 = vector.shape_cast %37 : vector<128xf32> to vector<128x1xf32>
    %39 = vector.broadcast %38 : vector<128x1xf32> to vector<128x128xf32>
    %40 = arith.subf %36, %39 : vector<128x128xf32>
    %41 = math.exp %40 : vector<128x128xf32>
    %42 = arith.truncf %41 : vector<128x128xf32> to vector<128x128xbf16>
    %43 = vector.extract_strided_slice %22 {offsets = [0, 0], sizes = [128, 32], strides = [1, 1]} : vector<128x128xbf16> to vector<128x32xbf16>
    %44 = tpu.concatenate %43, %16 in 1 : vector<128x32xbf16>, vector<128x1xbf16> -> vector<128x33xbf16>
    %cst_21 = arith.constant dense<0.000000e+00> : vector<128x33xf32>
    %45 = tpu.matmul %42, %44, %cst_21 {dimension_numbers = #tpu.dot_dimension_numbers<[1], [0], [0], [1], [0, 0, 1, 1], [], []>} : vector<128x128xbf16>, vector<128x33xbf16>, vector<128x33xf32> -> vector<128x33xf32>
    %46 = vector.extract_strided_slice %24 {offsets = [0, 1], sizes = [128, 1], strides = [1, 1]} : vector<128x4xf32> to vector<128x1xf32>
    %47 = vector.extract_strided_slice %25 {offsets = [1, 0], sizes = [1, 128], strides = [1, 1]} : vector<4x128xf32> to vector<1x128xf32>
    %48 = vector.broadcast %46 : vector<128x1xf32> to vector<128x128xf32>
    %49 = vector.broadcast %47 : vector<1x128xf32> to vector<128x128xf32>
    %50 = arith.addf %48, %49 : vector<128x128xf32>
    %cst_22 = arith.constant 0.000000e+00 : f32
    %51 = vector.broadcast %cst_22 : f32 to vector<128x128xf32>
    %52 = arith.cmpf ogt, %50, %51 : vector<128x128xf32>
    %cst_23 = arith.constant 2.000000e-01 : f32
    %53 = vector.broadcast %cst_23 : f32 to vector<128x128xf32>
    %54 = arith.mulf %53, %50 : vector<128x128xf32>
    %55 = arith.select %52, %50, %54 : vector<128x128xi1>, vector<128x128xf32>
    %56 = arith.addf %55, %6 : vector<128x128xf32>
    %cst_24 = arith.constant dense<0xFF800000> : vector<128xf32>
    %57 = vector.multi_reduction <maximumf>, %56, %cst_24 [1] : vector<128x128xf32> to vector<128xf32>
    %58 = vector.shape_cast %57 : vector<128xf32> to vector<128x1xf32>
    %59 = vector.broadcast %58 : vector<128x1xf32> to vector<128x128xf32>
    %60 = arith.subf %56, %59 : vector<128x128xf32>
    %61 = math.exp %60 : vector<128x128xf32>
    %62 = arith.truncf %61 : vector<128x128xf32> to vector<128x128xbf16>
    %63 = vector.extract_strided_slice %22 {offsets = [0, 32], sizes = [128, 32], strides = [1, 1]} : vector<128x128xbf16> to vector<128x32xbf16>
    %64 = tpu.concatenate %63, %16 in 1 : vector<128x32xbf16>, vector<128x1xbf16> -> vector<128x33xbf16>
    %cst_25 = arith.constant dense<0.000000e+00> : vector<128x33xf32>
    %65 = tpu.matmul %62, %64, %cst_25 {dimension_numbers = #tpu.dot_dimension_numbers<[1], [0], [0], [1], [0, 0, 1, 1], [], []>} : vector<128x128xbf16>, vector<128x33xbf16>, vector<128x33xf32> -> vector<128x33xf32>
    %66 = vector.extract_strided_slice %24 {offsets = [0, 2], sizes = [128, 1], strides = [1, 1]} : vector<128x4xf32> to vector<128x1xf32>
    %67 = vector.extract_strided_slice %25 {offsets = [2, 0], sizes = [1, 128], strides = [1, 1]} : vector<4x128xf32> to vector<1x128xf32>
    %68 = vector.broadcast %66 : vector<128x1xf32> to vector<128x128xf32>
    %69 = vector.broadcast %67 : vector<1x128xf32> to vector<128x128xf32>
    %70 = arith.addf %68, %69 : vector<128x128xf32>
    %cst_26 = arith.constant 0.000000e+00 : f32
    %71 = vector.broadcast %cst_26 : f32 to vector<128x128xf32>
    %72 = arith.cmpf ogt, %70, %71 : vector<128x128xf32>
    %cst_27 = arith.constant 2.000000e-01 : f32
    %73 = vector.broadcast %cst_27 : f32 to vector<128x128xf32>
    %74 = arith.mulf %73, %70 : vector<128x128xf32>
    %75 = arith.select %72, %70, %74 : vector<128x128xi1>, vector<128x128xf32>
    %76 = arith.addf %75, %6 : vector<128x128xf32>
    %cst_28 = arith.constant dense<0xFF800000> : vector<128xf32>
    %77 = vector.multi_reduction <maximumf>, %76, %cst_28 [1] : vector<128x128xf32> to vector<128xf32>
    %78 = vector.shape_cast %77 : vector<128xf32> to vector<128x1xf32>
    %79 = vector.broadcast %78 : vector<128x1xf32> to vector<128x128xf32>
    %80 = arith.subf %76, %79 : vector<128x128xf32>
    %81 = math.exp %80 : vector<128x128xf32>
    %82 = arith.truncf %81 : vector<128x128xf32> to vector<128x128xbf16>
    %83 = vector.extract_strided_slice %22 {offsets = [0, 64], sizes = [128, 32], strides = [1, 1]} : vector<128x128xbf16> to vector<128x32xbf16>
    %84 = tpu.concatenate %83, %16 in 1 : vector<128x32xbf16>, vector<128x1xbf16> -> vector<128x33xbf16>
    %cst_29 = arith.constant dense<0.000000e+00> : vector<128x33xf32>
    %85 = tpu.matmul %82, %84, %cst_29 {dimension_numbers = #tpu.dot_dimension_numbers<[1], [0], [0], [1], [0, 0, 1, 1], [], []>} : vector<128x128xbf16>, vector<128x33xbf16>, vector<128x33xf32> -> vector<128x33xf32>
    %86 = vector.extract_strided_slice %24 {offsets = [0, 3], sizes = [128, 1], strides = [1, 1]} : vector<128x4xf32> to vector<128x1xf32>
    %87 = vector.extract_strided_slice %25 {offsets = [3, 0], sizes = [1, 128], strides = [1, 1]} : vector<4x128xf32> to vector<1x128xf32>
    %88 = vector.broadcast %86 : vector<128x1xf32> to vector<128x128xf32>
    %89 = vector.broadcast %87 : vector<1x128xf32> to vector<128x128xf32>
    %90 = arith.addf %88, %89 : vector<128x128xf32>
    %cst_30 = arith.constant 0.000000e+00 : f32
    %91 = vector.broadcast %cst_30 : f32 to vector<128x128xf32>
    %92 = arith.cmpf ogt, %90, %91 : vector<128x128xf32>
    %cst_31 = arith.constant 2.000000e-01 : f32
    %93 = vector.broadcast %cst_31 : f32 to vector<128x128xf32>
    %94 = arith.mulf %93, %90 : vector<128x128xf32>
    %95 = arith.select %92, %90, %94 : vector<128x128xi1>, vector<128x128xf32>
    %96 = arith.addf %95, %6 : vector<128x128xf32>
    %cst_32 = arith.constant dense<0xFF800000> : vector<128xf32>
    %97 = vector.multi_reduction <maximumf>, %96, %cst_32 [1] : vector<128x128xf32> to vector<128xf32>
    %98 = vector.shape_cast %97 : vector<128xf32> to vector<128x1xf32>
    %99 = vector.broadcast %98 : vector<128x1xf32> to vector<128x128xf32>
    %100 = arith.subf %96, %99 : vector<128x128xf32>
    %101 = math.exp %100 : vector<128x128xf32>
    %102 = arith.truncf %101 : vector<128x128xf32> to vector<128x128xbf16>
    %103 = vector.extract_strided_slice %22 {offsets = [0, 96], sizes = [128, 32], strides = [1, 1]} : vector<128x128xbf16> to vector<128x32xbf16>
    %104 = tpu.concatenate %103, %16 in 1 : vector<128x32xbf16>, vector<128x1xbf16> -> vector<128x33xbf16>
    %cst_33 = arith.constant dense<0.000000e+00> : vector<128x33xf32>
    %105 = tpu.matmul %102, %104, %cst_33 {dimension_numbers = #tpu.dot_dimension_numbers<[1], [0], [0], [1], [0, 0, 1, 1], [], []>} : vector<128x128xbf16>, vector<128x33xbf16>, vector<128x33xf32> -> vector<128x33xf32>
    %106 = vector.extract_strided_slice %45 {offsets = [0, 32], sizes = [128, 1], strides = [1, 1]} : vector<128x33xf32> to vector<128x1xf32>
    %107 = vector.extract_strided_slice %65 {offsets = [0, 32], sizes = [128, 1], strides = [1, 1]} : vector<128x33xf32> to vector<128x1xf32>
    %108 = vector.extract_strided_slice %85 {offsets = [0, 32], sizes = [128, 1], strides = [1, 1]} : vector<128x33xf32> to vector<128x1xf32>
    %109 = vector.extract_strided_slice %105 {offsets = [0, 32], sizes = [128, 1], strides = [1, 1]} : vector<128x33xf32> to vector<128x1xf32>
    %110 = tpu.concatenate %106, %107, %108, %109 in 1 : vector<128x1xf32>, vector<128x1xf32>, vector<128x1xf32>, vector<128x1xf32> -> vector<128x4xf32>
    %111 = tpu.reciprocal %110 {approx = true} : vector<128x4xf32> -> vector<128x4xf32>
    %112 = vector.extract_strided_slice %45 {offsets = [0, 0], sizes = [128, 32], strides = [1, 1]} : vector<128x33xf32> to vector<128x32xf32>
    %113 = vector.extract_strided_slice %111 {offsets = [0, 0], sizes = [128, 1], strides = [1, 1]} : vector<128x4xf32> to vector<128x1xf32>
    %114 = vector.broadcast %113 : vector<128x1xf32> to vector<128x32xf32>
    %115 = arith.mulf %112, %114 : vector<128x32xf32>
    %116 = vector.extract_strided_slice %65 {offsets = [0, 0], sizes = [128, 32], strides = [1, 1]} : vector<128x33xf32> to vector<128x32xf32>
    %117 = vector.extract_strided_slice %111 {offsets = [0, 1], sizes = [128, 1], strides = [1, 1]} : vector<128x4xf32> to vector<128x1xf32>
    %118 = vector.broadcast %117 : vector<128x1xf32> to vector<128x32xf32>
    %119 = arith.mulf %116, %118 : vector<128x32xf32>
    %120 = vector.extract_strided_slice %85 {offsets = [0, 0], sizes = [128, 32], strides = [1, 1]} : vector<128x33xf32> to vector<128x32xf32>
    %121 = vector.extract_strided_slice %111 {offsets = [0, 2], sizes = [128, 1], strides = [1, 1]} : vector<128x4xf32> to vector<128x1xf32>
    %122 = vector.broadcast %121 : vector<128x1xf32> to vector<128x32xf32>
    %123 = arith.mulf %120, %122 : vector<128x32xf32>
    %124 = vector.extract_strided_slice %105 {offsets = [0, 0], sizes = [128, 32], strides = [1, 1]} : vector<128x33xf32> to vector<128x32xf32>
    %125 = vector.extract_strided_slice %111 {offsets = [0, 3], sizes = [128, 1], strides = [1, 1]} : vector<128x4xf32> to vector<128x1xf32>
    %126 = vector.broadcast %125 : vector<128x1xf32> to vector<128x32xf32>
    %127 = arith.mulf %124, %126 : vector<128x32xf32>
    %128 = tpu.concatenate %115, %119, %123, %127 in 1 : vector<128x32xf32>, vector<128x32xf32>, vector<128x32xf32>, vector<128x32xf32> -> vector<128x128xf32>
    %c0_34 = arith.constant 0 : index
    %c0_35 = arith.constant 0 : index
    %129 = vector.load %arg6[%c0_34, %c0_35] : memref<1x128xf32, #tpu.memory_space<vmem>>, vector<1x128xf32>
    %130 = vector.broadcast %129 : vector<1x128xf32> to vector<128x128xf32>
    %131 = arith.addf %128, %130 : vector<128x128xf32>
    %cst_36 = arith.constant 0.000000e+00 : f32
    %132 = vector.broadcast %cst_36 : f32 to vector<128x128xf32>
    %133 = arith.maximumf %131, %132 : vector<128x128xf32>
    %134 = arith.truncf %133 : vector<128x128xf32> to vector<128x128xbf16>
    %c0_37 = arith.constant 0 : index
    %c0_38 = arith.constant 0 : index
    %135 = vector.load %arg7[%c0_37, %c0_38] : memref<128x128xbf16, #tpu.memory_space<vmem>>, vector<128x128xbf16>
    %cst_39 = arith.constant dense<0.000000e+00> : vector<128x128xf32>
    %136 = tpu.matmul %134, %135, %cst_39 {dimension_numbers = #tpu.dot_dimension_numbers<[1], [0], [0], [1], [0, 0, 1, 1], [], []>} : vector<128x128xbf16>, vector<128x128xbf16>, vector<128x128xf32> -> vector<128x128xf32>
    %c0_40 = arith.constant 0 : index
    %c0_41 = arith.constant 0 : index
    %137 = vector.load %arg8[%c0_40, %c0_41] : memref<128x8xbf16, #tpu.memory_space<vmem>>, vector<128x8xbf16>
    %cst_42 = arith.constant dense<0.000000e+00> : vector<128x8xf32>
    %138 = tpu.matmul %134, %137, %cst_42 {dimension_numbers = #tpu.dot_dimension_numbers<[1], [0], [0], [1], [0, 0, 1, 1], [], []>} : vector<128x128xbf16>, vector<128x8xbf16>, vector<128x8xf32> -> vector<128x8xf32>
    %139 = arith.truncf %136 : vector<128x128xf32> to vector<128x128xbf16>
    %140 = vector.extract_strided_slice %138 {offsets = [0, 0], sizes = [128, 4], strides = [1, 1]} : vector<128x8xf32> to vector<128x4xf32>
    %141 = vector.extract_strided_slice %138 {offsets = [0, 4], sizes = [128, 4], strides = [1, 1]} : vector<128x8xf32> to vector<128x4xf32>
    %142 = tpu.transpose %140, [1, 0] : vector<128x4xf32> -> vector<4x128xf32>
    %143 = vector.extract_strided_slice %141 {offsets = [0, 0], sizes = [128, 1], strides = [1, 1]} : vector<128x4xf32> to vector<128x1xf32>
    %144 = vector.extract_strided_slice %142 {offsets = [0, 0], sizes = [1, 128], strides = [1, 1]} : vector<4x128xf32> to vector<1x128xf32>
    %145 = vector.broadcast %143 : vector<128x1xf32> to vector<128x128xf32>
    %146 = vector.broadcast %144 : vector<1x128xf32> to vector<128x128xf32>
    %147 = arith.addf %145, %146 : vector<128x128xf32>
    %cst_43 = arith.constant 0.000000e+00 : f32
    %148 = vector.broadcast %cst_43 : f32 to vector<128x128xf32>
    %149 = arith.cmpf ogt, %147, %148 : vector<128x128xf32>
    %cst_44 = arith.constant 2.000000e-01 : f32
    %150 = vector.broadcast %cst_44 : f32 to vector<128x128xf32>
    %151 = arith.mulf %150, %147 : vector<128x128xf32>
    %152 = arith.select %149, %147, %151 : vector<128x128xi1>, vector<128x128xf32>
    %153 = arith.addf %152, %6 : vector<128x128xf32>
    %cst_45 = arith.constant dense<0xFF800000> : vector<128xf32>
    %154 = vector.multi_reduction <maximumf>, %153, %cst_45 [1] : vector<128x128xf32> to vector<128xf32>
    %155 = vector.shape_cast %154 : vector<128xf32> to vector<128x1xf32>
    %156 = vector.broadcast %155 : vector<128x1xf32> to vector<128x128xf32>
    %157 = arith.subf %153, %156 : vector<128x128xf32>
    %158 = math.exp %157 : vector<128x128xf32>
    %159 = arith.truncf %158 : vector<128x128xf32> to vector<128x128xbf16>
    %160 = vector.extract_strided_slice %139 {offsets = [0, 0], sizes = [128, 32], strides = [1, 1]} : vector<128x128xbf16> to vector<128x32xbf16>
    %161 = tpu.concatenate %160, %16 in 1 : vector<128x32xbf16>, vector<128x1xbf16> -> vector<128x33xbf16>
    %cst_46 = arith.constant dense<0.000000e+00> : vector<128x33xf32>
    %162 = tpu.matmul %159, %161, %cst_46 {dimension_numbers = #tpu.dot_dimension_numbers<[1], [0], [0], [1], [0, 0, 1, 1], [], []>} : vector<128x128xbf16>, vector<128x33xbf16>, vector<128x33xf32> -> vector<128x33xf32>
    %163 = vector.extract_strided_slice %141 {offsets = [0, 1], sizes = [128, 1], strides = [1, 1]} : vector<128x4xf32> to vector<128x1xf32>
    %164 = vector.extract_strided_slice %142 {offsets = [1, 0], sizes = [1, 128], strides = [1, 1]} : vector<4x128xf32> to vector<1x128xf32>
    %165 = vector.broadcast %163 : vector<128x1xf32> to vector<128x128xf32>
    %166 = vector.broadcast %164 : vector<1x128xf32> to vector<128x128xf32>
    %167 = arith.addf %165, %166 : vector<128x128xf32>
    %cst_47 = arith.constant 0.000000e+00 : f32
    %168 = vector.broadcast %cst_47 : f32 to vector<128x128xf32>
    %169 = arith.cmpf ogt, %167, %168 : vector<128x128xf32>
    %cst_48 = arith.constant 2.000000e-01 : f32
    %170 = vector.broadcast %cst_48 : f32 to vector<128x128xf32>
    %171 = arith.mulf %170, %167 : vector<128x128xf32>
    %172 = arith.select %169, %167, %171 : vector<128x128xi1>, vector<128x128xf32>
    %173 = arith.addf %172, %6 : vector<128x128xf32>
    %cst_49 = arith.constant dense<0xFF800000> : vector<128xf32>
    %174 = vector.multi_reduction <maximumf>, %173, %cst_49 [1] : vector<128x128xf32> to vector<128xf32>
    %175 = vector.shape_cast %174 : vector<128xf32> to vector<128x1xf32>
    %176 = vector.broadcast %175 : vector<128x1xf32> to vector<128x128xf32>
    %177 = arith.subf %173, %176 : vector<128x128xf32>
    %178 = math.exp %177 : vector<128x128xf32>
    %179 = arith.truncf %178 : vector<128x128xf32> to vector<128x128xbf16>
    %180 = vector.extract_strided_slice %139 {offsets = [0, 32], sizes = [128, 32], strides = [1, 1]} : vector<128x128xbf16> to vector<128x32xbf16>
    %181 = tpu.concatenate %180, %16 in 1 : vector<128x32xbf16>, vector<128x1xbf16> -> vector<128x33xbf16>
    %cst_50 = arith.constant dense<0.000000e+00> : vector<128x33xf32>
    %182 = tpu.matmul %179, %181, %cst_50 {dimension_numbers = #tpu.dot_dimension_numbers<[1], [0], [0], [1], [0, 0, 1, 1], [], []>} : vector<128x128xbf16>, vector<128x33xbf16>, vector<128x33xf32> -> vector<128x33xf32>
    %183 = vector.extract_strided_slice %141 {offsets = [0, 2], sizes = [128, 1], strides = [1, 1]} : vector<128x4xf32> to vector<128x1xf32>
    %184 = vector.extract_strided_slice %142 {offsets = [2, 0], sizes = [1, 128], strides = [1, 1]} : vector<4x128xf32> to vector<1x128xf32>
    %185 = vector.broadcast %183 : vector<128x1xf32> to vector<128x128xf32>
    %186 = vector.broadcast %184 : vector<1x128xf32> to vector<128x128xf32>
    %187 = arith.addf %185, %186 : vector<128x128xf32>
    %cst_51 = arith.constant 0.000000e+00 : f32
    %188 = vector.broadcast %cst_51 : f32 to vector<128x128xf32>
    %189 = arith.cmpf ogt, %187, %188 : vector<128x128xf32>
    %cst_52 = arith.constant 2.000000e-01 : f32
    %190 = vector.broadcast %cst_52 : f32 to vector<128x128xf32>
    %191 = arith.mulf %190, %187 : vector<128x128xf32>
    %192 = arith.select %189, %187, %191 : vector<128x128xi1>, vector<128x128xf32>
    %193 = arith.addf %192, %6 : vector<128x128xf32>
    %cst_53 = arith.constant dense<0xFF800000> : vector<128xf32>
    %194 = vector.multi_reduction <maximumf>, %193, %cst_53 [1] : vector<128x128xf32> to vector<128xf32>
    %195 = vector.shape_cast %194 : vector<128xf32> to vector<128x1xf32>
    %196 = vector.broadcast %195 : vector<128x1xf32> to vector<128x128xf32>
    %197 = arith.subf %193, %196 : vector<128x128xf32>
    %198 = math.exp %197 : vector<128x128xf32>
    %199 = arith.truncf %198 : vector<128x128xf32> to vector<128x128xbf16>
    %200 = vector.extract_strided_slice %139 {offsets = [0, 64], sizes = [128, 32], strides = [1, 1]} : vector<128x128xbf16> to vector<128x32xbf16>
    %201 = tpu.concatenate %200, %16 in 1 : vector<128x32xbf16>, vector<128x1xbf16> -> vector<128x33xbf16>
    %cst_54 = arith.constant dense<0.000000e+00> : vector<128x33xf32>
    %202 = tpu.matmul %199, %201, %cst_54 {dimension_numbers = #tpu.dot_dimension_numbers<[1], [0], [0], [1], [0, 0, 1, 1], [], []>} : vector<128x128xbf16>, vector<128x33xbf16>, vector<128x33xf32> -> vector<128x33xf32>
    %203 = vector.extract_strided_slice %141 {offsets = [0, 3], sizes = [128, 1], strides = [1, 1]} : vector<128x4xf32> to vector<128x1xf32>
    %204 = vector.extract_strided_slice %142 {offsets = [3, 0], sizes = [1, 128], strides = [1, 1]} : vector<4x128xf32> to vector<1x128xf32>
    %205 = vector.broadcast %203 : vector<128x1xf32> to vector<128x128xf32>
    %206 = vector.broadcast %204 : vector<1x128xf32> to vector<128x128xf32>
    %207 = arith.addf %205, %206 : vector<128x128xf32>
    %cst_55 = arith.constant 0.000000e+00 : f32
    %208 = vector.broadcast %cst_55 : f32 to vector<128x128xf32>
    %209 = arith.cmpf ogt, %207, %208 : vector<128x128xf32>
    %cst_56 = arith.constant 2.000000e-01 : f32
    %210 = vector.broadcast %cst_56 : f32 to vector<128x128xf32>
    %211 = arith.mulf %210, %207 : vector<128x128xf32>
    %212 = arith.select %209, %207, %211 : vector<128x128xi1>, vector<128x128xf32>
    %213 = arith.addf %212, %6 : vector<128x128xf32>
    %cst_57 = arith.constant dense<0xFF800000> : vector<128xf32>
    %214 = vector.multi_reduction <maximumf>, %213, %cst_57 [1] : vector<128x128xf32> to vector<128xf32>
    %215 = vector.shape_cast %214 : vector<128xf32> to vector<128x1xf32>
    %216 = vector.broadcast %215 : vector<128x1xf32> to vector<128x128xf32>
    %217 = arith.subf %213, %216 : vector<128x128xf32>
    %218 = math.exp %217 : vector<128x128xf32>
    %219 = arith.truncf %218 : vector<128x128xf32> to vector<128x128xbf16>
    %220 = vector.extract_strided_slice %139 {offsets = [0, 96], sizes = [128, 32], strides = [1, 1]} : vector<128x128xbf16> to vector<128x32xbf16>
    %221 = tpu.concatenate %220, %16 in 1 : vector<128x32xbf16>, vector<128x1xbf16> -> vector<128x33xbf16>
    %cst_58 = arith.constant dense<0.000000e+00> : vector<128x33xf32>
    %222 = tpu.matmul %219, %221, %cst_58 {dimension_numbers = #tpu.dot_dimension_numbers<[1], [0], [0], [1], [0, 0, 1, 1], [], []>} : vector<128x128xbf16>, vector<128x33xbf16>, vector<128x33xf32> -> vector<128x33xf32>
    %223 = vector.extract_strided_slice %162 {offsets = [0, 32], sizes = [128, 1], strides = [1, 1]} : vector<128x33xf32> to vector<128x1xf32>
    %224 = vector.extract_strided_slice %182 {offsets = [0, 32], sizes = [128, 1], strides = [1, 1]} : vector<128x33xf32> to vector<128x1xf32>
    %225 = vector.extract_strided_slice %202 {offsets = [0, 32], sizes = [128, 1], strides = [1, 1]} : vector<128x33xf32> to vector<128x1xf32>
    %226 = vector.extract_strided_slice %222 {offsets = [0, 32], sizes = [128, 1], strides = [1, 1]} : vector<128x33xf32> to vector<128x1xf32>
    %227 = tpu.concatenate %223, %224, %225, %226 in 1 : vector<128x1xf32>, vector<128x1xf32>, vector<128x1xf32>, vector<128x1xf32> -> vector<128x4xf32>
    %228 = tpu.reciprocal %227 {approx = true} : vector<128x4xf32> -> vector<128x4xf32>
    %229 = vector.extract_strided_slice %162 {offsets = [0, 0], sizes = [128, 32], strides = [1, 1]} : vector<128x33xf32> to vector<128x32xf32>
    %230 = vector.extract_strided_slice %228 {offsets = [0, 0], sizes = [128, 1], strides = [1, 1]} : vector<128x4xf32> to vector<128x1xf32>
    %231 = vector.broadcast %230 : vector<128x1xf32> to vector<128x32xf32>
    %232 = arith.mulf %229, %231 : vector<128x32xf32>
    %233 = vector.extract_strided_slice %182 {offsets = [0, 0], sizes = [128, 32], strides = [1, 1]} : vector<128x33xf32> to vector<128x32xf32>
    %234 = vector.extract_strided_slice %228 {offsets = [0, 1], sizes = [128, 1], strides = [1, 1]} : vector<128x4xf32> to vector<128x1xf32>
    %235 = vector.broadcast %234 : vector<128x1xf32> to vector<128x32xf32>
    %236 = arith.mulf %233, %235 : vector<128x32xf32>
    %237 = vector.extract_strided_slice %202 {offsets = [0, 0], sizes = [128, 32], strides = [1, 1]} : vector<128x33xf32> to vector<128x32xf32>
    %238 = vector.extract_strided_slice %228 {offsets = [0, 2], sizes = [128, 1], strides = [1, 1]} : vector<128x4xf32> to vector<128x1xf32>
    %239 = vector.broadcast %238 : vector<128x1xf32> to vector<128x32xf32>
    %240 = arith.mulf %237, %239 : vector<128x32xf32>
    %241 = vector.extract_strided_slice %222 {offsets = [0, 0], sizes = [128, 32], strides = [1, 1]} : vector<128x33xf32> to vector<128x32xf32>
    %242 = vector.extract_strided_slice %228 {offsets = [0, 3], sizes = [128, 1], strides = [1, 1]} : vector<128x4xf32> to vector<128x1xf32>
    %243 = vector.broadcast %242 : vector<128x1xf32> to vector<128x32xf32>
    %244 = arith.mulf %241, %243 : vector<128x32xf32>
    %245 = tpu.concatenate %232, %236, %240, %244 in 1 : vector<128x32xf32>, vector<128x32xf32>, vector<128x32xf32>, vector<128x32xf32> -> vector<128x128xf32>
    %c0_59 = arith.constant 0 : index
    %c0_60 = arith.constant 0 : index
    %246 = vector.load %arg9[%c0_59, %c0_60] : memref<1x128xf32, #tpu.memory_space<vmem>>, vector<1x128xf32>
    %247 = vector.broadcast %246 : vector<1x128xf32> to vector<128x128xf32>
    %248 = arith.addf %245, %247 : vector<128x128xf32>
    %cst_61 = arith.constant 0.000000e+00 : f32
    %249 = vector.broadcast %cst_61 : f32 to vector<128x128xf32>
    %250 = arith.maximumf %248, %249 : vector<128x128xf32>
    %251 = arith.truncf %250 : vector<128x128xf32> to vector<128x128xbf16>
    %c0_62 = arith.constant 0 : index
    %c0_63 = arith.constant 0 : index
    %252 = vector.load %arg10[%c0_62, %c0_63] : memref<128x1xbf16, #tpu.memory_space<vmem>>, vector<128x1xbf16>
    %cst_64 = arith.constant dense<0.000000e+00> : vector<128x1xf32>
    %253 = tpu.matmul %251, %252, %cst_64 {dimension_numbers = #tpu.dot_dimension_numbers<[1], [0], [0], [1], [0, 0, 1, 1], [], []>} : vector<128x128xbf16>, vector<128x1xbf16>, vector<128x1xf32> -> vector<128x1xf32>
    %c0_65 = arith.constant 0 : index
    %c0_66 = arith.constant 0 : index
    %254 = vector.load %arg11[%c0_65, %c0_66] : memref<128x2xbf16, #tpu.memory_space<vmem>>, vector<128x2xbf16>
    %cst_67 = arith.constant dense<0.000000e+00> : vector<128x2xf32>
    %255 = tpu.matmul %251, %254, %cst_67 {dimension_numbers = #tpu.dot_dimension_numbers<[1], [0], [0], [1], [0, 0, 1, 1], [], []>} : vector<128x128xbf16>, vector<128x2xbf16>, vector<128x2xf32> -> vector<128x2xf32>
    %256 = arith.truncf %253 : vector<128x1xf32> to vector<128x1xbf16>
    %257 = vector.extract_strided_slice %255 {offsets = [0, 0], sizes = [128, 1], strides = [1, 1]} : vector<128x2xf32> to vector<128x1xf32>
    %258 = vector.extract_strided_slice %255 {offsets = [0, 1], sizes = [128, 1], strides = [1, 1]} : vector<128x2xf32> to vector<128x1xf32>
    %259 = tpu.transpose %257, [1, 0] : vector<128x1xf32> -> vector<1x128xf32>
    %260 = vector.broadcast %258 : vector<128x1xf32> to vector<128x128xf32>
    %261 = vector.broadcast %259 : vector<1x128xf32> to vector<128x128xf32>
    %262 = arith.addf %260, %261 : vector<128x128xf32>
    %cst_68 = arith.constant 0.000000e+00 : f32
    %263 = vector.broadcast %cst_68 : f32 to vector<128x128xf32>
    %264 = arith.cmpf ogt, %262, %263 : vector<128x128xf32>
    %cst_69 = arith.constant 2.000000e-01 : f32
    %265 = vector.broadcast %cst_69 : f32 to vector<128x128xf32>
    %266 = arith.mulf %265, %262 : vector<128x128xf32>
    %267 = arith.select %264, %262, %266 : vector<128x128xi1>, vector<128x128xf32>
    %268 = arith.addf %267, %6 : vector<128x128xf32>
    %cst_70 = arith.constant dense<0xFF800000> : vector<128xf32>
    %269 = vector.multi_reduction <maximumf>, %268, %cst_70 [1] : vector<128x128xf32> to vector<128xf32>
    %270 = vector.shape_cast %269 : vector<128xf32> to vector<128x1xf32>
    %271 = vector.broadcast %270 : vector<128x1xf32> to vector<128x128xf32>
    %272 = arith.subf %268, %271 : vector<128x128xf32>
    %273 = math.exp %272 : vector<128x128xf32>
    %274 = arith.truncf %273 : vector<128x128xf32> to vector<128x128xbf16>
    %275 = tpu.concatenate %256, %16 in 1 : vector<128x1xbf16>, vector<128x1xbf16> -> vector<128x2xbf16>
    %cst_71 = arith.constant dense<0.000000e+00> : vector<128x2xf32>
    %276 = tpu.matmul %274, %275, %cst_71 {dimension_numbers = #tpu.dot_dimension_numbers<[1], [0], [0], [1], [0, 0, 1, 1], [], []>} : vector<128x128xbf16>, vector<128x2xbf16>, vector<128x2xf32> -> vector<128x2xf32>
    %277 = vector.extract_strided_slice %276 {offsets = [0, 1], sizes = [128, 1], strides = [1, 1]} : vector<128x2xf32> to vector<128x1xf32>
    %278 = tpu.reciprocal %277 {approx = true} : vector<128x1xf32> -> vector<128x1xf32>
    %279 = vector.extract_strided_slice %276 {offsets = [0, 0], sizes = [128, 1], strides = [1, 1]} : vector<128x2xf32> to vector<128x1xf32>
    %280 = arith.mulf %279, %278 : vector<128x1xf32>
    %c0_72 = arith.constant 0 : index
    %c0_73 = arith.constant 0 : index
    %281 = vector.load %arg12[%c0_72, %c0_73] : memref<1x1xf32, #tpu.memory_space<vmem>>, vector<1x1xf32>
    %282 = vector.broadcast %281 : vector<1x1xf32> to vector<128x1xf32>
    %283 = arith.addf %280, %282 : vector<128x1xf32>
    %c0_74 = arith.constant 0 : index
    %c0_75 = arith.constant 0 : index
    %284 = vector.load %arg13[%c0_74, %c0_75] : memref<128x1xf32, #tpu.memory_space<vmem>>, vector<128x1xf32>
    tpu.vector_store %arg13[%c0_74, %c0_75], %283 {strides = array<i32>} : memref<128x1xf32, #tpu.memory_space<vmem>>, vector<128x1xf32>,
    return
  }
}

</mosaic_0001>

<bundles_post_ra>
// kernel: tpu_custom_call.1
= control target key start
LH: loop header
LB: loop body
LE: loop exit
PB: predicated region body
PF: predicated region fallthrough
CT: control target
= control target key end

     0   :  { %s12928_s0 = inlined_call_operand.hbm [shape: s8[128,128], index: 0, kind: input, shape index: {}]   ;;  %s12929_s1 = inlined_call_operand.hbm [shape: f32[128,32], index: 1, kind: input, shape index: {}]   ;;  %s12930_s2 = inlined_call_operand.hbm [shape: bf16[32,64], index: 2, kind: input, shape index: {}]   ;;  %s12931_s3 = inlined_call_operand.hbm [shape: f32[1,64], index: 3, kind: input, shape index: {}]   ;;  %s12932_s4 = inlined_call_operand.hbm [shape: bf16[64,128], index: 4, kind: input, shape index: {}]   ;;  %s12933_s5 = inlined_call_operand.hbm [shape: bf16[64,8], index: 5, kind: input, shape index: {}]   ;;  %s12934_s6 = inlined_call_operand.hbm [shape: f32[1,128], index: 6, kind: input, shape index: {}]   ;;  %s12935_s7 = inlined_call_operand.hbm [shape: bf16[128,128], index: 7, kind: input, shape index: {}]   ;;  %s12936_s8 = inlined_call_operand.hbm [shape: bf16[128,8], index: 8, kind: input, shape index: {}]   ;;  %s12937_s9 = inlined_call_operand.hbm [shape: f32[1,128], index: 9, kind: input, shape index: {}]   ;;  %s12938_s10 = inlined_call_operand.hbm [shape: bf16[128,1], index: 10, kind: input, shape index: {}]   ;;  %s12939_s11 = inlined_call_operand.hbm [shape: bf16[128,2], index: 11, kind: input, shape index: {}]   ;;  %s12940_s12 = inlined_call_operand.<no memory space> [shape: f32[1,1], index: 12, kind: input, shape index: {}]   ;;  %s12941_s13 = inlined_call_operand.hbm [shape: f32[128,1], index: 13, kind: output, shape index: {}]  }
   0x1   :  { %v18_v0 = vstv %s12940_s12 }
   0x2   :  { %19 = vst [vmem:[#allocation2] sm:$0x1] %v18_v0 }
   0x3   :  { %20 = vsyncpa [#allocation4], 0 }
   0x4   :  { %21 = vsyncpa [#allocation7], 0 }
   0x5   :  { %22 = vsyncpa [#allocation10], 0 }
   0x6   :  { %23 = vsyncpa [#allocation13], 0 }
   0x7   :  { %24 = vsyncpa [#allocation16], 0 }
   0x8   :  { %25 = vsyncpa [#allocation19], 0 }
   0x9   :  { %26 = vsyncpa [#allocation22], 0 }
   0xa   :  { %27 = vsyncpa [#allocation5], 0  ;;  %s8725_s27 = smov [#allocation6]   ;;  %s8726_s29 = smov [#allocation9]  }
   0xb   :  { %s45_s28 = sshll.u32 %s8725_s27, 4  ;;  %s70_s30 = sshll.u32 %s8726_s29, 4  ;;  %s46_s28 = int_to_ptr.vmem [resolvable:$true] %s45_s28  ;;  %s8830_s30 = int_to_ptr.vmem [resolvable:$true] %s70_s30 }
   0xc   :  { %s8423_s12 = scalar_lea.hbm %s12929_s1, 2048 }
   0xd   :  { %p8424_p0 = scmp.ne.s32.totalorder %s12929_s1, %s8423_s12  ;;  %p8427_p1 = scmp.lt.u32.totalorder %s8423_s12, %s12929_s1 }
   0xf   :  { %p8429_p2 = pnand %p8427_p1, %p8424_p0 }
  0x11   :  { %8432 = shalt.err (!%p8429_p2)
}
  0x12   :  { %s8433_s20 = scalar_lea.vmem %s46_s28, 2048  ;;  %p8438_p4 = scmp.lt.s32.totalorder %s46_s28, %s46_s28 }
  0x13   :  { %p8434_p3 = scmp.ne.s32.totalorder %s46_s28, %s8433_s20  ;;  %p8439_p5 = scmp.lt.s32.totalorder %s8433_s20, %s8433_s20 }
  0x15   :  { %p8440_p6 = por %p8439_p5, %p8438_p4 }
  0x17   :  { %p8441_p7 = pnand %p8440_p6, %p8434_p3 }
  0x19   :  { %8444 = shalt.err (!%p8441_p7)
}
  0x1a   :  { %s8727_s21 = smov 128   ;;  %s8728_s22 = smov 8  }
  0x1b   :  { %51 = dma.hbm_to_vmem [thread:$0]  %s12929_s1, 2048, %s46_s28, [#allocation7], %s8727_s21, %s8727_s21, %s8728_s22  }
  0x1c   :  { %s8445_s27 = scalar_lea.hbm %s12931_s3, 16 }
  0x1d   :  { %p8446_p8 = scmp.ne.s32.totalorder %s12931_s3, %s8445_s27  ;;  %p8449_p9 = scmp.lt.u32.totalorder %s8445_s27, %s12931_s3 }
  0x1f   :  { %p8451_p10 = pnand %p8449_p9, %p8446_p8 }
  0x21   :  { %8454 = shalt.err (!%p8451_p10)
}
  0x22   :  { %s8455_s16 = scalar_lea.vmem %s8830_s30, 16  ;;  %s8459_s1 = scalar_lea.vmem %s8830_s30, 32 }
  0x23   :  { %p8456_p11 = scmp.ne.s32.totalorder %s8830_s30, %s8455_s16  ;;  %p8460_p12 = scmp.lt.s32.totalorder %s8830_s30, %s8830_s30 }
  0x24   :  { %p8461_p13 = scmp.lt.s32.totalorder %s8459_s1, %s8455_s16 }
  0x26   :  { %p8462_p0 = por %p8461_p13, %p8460_p12 }
  0x28   :  { %p8463_p1 = pnand %p8462_p0, %p8456_p11 }
  0x2a   :  { %8466 = shalt.err (!%p8463_p1)
}
  0x2b   :  { %73 = dma.hbm_to_vmem [thread:$0]  %s12931_s3, 16, %s8830_s30, [#allocation10]  }
  0x2c   :  { %s8729_s18 = smov [#allocation12]   ;;  %s8730_s20 = smov [#allocation15]  }
  0x2d   :  { %s91_s19 = sshll.u32 %s8729_s18, 4  ;;  %s113_s23 = sshll.u32 %s8730_s20, 4  ;;  %s92_s19 = int_to_ptr.vmem [resolvable:$true] %s91_s19  ;;  %s8865_s23 = int_to_ptr.vmem [resolvable:$true] %s113_s23 }
  0x2e   :  { %s8467_s26 = scalar_lea.hbm %s12933_s5, 512 }
  0x2f   :  { %p8468_p2 = scmp.ne.s32.totalorder %s12933_s5, %s8467_s26  ;;  %p8471_p3 = scmp.lt.u32.totalorder %s8467_s26, %s12933_s5 }
  0x31   :  { %p8473_p4 = pnand %p8471_p3, %p8468_p2 }
  0x33   :  { %8476 = shalt.err (!%p8473_p4)
}
  0x34   :  { %s8477_s3 = scalar_lea.vmem %s92_s19, 512  ;;  %p8482_p6 = scmp.lt.s32.totalorder %s92_s19, %s92_s19 }
  0x35   :  { %p8478_p5 = scmp.ne.s32.totalorder %s92_s19, %s8477_s3  ;;  %p8483_p7 = scmp.lt.s32.totalorder %s8477_s3, %s8477_s3 }
  0x37   :  { %p8484_p8 = por %p8483_p7, %p8482_p6 }
  0x39   :  { %p8485_p9 = pnand %p8484_p8, %p8478_p5 }
  0x3b   :  { %8488 = shalt.err (!%p8485_p9)
}
  0x3c   :  { %s8731_s30 = smov 64   ;;  %s8732_s12 = smov 4  }
  0x3d   :  { %97 = dma.hbm_to_vmem [thread:$0]  %s12933_s5, 512, %s92_s19, [#allocation13], %s8731_s30, %s8731_s30, %s8732_s12  }
  0x3e   :  { %s8489_s18 = scalar_lea.hbm %s12935_s7, 1024 }
  0x3f   :  { %p8490_p10 = scmp.ne.s32.totalorder %s12935_s7, %s8489_s18  ;;  %p8493_p11 = scmp.lt.u32.totalorder %s8489_s18, %s12935_s7 }
  0x41   :  { %p8495_p12 = pnand %p8493_p11, %p8490_p10 }
  0x43   :  { %8498 = shalt.err (!%p8495_p12)
}
  0x44   :  { %s8499_s27 = scalar_lea.vmem %s8865_s23, 1024  ;;  %p8504_p0 = scmp.lt.s32.totalorder %s8865_s23, %s8865_s23 }
  0x45   :  { %p8500_p13 = scmp.ne.s32.totalorder %s8865_s23, %s8499_s27  ;;  %p8505_p1 = scmp.lt.s32.totalorder %s8499_s27, %s8499_s27 }
  0x47   :  { %p8506_p2 = por %p8505_p1, %p8504_p0 }
  0x49   :  { %p8507_p3 = pnand %p8506_p2, %p8500_p13 }
  0x4b   :  { %8510 = shalt.err (!%p8507_p3)
}
  0x4c   :  { %119 = dma.hbm_to_vmem [thread:$0]  %s12935_s7, 1024, %s8865_s23, [#allocation16], %s8731_s30, %s8731_s30, %s8732_s12  }
  0x4d   :  { %s8733_s29 = smov [#allocation18]   ;;  %s8734_s15 = smov [#allocation3]  }
  0x4e   :  { %s138_s14 = sshll.u32 %s8733_s29, 4  ;;  %s33_s3 = sshll.u32 %s8734_s15, 4  ;;  %s139_s14 = int_to_ptr.vmem [resolvable:$true] %s138_s14  ;;  %s8902_s3 = int_to_ptr.vmem [resolvable:$true] %s33_s3 }
  0x4f   :  { %s8511_s28 = scalar_lea.hbm %s12937_s9, 16 }
  0x50   :  { %p8512_p4 = scmp.ne.s32.totalorder %s12937_s9, %s8511_s28  ;;  %p8515_p5 = scmp.lt.u32.totalorder %s8511_s28, %s12937_s9 }
  0x52   :  { %p8517_p6 = pnand %p8515_p5, %p8512_p4 }
  0x54   :  { %8520 = shalt.err (!%p8517_p6)
}
  0x55   :  { %s8521_s7 = scalar_lea.vmem %s139_s14, 16  ;;  %s8525_s23 = scalar_lea.vmem %s139_s14, 32 }
  0x56   :  { %p8522_p7 = scmp.ne.s32.totalorder %s139_s14, %s8521_s7  ;;  %p8526_p8 = scmp.lt.s32.totalorder %s139_s14, %s139_s14 }
  0x57   :  { %p8527_p9 = scmp.lt.s32.totalorder %s8525_s23, %s8521_s7 }
  0x59   :  { %p8528_p10 = por %p8527_p9, %p8526_p8 }
  0x5b   :  { %p8529_p11 = pnand %p8528_p10, %p8522_p7 }
  0x5d   :  { %8532 = shalt.err (!%p8529_p11)
}
  0x5e   :  { %141 = dma.hbm_to_vmem [thread:$0]  %s12937_s9, 16, %s139_s14, [#allocation19]  }
  0x5f   :  { %s8533_s19 = scalar_lea.hbm %s12928_s0, 512 }
  0x60   :  { %p8534_p12 = scmp.ne.s32.totalorder %s12928_s0, %s8533_s19  ;;  %p8537_p13 = scmp.lt.u32.totalorder %s8533_s19, %s12928_s0 }
  0x62   :  { %p8539_p0 = pnand %p8537_p13, %p8534_p12 }
  0x64   :  { %8542 = shalt.err (!%p8539_p0)
}
  0x65   :  { %s8543_s28 = scalar_lea.vmem %s8902_s3, 512  ;;  %p8548_p2 = scmp.lt.s32.totalorder %s8902_s3, %s8902_s3 }
  0x66   :  { %p8544_p1 = scmp.ne.s32.totalorder %s8902_s3, %s8543_s28  ;;  %p8549_p3 = scmp.lt.s32.totalorder %s8543_s28, %s8543_s28 }
  0x68   :  { %p8550_p4 = por %p8549_p3, %p8548_p2 }
  0x6a   :  { %p8551_p5 = pnand %p8550_p4, %p8544_p1 }
  0x6c   :  { %8554 = shalt.err (!%p8551_p5)
}
  0x6d   :  { %39 = dma.hbm_to_vmem [thread:$0]  %s12928_s0, 512, %s8902_s3, [#allocation4], %s8727_s21, %s8727_s21, %s8728_s22  }
  0x6e   :  { %s8735_s17 = smov [#allocation8]   ;;  %s8736_s20 = smov [#allocation11]  }
  0x6f   :  { %s57_s18 = sshll.u32 %s8735_s17, 4  ;;  %s79_s24 = sshll.u32 %s8736_s20, 4  ;;  %s58_s18 = int_to_ptr.vmem [resolvable:$true] %s57_s18  ;;  %s8936_s24 = int_to_ptr.vmem [resolvable:$true] %s79_s24 }
  0x70   :  { %s8555_s25 = scalar_lea.hbm %s12930_s2, 256 }
  0x71   :  { %p8556_p6 = scmp.ne.s32.totalorder %s12930_s2, %s8555_s25  ;;  %p8559_p7 = scmp.lt.u32.totalorder %s8555_s25, %s12930_s2 }
  0x73   :  { %p8561_p8 = pnand %p8559_p7, %p8556_p6 }
  0x75   :  { %8564 = shalt.err (!%p8561_p8)
}
  0x76   :  { %s8565_s0 = scalar_lea.vmem %s58_s18, 256  ;;  %p8570_p10 = scmp.lt.s32.totalorder %s58_s18, %s58_s18 }
  0x77   :  { %p8566_p9 = scmp.ne.s32.totalorder %s58_s18, %s8565_s0  ;;  %p8571_p11 = scmp.lt.s32.totalorder %s8565_s0, %s8565_s0 }
  0x79   :  { %p8572_p12 = por %p8571_p11, %p8570_p10 }
  0x7b   :  { %p8573_p13 = pnand %p8572_p12, %p8566_p9 }
  0x7d   :  { %8576 = shalt.err (!%p8573_p13)
}
  0x7e   :  { %63 = dma.hbm_to_vmem [thread:$0]  %s12930_s2, 256, %s58_s18, [#allocation7], %s8731_s30, %s8731_s30, %s8732_s12  }
  0x7f   :  { %s8577_s1 = scalar_lea.hbm %s12932_s4, 512 }
  0x80   :  { %p8578_p0 = scmp.ne.s32.totalorder %s12932_s4, %s8577_s1  ;;  %p8581_p1 = scmp.lt.u32.totalorder %s8577_s1, %s12932_s4 }
  0x82   :  { %p8583_p2 = pnand %p8581_p1, %p8578_p0 }
  0x84   :  { %8586 = shalt.err (!%p8583_p2)
}
  0x85   :  { %s8587_s20 = scalar_lea.vmem %s8936_s24, 512  ;;  %p8592_p4 = scmp.lt.s32.totalorder %s8936_s24, %s8936_s24 }
  0x86   :  { %p8588_p3 = scmp.ne.s32.totalorder %s8936_s24, %s8587_s20  ;;  %p8593_p5 = scmp.lt.s32.totalorder %s8587_s20, %s8587_s20 }
  0x88   :  { %p8594_p6 = por %p8593_p5, %p8592_p4 }
  0x8a   :  { %p8595_p7 = pnand %p8594_p6, %p8588_p3 }
  0x8c   :  { %8598 = shalt.err (!%p8595_p7)
}
  0x8d   :  { %85 = dma.hbm_to_vmem [thread:$0]  %s12932_s4, 512, %s8936_s24, [#allocation10], %s8731_s30, %s8731_s30, %s8732_s12  }
  0x8e   :  { %s8737_s7 = smov [#allocation14]   ;;  %s8738_s25 = smov [#allocation17]  }
  0x8f   :  { %s104_s23 = sshll.u32 %s8737_s7, 4  ;;  %s125_s26 = sshll.u32 %s8738_s25, 4  ;;  %s105_s23 = int_to_ptr.vmem [resolvable:$true] %s104_s23  ;;  %s8973_s26 = int_to_ptr.vmem [resolvable:$true] %s125_s26 }
  0x90   :  { %s8599_s19 = scalar_lea.hbm %s12934_s6, 16 }
  0x91   :  { %p8600_p8 = scmp.ne.s32.totalorder %s12934_s6, %s8599_s19  ;;  %p8603_p9 = scmp.lt.u32.totalorder %s8599_s19, %s12934_s6 }
  0x93   :  { %p8605_p10 = pnand %p8603_p9, %p8600_p8 }
  0x95   :  { %8608 = shalt.err (!%p8605_p10)
}
  0x96   :  { %s8609_s4 = scalar_lea.vmem %s105_s23, 16  ;;  %s8613_s24 = scalar_lea.vmem %s105_s23, 32 }
  0x97   :  { %p8610_p11 = scmp.ne.s32.totalorder %s105_s23, %s8609_s4  ;;  %p8614_p12 = scmp.lt.s32.totalorder %s105_s23, %s105_s23 }
  0x98   :  { %p8615_p13 = scmp.lt.s32.totalorder %s8613_s24, %s8609_s4 }
  0x9a   :  { %p8616_p0 = por %p8615_p13, %p8614_p12 }
  0x9c   :  { %p8617_p1 = pnand %p8616_p0, %p8610_p11 }
  0x9e   :  { %8620 = shalt.err (!%p8617_p1)
}
  0x9f   :  { %107 = dma.hbm_to_vmem [thread:$0]  %s12934_s6, 16, %s105_s23, [#allocation13]  }
  0xa0   :  { %s8621_s14 = scalar_lea.hbm %s12936_s8, 1024 }
  0xa1   :  { %p8622_p2 = scmp.ne.s32.totalorder %s12936_s8, %s8621_s14  ;;  %p8625_p3 = scmp.lt.u32.totalorder %s8621_s14, %s12936_s8 }
  0xa3   :  { %p8627_p4 = pnand %p8625_p3, %p8622_p2 }
  0xa5   :  { %8630 = shalt.err (!%p8627_p4)
}
  0xa6   :  { %s8631_s7 = scalar_lea.vmem %s8973_s26, 1024  ;;  %p8636_p6 = scmp.lt.s32.totalorder %s8973_s26, %s8973_s26 }
  0xa7   :  { %p8632_p5 = scmp.ne.s32.totalorder %s8973_s26, %s8631_s7  ;;  %p8637_p7 = scmp.lt.s32.totalorder %s8631_s7, %s8631_s7 }
  0xa9   :  { %p8638_p8 = por %p8637_p7, %p8636_p6 }
  0xab   :  { %p8639_p9 = pnand %p8638_p8, %p8632_p5 }
  0xad   :  { %8642 = shalt.err (!%p8639_p9)
}
  0xae   :  { %131 = dma.hbm_to_vmem [thread:$0]  %s12936_s8, 1024, %s8973_s26, [#allocation16], %s8731_s30, %s8731_s30, %s8732_s12  }
  0xaf   :  { %s8739_s25 = smov [#allocation20]   ;;  %s8740_s5 = smov [#allocation21]  }
  0xb0   :  { %s147_s27 = sshll.u32 %s8739_s25, 4  ;;  %s159_s19 = sshll.u32 %s8740_s5, 4  ;;  %s148_s27 = int_to_ptr.vmem [resolvable:$true] %s147_s27  ;;  %s9007_s19 = int_to_ptr.vmem [resolvable:$true] %s159_s19 }
  0xb1   :  { %s8643_s29 = scalar_lea.hbm %s12938_s10, 1024 }
  0xb2   :  { %p8644_p10 = scmp.ne.s32.totalorder %s12938_s10, %s8643_s29  ;;  %p8647_p11 = scmp.lt.u32.totalorder %s8643_s29, %s12938_s10 }
  0xb4   :  { %p8649_p12 = pnand %p8647_p11, %p8644_p10 }
  0xb6   :  { %8652 = shalt.err (!%p8649_p12)
}
  0xb7   :  { %s8653_s8 = scalar_lea.vmem %s148_s27, 1024  ;;  %p8658_p0 = scmp.lt.s32.totalorder %s148_s27, %s148_s27 }
  0xb8   :  { %p8654_p13 = scmp.ne.s32.totalorder %s148_s27, %s8653_s8  ;;  %p8659_p1 = scmp.lt.s32.totalorder %s8653_s8, %s8653_s8 }
  0xba   :  { %p8660_p2 = por %p8659_p1, %p8658_p0 }
  0xbc   :  { %p8661_p3 = pnand %p8660_p2, %p8654_p13 }
  0xbe   :  { %8664 = shalt.err (!%p8661_p3)
}
  0xbf   :  { %153 = dma.hbm_to_vmem [thread:$0]  %s12938_s10, 1024, %s148_s27, [#allocation19], %s8731_s30, %s8731_s30, %s8732_s12  }
  0xc0   :  { %s8665_s14 = scalar_lea.hbm %s12939_s11, 1024 }
  0xc1   :  { %p8666_p4 = scmp.ne.s32.totalorder %s12939_s11, %s8665_s14  ;;  %p8669_p5 = scmp.lt.u32.totalorder %s8665_s14, %s12939_s11 }
  0xc3   :  { %p8671_p6 = pnand %p8669_p5, %p8666_p4 }
  0xc5   :  { %8674 = shalt.err (!%p8671_p6)
}
  0xc6   :  { %s8675_s7 = scalar_lea.vmem %s9007_s19, 1024  ;;  %p8680_p8 = scmp.lt.s32.totalorder %s9007_s19, %s9007_s19 }
  0xc7   :  { %p8676_p7 = scmp.ne.s32.totalorder %s9007_s19, %s8675_s7  ;;  %p8681_p9 = scmp.lt.s32.totalorder %s8675_s7, %s8675_s7 }
  0xc9   :  { %p8682_p10 = por %p8681_p9, %p8680_p8 }
  0xcb   :  { %p8683_p11 = pnand %p8682_p10, %p8676_p7 }
  0xcd   :  { %8686 = shalt.err (!%p8683_p11)
}
  0xce   :  { %165 = dma.hbm_to_vmem [thread:$0]  %s12939_s11, 1024, %s9007_s19, [#allocation22], %s8731_s30, %s8731_s30, %s8732_s12  }
  0xcf   :  { %8709 = dma.done.wait [#allocation4], 512  }
  0xd0   :  { %8710 = vsyncadd [#allocation4], 4294966784 }
  0xd1   :  { %8711 = dma.done.wait [#allocation7], 2304  }
  0xd2   :  { %8712 = vsyncadd [#allocation7], 4294964992 }
  0xd3   :  { %8713 = dma.done.wait [#allocation10], 528  }
  0xd4   :  { %8714 = vsyncadd [#allocation10], 4294966768 }
  0xd5   :  { %8715 = dma.done.wait [#allocation13], 528  }
  0xd6   :  { %8716 = vsyncadd [#allocation13], 4294966768 }
  0xd7   :  { %8717 = dma.done.wait [#allocation16], 2048  }
  0xd8   :  { %8718 = vsyncadd [#allocation16], 4294965248 }
  0xd9   :  { %8719 = dma.done.wait [#allocation19], 1040  }
  0xda   :  { %8720 = vsyncadd [#allocation19], 4294966256 }
  0xdb   :  { %8721 = dma.done.wait [#allocation22], 1024  }
  0xdc   :  { %8722 = vsyncadd [#allocation22], 4294966272  ;;  %v7997_v1 = vld [vmem:[#allocation8] sm:$0xff]   ;;  %v7998_v2 = vld [vmem:[#allocation8 + $0x8] sm:$0xff]   ;;  %vm321_vm0 = vcmask 261120   ;;  %v12948_v35 = vmov 6  }
  0xdd   :  { %7248 = vmatprep.subr.bf16.mxu0 %v7997_v1  ;;  %v274_v3 = vld [vmem:[#allocation6] sm:$0xff]  ;;  %v275_v4 = vld [vmem:[#allocation6 + $0x8] sm:$0xff]  ;;  %v276_v6 = vld [vmem:[#allocation6 + $0x10] sm:$0xff]  ;;  %7766 = vset.pattern.permute.xlu0 %v12948_v35  ;;  %v12946_v36 = vmov 4   ;;  %vm499_vm1 = vcmask 523264   ;;  %s8745_s11 = smov 96  }
  0xde   :  { %7249 = vmatpush3.bf16.msra.mxu0 %v7997_v1  ;;  %v290_v5 = vpack.c.bf16 %v275_v4, %v274_v3  ;;  %v277_v7 = vld [vmem:[#allocation6 + $0x18] sm:$0xff]  ;;  %v278_v8 = vld [vmem:[#allocation6 + $0x20] sm:$0xff]  ;;  %v279_v9 = vld [vmem:[#allocation6 + $0x28] sm:$0xff]  ;;  %7764 = vset.pattern.permute.xlu1 %v12946_v36  ;;  %s8746_s12 = smov 32   ;;  %s8748_s23 = smov 97  }
  0xdf   :  { %7250 = vmatprep.subr.bf16.mxu0 %v7998_v2  ;;  %v291_v10 = vpack.c.bf16 %v277_v7, %v276_v6  ;;  %v292_v11 = vpack.c.bf16 %v279_v9, %v278_v8  ;;  %v7999_v12 = vld [vmem:[#allocation12] sm:$0xff]   ;;  %v8000_v15 = vld [vmem:[#allocation12 + $0x8] sm:$0xff]   ;;  %v283_v17 = vld [vmem:[#allocation6 + $0x48] sm:$0xff]  ;;  %s8749_s25 = smov 98   ;;  %s8751_s27 = smov 99  }
  0xe0   :  { %7252 = vmatprep.mubr.msk.bf16.mxu0 %vm321_vm0, %v290_v5  ;;  %v280_v13 = vld [vmem:[#allocation6 + $0x30] sm:$0xff]  ;;  %v281_v14 = vld [vmem:[#allocation6 + $0x38] sm:$0xff]  ;;  %v282_v16 = vld [vmem:[#allocation6 + $0x40] sm:$0xff]  ;;  %s8756_s5 = smov [#allocation23]  }
  0xe1   :  { %v8001_v18 = vld [vmem:[#allocation11] sm:$0xff]   ;;  %v8002_v19 = vld [vmem:[#allocation12 + $0x10] sm:$0xff]   ;;  %v8003_v20 = vld [vmem:[#allocation11 + $0x8] sm:$0xff]   ;;  %v293_v21 = vpack.c.bf16 %v281_v14, %v280_v13  ;;  %v294_v22 = vpack.c.bf16 %v283_v17, %v282_v16  ;;  %s6918_s19 = sshll.u32 %s8756_s5, 4  ;;  %s6919_s19 = int_to_ptr.vmem [resolvable:$true] %s6918_s19 }
  0xe2   :  { %7251 = vmatpush3.bf16.msra.mxu0 %v7998_v2  ;;  %7268 = vmatprep.subr.bf16.mxu1 %v8001_v18  ;;  %v284_v23 = vld [vmem:[#allocation6 + $0x50] sm:$0xff]  ;;  %v285_v24 = vld [vmem:[#allocation6 + $0x58] sm:$0xff]  ;;  %v286_v25 = vld [vmem:[#allocation6 + $0x60] sm:$0xff]  ;;  %s8687_s0 = scalar_lea.vmem %s6919_s19, 2048  ;;  %p8692_p13 = scmp.lt.s32.totalorder %s6919_s19, %s6919_s19 }
  0xe3   :  { %7292 = vmatprep.subr.bf16.mxu0 %v7999_v12  ;;  %7269 = vmatpush3.bf16.msra.mxu1 %v8001_v18  ;;  %v287_v26 = vld [vmem:[#allocation6 + $0x68] sm:$0xff]  ;;  %v295_v27 = vpack.c.bf16 %v285_v24, %v284_v23  ;;  %v288_v29 = vld [vmem:[#allocation6 + $0x70] sm:$0xff]  ;;  %v289_v30 = vld [vmem:[#allocation6 + $0x78] sm:$0xff]  ;;  %p8688_p12 = scmp.ne.s32.totalorder %s6919_s19, %s8687_s0  ;;  %p8693_p0 = scmp.lt.s32.totalorder %s8687_s0, %s8687_s0 }
  0xe4   :  { %7270 = vmatprep.subr.bf16.mxu1 %v8003_v20  ;;  %v296_v28 = vpack.c.bf16 %v287_v26, %v286_v25  ;;  %v297_v31 = vpack.c.bf16 %v289_v30, %v288_v29  ;;  %v8004_v32 = vld [vmem:[#allocation11 + $0x10] sm:$0xff]   ;;  %v8005_v33 = vld [vmem:[#allocation12 + $0x18] sm:$0xff]  }
  0xe5   :  { %7253 = vmatmul.mubr.msk.bf16.vlgmr.msra.gmra.mrb[0].mxu0 %vm321_vm0, %v291_v10  ;;  %v8006_v34 = vld [vmem:[#allocation11 + $0x18] sm:$0xff]   ;;  %p8694_p1 = por %p8693_p0, %p8692_p13 }
  0xe6   :  { %7256 = vmatprep.mubr.msk.bf16.mxu0 %vm321_vm0, %v292_v11  ;;  %7293 = vmatpush3.bf16.msra.mxu0 %v7999_v12  ;;  %v9054_v37 = vld [vmem:[#allocation9] ss:$0 sm:$0xff] }
  0xe7   :  { %7294 = vmatprep.subr.bf16.mxu0 %v8000_v15  ;;  %7271 = vmatpush3.bf16.msra.mxu1 %v8003_v20  ;;  %p8695_p2 = pnand %p8694_p1, %p8688_p12 }
  0xe8   :  { %7272 = vmatprep.subr.bf16.mxu1 %v8004_v32 }
  0xea   :  { %7295 = vmatpush3.bf16.msra.mxu0 %v8000_v15 }
  0xeb   :  { %7296 = vmatprep.subr.bf16.mxu0 %v8002_v19  ;;  %7273 = vmatpush3.bf16.msra.mxu1 %v8004_v32 }
  0xec   :  { %7274 = vmatprep.subr.bf16.mxu1 %v8006_v34 }
  0xed   :  { %7257 = vmatmul.mubr.msk.bf16.gmra.mrb[4].mxu0 %vm321_vm0, %v293_v21 }
  0xee   :  { %7260 = vmatprep.mubr.msk.bf16.mxu0 %vm321_vm0, %v294_v22  ;;  %7297 = vmatpush3.bf16.msra.mxu0 %v8002_v19 }
  0xef   :  { %7298 = vmatprep.subr.bf16.mxu0 %v8005_v33  ;;  %7275 = vmatpush3.bf16.msra.mxu1 %v8006_v34 }
  0xf2   :  { %7299 = vmatpush3.bf16.msra.mxu0 %v8005_v33 }
  0xf5   :  { %7261 = vmatmul.mubr.msk.bf16.gmra.mrb[8].mxu0 %vm321_vm0, %v295_v27 }
  0xf6   :  { %7264 = vmatprep.mubr.msk.bf16.mxu0 %vm321_vm0, %v296_v28 }
  0xfd   :  { %7265 = vmatmul.mubr.msk.bf16.gmra.mrb[12].mxu0 %vm321_vm0, %v297_v31 }
 0x1b8   :  { %v7254_v38 = vpop.f32.mrb[0].mxu0 }
 0x1b9   :  { %v389_v39 = vadd.f32 %v7254_v38, %v9054_v37  ;;  %v380_v40 = vpop.f32.mrb[1].mxu0 }
 0x1ba   :  { %v381_v41 = vadd.f32 %v9054_v37, %v380_v40  ;;  %v7255_v42 = vpop.f32.mrb[2].mxu0 }
 0x1bb   :  { %v392_v43 = vadd.f32 %v7255_v42, %v9054_v37  ;;  %v383_v44 = vpop.f32.mrb[3].mxu0  ;;  %v445_v46 = vmax.f32 %v389_v39, 0.0  ;;  %v12944_v42 = vmov 7  }
 0x1bc   :  { %v384_v45 = vadd.f32 %v9054_v37, %v383_v44  ;;  %v443_v48 = vmax.f32 %v381_v41, 0.0 }
 0x1bd   :  { %v446_v47 = vmax.f32 %v392_v43, 0.0  ;;  %v12942_v43 = vmov 5  }
 0x1be   :  { %v444_v49 = vmax.f32 %v384_v45, 0.0 }
 0x1bf   :  { %v460_v50 = vpack.c.bf16 %v446_v47, %v445_v46 }
 0x1c0   :  { %v459_v51 = vpack.c.bf16 %v444_v49, %v443_v48  ;;  %v7258_v52 = vpop.f32.mrb[4].mxu0 }
 0x1c1   :  { %v405_v53 = vadd.f32 %v7258_v52, %v9054_v37  ;;  %v396_v54 = vpop.f32.mrb[5].mxu0 }
 0x1c2   :  { %7276 = vmatprep.mubr.msk.bf16.mxu1 %vm499_vm1, %v459_v51  ;;  %7300 = vmatprep.mubr.msk.bf16.mxu0 %vm499_vm1, %v459_v51  ;;  %v397_v55 = vadd.f32 %v9054_v37, %v396_v54  ;;  %v7259_v56 = vpop.f32.mrb[6].mxu0 }
 0x1c3   :  { %7277 = vmatmul.mubr.msk.bf16.vlgmr.msra.gmra.mrb[0].mxu1 %vm499_vm1, %v460_v50  ;;  %7301 = vmatmul.mubr.msk.bf16.vlgmr.msra.gmra.mrb[16].mxu0 %vm499_vm1, %v460_v50  ;;  %v449_v57 = vmax.f32 %v405_v53, 0.0  ;;  %v408_v58 = vadd.f32 %v7259_v56, %v9054_v37  ;;  %v399_v59 = vpop.f32.mrb[7].mxu0 }
 0x1c4   :  { %v447_v60 = vmax.f32 %v397_v55, 0.0  ;;  %v400_v61 = vadd.f32 %v9054_v37, %v399_v59 }
 0x1c5   :  { %v450_v62 = vmax.f32 %v408_v58, 0.0 }
 0x1c6   :  { %v448_v63 = vmax.f32 %v400_v61, 0.0 }
 0x1c7   :  { %v462_v0 = vpack.c.bf16 %v450_v62, %v449_v57 }
 0x1c8   :  { %v461_v1 = vpack.c.bf16 %v448_v63, %v447_v60  ;;  %v7262_v2 = vpop.f32.mrb[8].mxu0 }
 0x1c9   :  { %v421_v3 = vadd.f32 %v7262_v2, %v9054_v37  ;;  %v412_v4 = vpop.f32.mrb[9].mxu0 }
 0x1ca   :  { %7280 = vmatprep.mubr.msk.bf16.mxu1 %vm499_vm1, %v461_v1  ;;  %7304 = vmatprep.mubr.msk.bf16.mxu0 %vm499_vm1, %v461_v1  ;;  %v413_v5 = vadd.f32 %v9054_v37, %v412_v4  ;;  %v7263_v6 = vpop.f32.mrb[10].mxu0 }
 0x1cb   :  { %7281 = vmatmul.mubr.msk.bf16.gmra.mrb[4].mxu1 %vm499_vm1, %v462_v0  ;;  %7305 = vmatmul.mubr.msk.bf16.gmra.mrb[20].mxu0 %vm499_vm1, %v462_v0  ;;  %v453_v7 = vmax.f32 %v421_v3, 0.0  ;;  %v424_v8 = vadd.f32 %v7263_v6, %v9054_v37  ;;  %v415_v9 = vpop.f32.mrb[11].mxu0 }
 0x1cc   :  { %v451_v10 = vmax.f32 %v413_v5, 0.0  ;;  %v416_v11 = vadd.f32 %v9054_v37, %v415_v9 }
 0x1cd   :  { %v454_v12 = vmax.f32 %v424_v8, 0.0 }
 0x1ce   :  { %v452_v13 = vmax.f32 %v416_v11, 0.0 }
 0x1cf   :  { %v464_v14 = vpack.c.bf16 %v454_v12, %v453_v7 }
 0x1d0   :  { %v463_v15 = vpack.c.bf16 %v452_v13, %v451_v10  ;;  %v7266_v16 = vpop.f32.mrb[12].mxu0 }
 0x1d1   :  { %v437_v17 = vadd.f32 %v7266_v16, %v9054_v37  ;;  %v428_v18 = vpop.f32.mrb[13].mxu0 }
 0x1d2   :  { %7284 = vmatprep.mubr.msk.bf16.mxu1 %vm499_vm1, %v463_v15  ;;  %7308 = vmatprep.mubr.msk.bf16.mxu0 %vm499_vm1, %v463_v15  ;;  %v429_v19 = vadd.f32 %v9054_v37, %v428_v18  ;;  %v7267_v20 = vpop.f32.mrb[14].mxu0 }
 0x1d3   :  { %7285 = vmatmul.mubr.msk.bf16.gmra.mrb[8].mxu1 %vm499_vm1, %v464_v14  ;;  %7309 = vmatmul.mubr.msk.bf16.gmra.mrb[24].mxu0 %vm499_vm1, %v464_v14  ;;  %v457_v21 = vmax.f32 %v437_v17, 0.0  ;;  %v440_v22 = vadd.f32 %v7267_v20, %v9054_v37  ;;  %v431_v23 = vpop.f32.mrb[15].mxu0 }
 0x1d4   :  { %v455_v24 = vmax.f32 %v429_v19, 0.0  ;;  %v432_v25 = vadd.f32 %v9054_v37, %v431_v23 }
 0x1d5   :  { %v458_v26 = vmax.f32 %v440_v22, 0.0 }
 0x1d6   :  { %v456_v27 = vmax.f32 %v432_v25, 0.0 }
 0x1d7   :  { %v466_v28 = vpack.c.bf16 %v458_v26, %v457_v21 }
 0x1d8   :  { %v465_v29 = vpack.c.bf16 %v456_v27, %v455_v24 }
 0x1da   :  { %7288 = vmatprep.mubr.msk.bf16.mxu1 %vm499_vm1, %v465_v29  ;;  %7312 = vmatprep.mubr.msk.bf16.mxu0 %vm499_vm1, %v465_v29 }
 0x1db   :  { %7289 = vmatmul.mubr.msk.bf16.gmra.mrb[12].mxu1 %vm499_vm1, %v466_v28  ;;  %7313 = vmatmul.mubr.msk.bf16.gmra.mrb[28].mxu0 %vm499_vm1, %v466_v28 }
 0x296   :  { %v7278_v30 = vpop.f32.mrb[0].mxu1  ;;  %v9088_v31 = vpop.f32.mrb[16].mxu0 }
 0x297   :  { %1554 = vperm.xlu0 %7766, %v9088_v31   ;;  %802 = vperm.xlu1 %7764, %v9088_v31   ;;  %v558_v32 = vpop.f32.mrb[1].mxu1  ;;  %v9092_v33 = vpop.f32.mrb[17].mxu0 }
 0x298   :  { %v7279_v34 = vpop.f32.mrb[2].mxu1  ;;  %v9094_v37 = vpop.f32.mrb[18].mxu0 }
 0x299   :  { %v9096_v38 = vpack.c.bf16 %v7279_v34, %v7278_v30  ;;  %v561_v39 = vpop.f32.mrb[3].mxu1  ;;  %v9098_v40 = vpop.f32.mrb[19].mxu0 }
 0x29a   :  { %v9100_v41 = vpack.c.bf16 %v561_v39, %v558_v32 }
 0x29b   :  { %7767 = vset.pattern.permute.xlu0 %v12944_v42  ;;  %7765 = vset.pattern.permute.xlu1 %v12942_v43  ;;  %v1047_v45 = vsel %vm321_vm0, %v9096_v38, 1065369472 }
 0x29c   :  { %1927 = vperm.xlu0 %7767, %v9088_v31   ;;  %1173 = vperm.xlu1 %7765, %v9088_v31   ;;  %v1044_v44 = vsel %vm321_vm0, %v9100_v41, 1065369472 }
 0x29d   :  { %7316 = vmatprep.subr.bf16.mxu1 %v1044_v44 }
 0x29e   :  { %7317 = vmatpush3.bf16.msra.mxu1 %v1044_v44  ;;  %v7282_v46 = vpop.f32.mrb[4].mxu1  ;;  %v9110_v47 = vpop.f32.mrb[20].mxu0 }
 0x29f   :  { %7318 = vmatprep.subr.bf16.mxu1 %v1047_v45  ;;  %v574_v48 = vpop.f32.mrb[5].mxu1  ;;  %v9112_v49 = vpop.f32.mrb[21].mxu0 }
 0x2a0   :  { %7770 = vset.pattern.permute.xlu0 %v12948_v35  ;;  %7768 = vset.pattern.permute.xlu1 %v12946_v36  ;;  %v7283_v50 = vpop.f32.mrb[6].mxu1  ;;  %v9116_v51 = vpop.f32.mrb[22].mxu0 }
 0x2a1   :  { %1546 = vperm.xlu0 %7770, %v9092_v33   ;;  %792 = vperm.xlu1 %7768, %v9092_v33   ;;  %v9120_v52 = vpack.c.bf16 %v7283_v50, %v7282_v46  ;;  %v577_v53 = vpop.f32.mrb[7].mxu1  ;;  %v9122_v54 = vpop.f32.mrb[23].mxu0 }
 0x2a2   :  { %7319 = vmatpush3.bf16.msra.mxu1 %v1047_v45  ;;  %v9124_v55 = vpack.c.bf16 %v577_v53, %v574_v48 }
 0x2a3   :  { %13164 = vst [vmem:[#allocation32_spill] sm:$0xff] %v9120_v52  ;;  %v1053_v57 = vsel %vm321_vm0, %v9120_v52, 1065369472 }
 0x2a4   :  { %v1050_v56 = vsel %vm321_vm0, %v9124_v55, 1065369472 }
 0x2a5   :  { %7771 = vset.pattern.permute.xlu0 %v12944_v42  ;;  %7769 = vset.pattern.permute.xlu1 %v12942_v43 }
 0x2a6   :  { %1919 = vperm.xlu0 %7771, %v9092_v33   ;;  %1165 = vperm.xlu1 %7769, %v9092_v33   ;;  %v7286_v58 = vpop.f32.mrb[8].mxu1  ;;  %v9134_v59 = vpop.f32.mrb[24].mxu0 }
 0x2a7   :  { %7320 = vmatprep.subr.bf16.mxu1 %v1050_v56  ;;  %v590_v60 = vpop.f32.mrb[9].mxu1  ;;  %v9136_v61 = vpop.f32.mrb[25].mxu0 }
 0x2a8   :  { %7321 = vmatpush3.bf16.msra.mxu1 %v1050_v56  ;;  %v7287_v62 = vpop.f32.mrb[10].mxu1  ;;  %v9138_v63 = vpop.f32.mrb[26].mxu0 }
 0x2a9   :  { %7322 = vmatprep.subr.bf16.mxu1 %v1053_v57  ;;  %v9140_v0 = vpack.c.bf16 %v7287_v62, %v7286_v58  ;;  %v593_v1 = vpop.f32.mrb[11].mxu1  ;;  %v9142_v2 = vpop.f32.mrb[27].mxu0 }
 0x2aa   :  { %7774 = vset.pattern.permute.xlu0 %v12948_v35  ;;  %7772 = vset.pattern.permute.xlu1 %v12946_v36  ;;  %v9146_v3 = vpack.c.bf16 %v593_v1, %v590_v60 }
 0x2ab   :  { %13165 = vst [vmem:[#allocation33_spill] sm:$0xff] %v9140_v0  ;;  %1558 = vperm.xlu0 %7774, %v9094_v37   ;;  %807 = vperm.xlu1 %7772, %v9094_v37   ;;  %v1059_v7 = vsel %vm321_vm0, %v9140_v0, 1065369472 }
 0x2ac   :  { %13166 = vst [vmem:[#allocation34_spill] sm:$0xff] %v9146_v3  ;;  %7323 = vmatpush3.bf16.msra.mxu1 %v1053_v57  ;;  %v1056_v4 = vsel %vm321_vm0, %v9146_v3, 1065369472 }
 0x2ad   :  { %7324 = vmatprep.subr.bf16.mxu1 %v1056_v4 }
 0x2ae   :  { %v7290_v5 = vpop.f32.mrb[12].mxu1  ;;  %v9152_v6 = vpop.f32.mrb[28].mxu0 }
 0x2af   :  { %7777 = vset.pattern.permute.xlu0 %v12942_v43  ;;  %7773 = vset.pattern.permute.xlu1 %v12942_v43  ;;  %v606_v8 = vpop.f32.mrb[13].mxu1  ;;  %v9158_v9 = vpop.f32.mrb[29].mxu0 }
 0x2b0   :  { %1177 = vperm.xlu1 %7773, %v9094_v37   ;;  %1169 = vperm.xlu0 %7777, %v9098_v40   ;;  %v7291_v10 = vpop.f32.mrb[14].mxu1  ;;  %v9162_v11 = vpop.f32.mrb[30].mxu0 }
 0x2b1   :  { %7325 = vmatpush3.bf16.msra.mxu1 %v1056_v4  ;;  %v9164_v12 = vpack.c.bf16 %v7291_v10, %v7290_v5  ;;  %v609_v13 = vpop.f32.mrb[15].mxu1  ;;  %v9166_v14 = vpop.f32.mrb[31].mxu0 }
 0x2b2   :  { %7326 = vmatprep.subr.bf16.mxu1 %v1059_v7  ;;  %v9168_v15 = vpack.c.bf16 %v609_v13, %v606_v8 }
 0x2b3   :  { %13167 = vst [vmem:[#allocation35_spill] sm:$0xff] %v9164_v12  ;;  %v1065_v17 = vsel %vm321_vm0, %v9164_v12, 1065369472 }
 0x2b4   :  { %13168 = vst [vmem:[#allocation36_spill] sm:$0xff] %v9168_v15  ;;  %7775 = vset.pattern.permute.xlu1 %v12944_v42  ;;  %7778 = vset.pattern.permute.xlu0 %v12948_v35  ;;  %v1062_v16 = vsel %vm321_vm0, %v9168_v15, 1065369472 }
 0x2b5   :  { %1931 = vperm.xlu1 %7775, %v9094_v37   ;;  %1550 = vperm.xlu0 %7778, %v9098_v40  }
 0x2b6   :  { %7327 = vmatpush3.bf16.msra.mxu1 %v1059_v7 }
 0x2b7   :  { %7328 = vmatprep.subr.bf16.mxu1 %v1062_v16 }
 0x2b9   :  { %7776 = vset.pattern.permute.xlu1 %v12946_v36  ;;  %7779 = vset.pattern.permute.xlu0 %v12944_v42 }
 0x2ba   :  { %1923 = vperm.xlu0 %7779, %v9098_v40   ;;  %797 = vperm.xlu1 %7776, %v9098_v40  }
 0x2bb   :  { %7329 = vmatpush3.bf16.msra.mxu1 %v1062_v16 }
 0x2bc   :  { %7330 = vmatprep.subr.bf16.mxu1 %v1065_v17 }
 0x2be   :  { %1783 = vrot.lane.b32.xlu1 %v9096_v38, %s8731_s30  ;;  %1410 = vrot.lane.b32.xlu0 %v9096_v38, %s8745_s11 }
 0x2bf   :  { %7781 = vset.pattern.permute.xlu0 %v12948_v35  ;;  %7331 = vmatpush3.bf16.msra.mxu1 %v1065_v17 }
 0x2c2   :  { %2156 = vrot.lane.b32.xlu1 %v9096_v38, %s8746_s12  ;;  %2154 = vrot.lane.b32.xlu0 %v9100_v41, %s8746_s12 }
 0x2c6   :  { %1570 = vperm.xlu0 %7781, %v9110_v47   ;;  %1408 = vrot.lane.b32.xlu1 %v9100_v41, %s8745_s11 }
 0x2ca   :  { %1562 = vperm.xlu0 %7781, %v9112_v49   ;;  %1781 = vrot.lane.b32.xlu1 %v9100_v41, %s8731_s30 }
 0x2ce   :  { %7785 = vset.pattern.permute.xlu0 %v12944_v42  ;;  %822 = vperm.xlu1 %7776, %v9110_v47  }
 0x2cf   :  { %1935 = vperm.xlu0 %7785, %v9112_v49  }
 0x2d2   :  { %7780 = vset.pattern.permute.xlu1 %v12942_v43 }
 0x2d3   :  { %1947 = vperm.xlu0 %7785, %v9116_v51   ;;  %1189 = vperm.xlu1 %7780, %v9110_v47  }
 0x2d7   :  { %7791 = vset.pattern.permute.xlu0 %v12948_v35  ;;  %7782 = vset.pattern.permute.xlu1 %v12944_v42 }
 0x2d8   :  { %1566 = vperm.xlu0 %7791, %v9122_v54   ;;  %1943 = vperm.xlu1 %7782, %v9110_v47  }
 0x2dc   :  { %7783 = vset.pattern.permute.xlu1 %v12946_v36  ;;  %1414 = vrot.lane.b32.xlu0 %v9120_v52, %s8745_s11 }
 0x2dd   :  { %812 = vperm.xlu1 %7783, %v9112_v49   ;;  %7800 = vset.pattern.permute.xlu0 %v12944_v42 }
 0x2e0   :  { %1951 = vperm.xlu0 %7800, %v9136_v61  }
 0x2e1   :  { %7784 = vset.pattern.permute.xlu1 %v12942_v43 }
 0x2e2   :  { %1181 = vperm.xlu1 %7784, %v9112_v49  }
 0x2e4   :  { %7802 = vset.pattern.permute.xlu0 %v12942_v43 }
 0x2e5   :  { %1209 = vperm.xlu0 %7802, %v9138_v63  }
 0x2e6   :  { %7786 = vset.pattern.permute.xlu1 %v12946_v36 }
 0x2e7   :  { %827 = vperm.xlu1 %7786, %v9116_v51  }
 0x2e9   :  { %7804 = vset.pattern.permute.xlu0 %v12944_v42 }
 0x2ea   :  { %1963 = vperm.xlu0 %7804, %v9138_v63  }
 0x2eb   :  { %7787 = vset.pattern.permute.xlu1 %v12942_v43 }
 0x2ec   :  { %1193 = vperm.xlu1 %7787, %v9116_v51  }
 0x2ee   :  { %7806 = vset.pattern.permute.xlu0 %v12942_v43 }
 0x2ef   :  { %1201 = vperm.xlu0 %7806, %v9142_v2  }
 0x2f0   :  { %7788 = vset.pattern.permute.xlu1 %v12948_v35 }
 0x2f1   :  { %1574 = vperm.xlu1 %7788, %v9116_v51  }
 0x2f3   :  { %7807 = vset.pattern.permute.xlu0 %v12948_v35 }
 0x2f4   :  { %1582 = vperm.xlu0 %7807, %v9142_v2  }
 0x2f5   :  { %7789 = vset.pattern.permute.xlu1 %v12946_v36 }
 0x2f6   :  { %817 = vperm.xlu1 %7789, %v9122_v54  }
 0x2f8   :  { %1418 = vrot.lane.b32.xlu0 %v9140_v0, %s8745_s11 }
 0x2f9   :  { %7816 = vset.pattern.permute.xlu0 %v12944_v42 }
 0x2fa   :  { %7790 = vset.pattern.permute.xlu1 %v12942_v43 }
 0x2fb   :  { %1185 = vperm.xlu1 %7790, %v9122_v54  }
 0x2fc   :  { %1967 = vperm.xlu0 %7816, %v9158_v9  }
 0x2ff   :  { %7792 = vset.pattern.permute.xlu1 %v12944_v42 }
 0x300   :  { %1939 = vperm.xlu1 %7792, %v9122_v54   ;;  %7818 = vset.pattern.permute.xlu0 %v12942_v43 }
 0x301   :  { %1225 = vperm.xlu0 %7818, %v9162_v11  }
 0x304   :  { %1412 = vrot.lane.b32.xlu1 %v9124_v55, %s8745_s11 }
 0x305   :  { %7820 = vset.pattern.permute.xlu0 %v12944_v42  ;;  %7793 = vset.pattern.permute.xlu1 %v12946_v36 }
 0x306   :  { %1979 = vperm.xlu0 %7820, %v9162_v11  }
 0x308   :  { %1785 = vrot.lane.b32.xlu1 %v9124_v55, %s8731_s30 }
 0x30a   :  { %7822 = vset.pattern.permute.xlu0 %v12942_v43 }
 0x30b   :  { %1217 = vperm.xlu0 %7822, %v9166_v14  }
 0x30c   :  { %842 = vperm.xlu1 %7793, %v9134_v59  }
 0x30f   :  { %7823 = vset.pattern.permute.xlu0 %v12948_v35 }
 0x310   :  { %7794 = vset.pattern.permute.xlu1 %v12942_v43  ;;  %1598 = vperm.xlu0 %7823, %v9166_v14  }
 0x311   :  { %1205 = vperm.xlu1 %7794, %v9134_v59  }
 0x314   :  { %1422 = vrot.lane.b32.xlu0 %v9164_v12, %s8745_s11 }
 0x315   :  { %7795 = vset.pattern.permute.xlu1 %v12948_v35 }
 0x316   :  { %v9258_v18 = vpop.permute.xlu0 %1554  ;;  %v9260_v19 = vpop.permute.xlu1 %802  ;;  %1586 = vperm.xlu1 %7795, %v9134_v59  }
 0x31a   :  { %7796 = vset.pattern.permute.xlu1 %v12944_v42 }
 0x31b   :  { %v9264_v20 = vpop.permute.xlu0 %1927  ;;  %v9266_v21 = vpop.permute.xlu1 %1173  ;;  %1959 = vperm.xlu1 %7796, %v9134_v59  }
 0x31f   :  { %7797 = vset.pattern.permute.xlu1 %v12946_v36 }
 0x320   :  { %v9270_v22 = vpop.permute.xlu0 %1546  ;;  %v9272_v23 = vpop.permute.xlu1 %792  ;;  %832 = vperm.xlu1 %7797, %v9136_v61  }
 0x324   :  { %7798 = vset.pattern.permute.xlu1 %v12942_v43 }
 0x325   :  { %v9276_v24 = vpop.permute.xlu0 %1919  ;;  %v9278_v25 = vpop.permute.xlu1 %1165  ;;  %1197 = vperm.xlu1 %7798, %v9136_v61  }
 0x329   :  { %7799 = vset.pattern.permute.xlu1 %v12948_v35 }
 0x32a   :  { %v9282_v26 = vpop.permute.xlu0 %1558  ;;  %v9284_v27 = vpop.permute.xlu1 %807  ;;  %1578 = vperm.xlu1 %7799, %v9136_v61  }
 0x32e   :  { %7801 = vset.pattern.permute.xlu1 %v12946_v36 }
 0x32f   :  { %v9288_v28 = vpop.permute.xlu1 %1177  ;;  %v9290_v29 = vpop.permute.xlu0 %1169  ;;  %847 = vperm.xlu1 %7801, %v9138_v63  }
 0x332   :  { %758 = vxpose.xlu0.b32.start [1/16] (narrow) %v9092_v33, 8 }
 0x333   :  { %7803 = vset.pattern.permute.xlu1 %v12948_v35 }
 0x334   :  { %v9295_v30 = vpop.permute.xlu1 %1931  ;;  %v9297_v32 = vpop.permute.xlu0 %1550  ;;  %1590 = vperm.xlu1 %7803, %v9138_v63  }
 0x336   :  { %759 = vxpose.xlu0.b32.cont [2/16] (narrow) %v9098_v40, 8 }
 0x338   :  { %7805 = vset.pattern.permute.xlu1 %v12946_v36 }
 0x339   :  { %v9302_v34 = vpop.permute.xlu0 %1923  ;;  %v9304_v38 = vpop.permute.xlu1 %797  ;;  %837 = vperm.xlu1 %7805, %v9142_v2  }
 0x33a   :  { %760 = vxpose.xlu0.b32.cont [3/16] (narrow) %v9088_v31, 8 }
 0x33d   :  { %v9308_v33 = vpop.permute.xlu1 %1783  ;;  %v1411_v39 = vpop.permute.xlu0 %1410  ;;  %7808 = vset.pattern.permute.xlu1 %v12944_v42 }
 0x33e   :  { %13169 = vst [vmem:[#allocation37_spill] sm:$0xff] %v9308_v33  ;;  %1955 = vperm.xlu1 %7808, %v9142_v2   ;;  %761 = vxpose.xlu0.b32.cont [4/16] (narrow) %v9094_v37, 8  ;;  %v1428_v45 = vsel %vm321_vm0, %v1411_v39, 1065369472 }
 0x341   :  { %v9313_v40 = vpop.permute.xlu1 %2156  ;;  %v9315_v41 = vpop.permute.xlu0 %2154 }
 0x342   :  { %13170 = vst [vmem:[#allocation38_spill] sm:$0xff] %v9313_v40  ;;  %1416 = vrot.lane.b32.xlu1 %v9146_v3, %s8745_s11  ;;  %762 = vxpose.xlu0.b32.cont [5/16] (narrow) %v9112_v49, 8 }
 0x343   :  { %7809 = vset.pattern.permute.xlu1 %v12946_v36 }
 0x345   :  { %v1409_v31 = vpop.permute.xlu1 %1408  ;;  %v9324_v37 = vpop.permute.xlu0 %1570 }
 0x346   :  { %862 = vperm.xlu1 %7809, %v9152_v6   ;;  %763 = vxpose.xlu0.b32.cont [6/16] (narrow) %v9122_v54, 8  ;;  %v1425_v44 = vsel %vm321_vm0, %v1409_v31, 1065369472  ;;  %13171 = vst [vmem:[#allocation39_spill] sm:$0xff] %v9324_v37  ;;  %v13192_v37 = vmov -1e+30  }
 0x347   :  { %7348 = vmatprep.subr.bf16.mxu0 %v1425_v44 }
 0x348   :  { %7349 = vmatpush3.bf16.msra.mxu0 %v1425_v44 }
 0x349   :  { %7350 = vmatprep.subr.bf16.mxu0 %v1428_v45  ;;  %v1782_v46 = vpop.permute.xlu1 %1781  ;;  %v9336_v50 = vpop.permute.xlu0 %1562 }
 0x34a   :  { %7810 = vset.pattern.permute.xlu1 %v12942_v43  ;;  %764 = vxpose.xlu0.b32.cont [7/16] (narrow) %v9110_v47, 8  ;;  %v9330_v48 = vsel %vm321_vm0, %v1782_v46, 1065369472 }
 0x34b   :  { %13172 = vst [vmem:[#allocation40_spill] sm:$0xff] %v9330_v48  ;;  %1221 = vperm.xlu1 %7810, %v9152_v6   ;;  %7380 = vmatprep.subr.bf16.mxu1 %v9330_v48 }
 0x34c   :  { %7351 = vmatpush3.bf16.msra.mxu0 %v1428_v45 }
 0x34d   :  { %v9334_v49 = vpop.permute.xlu1 %822 }
 0x34e   :  { %765 = vxpose.xlu0.b32.cont [8/16] (narrow) %v9116_v51, 8  ;;  %v9344_v47 = vpop.permute.xlu0 %1935 }
 0x34f   :  { %7811 = vset.pattern.permute.xlu1 %v12948_v35 }
 0x350   :  { %1602 = vperm.xlu1 %7811, %v9152_v6  }
 0x352   :  { %v9341_v53 = vpop.permute.xlu1 %1189  ;;  %766 = vxpose.xlu0.b32.cont [9/16] (narrow) %v9136_v61, 8  ;;  %v9352_v51 = vpop.permute.xlu0 %1947 }
 0x353   :  { %13174 = vst [vmem:[#allocation42_spill] sm:$0xff] %v9352_v51 }
 0x354   :  { %7812 = vset.pattern.permute.xlu1 %v12944_v42 }
 0x355   :  { %1975 = vperm.xlu1 %7812, %v9152_v6  }
 0x356   :  { %767 = vxpose.xlu0.b32.cont [10/16] (narrow) %v9142_v2, 8 }
 0x357   :  { %v9349_v54 = vpop.permute.xlu1 %1943  ;;  %v9361_v57 = vpop.permute.xlu0 %1566 }
 0x358   :  { %13173 = vst [vmem:[#allocation41_spill] sm:$0xff] %v9349_v54 }
 0x359   :  { %7813 = vset.pattern.permute.xlu1 %v12946_v36 }
 0x35a   :  { %852 = vperm.xlu1 %7813, %v9158_v9   ;;  %768 = vxpose.xlu0.b32.cont [11/16] (narrow) %v9134_v59, 8 }
 0x35b   :  { %v1415_v60 = vpop.permute.xlu0 %1414 }
 0x35c   :  { %v9356_v56 = vpop.permute.xlu1 %812 }
 0x35e   :  { %7814 = vset.pattern.permute.xlu1 %v12942_v43  ;;  %769 = vxpose.xlu0.b32.cont [12/16] (narrow) %v9138_v63, 8  ;;  %v206_v43 = vld [vmem:[#allocation3] sm:$0xff] }
 0x35f   :  { %1213 = vperm.xlu1 %7814, %v9158_v9   ;;  %v9376_v62 = vpop.permute.xlu0 %1951 }
 0x360   :  { %13175 = vst [vmem:[#allocation43_spill] sm:$0xff] %v9376_v62 }
 0x361   :  { %v9363_v58 = vpop.permute.xlu1 %1181 }
 0x362   :  { %770 = vxpose.xlu0.b32.cont [13/16] (narrow) %v9158_v9, 8 }
 0x363   :  { %7815 = vset.pattern.permute.xlu1 %v12948_v35 }
 0x364   :  { %1594 = vperm.xlu1 %7815, %v9158_v9   ;;  %v9383_v1 = vpop.permute.xlu0 %1209 }
 0x366   :  { %v9368_v59 = vpop.permute.xlu1 %827  ;;  %771 = vxpose.xlu0.b32.cont [14/16] (narrow) %v9166_v14, 8 }
 0x368   :  { %7817 = vset.pattern.permute.xlu1 %v12946_v36 }
 0x369   :  { %867 = vperm.xlu1 %7817, %v9162_v11   ;;  %v9390_v4 = vpop.permute.xlu0 %1963 }
 0x36a   :  { %772 = vxpose.xlu0.b32.cont [15/16] (narrow) %v9152_v6, 8  ;;  %13176 = vst [vmem:[#allocation44_spill] sm:$0xff] %v9390_v4 }
 0x36b   :  { %v9374_v61 = vpop.permute.xlu1 %1193 }
 0x36d   :  { %7819 = vset.pattern.permute.xlu1 %v12948_v35  ;;  %v211_v35 = vunpack.c.1.s8 %v206_v43 }
 0x36e   :  { %1606 = vperm.xlu1 %7819, %v9162_v11   ;;  %773 = vxpose.xlu0.b32.end [16/16] (narrow) %v9162_v11, 8  ;;  %v9397_v6 = vpop.permute.xlu0 %1201  ;;  %v1434_v11 = vsel %vm321_vm0, %v1415_v60, 1065369472 }
 0x370   :  { %v9381_v63 = vpop.permute.xlu1 %1574 }
 0x372   :  { %7821 = vset.pattern.permute.xlu1 %v12946_v36 }
 0x373   :  { %857 = vperm.xlu1 %7821, %v9166_v14   ;;  %v9401_v9 = vpop.permute.xlu0 %1582 }
 0x374   :  { %13178 = vst [vmem:[#allocation46_spill] sm:$0xff] %v9401_v9 }
 0x375   :  { %v9387_v2 = vpop.permute.xlu1 %817 }
 0x377   :  { %7824 = vset.pattern.permute.xlu1 %v12944_v42 }
 0x378   :  { %1971 = vperm.xlu1 %7824, %v9166_v14   ;;  %v9407_v14 = vpop.permute.xlu0 %1418 }
 0x37a   :  { %v9393_v5 = vpop.permute.xlu1 %1185 }
 0x37c   :  { %1420 = vrot.lane.b32.xlu1 %v9168_v15, %s8745_s11  ;;  %v9411_v17 = vpop.permute.xlu0 %1967 }
 0x37d   :  { %13180 = vst [vmem:[#allocation48_spill] sm:$0xff] %v9411_v17  ;;  %v210_v17 = vunpack.c.0.s8 %v206_v43 }
 0x37f   :  { %v9399_v7 = vpop.permute.xlu1 %1939  ;;  %v226_v62 = vcvt.s32.f32 %v210_v17 }
 0x380   :  { %13177 = vst [vmem:[#allocation45_spill] sm:$0xff] %v9399_v7  ;;  %v9417_v44 = vpop.permute.xlu0 %1225 }
 0x381   :  { %vm242_vm3 = vcmp.gt.f32.partialorder %v226_v62, 0.0 }
 0x383   :  { %v1413_v8 = vpop.permute.xlu1 %1412 }
 0x384   :  { %v1431_v10 = vsel %vm321_vm0, %v1413_v8, 1065369472 }
 0x385   :  { %7352 = vmatprep.subr.bf16.mxu0 %v1431_v10  ;;  %v9421_v46 = vpop.permute.xlu0 %1979 }
 0x386   :  { %7353 = vmatpush3.bf16.msra.mxu0 %v1431_v10  ;;  %13183 = vst [vmem:[#allocation51_spill] sm:$0xff] %v9421_v46  ;;  %v227_v46 = vcvt.s32.f32 %v211_v35 }
 0x387   :  { %7354 = vmatprep.subr.bf16.mxu0 %v1434_v11  ;;  %v9405_v13 = vpop.permute.xlu1 %1785 }
 0x388   :  { %13179 = vst [vmem:[#allocation47_spill] sm:$0xff] %v9405_v13  ;;  %v213_v13 = vunpack.c.3.s8 %v206_v43  ;;  %vm243_vm2 = vcmp.gt.f32.partialorder %v227_v46, 0.0 }
 0x38a   :  { %7355 = vmatpush3.bf16.msra.mxu0 %v1434_v11  ;;  %v9425_v8 = vpop.permute.xlu0 %1217  ;;  %v870_v11 = vlaneseq  ;;  %v229_v46 = vcvt.s32.f32 %v213_v13 }
 0x38b   :  { %v9409_v16 = vpop.permute.xlu1 %842 }
 0x38c   :  { %v9433_v12 = vshrl.u32 %v870_v11, 7  ;;  %vm245_vm9 = vcmp.gt.f32.partialorder %v229_v46, 0.0 }
 0x38e   :  { %13186 = vst [vmem:[#allocation54_spill] sm:$0xff] %v9433_v12  ;;  %v9440_v4 = vsub.s32 0, %v9433_v12  ;;  %v12959_v40 = vsub.s32 1, %v9433_v12  ;;  %v13194_v51 = vsub.s32 3, %v9433_v12 }
 0x38f   :  { %v9429_v42 = vpop.permute.xlu0 %1598 }
 0x390   :  { %v9413_v39 = vpop.permute.xlu1 %1205  ;;  %13184 = vst [vmem:[#allocation52_spill] sm:$0xff] %v9429_v42  ;;  %13187 = vst [vmem:[#allocation55_spill] sm:$0xff] %v9440_v4 }
 0x393   :  { %v9435_v15 = vpop.permute.xlu0 %1422 }
 0x395   :  { %v9415_v31 = vpop.permute.xlu1 %1586 }
 0x396   :  { %13181 = vst [vmem:[#allocation49_spill] sm:$0xff] %v9415_v31 }
 0x39a   :  { %v9419_v45 = vpop.permute.xlu1 %1959 }
 0x39b   :  { %13182 = vst [vmem:[#allocation50_spill] sm:$0xff] %v9419_v45  ;;  %v212_v45 = vunpack.c.2.s8 %v206_v43 }
 0x39d   :  { %v228_v33 = vcvt.s32.f32 %v212_v45 }
 0x39f   :  { %v9423_v60 = vpop.permute.xlu1 %832  ;;  %vm244_vm4 = vcmp.gt.f32.partialorder %v228_v33, 0.0 }
 0x3a4   :  { %v9427_v10 = vpop.permute.xlu1 %1197 }
 0x3a9   :  { %v9431_v36 = vpop.permute.xlu1 %1578 }
 0x3aa   :  { %13185 = vst [vmem:[#allocation53_spill] sm:$0xff] %v9431_v36 }
 0x3ae   :  { %v9437_v0 = vpop.permute.xlu1 %847 }
 0x3b2   :  { %v774_v42 = vpop.trf.xlu0 }
 0x3b3   :  { %v9444_v11 = vrot.slane %v774_v42, %v9440_v4  ;;  %v9448_v48 = vrot.slane %v774_v42, %v12959_v40  ;;  %v9450_v31 = vpop.permute.xlu1 %1590  ;;  %v12960_v4 = vmov -1e+30   ;;  %v9487_v54 = vrot.slane %v774_v42, %v13194_v51 }
 0x3b4   :  { %13188 = vst [vmem:[#allocation56_spill] sm:$0xff] %v9450_v31  ;;  %v9461_v40 = vsel %vm243_vm2, 0.0, %v12960_v4  ;;  %v9464_v62 = vsel %vm242_vm3, 0.0, %v12960_v4  ;;  %v13191_v4 = vsub.s32 2, %v9433_v12 }
 0x3b5   :  { %v875_v43 = vadd.f32 %v9444_v11, %v9304_v38  ;;  %v874_v17 = vadd.f32 %v9444_v11, %v9272_v23  ;;  %v876_v45 = vadd.f32 %v9444_v11, %v9260_v19  ;;  %13189 = vst [vmem:[#allocation57_spill] sm:$0xff] %v9461_v40  ;;  %13190 = vst [vmem:[#allocation58_spill] sm:$0xff] %v9464_v62 }
 0x3b6   :  { %v1233_v9 = vadd.f32 %v9448_v48, %v9290_v29  ;;  %v877_v23 = vadd.f32 %v9444_v11, %v9284_v27  ;;  %v1235_v19 = vadd.f32 %v9448_v48, %v9288_v28  ;;  %v9476_v36 = vrot.slane %v774_v42, %v13191_v4 }
 0x3b7   :  { %vm891_vm5 = vcmp.gt.f32.partialorder %v875_v43, 0.0  ;;  %v907_v38 = vmul.f32 0.2, %v875_v43  ;;  %vm890_vm6 = vcmp.gt.f32.partialorder %v874_v17, 0.0  ;;  %v906_v35 = vmul.f32 0.2, %v874_v17 }
 0x3b8   :  { %v9472_v13 = vpop.permute.xlu1 %837  ;;  %vm892_vm7 = vcmp.gt.f32.partialorder %v876_v45, 0.0  ;;  %v908_v31 = vmul.f32 0.2, %v876_v45  ;;  %vm1249_vm8 = vcmp.gt.f32.partialorder %v1233_v9, 0.0  ;;  %v1265_v29 = vmul.f32 0.2, %v1233_v9 }
 0x3b9   :  { %v923_v3 = vsel %vm891_vm5, %v875_v43, %v907_v38  ;;  %v922_v27 = vsel %vm890_vm6, %v874_v17, %v906_v35  ;;  %v9483_v28 = vsel %vm244_vm4, 0.0, %v13192_v37  ;;  %v1232_v43 = vadd.f32 %v9448_v48, %v9278_v25  ;;  %v9494_v38 = vld [vmem:[#allocation3 + $0x8] sm:$0xff] }
 0x3ba   :  { %v9479_v52 = vadd.f32 %v923_v3, %v9461_v40  ;;  %13193 = vst [vmem:[#allocation59_spill] sm:$0xff] %v9483_v28  ;;  %v9490_v7 = vadd.f32 %v922_v27, %v9464_v62  ;;  %v924_v4 = vsel %vm892_vm7, %v876_v45, %v908_v31  ;;  %v1281_v3 = vsel %vm1249_vm8, %v1233_v9, %v1265_v29 }
 0x3bb   :  { %vm893_vm10 = vcmp.gt.f32.partialorder %v877_v23, 0.0  ;;  %v909_v33 = vmul.f32 0.2, %v877_v23  ;;  %v1267_v35 = vmul.f32 0.2, %v1235_v19  ;;  %vm1251_vm11 = vcmp.gt.f32.partialorder %v1235_v19, 0.0 }
 0x3bc   :  { %956 = vmax.xlane.f32.xlu1 %v9479_v52  ;;  %954 = vmax.xlane.f32.xlu0 %v9490_v7  ;;  %v1614_v42 = vadd.f32 %v9476_v36, %v9297_v32  ;;  %v9503_v51 = vadd.f32 %v924_v4, %v9483_v28  ;;  %v9507_v25 = vsel %vm245_vm9, 0.0, %v13192_v37  ;;  %v216_v9 = vunpack.c.2.s8 %v9494_v38 }
 0x3bd   :  { %v9498_v17 = vpop.permute.xlu1 %1955  ;;  %13197 = vst [vmem:[#allocation62_spill] sm:$0xff] %v9507_v25  ;;  %v9511_v31 = vadd.f32 %v1281_v3, %v9461_v40  ;;  %v925_v45 = vsel %vm893_vm10, %v877_v23, %v909_v33  ;;  %v1264_v29 = vmul.f32 0.2, %v1232_v43  ;;  %v1234_v27 = vadd.f32 %v9448_v48, %v9266_v21 }
 0x3be   :  { %13195 = vst [vmem:[#allocation60_spill] sm:$0xff] %v9498_v17  ;;  %13196 = vst [vmem:[#allocation61_spill] sm:$0xff] %v9503_v51  ;;  %v1283_v32 = vsel %vm1251_vm11, %v1235_v19, %v1267_v35  ;;  %vm1248_vm12 = vcmp.gt.f32.partialorder %v1232_v43, 0.0  ;;  %v1646_v4 = vmul.f32 0.2, %v1614_v42  ;;  %v1989_v46 = vadd.f32 %v9487_v54, %v9295_v30 }
 0x3bf   :  { %13198 = vst [vmem:[#allocation63_spill] sm:$0xff] %v9511_v31  ;;  %vm1630_vm13 = vcmp.gt.f32.partialorder %v1614_v42, 0.0  ;;  %v217_v3 = vunpack.c.3.s8 %v9494_v38  ;;  %v9522_v33 = vadd.f32 %v925_v45, %v9507_v25  ;;  %v1440_v21 = vsel %vm321_vm0, %v9407_v14, 1065369472 }
 0x3c0   :  { %958 = vmax.xlane.f32.xlu1 %v9503_v51  ;;  %1314 = vmax.xlane.f32.xlu0 %v9511_v31  ;;  %v232_v19 = vcvt.s32.f32 %v216_v9  ;;  %v9527_v35 = vadd.f32 %v1283_v32, %v9507_v25  ;;  %v1280_v30 = vsel %vm1248_vm12, %v1232_v43, %v1264_v29  ;;  %v1266_v17 = vmul.f32 0.2, %v1234_v27 }
 0x3c1   :  { %v1417_v12 = vpop.permute.xlu1 %1416  ;;  %v1613_v31 = vadd.f32 %v9476_v36, %v9270_v22  ;;  %vm1250_vm14 = vcmp.gt.f32.partialorder %v1234_v27, 0.0  ;;  %v2021_v45 = vmul.f32 0.2, %v1989_v46  ;;  %v1238_v51 = vadd.f32 %v9448_v48, %v9341_v53 }
 0x3c2   :  { %v1437_v23 = vsel %vm321_vm0, %v1417_v12, 1065369472  ;;  %v1662_v12 = vsel %vm1630_vm13, %v1614_v42, %v1646_v4  ;;  %vm2005_vm15 = vcmp.gt.f32.partialorder %v1989_v46, 0.0  ;;  %v9538_v43 = vadd.f32 %v1280_v30, %v9464_v62 }
 0x3c3   :  { %7356 = vmatprep.subr.bf16.mxu0 %v1437_v23  ;;  %vm248_vm2 = vcmp.gt.f32.partialorder %v232_v19, 0.0  ;;  %v233_v22 = vcvt.s32.f32 %v217_v3  ;;  %v215_v9 = vunpack.c.1.s8 %v9494_v38  ;;  %v9542_v42 = vadd.f32 %v1662_v12, %v9461_v40 }
 0x3c4   :  { %7357 = vmatpush3.bf16.msra.mxu0 %v1437_v23  ;;  %960 = vmax.xlane.f32.xlu1 %v9522_v33  ;;  %v1282_v29 = vsel %vm1250_vm14, %v1234_v27, %v1266_v17  ;;  %v1645_v32 = vmul.f32 0.2, %v1613_v31  ;;  %v1615_v53 = vadd.f32 %v9476_v36, %v9258_v18  ;;  %v2037_v4 = vsel %vm2005_vm15, %v1989_v46, %v2021_v45  ;;  %v9564_v45 = vld [vmem:[#allocation3 + $0x10] sm:$0xff] }
 0x3c5   :  { %1318 = vmax.xlane.f32.xlu0 %v9527_v35  ;;  %7358 = vmatprep.subr.bf16.mxu0 %v1440_v21  ;;  %v9535_v14 = vpop.permute.xlu1 %862  ;;  %13199 = vst [vmem:[#allocation64_spill] sm:$0xff] %v9542_v42  ;;  %vm1629_vm3 = vcmp.gt.f32.partialorder %v1613_v31, 0.0  ;;  %v1270_v23 = vmul.f32 0.2, %v1238_v51  ;;  %v881_v30 = vadd.f32 %v9444_v11, %v9368_v59  ;;  %vm1254_vm4 = vcmp.gt.f32.partialorder %v1238_v51, 0.0 }
 0x3c6   :  { %v9553_v17 = vadd.f32 %v1282_v29, %v9483_v28  ;;  %v9557_v18 = vsel %vm248_vm2, 0.0, %v13192_v37  ;;  %vm249_vm5 = vcmp.gt.f32.partialorder %v233_v22, 0.0  ;;  %v231_v27 = vcvt.s32.f32 %v215_v9 }
 0x3c7   :  { %13200 = vst [vmem:[#allocation65_spill] sm:$0xff] %v9557_v18  ;;  %v9560_v46 = vadd.f32 %v2037_v4, %v9507_v25  ;;  %v1647_v12 = vmul.f32 0.2, %v1615_v53  ;;  %v1616_v59 = vadd.f32 %v9476_v36, %v9282_v26  ;;  %v1286_v29 = vsel %vm1254_vm4, %v1238_v51, %v1270_v23 }
 0x3c8   :  { %7359 = vmatpush3.bf16.msra.mxu0 %v1440_v21  ;;  %1312 = vmax.xlane.f32.xlu1 %v9538_v43  ;;  %v1661_v21 = vsel %vm1629_vm3, %v1613_v31, %v1645_v32  ;;  %vm1631_vm6 = vcmp.gt.f32.partialorder %v1615_v53, 0.0  ;;  %v879_v19 = vadd.f32 %v9444_v11, %v9387_v2  ;;  %vm897_vm7 = vcmp.gt.f32.partialorder %v881_v30, 0.0 }
 0x3c9   :  { %1695 = vmax.xlane.f32.xlu0 %v9542_v42  ;;  %13201 = vst [vmem:[#allocation66_spill] sm:$0xff] %v9560_v46  ;;  %v913_v42 = vmul.f32 0.2, %v881_v30  ;;  %v9571_v22 = vadd.f32 %v1661_v21, %v9464_v62  ;;  %v9574_v31 = vsel %vm249_vm5, 0.0, %v13192_v37  ;;  %vm247_vm8 = vcmp.gt.f32.partialorder %v231_v27, 0.0 }
 0x3ca   :  { %v9550_v3 = vpop.permute.xlu1 %1221  ;;  %13203 = vst [vmem:[#allocation68_spill] sm:$0xff] %v9574_v31  ;;  %v220_v26 = vunpack.c.2.s8 %v9564_v45  ;;  %v9580_v51 = vadd.f32 %v1286_v29, %v9557_v18  ;;  %v1663_v32 = vsel %vm1631_vm6, %v1615_v53, %v1647_v12  ;;  %v1648_v4 = vmul.f32 0.2, %v1616_v59 }
 0x3cb   :  { %13202 = vst [vmem:[#allocation67_spill] sm:$0xff] %v9571_v22  ;;  %v1986_v2 = vadd.f32 %v9487_v54, %v9276_v24  ;;  %v929_v23 = vsel %vm897_vm7, %v881_v30, %v913_v42  ;;  %vm1632_vm9 = vcmp.gt.f32.partialorder %v1616_v59, 0.0  ;;  %v911_v21 = vmul.f32 0.2, %v879_v19 }
 0x3cc   :  { %1316 = vmax.xlane.f32.xlu1 %v9553_v17  ;;  %v1237_v27 = vadd.f32 %v9448_v48, %v9393_v5  ;;  %vm895_vm10 = vcmp.gt.f32.partialorder %v879_v19, 0.0  ;;  %v9592_v53 = vsel %vm247_vm8, 0.0, %v13192_v37  ;;  %v236_v12 = vcvt.s32.f32 %v220_v26 }
 0x3cd   :  { %2072 = vmax.xlane.f32.xlu0 %v9560_v46  ;;  %v9589_v46 = vadd.f32 %v1663_v32, %v9483_v28  ;;  %13206 = vst [vmem:[#allocation71_spill] sm:$0xff] %v9592_v53  ;;  %v221_v24 = vunpack.c.3.s8 %v9564_v45  ;;  %v9596_v29 = vadd.f32 %v929_v23, %v9574_v31  ;;  %v1664_v42 = vsel %vm1632_vm9, %v1616_v59, %v1648_v4 }
 0x3ce   :  { %v2018_v30 = vmul.f32 0.2, %v1986_v2  ;;  %v1987_v5 = vadd.f32 %v9487_v54, %v9302_v34  ;;  %v927_v32 = vsel %vm895_vm10, %v879_v19, %v911_v21  ;;  %vm2002_vm11 = vcmp.gt.f32.partialorder %v1986_v2, 0.0 }
 0x3cf   :  { %v9577_v9 = vpop.permute.xlu1 %1602  ;;  %13205 = vst [vmem:[#allocation70_spill] sm:$0xff] %v9589_v46  ;;  %v1242_v26 = vadd.f32 %v9448_v48, %v9413_v39  ;;  %vm1253_vm12 = vcmp.gt.f32.partialorder %v1237_v27, 0.0  ;;  %v9607_v23 = vadd.f32 %v1664_v42, %v9507_v25  ;;  %vm252_vm13 = vcmp.gt.f32.partialorder %v236_v12, 0.0 }
 0x3d0   :  { %13204 = vst [vmem:[#allocation69_spill] sm:$0xff] %v9577_v9  ;;  %1693 = vmax.xlane.f32.xlu1 %v9571_v22  ;;  %v1269_v22 = vmul.f32 0.2, %v1237_v27  ;;  %v237_v59 = vcvt.s32.f32 %v221_v24  ;;  %v9610_v34 = vadd.f32 %v927_v32, %v9592_v53  ;;  %v2034_v4 = vsel %vm2002_vm11, %v1986_v2, %v2018_v30 }
 0x3d1   :  { %1324 = vmax.xlane.f32.xlu0 %v9580_v51  ;;  %13208 = vst [vmem:[#allocation73_spill] sm:$0xff] %v9607_v23  ;;  %v1988_v19 = vadd.f32 %v9487_v54, %v9264_v20  ;;  %vm2003_vm14 = vcmp.gt.f32.partialorder %v1987_v5, 0.0  ;;  %v1274_v39 = vmul.f32 0.2, %v1242_v26  ;;  %v9621_v24 = vsel %vm252_vm13, 0.0, %v13192_v37 }
 0x3d2   :  { %v1285_v21 = vsel %vm1253_vm12, %v1237_v27, %v1269_v22  ;;  %13209 = vst [vmem:[#allocation74_spill] sm:$0xff] %v9621_v24  ;;  %vm1258_vm15 = vcmp.gt.f32.partialorder %v1242_v26, 0.0  ;;  %v9624_v2 = vadd.f32 %v2034_v4, %v9464_v62  ;;  %vm253_vm2 = vcmp.gt.f32.partialorder %v237_v59, 0.0 }
 0x3d3   :  { %v219_v20 = vunpack.c.1.s8 %v9564_v45  ;;  %v214_v22 = vunpack.c.0.s8 %v9494_v38  ;;  %v9629_v27 = vadd.f32 %v1285_v21, %v9592_v53  ;;  %v2020_v42 = vmul.f32 0.2, %v1988_v19 }
 0x3d4   :  { %v9600_v9 = vpop.permute.xlu1 %1975  ;;  %1697 = vmax.xlane.f32.xlu1 %v9589_v46  ;;  %v885_v46 = vadd.f32 %v9444_v11, %v9437_v0  ;;  %13210 = vst [vmem:[#allocation75_spill] sm:$0xff] %v9624_v2  ;;  %v880_v30 = vadd.f32 %v9444_v11, %v9334_v49  ;;  %v883_v32 = vadd.f32 %v9444_v11, %v9472_v13  ;;  %vm2004_vm3 = vcmp.gt.f32.partialorder %v1988_v19, 0.0 }
 0x3d5   :  { %13207 = vst [vmem:[#allocation72_spill] sm:$0xff] %v9600_v9  ;;  %968 = vmax.xlane.f32.xlu0 %v9596_v29  ;;  %v2019_v9 = vmul.f32 0.2, %v1987_v5  ;;  %v1290_v4 = vsel %vm1258_vm15, %v1242_v26, %v1274_v39  ;;  %v235_v49 = vcvt.s32.f32 %v219_v20  ;;  %v2036_v26 = vsel %vm2004_vm3, %v1988_v19, %v2020_v42  ;;  %v9655_v20 = vld [vmem:[#allocation3 + $0x18] sm:$0xff] }
 0x3d6   :  { %v917_v25 = vmul.f32 0.2, %v885_v46  ;;  %vm901_vm4 = vcmp.gt.f32.partialorder %v885_v46, 0.0  ;;  %v9647_v13 = vadd.f32 %v1290_v4, %v9621_v24  ;;  %v912_v39 = vmul.f32 0.2, %v880_v30 }
 0x3d7   :  { %v2035_v0 = vsel %vm2003_vm14, %v1987_v5, %v2019_v9  ;;  %v9644_v9 = vsel %vm253_vm2, 0.0, %v13192_v37  ;;  %v230_v5 = vcvt.s32.f32 %v214_v22  ;;  %v878_v62 = vadd.f32 %v9444_v11, %v9356_v56 }
 0x3d8   :  { %1699 = vmax.xlane.f32.xlu1 %v9607_v23  ;;  %v9640_v21 = vadd.f32 %v2035_v0, %v9461_v40  ;;  %13212 = vst [vmem:[#allocation77_spill] sm:$0xff] %v9644_v9  ;;  %v915_v23 = vmul.f32 0.2, %v883_v32  ;;  %vm896_vm5 = vcmp.gt.f32.partialorder %v880_v30, 0.0  ;;  %v1241_v59 = vadd.f32 %v9448_v48, %v9397_v6 }
 0x3d9   :  { %964 = vmax.xlane.f32.xlu0 %v9610_v34  ;;  %v9618_v12 = vpop.permute.xlu1 %852  ;;  %vm899_vm6 = vcmp.gt.f32.partialorder %v883_v32, 0.0  ;;  %v9658_v22 = vadd.f32 %v2036_v26, %v9483_v28  ;;  %vm251_vm7 = vcmp.gt.f32.partialorder %v235_v49, 0.0  ;;  %vm246_vm8 = vcmp.gt.f32.partialorder %v230_v5, 0.0 }
 0x3da   :  { %13211 = vst [vmem:[#allocation76_spill] sm:$0xff] %v9640_v21  ;;  %v224_v56 = vunpack.c.2.s8 %v9655_v20  ;;  %v910_v0 = vmul.f32 0.2, %v878_v62  ;;  %v1236_v6 = vadd.f32 %v9448_v48, %v9363_v58  ;;  %v1246_v42 = vadd.f32 %v9448_v48, %v9550_v3 }
 0x3db   :  { %13213 = vst [vmem:[#allocation78_spill] sm:$0xff] %v9658_v22  ;;  %v931_v4 = vsel %vm899_vm6, %v883_v32, %v915_v23  ;;  %vm894_vm9 = vcmp.gt.f32.partialorder %v878_v62, 0.0  ;;  %v1273_v26 = vmul.f32 0.2, %v1241_v59  ;;  %vm1257_vm10 = vcmp.gt.f32.partialorder %v1241_v59, 0.0 }
 0x3dc   :  { %2066 = vmax.xlane.f32.xlu1 %v9624_v2  ;;  %v933_v2 = vsel %vm901_vm4, %v885_v46, %v917_v25  ;;  %v928_v46 = vsel %vm896_vm5, %v880_v30, %v912_v39  ;;  %v225_v28 = vunpack.c.3.s8 %v9655_v20  ;;  %v9678_v30 = vsel %vm251_vm7, 0.0, %v13192_v37 }
 0x3dd   :  { %1322 = vmax.xlane.f32.xlu0 %v9629_v27  ;;  %v9664_v25 = vadd.f32 %v933_v2, %v9644_v9  ;;  %v9674_v2 = vadd.f32 %v928_v46, %v9557_v18  ;;  %13215 = vst [vmem:[#allocation80_spill] sm:$0xff] %v9678_v30  ;;  %v9682_v58 = vsel %vm246_vm8, 0.0, %v13192_v37  ;;  %v240_v3 = vcvt.s32.f32 %v224_v56 }
 0x3de   :  { %v9637_v38 = vpop.permute.xlu1 %1213  ;;  %13216 = vst [vmem:[#allocation81_spill] sm:$0xff] %v9682_v58  ;;  %v9685_v23 = vadd.f32 %v931_v4, %v9678_v30  ;;  %v926_v32 = vsel %vm894_vm9, %v878_v62, %v910_v0  ;;  %v1268_v39 = vmul.f32 0.2, %v1236_v6  ;;  %v1239_v40 = vadd.f32 %v9448_v48, %v9374_v61 }
 0x3df   :  { %v1289_v49 = vsel %vm1257_vm10, %v1241_v59, %v1273_v26  ;;  %vm1252_vm11 = vcmp.gt.f32.partialorder %v1236_v6, 0.0  ;;  %vm1262_vm12 = vcmp.gt.f32.partialorder %v1246_v42, 0.0  ;;  %v241_v5 = vcvt.s32.f32 %v225_v28 }
 0x3e0   :  { %2068 = vmax.xlane.f32.xlu1 %v9640_v21  ;;  %v9693_v56 = vadd.f32 %v926_v32, %v9682_v58  ;;  %vm256_vm13 = vcmp.gt.f32.partialorder %v240_v3, 0.0  ;;  %v218_v62 = vunpack.c.0.s8 %v9564_v45  ;;  %v9697_v61 = vadd.f32 %v1289_v49, %v9678_v30 }
 0x3e1   :  { %1332 = vmax.xlane.f32.xlu0 %v9647_v13  ;;  %v1284_v0 = vsel %vm1252_vm11, %v1236_v6, %v1268_v39  ;;  %v1271_v4 = vmul.f32 0.2, %v1239_v40  ;;  %v884_v59 = vadd.f32 %v9444_v11, %v9409_v16  ;;  %vm1255_vm14 = vcmp.gt.f32.partialorder %v1239_v40, 0.0 }
 0x3e2   :  { %v1618_v28 = vadd.f32 %v9476_v36, %v9361_v57  ;;  %vm257_vm15 = vcmp.gt.f32.partialorder %v241_v5, 0.0  ;;  %v9708_v45 = vadd.f32 %v1284_v0, %v9682_v58  ;;  %v9712_v16 = vsel %vm256_vm13, 0.0, %v13192_v37 }
 0x3e3   :  { %v9661_v19 = vpop.permute.xlu1 %1594  ;;  %13218 = vst [vmem:[#allocation83_spill] sm:$0xff] %v9712_v16  ;;  %v234_v6 = vcvt.s32.f32 %v218_v62  ;;  %v1287_v57 = vsel %vm1255_vm14, %v1239_v40, %v1271_v4  ;;  %v916_v39 = vmul.f32 0.2, %v884_v59  ;;  %v882_v49 = vadd.f32 %v9444_v11, %v9423_v60 }
 0x3e4   :  { %13214 = vst [vmem:[#allocation79_spill] sm:$0xff] %v9661_v19  ;;  %2070 = vmax.xlane.f32.xlu1 %v9658_v22  ;;  %v1278_v22 = vmul.f32 0.2, %v1246_v42  ;;  %vm900_vm3 = vcmp.gt.f32.partialorder %v884_v59, 0.0  ;;  %v1650_v0 = vmul.f32 0.2, %v1618_v28  ;;  %v1240_v60 = vadd.f32 %v9448_v48, %v9427_v10 }
 0x3e5   :  { %976 = vmax.xlane.f32.xlu0 %v9664_v25  ;;  %v9723_v3 = vsel %vm257_vm15, 0.0, %v13192_v37  ;;  %vm1634_vm4 = vcmp.gt.f32.partialorder %v1618_v28, 0.0  ;;  %vm250_vm5 = vcmp.gt.f32.partialorder %v234_v6, 0.0  ;;  %vm898_vm6 = vcmp.gt.f32.partialorder %v882_v49, 0.0 }
 0x3e6   :  { %13220 = vst [vmem:[#allocation85_spill] sm:$0xff] %v9723_v3  ;;  %v9742_v6 = vsel %vm250_vm5, 0.0, %v13192_v37  ;;  %vm1256_vm9 = vcmp.gt.f32.partialorder %v1240_v60, 0.0 }
 0x3e7   :  { %13221 = vst [vmem:[#allocation86_spill] sm:$0xff] %v9742_v6 }
 0x3e8   :  { %v868_v46 = vpop.permute.xlu1 %867  ;;  %966 = vmax.xlane.f32.xlu1 %v9674_v2 }
 0x3e9   :  { %v889_v19 = vadd.f32 %v9444_v11, %v868_v46  ;;  %972 = vmax.xlane.f32.xlu0 %v9685_v23  ;;  %v1294_v46 = vsel %vm1262_vm12, %v1246_v42, %v1278_v22  ;;  %v223_v22 = vunpack.c.1.s8 %v9655_v20 }
 0x3ea   :  { %v9716_v42 = vadd.f32 %v1294_v46, %v9712_v16  ;;  %v9726_v46 = vadd.f32 %v1287_v57, %v9574_v31  ;;  %v1245_v57 = vadd.f32 %v9448_v48, %v9425_v8  ;;  %v1243_v8 = vadd.f32 %v9448_v48, %v9383_v1 }
 0x3eb   :  { %v921_v26 = vmul.f32 0.2, %v889_v19  ;;  %vm905_vm2 = vcmp.gt.f32.partialorder %v889_v19, 0.0  ;;  %v239_v40 = vcvt.s32.f32 %v223_v22 }
 0x3ec   :  { %962 = vmax.xlane.f32.xlu1 %v9693_v56  ;;  %13219 = vst [vmem:[#allocation84_spill] sm:$0xff] %v9716_v42  ;;  %vm1261_vm10 = vcmp.gt.f32.partialorder %v1245_v57, 0.0  ;;  %vm1259_vm11 = vcmp.gt.f32.partialorder %v1243_v8, 0.0 }
 0x3ed   :  { %1330 = vmax.xlane.f32.xlu0 %v9697_v61  ;;  %v9705_v32 = vpop.permute.xlu1 %1606  ;;  %v937_v5 = vsel %vm905_vm2, %v889_v19, %v921_v26  ;;  %v932_v26 = vsel %vm900_vm3, %v884_v59, %v916_v39  ;;  %vm255_vm8 = vcmp.gt.f32.partialorder %v239_v40, 0.0  ;;  %v1272_v39 = vmul.f32 0.2, %v1240_v60 }
 0x3ee   :  { %13217 = vst [vmem:[#allocation82_spill] sm:$0xff] %v9705_v32  ;;  %v9732_v19 = vadd.f32 %v937_v5, %v9723_v3  ;;  %v914_v32 = vmul.f32 0.2, %v882_v49  ;;  %v9739_v10 = vadd.f32 %v932_v26, %v9621_v24  ;;  %v9757_v40 = vsel %vm255_vm8, 0.0, %v13192_v37 }
 0x3ef   :  { %13222 = vst [vmem:[#allocation87_spill] sm:$0xff] %v9757_v40 }
 0x3f0   :  { %1320 = vmax.xlane.f32.xlu1 %v9708_v45 }
 0x3f1   :  { %1340 = vmax.xlane.f32.xlu0 %v9716_v42  ;;  %v1666_v42 = vsel %vm1634_vm4, %v1618_v28, %v1650_v0  ;;  %v930_v28 = vsel %vm898_vm6, %v882_v49, %v914_v32  ;;  %v1277_v0 = vmul.f32 0.2, %v1245_v57  ;;  %v888_v32 = vadd.f32 %v9444_v11, %v9535_v14 }
 0x3f2   :  { %v858_v62 = vpop.permute.xlu1 %857  ;;  %v9747_v22 = vadd.f32 %v1666_v42, %v9592_v53  ;;  %v1288_v49 = vsel %vm1256_vm9, %v1240_v60, %v1272_v39  ;;  %v886_v39 = vadd.f32 %v9444_v11, %v9618_v12  ;;  %v1244_v12 = vadd.f32 %v9448_v48, %v9637_v38 }
 0x3f3   :  { %v887_v4 = vadd.f32 %v9444_v11, %v858_v62  ;;  %v9754_v62 = vadd.f32 %v930_v28, %v9742_v6  ;;  %v1293_v26 = vsel %vm1261_vm10, %v1245_v57, %v1277_v0  ;;  %v1446_v28 = vsel %vm321_vm0, %v9435_v15, 1065369472 }
 0x3f4   :  { %1326 = vmax.xlane.f32.xlu1 %v9726_v46  ;;  %v9770_v14 = vadd.f32 %v1288_v49, %v9742_v6  ;;  %v920_v60 = vmul.f32 0.2, %v888_v32  ;;  %v9776_v57 = vadd.f32 %v1293_v26, %v9757_v40  ;;  %vm904_vm12 = vcmp.gt.f32.partialorder %v888_v32, 0.0 }
 0x3f5   :  { %v919_v21 = vmul.f32 0.2, %v887_v4  ;;  %984 = vmax.xlane.f32.xlu0 %v9732_v19  ;;  %vm903_vm7 = vcmp.gt.f32.partialorder %v887_v4, 0.0  ;;  %v9782_v15 = vsel %vm321_vm0, %v9315_v41, 1065369472  ;;  %vm902_vm13 = vcmp.gt.f32.partialorder %v886_v39, 0.0 }
 0x3f6   :  { %v918_v11 = vmul.f32 0.2, %v886_v39  ;;  %v1276_v41 = vmul.f32 0.2, %v1244_v12  ;;  %vm1260_vm15 = vcmp.gt.f32.partialorder %v1244_v12, 0.0 }
 0x3f7   :  { %v9744_v59 = vpop.permute.xlu1 %1971  ;;  %v935_v5 = vsel %vm903_vm7, %v887_v4, %v919_v21  ;;  %v1275_v21 = vmul.f32 0.2, %v1243_v8 }
 0x3f8   :  { %974 = vmax.xlane.f32.xlu1 %v9739_v10  ;;  %v9762_v1 = vadd.f32 %v935_v5, %v9757_v40  ;;  %v222_v5 = vunpack.c.0.s8 %v9655_v20  ;;  %v1292_v26 = vsel %vm1260_vm15, %v1244_v12, %v1276_v41 }
 0x3f9   :  { %1703 = vmax.xlane.f32.xlu0 %v9747_v22  ;;  %v1291_v0 = vsel %vm1259_vm11, %v1243_v8, %v1275_v21  ;;  %v936_v8 = vsel %vm904_vm12, %v888_v32, %v920_v60  ;;  %v934_v21 = vsel %vm902_vm13, %v886_v39, %v918_v11 }
 0x3fa   :  { %v9785_v20 = vadd.f32 %v1291_v0, %v9644_v9  ;;  %v9792_v49 = vadd.f32 %v936_v8, %v9712_v16  ;;  %v13224_v8 = vld [vmem:[#allocation45_spill] sm:$0xff] }
 0x3fb   :  { %v1421_v42 = vpop.permute.xlu1 %1420  ;;  %v1991_v41 = vadd.f32 %v9487_v54, %v13224_v8  ;;  %v13231_v8 = vld [vmem:[#allocation39_spill] sm:$0xff] }
 0x3fc   :  { %970 = vmax.xlane.f32.xlu1 %v9754_v62  ;;  %v1443_v4 = vsel %vm321_vm0, %v1421_v42, 1065369472  ;;  %v238_v42 = vcvt.s32.f32 %v222_v5  ;;  %v1617_v5 = vadd.f32 %v9476_v36, %v9336_v50  ;;  %v1990_v50 = vadd.f32 %v9487_v54, %v9344_v47 }
 0x3fd   :  { %980 = vmax.xlane.f32.xlu0 %v9762_v1  ;;  %7360 = vmatprep.subr.bf16.mxu0 %v1443_v4  ;;  %vm2007_vm6 = vcmp.gt.f32.partialorder %v1991_v41, 0.0 }
 0x3fe   :  { %7361 = vmatpush3.bf16.msra.mxu0 %v1443_v4  ;;  %vm254_vm14 = vcmp.gt.f32.partialorder %v238_v42, 0.0  ;;  %v1247_v4 = vadd.f32 %v9448_v48, %v9417_v44  ;;  %v1649_v44 = vmul.f32 0.2, %v1617_v5  ;;  %vm1633_vm3 = vcmp.gt.f32.partialorder %v1617_v5, 0.0 }
 0x3ff   :  { %7362 = vmatprep.subr.bf16.mxu0 %v1446_v28  ;;  %v9798_v38 = vsel %vm254_vm14, 0.0, %v13192_v37  ;;  %v1620_v37 = vadd.f32 %v9476_v36, %v9381_v63  ;;  %v2022_v12 = vmul.f32 0.2, %v1990_v50  ;;  %vm2006_vm5 = vcmp.gt.f32.partialorder %v1990_v50, 0.0 }
 0x400   :  { %1328 = vmax.xlane.f32.xlu1 %v9770_v14  ;;  %13223 = vst [vmem:[#allocation88_spill] sm:$0xff] %v9798_v38  ;;  %v9801_v32 = vadd.f32 %v934_v21, %v9798_v38  ;;  %vm1263_vm2 = vcmp.gt.f32.partialorder %v1247_v4, 0.0  ;;  %v9807_v60 = vadd.f32 %v1292_v26, %v9798_v38  ;;  %v1665_v0 = vsel %vm1633_vm3, %v1617_v5, %v1649_v44  ;;  %v13226_v26 = vld [vmem:[#allocation41_spill] sm:$0xff]  ;;  %v13228_v44 = vld [vmem:[#allocation42_spill] sm:$0xff] }
 0x401   :  { %1338 = vmax.xlane.f32.xlu0 %v9776_v57  ;;  %v1652_v42 = vmul.f32 0.2, %v1620_v37  ;;  %vm1636_vm4 = vcmp.gt.f32.partialorder %v1620_v37, 0.0  ;;  %v9819_v11 = vadd.f32 %v1665_v0, %v9682_v58  ;;  %v2038_v47 = vsel %vm2006_vm5, %v1990_v50, %v2022_v12 }
 0x402   :  { %7363 = vmatpush3.bf16.msra.mxu0 %v1446_v28  ;;  %v1279_v28 = vmul.f32 0.2, %v1247_v4 }
 0x403   :  { %7412 = vmatprep.subr.bf16.mxu0 %v9782_v15  ;;  %v1668_v63 = vsel %vm1636_vm4, %v1620_v37, %v1652_v42  ;;  %v1993_v37 = vadd.f32 %v9487_v54, %v13228_v44 }
 0x404   :  { %1334 = vmax.xlane.f32.xlu1 %v9785_v20  ;;  %v1295_v48 = vsel %vm1263_vm2, %v1247_v4, %v1279_v28  ;;  %v9827_v21 = vadd.f32 %v1668_v63, %v9574_v31  ;;  %v2023_v4 = vmul.f32 0.2, %v1991_v41  ;;  %v1992_v28 = vadd.f32 %v9487_v54, %v13226_v26 }
 0x405   :  { %v9813_v39 = vadd.f32 %v1295_v48, %v9723_v3  ;;  %v2025_v50 = vmul.f32 0.2, %v1993_v37  ;;  %vm2009_vm8 = vcmp.gt.f32.partialorder %v1993_v37, 0.0 }
 0x406   :  { %13225 = vst [vmem:[#allocation45_spill] sm:$0xff] %v9827_v21  ;;  %v2039_v5 = vsel %vm2007_vm6, %v1991_v41, %v2023_v4  ;;  %v2024_v48 = vmul.f32 0.2, %v1992_v28  ;;  %vm2008_vm7 = vcmp.gt.f32.partialorder %v1992_v28, 0.0  ;;  %v1619_v41 = vadd.f32 %v9476_v36, %v13231_v8 }
 0x407   :  { %v9839_v0 = vadd.f32 %v2039_v5, %v9592_v53  ;;  %v2041_v12 = vsel %vm2009_vm8, %v1993_v37, %v2025_v50  ;;  %v13234_v5 = vld [vmem:[#allocation32_spill] sm:$0xff] }
 0x408   :  { %982 = vmax.xlane.f32.xlu1 %v9792_v49  ;;  %v2040_v42 = vsel %vm2008_vm7, %v1992_v28, %v2024_v48  ;;  %v1651_v4 = vmul.f32 0.2, %v1619_v41  ;;  %vm1635_vm9 = vcmp.gt.f32.partialorder %v1619_v41, 0.0  ;;  %v13235_v48 = vld [vmem:[#allocation34_spill] sm:$0xff] }
 0x409   :  { %13229 = vst [vmem:[#allocation42_spill] sm:$0xff] %v9839_v0  ;;  %v9843_v63 = vadd.f32 %v2040_v42, %v9557_v18 }
 0x40a   :  { %v1667_v26 = vsel %vm1635_vm9, %v1619_v41, %v1651_v4  ;;  %v13236_v4 = vld [vmem:[#allocation61_spill] sm:$0xff] }
 0x40b   :  { %13230 = vst [vmem:[#allocation89_spill] sm:$0xff] %v9843_v63  ;;  %v9853_v28 = vadd.f32 %v1667_v26, %v9557_v18 }
 0x40c   :  { %978 = vmax.xlane.f32.xlu1 %v9801_v32 }
 0x40d   :  { %13233 = vst [vmem:[#allocation90_spill] sm:$0xff] %v9853_v28 }
 0x410   :  { %1336 = vmax.xlane.f32.xlu1 %v9807_v60 }
 0x414   :  { %1342 = vmax.xlane.f32.xlu1 %v9813_v39 }
 0x417   :  { %2158 = vrot.lane.b32.xlu0 %v9124_v55, %s8746_s12  ;;  %v9833_v55 = vadd.f32 %v2038_v47, %v9682_v58  ;;  %v9849_v47 = vadd.f32 %v2041_v12, %v9574_v31  ;;  %v13237_v58 = vld [vmem:[#allocation63_spill] sm:$0xff] }
 0x418   :  { %1701 = vmax.xlane.f32.xlu1 %v9819_v11 }
 0x419   :  { %13227 = vst [vmem:[#allocation41_spill] sm:$0xff] %v9833_v55  ;;  %13232 = vst [vmem:[#allocation39_spill] sm:$0xff] %v9849_v47 }
 0x41c   :  { %1707 = vmax.xlane.f32.xlu1 %v9827_v21 }
 0x420   :  { %2074 = vmax.xlane.f32.xlu1 %v9833_v55 }
 0x424   :  { %2076 = vmax.xlane.f32.xlu1 %v9839_v0 }
 0x428   :  { %2078 = vmax.xlane.f32.xlu1 %v9843_v63 }
 0x42c   :  { %2080 = vmax.xlane.f32.xlu1 %v9849_v47 }
 0x436   :  { %1705 = vmax.xlane.f32.xlu0 %v9853_v28 }
 0x43d   :  { %1787 = vrot.lane.b32.xlu1 %v13234_v5, %s8731_s30 }
 0x441   :  { %1789 = vrot.lane.b32.xlu1 %v13235_v48, %s8731_s30 }
 0x449   :  { %v957_v44 = vpop.xlane.xlu1 %956  ;;  %v955_v42 = vpop.xlane.xlu0 %954 }
 0x44a   :  { %v987_v37 = vsub.f32 %v9479_v52, %v957_v44  ;;  %v986_v50 = vsub.f32 %v9490_v7, %v955_v42 }
 0x44c   :  { %v1004_v12 = vmul.f32 1.442695, %v987_v37  ;;  %2160 = vrot.lane.b32.xlu0 %v13234_v5, %s8746_s12  ;;  %v1002_v8 = vmul.f32 1.442695, %v986_v50 }
 0x44d   :  { %v959_v41 = vpop.xlane.xlu1 %958  ;;  %v1315_v53 = vpop.xlane.xlu0 %1314 }
 0x44e   :  { %8039 = vpow2.f32 %v1004_v12  ;;  %v988_v26 = vsub.f32 %v13236_v4, %v959_v41  ;;  %v1345_v18 = vsub.f32 %v13237_v58, %v1315_v53  ;;  %v13238_v41 = vld [vmem:[#allocation53_spill] sm:$0xff] }
 0x44f   :  { %8041 = vpow2.f32 %v1002_v8  ;;  %v1621_v53 = vadd.f32 %v9476_v36, %v13238_v41  ;;  %v13241_v41 = vld [vmem:[#allocation49_spill] sm:$0xff] }
 0x450   :  { %v1006_v31 = vmul.f32 1.442695, %v988_v26  ;;  %v1362_v7 = vmul.f32 1.442695, %v1345_v18 }
 0x451   :  { %v961_v63 = vpop.xlane.xlu1 %960  ;;  %vm1637_vm10 = vcmp.gt.f32.partialorder %v1621_v53, 0.0 }
 0x452   :  { %v989_v52 = vsub.f32 %v9522_v33, %v961_v63  ;;  %v1319_v44 = vpop.xlane.xlu0 %1318  ;;  %8043 = vpow2.f32 %v1006_v31 }
 0x453   :  { %v1347_v37 = vsub.f32 %v9527_v35, %v1319_v44 }
 0x454   :  { %v1008_v47 = vmul.f32 1.442695, %v989_v52  ;;  %v13240_v52 = vld [vmem:[#allocation46_spill] sm:$0xff] }
 0x455   :  { %v1313_v5 = vpop.xlane.xlu1 %1312  ;;  %v1366_v33 = vmul.f32 1.442695, %v1347_v37  ;;  %v1622_v44 = vadd.f32 %v9476_v36, %v13240_v52 }
 0x456   :  { %8045 = vpow2.f32 %v1008_v47  ;;  %v1344_v42 = vsub.f32 %v9538_v43, %v1313_v5  ;;  %v9869_v50 = vpop.xlane.xlu0 %1695  ;;  %v1653_v43 = vmul.f32 0.2, %v1621_v53 }
 0x457   :  { %8047 = vpow2.f32 %v1362_v7  ;;  %vm1638_vm11 = vcmp.gt.f32.partialorder %v1622_v44, 0.0 }
 0x458   :  { %v8040_v12 = vpop.eup %8039  ;;  %v1360_v8 = vmul.f32 1.442695, %v1344_v42  ;;  %v1669_v5 = vsel %vm1637_vm10, %v1621_v53, %v1653_v43 }
 0x459   :  { %v8042_v58 = vpop.eup %8041  ;;  %v1317_v63 = vpop.xlane.xlu1 %1316 }
 0x45a   :  { %8049 = vpow2.f32 %v1360_v8  ;;  %v1346_v18 = vsub.f32 %v9553_v17, %v1317_v63  ;;  %v9874_v31 = vpop.xlane.xlu0 %2072  ;;  %v1034_v35 = vpack.c.bf16 %v8040_v12, %v8042_v58  ;;  %v1654_v8 = vmul.f32 0.2, %v1622_v44 }
 0x45b   :  { %13239 = vst [vmem:[#allocation32_spill] sm:$0xff] %v9874_v31  ;;  %8051 = vpow2.f32 %v1366_v33  ;;  %v1623_v58 = vadd.f32 %v9476_v36, %v13241_v41  ;;  %v9889_v63 = vadd.f32 %v1669_v5, %v9742_v6 }
 0x45c   :  { %v1364_v47 = vmul.f32 1.442695, %v1346_v18  ;;  %7332 = vmatprep.mubr.bf16.mxu1 %v1034_v35  ;;  %v8044_v7 = vpop.eup %8043  ;;  %v13243_v35 = vld [vmem:[#allocation40_spill] sm:$0xff]  ;;  %v1670_v41 = vsel %vm1638_vm11, %v1622_v44, %v1654_v8  ;;  %v13248_v44 = vld [vmem:[#allocation43_spill] sm:$0xff] }
 0x45d   :  { %v9876_v4 = vpop.xlane.xlu1 %1693  ;;  %13242 = vst [vmem:[#allocation34_spill] sm:$0xff] %v9889_v63  ;;  %v1655_v5 = vmul.f32 0.2, %v1623_v58  ;;  %vm1639_vm12 = vcmp.gt.f32.partialorder %v1623_v58, 0.0  ;;  %v1994_v8 = vadd.f32 %v9487_v54, %v13248_v44 }
 0x45e   :  { %8053 = vpow2.f32 %v1364_v47  ;;  %v9878_v26 = vpop.xlane.xlu0 %1324  ;;  %v13244_v47 = vld [vmem:[#allocation37_spill] sm:$0xff] }
 0x45f   :  { %v1801_v53 = vsel %vm321_vm0, %v13244_v47, 1065369472  ;;  %v1671_v31 = vsel %vm1639_vm12, %v1623_v58, %v1655_v5  ;;  %v2026_v44 = vmul.f32 0.2, %v1994_v8  ;;  %vm2010_vm14 = vcmp.gt.f32.partialorder %v1994_v8, 0.0 }
 0x460   :  { %v8046_v37 = vpop.eup %8045  ;;  %vm2547_vm12 = vcmask 7168  }
 0x461   :  { %v9882_v17 = vpop.xlane.xlu1 %1697  ;;  %v1035_v42 = vpack.c.bf16 %v8046_v37, %v8044_v7  ;;  %v8048_v33 = vpop.eup %8047  ;;  %v13245_v7 = vld [vmem:[#allocation56_spill] sm:$0xff] }
 0x462   :  { %v9884_v12 = vpop.xlane.xlu0 %968  ;;  %v1624_v37 = vadd.f32 %v9476_v36, %v13245_v7 }
 0x463   :  { %7333 = vmatmul.mubr.bf16.vlgmr.msra.gmra.mrb[16].mxu1 %v1035_v42 }
 0x464   :  { %v8050_v18 = vpop.eup %8049  ;;  %7381 = vmatpush3.bf16.msra.mxu1 %v13243_v35  ;;  %v13246_v35 = vld [vmem:[#allocation47_spill] sm:$0xff]  ;;  %vm1640_vm13 = vcmp.gt.f32.partialorder %v1624_v37, 0.0 }
 0x465   :  { %7382 = vmatprep.subr.bf16.mxu1 %v1801_v53  ;;  %1709 = vmax.xlane.f32.xlu1 %v9889_v63  ;;  %v9895_v43 = vpop.xlane.xlu1 %1699  ;;  %v1392_v52 = vpack.c.bf16 %v8048_v33, %v8050_v18  ;;  %v8052_v21 = vpop.eup %8051  ;;  %v1804_v47 = vsel %vm321_vm0, %v13246_v35, 1065369472  ;;  %v9904_v63 = vadd.f32 %v1670_v41, %v9678_v30  ;;  %v1656_v18 = vmul.f32 0.2, %v1624_v37 }
 0x466   :  { %v965_v42 = vpop.xlane.xlu0 %964 }
 0x467   :  { %7364 = vmatprep.mubr.bf16.mxu0 %v1392_v52  ;;  %13247 = vst [vmem:[#allocation61_spill] sm:$0xff] %v9904_v63  ;;  %v1672_v35 = vsel %vm1640_vm13, %v1624_v37, %v1656_v18  ;;  %v991_v37 = vsub.f32 %v9610_v34, %v965_v42  ;;  %vm2564_vm13 = vcmask 15360  }
 0x468   :  { %v8054_v28 = vpop.eup %8053  ;;  %7383 = vmatpush3.bf16.msra.mxu1 %v1801_v53  ;;  %v13249_v53 = vld [vmem:[#allocation38_spill] sm:$0xff] }
 0x469   :  { %7384 = vmatprep.subr.bf16.mxu1 %v1804_v47  ;;  %v9901_v55 = vpop.xlane.xlu1 %2066  ;;  %v1393_v33 = vpack.c.bf16 %v8052_v21, %v8054_v28  ;;  %v2174_v52 = vsel %vm321_vm0, %v13249_v53, 1065369472  ;;  %v9915_v21 = vadd.f32 %v1671_v31, %v9621_v24  ;;  %v13251_v28 = vld [vmem:[#allocation60_spill] sm:$0xff]  ;;  %v2042_v31 = vsel %vm2010_vm14, %v1994_v8, %v2026_v44 }
 0x46a   :  { %v1323_v7 = vpop.xlane.xlu0 %1322  ;;  %v1995_v58 = vadd.f32 %v9487_v54, %v13251_v28  ;;  %v1012_v44 = vmul.f32 1.442695, %v991_v37  ;;  %vm2581_vm14 = vcmask 23552  }
 0x46b   :  { %1711 = vmax.xlane.f32.xlu0 %v9904_v63  ;;  %7365 = vmatmul.mubr.bf16.vlgmr.msra.gmra.mrb[32].mxu0 %v1393_v33  ;;  %13250 = vst [vmem:[#allocation63_spill] sm:$0xff] %v9915_v21  ;;  %v13252_v63 = vld [vmem:[#allocation44_spill] sm:$0xff]  ;;  %v1349_v34 = vsub.f32 %v9629_v27, %v1323_v7 }
 0x46c   :  { %7385 = vmatpush3.bf16.msra.mxu1 %v1804_v47  ;;  %7413 = vmatpush3.bf16.msra.mxu0 %v9782_v15  ;;  %v9925_v47 = vadd.f32 %v1672_v35, %v9644_v9  ;;  %v2027_v33 = vmul.f32 0.2, %v1995_v58  ;;  %v1997_v28 = vadd.f32 %v9487_v54, %v13252_v63  ;;  %vm2011_vm15 = vcmp.gt.f32.partialorder %v1995_v58, 0.0 }
 0x46d   :  { %7414 = vmatprep.subr.bf16.mxu0 %v2174_v52  ;;  %v9912_v41 = vpop.xlane.xlu1 %2068  ;;  %v993_v63 = vsub.f32 %v9596_v29, %v9884_v12  ;;  %8055 = vpow2.f32 %v1012_v44  ;;  %v1350_v12 = vsub.f32 %v9580_v51, %v9878_v26 }
 0x46e   :  { %v9919_v5 = vpop.xlane.xlu0 %1332  ;;  %v2043_v0 = vsel %vm2011_vm15, %v1995_v58, %v2027_v33  ;;  %v2029_v8 = vmul.f32 0.2, %v1997_v28  ;;  %vm2013_vm2 = vcmp.gt.f32.partialorder %v1997_v28, 0.0  ;;  %v1370_v33 = vmul.f32 1.442695, %v1349_v34 }
 0x46f   :  { %1713 = vmax.xlane.f32.xlu0 %v9915_v21  ;;  %v1016_v58 = vmul.f32 1.442695, %v993_v63  ;;  %vm3174_vm15 = vcmask 785408  }
 0x470   :  { %7415 = vmatpush3.bf16.msra.mxu0 %v2174_v52  ;;  %v9934_v52 = vadd.f32 %v2042_v31, %v9742_v6  ;;  %v9944_v6 = vadd.f32 %v2043_v0, %v9678_v30 }
 0x471   :  { %v9922_v15 = vpop.xlane.xlu1 %2070 }
 0x472   :  { %v9927_v53 = vpop.xlane.xlu0 %976 }
 0x473   :  { %1715 = vmax.xlane.f32.xlu0 %v9925_v47 }
 0x475   :  { %v967_v18 = vpop.xlane.xlu1 %966 }
 0x476   :  { %v992_v21 = vsub.f32 %v9674_v2, %v967_v18  ;;  %v973_v35 = vpop.xlane.xlu0 %972  ;;  %2162 = vrot.lane.b32.xlu1 %v13235_v48, %s8746_s12  ;;  %v2045_v48 = vsel %vm2013_vm2, %v1997_v28, %v2029_v8  ;;  %v1372_v28 = vmul.f32 1.442695, %v1350_v12 }
 0x477   :  { %2082 = vmax.xlane.f32.xlu0 %v9934_v52  ;;  %v9951_v7 = vadd.f32 %v2045_v48, %v9644_v9  ;;  %v995_v8 = vsub.f32 %v9685_v23, %v973_v35 }
 0x478   :  { %v1014_v42 = vmul.f32 1.442695, %v992_v21 }
 0x479   :  { %v963_v31 = vpop.xlane.xlu1 %962 }
 0x47a   :  { %v990_v2 = vsub.f32 %v9693_v56, %v963_v31  ;;  %v1331_v18 = vpop.xlane.xlu0 %1330  ;;  %8057 = vpow2.f32 %v1014_v42 }
 0x47b   :  { %2084 = vmax.xlane.f32.xlu0 %v9944_v6 }
 0x47c   :  { %v1010_v29 = vmul.f32 1.442695, %v990_v2  ;;  %v997_v2 = vsub.f32 %v9664_v25, %v9927_v53  ;;  %v13253_v25 = vld [vmem:[#allocation50_spill] sm:$0xff] }
 0x47d   :  { %v1321_v27 = vpop.xlane.xlu1 %1320  ;;  %v1996_v53 = vadd.f32 %v9487_v54, %v13253_v25 }
 0x47e   :  { %8059 = vpow2.f32 %v1010_v29  ;;  %v1348_v0 = vsub.f32 %v9708_v45, %v1321_v27  ;;  %v9954_v56 = vpop.xlane.xlu0 %1340  ;;  %v8056_v45 = vpop.eup %8055  ;;  %v1353_v29 = vsub.f32 %v9697_v61, %v1331_v18  ;;  %v1354_v61 = vsub.f32 %v9647_v13, %v9919_v5 }
 0x47f   :  { %8061 = vpow2.f32 %v1016_v58  ;;  %2088 = vmax.xlane.f32.xlu0 %v9951_v7  ;;  %v1020_v58 = vmul.f32 1.442695, %v995_v8  ;;  %v2028_v5 = vmul.f32 0.2, %v1996_v53  ;;  %vm2012_vm3 = vcmp.gt.f32.partialorder %v1996_v53, 0.0 }
 0x480   :  { %v1368_v21 = vmul.f32 1.442695, %v1348_v0  ;;  %8063 = vpow2.f32 %v1370_v33  ;;  %v1378_v18 = vmul.f32 1.442695, %v1353_v29 }
 0x481   :  { %v1327_v37 = vpop.xlane.xlu1 %1326 }
 0x482   :  { %8065 = vpow2.f32 %v1368_v21  ;;  %v1351_v51 = vsub.f32 %v9726_v46, %v1327_v37  ;;  %v9958_v26 = vpop.xlane.xlu0 %984 }
 0x483   :  { %8067 = vpow2.f32 %v1372_v28 }
 0x484   :  { %v1374_v63 = vmul.f32 1.442695, %v1351_v51  ;;  %v8058_v31 = vpop.eup %8057 }
 0x485   :  { %v975_v44 = vpop.xlane.xlu1 %974 }
 0x486   :  { %8069 = vpow2.f32 %v1374_v63  ;;  %v996_v34 = vsub.f32 %v9739_v10, %v975_v44  ;;  %v9962_v42 = vpop.xlane.xlu0 %1703  ;;  %v1024_v10 = vmul.f32 1.442695, %v997_v2 }
 0x487   :  { %8071 = vpow2.f32 %v1020_v58 }
 0x488   :  { %v8060_v48 = vpop.eup %8059  ;;  %v1022_v12 = vmul.f32 1.442695, %v996_v34 }
 0x489   :  { %v8062_v46 = vpop.eup %8061  ;;  %v971_v23 = vpop.xlane.xlu1 %970  ;;  %v1036_v35 = vpack.c.bf16 %v8056_v45, %v8060_v48  ;;  %v1380_v48 = vmul.f32 1.442695, %v1354_v61  ;;  %v13257_v61 = vld [vmem:[#allocation64_spill] sm:$0xff] }
 0x48a   :  { %v994_v33 = vsub.f32 %v9754_v62, %v971_v23  ;;  %v981_v27 = vpop.xlane.xlu0 %980  ;;  %v1037_v0 = vpack.c.bf16 %v8062_v46, %v8058_v31  ;;  %v8064_v21 = vpop.eup %8063  ;;  %8073 = vpow2.f32 %v1022_v12  ;;  %v13254_v31 = vld [vmem:[#allocation52_spill] sm:$0xff] }
 0x48b   :  { %7336 = vmatprep.mubr.bf16.mxu1 %v1036_v35  ;;  %v1626_v2 = vadd.f32 %v9476_v36, %v13254_v31  ;;  %v999_v35 = vsub.f32 %v9762_v1, %v981_v27  ;;  %v1001_v1 = vsub.f32 %v9732_v19, %v9958_v26 }
 0x48c   :  { %v8066_v28 = vpop.eup %8065  ;;  %v1018_v37 = vmul.f32 1.442695, %v994_v33  ;;  %7337 = vmatmul.mubr.bf16.gmra.mrb[20].mxu1 %v1037_v0 }
 0x48d   :  { %v1329_v51 = vpop.xlane.xlu1 %1328  ;;  %v1394_v8 = vpack.c.bf16 %v8064_v21, %v8066_v28  ;;  %v8068_v44 = vpop.eup %8067  ;;  %v1658_v0 = vmul.f32 0.2, %v1626_v2  ;;  %v13256_v21 = vld [vmem:[#allocation33_spill] sm:$0xff]  ;;  %vm1642_vm4 = vcmp.gt.f32.partialorder %v1626_v2, 0.0  ;;  %v1032_v31 = vmul.f32 1.442695, %v1001_v1 }
 0x48e   :  { %8075 = vpow2.f32 %v1018_v37  ;;  %v1352_v62 = vsub.f32 %v9770_v14, %v1329_v51  ;;  %v1339_v63 = vpop.xlane.xlu0 %1338  ;;  %v13255_v14 = vld [vmem:[#allocation67_spill] sm:$0xff]  ;;  %v1028_v51 = vmul.f32 1.442695, %v999_v35 }
 0x48f   :  { %8077 = vpow2.f32 %v1024_v10  ;;  %7368 = vmatprep.mubr.bf16.mxu0 %v1394_v8  ;;  %v1725_v12 = vsub.f32 %v13255_v14, %v9876_v4 }
 0x490   :  { %v8070_v45 = vpop.eup %8069  ;;  %v1376_v34 = vmul.f32 1.442695, %v1352_v62  ;;  %8079 = vpow2.f32 %v1378_v18  ;;  %v1726_v18 = vsub.f32 %v13257_v61, %v9869_v50  ;;  %v1674_v62 = vsel %vm1642_vm4, %v1626_v2, %v1658_v0 }
 0x491   :  { %v1335_v58 = vpop.xlane.xlu1 %1334  ;;  %v1395_v13 = vpack.c.bf16 %v8070_v45, %v8068_v44  ;;  %v8072_v28 = vpop.eup %8071  ;;  %v1741_v25 = vmul.f32 1.442695, %v1725_v12  ;;  %v1357_v44 = vsub.f32 %v9776_v57, %v1339_v63  ;;  %v9996_v2 = vadd.f32 %v1674_v62, %v9757_v40  ;;  %v13258_v63 = vld [vmem:[#allocation76_spill] sm:$0xff] }
 0x492   :  { %8081 = vpow2.f32 %v1376_v34  ;;  %v1355_v46 = vsub.f32 %v9785_v20, %v1335_v58  ;;  %v2159_v29 = vpop.permute.xlu0 %2158  ;;  %v2044_v20 = vsel %vm2012_vm3, %v1996_v53, %v2028_v5  ;;  %v1743_v57 = vmul.f32 1.442695, %v1726_v18 }
 0x493   :  { %7369 = vmatmul.mubr.bf16.gmra.mrb[36].mxu0 %v1395_v13  ;;  %v2177_v23 = vsel %vm321_vm0, %v2159_v29, 1065369472  ;;  %8083 = vpow2.f32 %v1380_v48  ;;  %v9988_v8 = vadd.f32 %v2044_v20, %v9621_v24  ;;  %v2099_v58 = vsub.f32 %v13258_v63, %v9912_v41  ;;  %v13260_v29 = vld [vmem:[#allocation36_spill] sm:$0xff]  ;;  %v13261_v41 = vld [vmem:[#allocation75_spill] sm:$0xff] }
 0x494   :  { %v1382_v33 = vmul.f32 1.442695, %v1355_v46  ;;  %7416 = vmatprep.subr.bf16.mxu0 %v2177_v23  ;;  %v8074_v37 = vpop.eup %8073  ;;  %v1386_v46 = vmul.f32 1.442695, %v1357_v44 }
 0x495   :  { %1791 = vrot.lane.b32.xlu0 %v13256_v21, %s8731_s30  ;;  %7417 = vmatpush3.bf16.msra.mxu0 %v2177_v23  ;;  %v983_v10 = vpop.xlane.xlu1 %982 }
 0x496   :  { %8085 = vpow2.f32 %v1382_v33  ;;  %v1000_v4 = vsub.f32 %v9792_v49, %v983_v10  ;;  %v2098_v33 = vsub.f32 %v13261_v41, %v9901_v55  ;;  %v13264_v41 = vld [vmem:[#allocation48_spill] sm:$0xff] }
 0x497   :  { %8087 = vpow2.f32 %v1741_v25 }
 0x498   :  { %v8076_v27 = vpop.eup %8075  ;;  %v1030_v45 = vmul.f32 1.442695, %v1000_v4  ;;  %8089 = vpow2.f32 %v1028_v51 }
 0x499   :  { %v8078_v53 = vpop.eup %8077  ;;  %2164 = vrot.lane.b32.xlu0 %v13256_v21, %s8746_s12  ;;  %v979_v49 = vpop.xlane.xlu1 %978  ;;  %v1038_v34 = vpack.c.bf16 %v8072_v28, %v8076_v27 }
 0x49a   :  { %v998_v19 = vsub.f32 %v9801_v32, %v979_v49  ;;  %2086 = vmax.xlane.f32.xlu1 %v9988_v8  ;;  %v1039_v26 = vpack.c.bf16 %v8078_v53, %v8074_v37  ;;  %v8080_v50 = vpop.eup %8079  ;;  %v13259_v32 = vld [vmem:[#allocation84_spill] sm:$0xff]  ;;  %8091 = vpow2.f32 %v1030_v45 }
 0x49b   :  { %7340 = vmatprep.mubr.bf16.mxu1 %v1038_v34  ;;  %v1358_v5 = vsub.f32 %v13259_v32, %v9954_v56  ;;  %v2116_v56 = vmul.f32 1.442695, %v2099_v58 }
 0x49c   :  { %v8082_v48 = vpop.eup %8081  ;;  %v1026_v13 = vmul.f32 1.442695, %v998_v19  ;;  %7341 = vmatmul.mubr.bf16.gmra.mrb[24].mxu1 %v1039_v26 }
 0x49d   :  { %1793 = vrot.lane.b32.xlu0 %v13260_v29, %s8731_s30  ;;  %v1337_v14 = vpop.xlane.xlu1 %1336  ;;  %v1396_v12 = vpack.c.bf16 %v8080_v50, %v8082_v48  ;;  %v8084_v35 = vpop.eup %8083  ;;  %v1388_v10 = vmul.f32 1.442695, %v1358_v5 }
 0x49e   :  { %8093 = vpow2.f32 %v1026_v13  ;;  %v1356_v23 = vsub.f32 %v9807_v60, %v1337_v14  ;;  %1719 = vmax.xlane.f32.xlu1 %v9996_v2  ;;  %v2114_v60 = vmul.f32 1.442695, %v2098_v33 }
 0x49f   :  { %8095 = vpow2.f32 %v1032_v31  ;;  %7372 = vmatprep.mubr.bf16.mxu0 %v1396_v12  ;;  %v13262_v31 = vld [vmem:[#allocation79_spill] sm:$0xff] }
 0x4a0   :  { %v8086_v0 = vpop.eup %8085  ;;  %8097 = vpow2.f32 %v1743_v57  ;;  %v1384_v21 = vmul.f32 1.442695, %v1356_v23  ;;  %v1625_v48 = vadd.f32 %v9476_v36, %v13262_v31 }
 0x4a1   :  { %8099 = vpow2.f32 %v1386_v46  ;;  %v1343_v20 = vpop.xlane.xlu1 %1342  ;;  %v1397_v28 = vpack.c.bf16 %v8086_v0, %v8084_v35  ;;  %v8088_v25 = vpop.eup %8087  ;;  %v13263_v46 = vld [vmem:[#allocation82_spill] sm:$0xff] }
 0x4a2   :  { %8101 = vpow2.f32 %v1384_v21  ;;  %v1359_v4 = vsub.f32 %v9813_v39, %v1343_v20  ;;  %v8090_v1 = vpop.eup %8089  ;;  %v1657_v5 = vmul.f32 0.2, %v1625_v48  ;;  %v1628_v14 = vadd.f32 %v9476_v36, %v13263_v46 }
 0x4a3   :  { %7373 = vmatmul.mubr.bf16.gmra.mrb[40].mxu0 %v1397_v28  ;;  %8103 = vpow2.f32 %v2116_v56  ;;  %vm1641_vm5 = vcmp.gt.f32.partialorder %v1625_v48, 0.0  ;;  %v1999_v56 = vadd.f32 %v9487_v54, %v9744_v59 }
 0x4a4   :  { %v1390_v37 = vmul.f32 1.442695, %v1359_v4  ;;  %8105 = vpow2.f32 %v1388_v10  ;;  %v8092_v27 = vpop.eup %8091  ;;  %v1660_v23 = vmul.f32 0.2, %v1628_v14  ;;  %v1673_v35 = vsel %vm1641_vm5, %v1625_v48, %v1657_v5  ;;  %v13268_v5 = vld [vmem:[#allocation35_spill] sm:$0xff] }
 0x4a5   :  { %v10009_v55 = vpop.xlane.xlu1 %1701  ;;  %vm1644_vm6 = vcmp.gt.f32.partialorder %v1628_v14, 0.0  ;;  %v10030_v0 = vadd.f32 %v1673_v35, %v9798_v38  ;;  %vm2015_vm8 = vcmp.gt.f32.partialorder %v1999_v56, 0.0 }
 0x4a6   :  { %8107 = vpow2.f32 %v1390_v37  ;;  %v1676_v21 = vsel %vm1644_vm6, %v1628_v14, %v1660_v23 }
 0x4a7   :  { %8109 = vpow2.f32 %v2114_v60  ;;  %v10036_v28 = vadd.f32 %v1676_v21, %v9723_v3  ;;  %v13265_v60 = vld [vmem:[#allocation72_spill] sm:$0xff] }
 0x4a8   :  { %v8094_v61 = vpop.eup %8093  ;;  %v2000_v37 = vadd.f32 %v9487_v54, %v13265_v60 }
 0x4a9   :  { %v8096_v18 = vpop.eup %8095  ;;  %v10011_v51 = vpop.xlane.xlu1 %1707  ;;  %v1040_v62 = vpack.c.bf16 %v8090_v1, %v8094_v61 }
 0x4aa   :  { %v8098_v53 = vpop.eup %8097  ;;  %v1041_v44 = vpack.c.bf16 %v8096_v18, %v8092_v27  ;;  %v2032_v18 = vmul.f32 0.2, %v2000_v37  ;;  %vm2016_vm9 = vcmp.gt.f32.partialorder %v2000_v37, 0.0 }
 0x4ab   :  { %v8100_v39 = vpop.eup %8099  ;;  %7344 = vmatprep.mubr.bf16.mxu1 %v1040_v62  ;;  %v1773_v45 = vpack.c.bf16 %v8098_v53, %v8088_v25  ;;  %v2031_v25 = vmul.f32 0.2, %v1999_v56 }
 0x4ac   :  { %v8102_v49 = vpop.eup %8101  ;;  %7345 = vmatmul.mubr.bf16.gmra.mrb[28].mxu1 %v1041_v44  ;;  %v13266_v44 = vld [vmem:[#allocation51_spill] sm:$0xff] }
 0x4ad   :  { %v10013_v34 = vpop.xlane.xlu1 %2074  ;;  %7396 = vmatprep.mubr.bf16.mxu1 %v1773_v45  ;;  %v1398_v19 = vpack.c.bf16 %v8100_v39, %v8102_v49  ;;  %v8104_v26 = vpop.eup %8103  ;;  %v2047_v53 = vsel %vm2015_vm8, %v1999_v56, %v2031_v25  ;;  %v2001_v39 = vadd.f32 %v9487_v54, %v13266_v44  ;;  %v13267_v45 = vld [vmem:[#allocation69_spill] sm:$0xff] }
 0x4ae   :  { %v8106_v50 = vpop.eup %8105  ;;  %v1627_v49 = vadd.f32 %v9476_v36, %v13267_v45 }
 0x4af   :  { %2166 = vrot.lane.b32.xlu1 %v13260_v29, %s8746_s12  ;;  %7376 = vmatprep.mubr.bf16.mxu0 %v1398_v19  ;;  %v1998_v29 = vadd.f32 %v9487_v54, %v13264_v41  ;;  %v10054_v19 = vadd.f32 %v2047_v53, %v9757_v40  ;;  %v2033_v31 = vmul.f32 0.2, %v2001_v39  ;;  %vm2017_vm10 = vcmp.gt.f32.partialorder %v2001_v39, 0.0 }
 0x4b0   :  { %v8108_v57 = vpop.eup %8107  ;;  %v1659_v54 = vmul.f32 0.2, %v1627_v49  ;;  %vm1643_vm11 = vcmp.gt.f32.partialorder %v1627_v49, 0.0 }
 0x4b1   :  { %v8110_v63 = vpop.eup %8109  ;;  %v10019_v58 = vpop.xlane.xlu1 %2076  ;;  %v1399_v13 = vpack.c.bf16 %v8108_v57, %v8106_v50  ;;  %v2030_v10 = vmul.f32 0.2, %v1998_v29  ;;  %vm2014_vm7 = vcmp.gt.f32.partialorder %v1998_v29, 0.0  ;;  %v2048_v50 = vsel %vm2016_vm9, %v2000_v37, %v2032_v18 }
 0x4b2   :  { %v2146_v32 = vpack.c.bf16 %v8104_v26, %v8110_v63  ;;  %v10059_v57 = vadd.f32 %v2048_v50, %v9712_v16  ;;  %v2049_v63 = vsel %vm2017_vm10, %v2001_v39, %v2033_v31 }
 0x4b3   :  { %7377 = vmatmul.mubr.bf16.gmra.mrb[44].mxu0 %v1399_v13  ;;  %v2046_v1 = vsel %vm2014_vm7, %v1998_v29, %v2030_v10  ;;  %v10063_v36 = vadd.f32 %v2049_v63, %v9723_v3  ;;  %v1675_v13 = vsel %vm1643_vm11, %v1627_v49, %v1659_v54  ;;  %v13276_v3 = vld [vmem:[#allocation42_spill] sm:$0xff] }
 0x4b4   :  { %7428 = vmatprep.mubr.bf16.mxu0 %v2146_v32  ;;  %v10043_v27 = vadd.f32 %v2046_v1, %v9798_v38  ;;  %v10067_v32 = vadd.f32 %v1675_v13, %v9712_v16  ;;  %v13273_v13 = vld [vmem:[#allocation73_spill] sm:$0xff] }
 0x4b5   :  { %v10023_v12 = vpop.xlane.xlu1 %2078 }
 0x4b9   :  { %v10027_v33 = vpop.xlane.xlu1 %2080 }
 0x4bc   :  { %1717 = vmax.xlane.f32.xlu0 %v10030_v0 }
 0x4bd   :  { %v1788_v20 = vpop.permute.xlu1 %1787 }
 0x4be   :  { %v1807_v4 = vsel %vm321_vm0, %v1788_v20, 1065369472 }
 0x4bf   :  { %7386 = vmatprep.subr.bf16.mxu1 %v1807_v4 }
 0x4c0   :  { %1723 = vmax.xlane.f32.xlu0 %v10036_v28  ;;  %7387 = vmatpush3.bf16.msra.mxu1 %v1807_v4 }
 0x4c1   :  { %v1790_v59 = vpop.permute.xlu1 %1789 }
 0x4c2   :  { %v1810_v61 = vsel %vm321_vm0, %v1790_v59, 1065369472 }
 0x4c3   :  { %v10046_v62 = vpop.xlane.xlu0 %1705  ;;  %7388 = vmatprep.subr.bf16.mxu1 %v1810_v61 }
 0x4c4   :  { %2090 = vmax.xlane.f32.xlu0 %v10043_v27  ;;  %7389 = vmatpush3.bf16.msra.mxu1 %v1810_v61 }
 0x4c7   :  { %v2161_v26 = vpop.permute.xlu0 %2160 }
 0x4c8   :  { %2092 = vmax.xlane.f32.xlu0 %v10054_v19  ;;  %v2180_v48 = vsel %vm321_vm0, %v2161_v26, 1065369472 }
 0x4c9   :  { %7418 = vmatprep.subr.bf16.mxu0 %v2180_v48 }
 0x4ca   :  { %7419 = vmatpush3.bf16.msra.mxu0 %v2180_v48 }
 0x4cc   :  { %2094 = vmax.xlane.f32.xlu0 %v10059_v57 }
 0x4d0   :  { %2096 = vmax.xlane.f32.xlu0 %v10063_v36 }
 0x4d3   :  { %1721 = vmax.xlane.f32.xlu1 %v10067_v32 }
 0x4e4   :  { %2168 = vrot.lane.b32.xlu1 %v13268_v5, %s8746_s12 }
 0x4e6   :  { %1795 = vrot.lane.b32.xlu0 %v13268_v5, %s8731_s30  ;;  %v1728_v5 = vsub.f32 %v13273_v13, %v9895_v43  ;;  %v2103_v43 = vsub.f32 %v13276_v3, %v10019_v58 }
 0x4f2   :  { %v10074_v46 = vpop.xlane.xlu1 %1709 }
 0x4f6   :  { %v2163_v14 = vpop.permute.xlu1 %2162 }
 0x4f7   :  { %v2183_v23 = vsel %vm321_vm0, %v2163_v14, 1065369472  ;;  %v13274_v14 = vld [vmem:[#allocation70_spill] sm:$0xff] }
 0x4f8   :  { %v10077_v35 = vpop.xlane.xlu0 %1711  ;;  %7420 = vmatprep.subr.bf16.mxu0 %v2183_v23 }
 0x4f9   :  { %7421 = vmatpush3.bf16.msra.mxu0 %v2183_v23  ;;  %v1727_v23 = vsub.f32 %v13274_v14, %v9882_v17  ;;  %v13277_v17 = vld [vmem:[#allocation32_spill] sm:$0xff]  ;;  %v13278_v14 = vld [vmem:[#allocation66_spill] sm:$0xff] }
 0x4fa   :  { %v2101_v40 = vsub.f32 %v13278_v14, %v13277_v17  ;;  %v13282_v17 = vld [vmem:[#allocation45_spill] sm:$0xff] }
 0x4fc   :  { %v10079_v41 = vpop.xlane.xlu0 %1713 }
 0x500   :  { %v10081_v29 = vpop.xlane.xlu0 %1715 }
 0x504   :  { %v10083_v56 = vpop.xlane.xlu0 %2082 }
 0x508   :  { %v10085_v21 = vpop.xlane.xlu0 %2084 }
 0x50c   :  { %v10087_v10 = vpop.xlane.xlu0 %2088 }
 0x510   :  { %v1792_v20 = vpop.permute.xlu0 %1791 }
 0x511   :  { %v1813_v4 = vsel %vm321_vm0, %v1792_v20, 1065369472  ;;  %v1729_v20 = vsub.f32 %v9819_v11, %v10009_v55  ;;  %v13279_v55 = vld [vmem:[#allocation41_spill] sm:$0xff] }
 0x512   :  { %7390 = vmatprep.subr.bf16.mxu1 %v1813_v4 }
 0x513   :  { %7391 = vmatpush3.bf16.msra.mxu1 %v1813_v4 }
 0x514   :  { %v2165_v60 = vpop.permute.xlu0 %2164 }
 0x515   :  { %v2186_v37 = vsel %vm321_vm0, %v2165_v60, 1065369472  ;;  %v1747_v60 = vmul.f32 1.442695, %v1728_v5  ;;  %v2102_v5 = vsub.f32 %v13279_v55, %v10013_v34  ;;  %v13283_v34 = vld [vmem:[#allocation34_spill] sm:$0xff] }
 0x516   :  { %7422 = vmatprep.subr.bf16.mxu0 %v2186_v37 }
 0x517   :  { %7423 = vmatpush3.bf16.msra.mxu0 %v2186_v37  ;;  %v1730_v37 = vsub.f32 %v9747_v22, %v9962_v42  ;;  %8111 = vpow2.f32 %v1747_v60  ;;  %v13280_v42 = vld [vmem:[#allocation90_spill] sm:$0xff]  ;;  %v1732_v60 = vsub.f32 %v13282_v17, %v10011_v51  ;;  %v13285_v51 = vld [vmem:[#allocation89_spill] sm:$0xff] }
 0x518   :  { %v1794_v25 = vpop.permute.xlu0 %1793 }
 0x519   :  { %v1816_v1 = vsel %vm321_vm0, %v1794_v25, 1065369472  ;;  %v1745_v25 = vmul.f32 1.442695, %v1727_v23  ;;  %v1751_v11 = vmul.f32 1.442695, %v1730_v37  ;;  %v1731_v23 = vsub.f32 %v13280_v42, %v10046_v62 }
 0x51a   :  { %7392 = vmatprep.subr.bf16.mxu1 %v1816_v1  ;;  %v2122_v37 = vmul.f32 1.442695, %v2102_v5 }
 0x51b   :  { %7393 = vmatpush3.bf16.msra.mxu1 %v1816_v1  ;;  %v13275_v1 = vld [vmem:[#allocation78_spill] sm:$0xff]  ;;  %8113 = vpow2.f32 %v1745_v25  ;;  %v1733_v25 = vsub.f32 %v13283_v34, %v10074_v46  ;;  %v2106_v46 = vsub.f32 %v9934_v52, %v10083_v56 }
 0x51d   :  { %v1757_v55 = vmul.f32 1.442695, %v1733_v25 }
 0x527   :  { %v10092_v59 = vpop.xlane.xlu1 %2086 }
 0x52b   :  { %v10094_v61 = vpop.xlane.xlu1 %1719 }
 0x52f   :  { %v2167_v18 = vpop.permute.xlu1 %2166 }
 0x530   :  { %v2189_v53 = vsel %vm321_vm0, %v2167_v18, 1065369472  ;;  %v2100_v18 = vsub.f32 %v13275_v1, %v9922_v15  ;;  %v2124_v15 = vmul.f32 1.442695, %v2103_v43  ;;  %v2120_v1 = vmul.f32 1.442695, %v2101_v40 }
 0x531   :  { %7424 = vmatprep.subr.bf16.mxu0 %v2189_v53  ;;  %v1755_v40 = vmul.f32 1.442695, %v1732_v60  ;;  %v2130_v60 = vmul.f32 1.442695, %v2106_v46 }
 0x532   :  { %7425 = vmatpush3.bf16.msra.mxu0 %v2189_v53  ;;  %v1749_v53 = vmul.f32 1.442695, %v1729_v20  ;;  %v2118_v22 = vmul.f32 1.442695, %v2100_v18  ;;  %v13281_v20 = vld [vmem:[#allocation61_spill] sm:$0xff]  ;;  %v13284_v18 = vld [vmem:[#allocation39_spill] sm:$0xff] }
 0x533   :  { %v1734_v3 = vsub.f32 %v13281_v20, %v10077_v35  ;;  %v2105_v62 = vsub.f32 %v13284_v18, %v10027_v33  ;;  %v2107_v35 = vsub.f32 %v9944_v6, %v10085_v21 }
 0x534   :  { %8115 = vpow2.f32 %v1749_v53  ;;  %v1753_v53 = vmul.f32 1.442695, %v1731_v23 }
 0x535   :  { %8117 = vpow2.f32 %v1751_v11  ;;  %v1759_v43 = vmul.f32 1.442695, %v1734_v3  ;;  %v2104_v11 = vsub.f32 %v13285_v51, %v10023_v12  ;;  %v2128_v33 = vmul.f32 1.442695, %v2105_v62  ;;  %v8112_v12 = vpop.eup %8111 }
 0x536   :  { %v10097_v44 = vpop.f32.mrb[16].mxu1  ;;  %8119 = vpow2.f32 %v2118_v22  ;;  %v1736_v22 = vsub.f32 %v9925_v47, %v10081_v29  ;;  %v2132_v42 = vmul.f32 1.442695, %v2107_v35  ;;  %v13289_v47 = vld [vmem:[#allocation63_spill] sm:$0xff] }
 0x537   :  { %13269 = vst [vmem:[#allocation53_spill] sm:$0xff] %v10097_v44  ;;  %2311 = vrot.lane.b32.xlu0 %v10097_v44, %s8745_s11  ;;  %v10101_v39 = vpop.f32.mrb[17].mxu1  ;;  %8121 = vpow2.f32 %v2124_v15  ;;  %v8114_v15 = vpop.eup %8113  ;;  %v2126_v20 = vmul.f32 1.442695, %v2104_v11  ;;  %v1735_v29 = vsub.f32 %v13289_v47, %v10079_v41 }
 0x538   :  { %13270 = vst [vmem:[#allocation46_spill] sm:$0xff] %v10101_v39  ;;  %v10103_v45 = vpop.f32.mrb[18].mxu1  ;;  %8123 = vpow2.f32 %v2120_v1  ;;  %v1774_v34 = vpack.c.bf16 %v8112_v12, %v8114_v15 }
 0x539   :  { %13271 = vst [vmem:[#allocation49_spill] sm:$0xff] %v10103_v45  ;;  %2313 = vrot.lane.b32.xlu1 %v10103_v45, %s8745_s11  ;;  %v10107_v49 = vpop.f32.mrb[19].mxu1  ;;  %8125 = vpow2.f32 %v2122_v37  ;;  %v2108_v37 = vsub.f32 %v9988_v8, %v10092_v59 }
 0x53a   :  { %13272 = vst [vmem:[#allocation40_spill] sm:$0xff] %v10107_v49  ;;  %8127 = vpow2.f32 %v1753_v53 }
 0x53b   :  { %8129 = vpow2.f32 %v1759_v43  ;;  %v2134_v11 = vmul.f32 1.442695, %v2108_v37 }
 0x53c   :  { %8131 = vpow2.f32 %v1755_v40 }
 0x53d   :  { %8133 = vpow2.f32 %v1757_v55 }
 0x53e   :  { %v10109_v26 = vpop.f32.mrb[32].mxu0  ;;  %v8116_v17 = vpop.eup %8115  ;;  %8135 = vpow2.f32 %v2128_v33 }
 0x53f   :  { %2375 = vrot.lane.b32.xlu0 %v10109_v26, %s8748_s23  ;;  %v10113_v50 = vpop.f32.mrb[33].mxu0  ;;  %v8118_v25 = vpop.eup %8117  ;;  %8137 = vpow2.f32 %v2132_v42 }
 0x540   :  { %v10115_v31 = vpop.f32.mrb[34].mxu0  ;;  %v8120_v43 = vpop.eup %8119  ;;  %8139 = vpow2.f32 %v2126_v20  ;;  %v1775_v8 = vpack.c.bf16 %v8118_v25, %v8116_v17 }
 0x541   :  { %2377 = vrot.lane.b32.xlu1 %v10115_v31, %s8748_s23  ;;  %v10119_v48 = vpop.f32.mrb[35].mxu0  ;;  %v8122_v59 = vpop.eup %8121  ;;  %8141 = vpow2.f32 %v2130_v60 }
 0x543   :  { %2307 = vrot.lane.b32.xlu0 %v10101_v39, %s8745_s11 }
 0x545   :  { %2309 = vrot.lane.b32.xlu1 %v10107_v49, %s8745_s11 }
 0x547   :  { %2371 = vrot.lane.b32.xlu0 %v10113_v50, %s8748_s23 }
 0x549   :  { %v10127_v54 = vpop.xlane.xlu0 %1717  ;;  %2373 = vrot.lane.b32.xlu1 %v10119_v48, %s8748_s23 }
 0x54a   :  { %v1737_v52 = vsub.f32 %v10030_v0, %v10127_v54  ;;  %v1738_v0 = vsub.f32 %v9996_v2, %v10094_v61  ;;  %v1763_v54 = vmul.f32 1.442695, %v1736_v22  ;;  %v1761_v2 = vmul.f32 1.442695, %v1735_v29 }
 0x54b   :  { %v2109_v61 = vsub.f32 %v9951_v7, %v10087_v10 }
 0x54c   :  { %v1765_v18 = vmul.f32 1.442695, %v1737_v52  ;;  %v1767_v40 = vmul.f32 1.442695, %v1738_v0  ;;  %8143 = vpow2.f32 %v1763_v54 }
 0x54d   :  { %v10131_v63 = vpop.xlane.xlu0 %1723  ;;  %v2136_v22 = vmul.f32 1.442695, %v2109_v61 }
 0x54e   :  { %8145 = vpow2.f32 %v1765_v18  ;;  %v1740_v12 = vsub.f32 %v10036_v28, %v10131_v63 }
 0x54f   :  { %8147 = vpow2.f32 %v1761_v2 }
 0x550   :  { %8149 = vpow2.f32 %v1767_v40  ;;  %v1771_v47 = vmul.f32 1.442695, %v1740_v12 }
 0x551   :  { %v10139_v4 = vpop.xlane.xlu0 %2090  ;;  %8151 = vpow2.f32 %v2134_v11 }
 0x552   :  { %v2110_v51 = vsub.f32 %v10043_v27, %v10139_v4 }
 0x554   :  { %v2138_v42 = vmul.f32 1.442695, %v2110_v51 }
 0x555   :  { %v10147_v13 = vpop.xlane.xlu0 %2092 }
 0x556   :  { %v2111_v62 = vsub.f32 %v10054_v19, %v10147_v13  ;;  %v8124_v13 = vpop.eup %8123 }
 0x557   :  { %v8126_v55 = vpop.eup %8125  ;;  %v2147_v4 = vpack.c.bf16 %v8124_v13, %v8120_v43 }
 0x558   :  { %v2140_v46 = vmul.f32 1.442695, %v2111_v62  ;;  %v8128_v33 = vpop.eup %8127 }
 0x559   :  { %v10157_v58 = vpop.xlane.xlu0 %2094 }
 0x55a   :  { %8153 = vpow2.f32 %v2140_v46  ;;  %v2112_v29 = vsub.f32 %v10059_v57, %v10157_v58 }
 0x55b   :  { %8155 = vpow2.f32 %v2136_v22 }
 0x55c   :  { %8157 = vpow2.f32 %v2138_v42 }
 0x55d   :  { %v10167_v14 = vpop.xlane.xlu0 %2096 }
 0x55f   :  { %v10173_v5 = vpop.f32.mrb[20].mxu1 }
 0x560   :  { %13286 = vst [vmem:[#allocation37_spill] sm:$0xff] %v10173_v5  ;;  %v10177_v6 = vpop.xlane.xlu1 %1721  ;;  %2319 = vrot.lane.b32.xlu0 %v10173_v5, %s8745_s11  ;;  %v10181_v21 = vpop.f32.mrb[21].mxu1 }
 0x561   :  { %13287 = vst [vmem:[#allocation56_spill] sm:$0xff] %v10181_v21  ;;  %v1796_v56 = vpop.permute.xlu0 %1795  ;;  %v10185_v23 = vpop.f32.mrb[22].mxu1  ;;  %v1739_v7 = vsub.f32 %v10067_v32, %v10177_v6  ;;  %v2148_v32 = vpack.c.bf16 %v8122_v59, %v8126_v55 }
 0x562   :  { %13288 = vst [vmem:[#allocation47_spill] sm:$0xff] %v10185_v23  ;;  %2321 = vrot.lane.b32.xlu1 %v10185_v23, %s8745_s11  ;;  %v10191_v3 = vpop.f32.mrb[23].mxu1  ;;  %v1819_v1 = vsel %vm321_vm0, %v1796_v56, 1065369472  ;;  %v8130_v6 = vpop.eup %8129  ;;  %v2113_v56 = vsub.f32 %v10063_v36, %v10167_v14 }
 0x563   :  { %13290 = vst [vmem:[#allocation43_spill] sm:$0xff] %v10191_v3  ;;  %7394 = vmatprep.subr.bf16.mxu1 %v1819_v1  ;;  %v8132_v52 = vpop.eup %8131  ;;  %v1769_v15 = vmul.f32 1.442695, %v1739_v7 }
 0x564   :  { %7395 = vmatpush3.bf16.msra.mxu1 %v1819_v1  ;;  %v2169_v41 = vpop.permute.xlu1 %2168  ;;  %v8134_v20 = vpop.eup %8133  ;;  %v1776_v28 = vpack.c.bf16 %v8132_v52, %v8128_v33  ;;  %v2144_v60 = vmul.f32 1.442695, %v2113_v56 }
 0x565   :  { %v2192_v53 = vsel %vm321_vm0, %v2169_v41, 1065369472  ;;  %v8136_v63 = vpop.eup %8135  ;;  %v1777_v1 = vpack.c.bf16 %v8130_v6, %v8134_v20  ;;  %8159 = vpow2.f32 %v1769_v15  ;;  %v2142_v41 = vmul.f32 1.442695, %v2112_v29 }
 0x566   :  { %v10203_v35 = vpop.f32.mrb[36].mxu0  ;;  %7426 = vmatprep.subr.bf16.mxu0 %v2192_v53  ;;  %v8138_v17 = vpop.eup %8137  ;;  %8161 = vpow2.f32 %v1771_v47 }
 0x567   :  { %7397 = vmatmul.mubr.bf16.vlgmr.msra.gmra.mrb[32].mxu1 %v1774_v34  ;;  %2383 = vrot.lane.b32.xlu0 %v10203_v35, %s8748_s23  ;;  %v10209_v19 = vpop.f32.mrb[37].mxu0  ;;  %v8140_v14 = vpop.eup %8139  ;;  %8163 = vpow2.f32 %v2144_v60 }
 0x568   :  { %7400 = vmatprep.mubr.bf16.mxu1 %v1775_v8  ;;  %7427 = vmatpush3.bf16.msra.mxu0 %v2192_v53  ;;  %v10213_v10 = vpop.f32.mrb[38].mxu0  ;;  %v8142_v54 = vpop.eup %8141  ;;  %v2149_v58 = vpack.c.bf16 %v8136_v63, %v8140_v14  ;;  %8165 = vpow2.f32 %v2142_v41 }
 0x569   :  { %2385 = vrot.lane.b32.xlu1 %v10213_v10, %s8748_s23  ;;  %v10217_v27 = vpop.f32.mrb[39].mxu0  ;;  %v8144_v37 = vpop.eup %8143  ;;  %v2150_v25 = vpack.c.bf16 %v8138_v17, %v8142_v54  ;;  %v13010_v54 = vmov 1  }
 0x56a   :  { %v8146_v18 = vpop.eup %8145  ;;  %7825 = vset.pattern.permute.xlu1 %v13010_v54  ;;  %7829 = vset.pattern.permute.xlu0 %v13010_v54 }
 0x56b   :  { %7429 = vmatmul.mubr.bf16.vlgmr.msra.gmra.mrb[48].mxu0 %v2147_v4  ;;  %2315 = vrot.lane.b32.xlu0 %v10181_v21, %s8745_s11  ;;  %v8148_v62 = vpop.eup %8147 }
 0x56c   :  { %7432 = vmatprep.mubr.bf16.mxu0 %v2148_v32  ;;  %v8150_v53 = vpop.eup %8149  ;;  %v1778_v43 = vpack.c.bf16 %v8144_v37, %v8148_v62 }
 0x56d   :  { %2317 = vrot.lane.b32.xlu1 %v10191_v3, %s8745_s11  ;;  %v8152_v2 = vpop.eup %8151  ;;  %v1779_v8 = vpack.c.bf16 %v8150_v53, %v8146_v18 }
 0x56e   :  { %v8154_v59 = vpop.eup %8153 }
 0x56f   :  { %7401 = vmatmul.mubr.bf16.gmra.mrb[36].mxu1 %v1776_v28  ;;  %2379 = vrot.lane.b32.xlu0 %v10209_v19, %s8748_s23  ;;  %v10231_v36 = vpop.f32.mrb[24].mxu1  ;;  %v8156_v51 = vpop.eup %8155 }
 0x570   :  { %13291 = vst [vmem:[#allocation38_spill] sm:$0xff] %v10231_v36  ;;  %7404 = vmatprep.mubr.bf16.mxu1 %v1777_v1  ;;  %v10233_v0 = vpop.f32.mrb[25].mxu1  ;;  %v8158_v11 = vpop.eup %8157  ;;  %v2151_v55 = vpack.c.bf16 %v8156_v51, %v8152_v2 }
 0x571   :  { %13292 = vst [vmem:[#allocation60_spill] sm:$0xff] %v10233_v0  ;;  %2381 = vrot.lane.b32.xlu1 %v10217_v27, %s8748_s23  ;;  %v10237_v57 = vpop.f32.mrb[26].mxu1  ;;  %v8160_v46 = vpop.eup %8159  ;;  %v2152_v4 = vpack.c.bf16 %v8154_v59, %v8158_v11 }
 0x572   :  { %13293 = vst [vmem:[#allocation44_spill] sm:$0xff] %v10237_v57  ;;  %v10239_v34 = vpop.f32.mrb[27].mxu1  ;;  %v8162_v33 = vpop.eup %8161 }
 0x573   :  { %13294 = vst [vmem:[#allocation50_spill] sm:$0xff] %v10239_v34  ;;  %7433 = vmatmul.mubr.bf16.gmra.mrb[52].mxu0 %v2149_v58  ;;  %2327 = vrot.lane.b32.xlu0 %v10231_v36, %s8745_s11  ;;  %v1780_v22 = vpack.c.bf16 %v8162_v33, %v8160_v46  ;;  %v8164_v12 = vpop.eup %8163 }
 0x574   :  { %7436 = vmatprep.mubr.bf16.mxu0 %v2150_v25  ;;  %v8166_v6 = vpop.eup %8165 }
 0x575   :  { %2329 = vrot.lane.b32.xlu1 %v10237_v57, %s8745_s11  ;;  %v2153_v56 = vpack.c.bf16 %v8164_v12, %v8166_v6 }
 0x576   :  { %v10245_v61 = vpop.f32.mrb[40].mxu0 }
 0x577   :  { %13295 = vst [vmem:[#allocation52_spill] sm:$0xff] %v10245_v61  ;;  %7405 = vmatmul.mubr.bf16.gmra.mrb[40].mxu1 %v1778_v43  ;;  %2391 = vrot.lane.b32.xlu0 %v10245_v61, %s8748_s23  ;;  %v10249_v40 = vpop.f32.mrb[41].mxu0 }
 0x578   :  { %13296 = vst [vmem:[#allocation67_spill] sm:$0xff] %v10249_v40  ;;  %7408 = vmatprep.mubr.bf16.mxu1 %v1779_v8  ;;  %v10251_v13 = vpop.f32.mrb[42].mxu0 }
 0x579   :  { %13297 = vst [vmem:[#allocation33_spill] sm:$0xff] %v10251_v13  ;;  %2393 = vrot.lane.b32.xlu1 %v10251_v13, %s8748_s23  ;;  %v10255_v7 = vpop.f32.mrb[43].mxu0 }
 0x57a   :  { %13298 = vst [vmem:[#allocation64_spill] sm:$0xff] %v10255_v7 }
 0x57b   :  { %7437 = vmatmul.mubr.bf16.gmra.mrb[56].mxu0 %v2151_v55  ;;  %2323 = vrot.lane.b32.xlu0 %v10233_v0, %s8745_s11 }
 0x57c   :  { %7440 = vmatprep.mubr.bf16.mxu0 %v2152_v4 }
 0x57d   :  { %2325 = vrot.lane.b32.xlu1 %v10239_v34, %s8745_s11 }
 0x57f   :  { %7409 = vmatmul.mubr.bf16.gmra.mrb[44].mxu1 %v1780_v22  ;;  %2387 = vrot.lane.b32.xlu0 %v10249_v40, %s8748_s23  ;;  %v10263_v32 = vpop.f32.mrb[28].mxu1 }
 0x580   :  { %13299 = vst [vmem:[#allocation76_spill] sm:$0xff] %v10263_v32  ;;  %v10265_v42 = vpop.f32.mrb[29].mxu1 }
 0x581   :  { %13300 = vst [vmem:[#allocation84_spill] sm:$0xff] %v10265_v42  ;;  %2389 = vrot.lane.b32.xlu1 %v10255_v7, %s8748_s23  ;;  %v10269_v52 = vpop.f32.mrb[30].mxu1 }
 0x582   :  { %13301 = vst [vmem:[#allocation36_spill] sm:$0xff] %v10269_v52  ;;  %v10271_v15 = vpop.f32.mrb[31].mxu1 }
 0x583   :  { %13302 = vst [vmem:[#allocation75_spill] sm:$0xff] %v10271_v15  ;;  %7441 = vmatmul.mubr.bf16.gmra.mrb[60].mxu0 %v2153_v56  ;;  %2335 = vrot.lane.b32.xlu0 %v10263_v32, %s8745_s11 }
 0x585   :  { %2337 = vrot.lane.b32.xlu1 %v10269_v52, %s8745_s11 }
 0x586   :  { %v10277_v20 = vpop.f32.mrb[44].mxu0 }
 0x587   :  { %13303 = vst [vmem:[#allocation79_spill] sm:$0xff] %v10277_v20  ;;  %2399 = vrot.lane.b32.xlu0 %v10277_v20, %s8748_s23  ;;  %v10281_v28 = vpop.f32.mrb[45].mxu0 }
 0x588   :  { %13304 = vst [vmem:[#allocation82_spill] sm:$0xff] %v10281_v28  ;;  %v10283_v63 = vpop.f32.mrb[46].mxu0 }
 0x589   :  { %13305 = vst [vmem:[#allocation48_spill] sm:$0xff] %v10283_v63  ;;  %2401 = vrot.lane.b32.xlu1 %v10283_v63, %s8748_s23  ;;  %v10287_v47 = vpop.f32.mrb[47].mxu0 }
 0x58a   :  { %13306 = vst [vmem:[#allocation72_spill] sm:$0xff] %v10287_v47 }
 0x58b   :  { %2331 = vrot.lane.b32.xlu0 %v10265_v42, %s8745_s11 }
 0x58d   :  { %2333 = vrot.lane.b32.xlu1 %v10271_v15, %s8745_s11 }
 0x58f   :  { %2395 = vrot.lane.b32.xlu0 %v10281_v28, %s8748_s23 }
 0x591   :  { %2397 = vrot.lane.b32.xlu1 %v10287_v47, %s8748_s23 }
 0x5a9   :  { %v2312_v38 = vpop.permute.xlu0 %2311 }
 0x5ab   :  { %v10401_v32 = vpop.permute.xlu1 %2313 }
 0x5b1   :  { %v2376_v15 = vpop.permute.xlu0 %2375 }
 0x5b3   :  { %v10407_v34 = vpop.permute.xlu1 %2377 }
 0x5b5   :  { %v2308_v52 = vpop.permute.xlu0 %2307 }
 0x5b7   :  { %v10417_v36 = vpop.permute.xlu1 %2309 }
 0x5b9   :  { %v2372_v0 = vpop.permute.xlu0 %2371 }
 0x5ba   :  { %v2548_v61 = vsel %vm2547_vm12, %v2308_v52, %v2372_v0  ;;  %v2551_v0 = vsel %vm2547_vm12, %v10401_v32, %v10407_v34 }
 0x5bb   :  { %v10427_v3 = vpop.permute.xlu1 %2373 }
 0x5d2   :  { %v10413_v57 = vpop.permute.xlu0 %2319 }
 0x5d4   :  { %v10435_v23 = vpop.permute.xlu1 %2321 }
 0x5d9   :  { %v10421_v21 = vpop.permute.xlu0 %2383 }
 0x5db   :  { %v10441_v39 = vpop.permute.xlu1 %2385 }
 0x5dd   :  { %v10431_v5 = vpop.permute.xlu0 %2315 }
 0x5df   :  { %v10447_v44 = vpop.permute.xlu1 %2317 }
 0x5e1   :  { %v10443_v49 = vpop.permute.xlu0 %2379 }
 0x5e3   :  { %v10451_v47 = vpop.permute.xlu1 %2381 }
 0x5e5   :  { %v10449_v45 = vpop.permute.xlu0 %2327 }
 0x63a   :  { %v10297_v29 = vpop.f32.mrb[32].mxu1 }
 0x63b   :  { %2439 = vrot.lane.b32.xlu0 %v10297_v29, %s8749_s25  ;;  %v10301_v1 = vpop.f32.mrb[33].mxu1 }
 0x63c   :  { %v10303_v17 = vpop.f32.mrb[34].mxu1 }
 0x63d   :  { %2441 = vrot.lane.b32.xlu1 %v10303_v17, %s8749_s25  ;;  %v10307_v14 = vpop.f32.mrb[35].mxu1 }
 0x63e   :  { %v10309_v60 = vpop.f32.mrb[48].mxu0 }
 0x63f   :  { %v10313_v58 = vpop.f32.mrb[49].mxu0  ;;  %2503 = vrot.lane.b32.xlu0 %v10309_v60, %s8751_s27 }
 0x640   :  { %v10317_v37 = vpop.f32.mrb[50].mxu0 }
 0x641   :  { %v10319_v41 = vpop.f32.mrb[51].mxu0  ;;  %2505 = vrot.lane.b32.xlu1 %v10317_v37, %s8751_s27 }
 0x642   :  { %v10323_v25 = vpop.f32.mrb[36].mxu1 }
 0x643   :  { %2435 = vrot.lane.b32.xlu0 %v10301_v1, %s8749_s25  ;;  %v10327_v18 = vpop.f32.mrb[37].mxu1 }
 0x644   :  { %13307 = vst [vmem:[#allocation51_spill] sm:$0xff] %v10327_v18  ;;  %v10329_v62 = vpop.f32.mrb[38].mxu1 }
 0x645   :  { %2437 = vrot.lane.b32.xlu1 %v10307_v14, %s8749_s25  ;;  %v10333_v53 = vpop.f32.mrb[39].mxu1 }
 0x646   :  { %13308 = vst [vmem:[#allocation69_spill] sm:$0xff] %v10333_v53  ;;  %v10335_v43 = vpop.f32.mrb[52].mxu0 }
 0x647   :  { %v10337_v2 = vpop.f32.mrb[53].mxu0  ;;  %2499 = vrot.lane.b32.xlu0 %v10313_v58, %s8751_s27 }
 0x648   :  { %13309 = vst [vmem:[#allocation35_spill] sm:$0xff] %v10337_v2  ;;  %v10341_v8 = vpop.f32.mrb[54].mxu0 }
 0x649   :  { %v10343_v59 = vpop.f32.mrb[55].mxu0  ;;  %2501 = vrot.lane.b32.xlu1 %v10319_v41, %s8751_s27 }
 0x64a   :  { %13310 = vst [vmem:[#allocation73_spill] sm:$0xff] %v10343_v59  ;;  %v10347_v51 = vpop.f32.mrb[40].mxu1 }
 0x64b   :  { %13311 = vst [vmem:[#allocation70_spill] sm:$0xff] %v10347_v51  ;;  %2447 = vrot.lane.b32.xlu0 %v10323_v25, %s8749_s25  ;;  %v10351_v11 = vpop.f32.mrb[41].mxu1 }
 0x64c   :  { %13312 = vst [vmem:[#allocation78_spill] sm:$0xff] %v10351_v11  ;;  %v10353_v55 = vpop.f32.mrb[42].mxu1 }
 0x64d   :  { %13313 = vst [vmem:[#allocation42_spill] sm:$0xff] %v10353_v55  ;;  %2449 = vrot.lane.b32.xlu1 %v10329_v62, %s8749_s25  ;;  %v10357_v46 = vpop.f32.mrb[43].mxu1 }
 0x64e   :  { %13314 = vst [vmem:[#allocation32_spill] sm:$0xff] %v10357_v46  ;;  %v10359_v4 = vpop.f32.mrb[56].mxu0 }
 0x64f   :  { %13315 = vst [vmem:[#allocation66_spill] sm:$0xff] %v10359_v4  ;;  %v10361_v33 = vpop.f32.mrb[57].mxu0  ;;  %2511 = vrot.lane.b32.xlu0 %v10335_v43, %s8751_s27 }
 0x650   :  { %13316 = vst [vmem:[#allocation41_spill] sm:$0xff] %v10361_v33  ;;  %v10365_v22 = vpop.f32.mrb[58].mxu0 }
 0x651   :  { %13317 = vst [vmem:[#allocation90_spill] sm:$0xff] %v10365_v22  ;;  %v10367_v12 = vpop.f32.mrb[59].mxu0  ;;  %2513 = vrot.lane.b32.xlu1 %v10341_v8, %s8751_s27 }
 0x652   :  { %13318 = vst [vmem:[#allocation61_spill] sm:$0xff] %v10367_v12  ;;  %v10371_v6 = vpop.f32.mrb[44].mxu1 }
 0x653   :  { %13319 = vst [vmem:[#allocation45_spill] sm:$0xff] %v10371_v6  ;;  %2443 = vrot.lane.b32.xlu0 %v10327_v18, %s8749_s25  ;;  %v10375_v56 = vpop.f32.mrb[45].mxu1 }
 0x654   :  { %13320 = vst [vmem:[#allocation34_spill] sm:$0xff] %v10375_v56  ;;  %v10377_v54 = vpop.f32.mrb[46].mxu1 }
 0x655   :  { %13321 = vst [vmem:[#allocation39_spill] sm:$0xff] %v10377_v54  ;;  %2445 = vrot.lane.b32.xlu1 %v10333_v53, %s8749_s25  ;;  %v10381_v16 = vpop.f32.mrb[47].mxu1 }
 0x656   :  { %13322 = vst [vmem:[#allocation89_spill] sm:$0xff] %v10381_v16  ;;  %v10383_v24 = vpop.f32.mrb[60].mxu0 }
 0x657   :  { %13323 = vst [vmem:[#allocation63_spill] sm:$0xff] %v10383_v24  ;;  %v10385_v30 = vpop.f32.mrb[61].mxu0  ;;  %2507 = vrot.lane.b32.xlu0 %v10337_v2, %s8751_s27 }
 0x658   :  { %13324 = vst [vmem:[#allocation91_spill] sm:$0xff] %v10385_v30  ;;  %v10389_v9 = vpop.f32.mrb[62].mxu0 }
 0x659   :  { %13325 = vst [vmem:[#allocation92_spill] sm:$0xff] %v10389_v9  ;;  %v10391_v42 = vpop.f32.mrb[63].mxu0  ;;  %2509 = vrot.lane.b32.xlu1 %v10343_v59, %s8751_s27 }
 0x65a   :  { %13326 = vst [vmem:[#allocation93_spill] sm:$0xff] %v10391_v42 }
 0x65b   :  { %2455 = vrot.lane.b32.xlu0 %v10347_v51, %s8749_s25 }
 0x65d   :  { %2457 = vrot.lane.b32.xlu1 %v10353_v55, %s8749_s25 }
 0x65f   :  { %2519 = vrot.lane.b32.xlu0 %v10359_v4, %s8751_s27 }
 0x661   :  { %2521 = vrot.lane.b32.xlu1 %v10365_v22, %s8751_s27 }
 0x663   :  { %2451 = vrot.lane.b32.xlu0 %v10351_v11, %s8749_s25 }
 0x665   :  { %2453 = vrot.lane.b32.xlu1 %v10357_v46, %s8749_s25 }
 0x667   :  { %2515 = vrot.lane.b32.xlu0 %v10361_v33, %s8751_s27  ;;  %v2550_v33 = vsel %vm2547_vm12, %v2312_v38, %v2376_v15 }
 0x669   :  { %2517 = vrot.lane.b32.xlu1 %v10367_v12, %s8751_s27 }
 0x66b   :  { %2463 = vrot.lane.b32.xlu0 %v10371_v6, %s8749_s25 }
 0x66d   :  { %2465 = vrot.lane.b32.xlu1 %v10377_v54, %s8749_s25  ;;  %v10455_v54 = vpop.permute.xlu1 %2329 }
 0x66f   :  { %2527 = vrot.lane.b32.xlu0 %v10383_v24, %s8751_s27 }
 0x671   :  { %2529 = vrot.lane.b32.xlu1 %v10389_v9, %s8751_s27  ;;  %v10453_v9 = vpop.permute.xlu0 %2391  ;;  %v10459_v63 = vpop.permute.xlu1 %2393 }
 0x673   :  { %2459 = vrot.lane.b32.xlu0 %v10375_v56, %s8749_s25 }
 0x675   :  { %2461 = vrot.lane.b32.xlu1 %v10381_v16, %s8749_s25  ;;  %v10457_v16 = vpop.permute.xlu0 %2323  ;;  %v10463_v56 = vpop.permute.xlu1 %2325 }
 0x677   :  { %2523 = vrot.lane.b32.xlu0 %v10385_v30, %s8751_s27 }
 0x679   :  { %2525 = vrot.lane.b32.xlu1 %v10391_v42, %s8751_s27  ;;  %v10461_v30 = vpop.permute.xlu0 %2387  ;;  %v10467_v42 = vpop.permute.xlu1 %2389 }
 0x67d   :  { %v10465_v28 = vpop.permute.xlu0 %2335  ;;  %v10471_v6 = vpop.permute.xlu1 %2337 }
 0x681   :  { %v10469_v24 = vpop.permute.xlu0 %2399  ;;  %v10475_v20 = vpop.permute.xlu1 %2401 }
 0x685   :  { %v10473_v12 = vpop.permute.xlu0 %2331  ;;  %v10479_v22 = vpop.permute.xlu1 %2333 }
 0x689   :  { %v10477_v46 = vpop.permute.xlu0 %2395  ;;  %v10484_v4 = vpop.permute.xlu1 %2397 }
 0x6ad   :  { %v2440_v7 = vpop.permute.xlu0 %2439 }
 0x6ae   :  { %v2567_v55 = vsel %vm2564_vm13, %v2550_v33, %v2440_v7  ;;  %v13070_v7 = vmov 2  }
 0x6af   :  { %v2442_v13 = vpop.permute.xlu1 %2441 }
 0x6b1   :  { %v2504_v11 = vpop.permute.xlu0 %2503 }
 0x6b2   :  { %v2584_v40 = vsel %vm2581_vm14, %v2567_v55, %v2504_v11 }
 0x6b3   :  { %8167 = vrcp.f32 %v2584_v40  ;;  %v2506_v38 = vpop.permute.xlu1 %2505 }
 0x6b5   :  { %v2436_v51 = vpop.permute.xlu0 %2435 }
 0x6b6   :  { %v2565_v2 = vsel %vm2564_vm13, %v2548_v61, %v2436_v51  ;;  %v2568_v61 = vsel %vm2564_vm13, %v2551_v0, %v2442_v13  ;;  %v2549_v51 = vsel %vm2547_vm12, %v10417_v36, %v10427_v3  ;;  %v13066_v13 = vmov 0  }
 0x6b7   :  { %v2438_v40 = vpop.permute.xlu1 %2437  ;;  %v13327_v36 = vmov 1  }
 0x6b8   :  { %v2566_v34 = vsel %vm2564_vm13, %v2549_v51, %v2438_v40  ;;  %v2552_v40 = vsel %vm2547_vm12, %v10431_v5, %v10443_v49  ;;  %v2555_v49 = vsel %vm2547_vm12, %v10435_v23, %v10441_v39  ;;  %v2553_v23 = vsel %vm2547_vm12, %v10447_v44, %v10451_v47 }
 0x6b9   :  { %v2500_v59 = vpop.permute.xlu0 %2499 }
 0x6ba   :  { %v2582_v18 = vsel %vm2581_vm14, %v2565_v2, %v2500_v59  ;;  %v2585_v2 = vsel %vm2581_vm14, %v2568_v61, %v2506_v38 }
 0x6bb   :  { %8169 = vrcp.f32 %v2582_v18  ;;  %v13068_v18 = vmov 3   ;;  %v2502_v59 = vpop.permute.xlu1 %2501 }
 0x6bc   :  { %8171 = vrcp.f32 %v2585_v2  ;;  %v2583_v32 = vsel %vm2581_vm14, %v2566_v34, %v2502_v59 }
 0x6bd   :  { %v8168_v53 = vpop.eup %8167  ;;  %v2448_v52 = vpop.permute.xlu0 %2447  ;;  %8173 = vrcp.f32 %v2583_v32 }
 0x6be   :  { %2719 = vperm.xlu1 %7825, %v8168_v53  }
 0x6bf   :  { %v2450_v33 = vpop.permute.xlu1 %2449 }
 0x6c0   :  { %v2572_v51 = vsel %vm2564_vm13, %v2555_v49, %v2450_v33 }
 0x6c1   :  { %v2512_v11 = vpop.permute.xlu0 %2511 }
 0x6c2   :  { %7826 = vset.pattern.permute.xlu1 %v13070_v7 }
 0x6c3   :  { %2799 = vperm.xlu1 %7826, %v8168_v53  }
 0x6c5   :  { %v8170_v15 = vpop.eup %8169  ;;  %v2444_v55 = vpop.permute.xlu0 %2443 }
 0x6c6   :  { %2711 = vperm.xlu0 %7829, %v8170_v15   ;;  %v8172_v3 = vpop.eup %8171  ;;  %v2569_v0 = vsel %vm2564_vm13, %v2552_v40, %v2444_v55  ;;  %v2556_v40 = vsel %vm2547_vm12, %v10457_v16, %v10461_v30  ;;  %v2559_v30 = vsel %vm2547_vm12, %v10455_v54, %v10459_v63 }
 0x6c7   :  { %7827 = vset.pattern.permute.xlu1 %v13068_v18  ;;  %v8174_v61 = vpop.eup %8173 }
 0x6c8   :  { %2879 = vperm.xlu1 %7827, %v8168_v53  }
 0x6c9   :  { %v2508_v38 = vpop.permute.xlu0 %2507 }
 0x6ca   :  { %7831 = vset.pattern.permute.xlu0 %v13068_v18  ;;  %v2586_v2 = vsel %vm2581_vm14, %v2569_v0, %v2508_v38 }
 0x6cb   :  { %2871 = vperm.xlu0 %7831, %v8170_v15   ;;  %8175 = vrcp.f32 %v2586_v2 }
 0x6cc   :  { %7828 = vset.pattern.permute.xlu1 %v13066_v13 }
 0x6cd   :  { %2626 = vperm.xlu1 %7828, %v8168_v53   ;;  %v2514_v53 = vpop.permute.xlu1 %2513 }
 0x6ce   :  { %v2589_v34 = vsel %vm2581_vm14, %v2572_v51, %v2514_v53 }
 0x6cf   :  { %7832 = vset.pattern.permute.xlu0 %v13066_v13 }
 0x6d0   :  { %2616 = vperm.xlu0 %7832, %v8170_v15  }
 0x6d1   :  { %7830 = vset.pattern.permute.xlu1 %v13070_v7 }
 0x6d2   :  { %2791 = vperm.xlu1 %7830, %v8170_v15   ;;  %v2554_v15 = vsel %vm2547_vm12, %v10413_v57, %v10421_v21  ;;  %v2446_v21 = vpop.permute.xlu1 %2445  ;;  %v2456_v57 = vpop.permute.xlu0 %2455 }
 0x6d3   :  { %v2571_v59 = vsel %vm2564_vm13, %v2554_v15, %v2448_v52 }
 0x6d4   :  { %7833 = vset.pattern.permute.xlu0 %v13327_v36  ;;  %v2588_v5 = vsel %vm2581_vm14, %v2571_v59, %v2512_v11  ;;  %v2570_v11 = vsel %vm2564_vm13, %v2553_v23, %v2446_v21 }
 0x6d5   :  { %2723 = vperm.xlu0 %7833, %v8172_v3   ;;  %8177 = vrcp.f32 %v2588_v5  ;;  %v8176_v52 = vpop.eup %8175  ;;  %v2558_v5 = vsel %vm2547_vm12, %v10449_v45, %v10453_v9 }
 0x6d6   :  { %2803 = vperm.xlu1 %7830, %v8172_v3   ;;  %8179 = vrcp.f32 %v2589_v34  ;;  %v2510_v39 = vpop.permute.xlu1 %2509  ;;  %v2520_v55 = vpop.permute.xlu0 %2519  ;;  %v2575_v51 = vsel %vm2564_vm13, %v2558_v5, %v2456_v57 }
 0x6d7   :  { %v2587_v32 = vsel %vm2581_vm14, %v2570_v11, %v2510_v39  ;;  %v2557_v39 = vsel %vm2547_vm12, %v10463_v56, %v10467_v42  ;;  %v2592_v23 = vsel %vm2581_vm14, %v2575_v51, %v2520_v55  ;;  %v2560_v56 = vsel %vm2547_vm12, %v10473_v12, %v10477_v46 }
 0x6d8   :  { %8181 = vrcp.f32 %v2587_v32 }
 0x6d9   :  { %7834 = vset.pattern.permute.xlu0 %v13068_v18 }
 0x6da   :  { %7836 = vset.pattern.permute.xlu1 %v13327_v36  ;;  %2883 = vperm.xlu0 %7834, %v8172_v3   ;;  %v2452_v38 = vpop.permute.xlu0 %2451 }
 0x6db   :  { %2715 = vperm.xlu1 %7836, %v8174_v61   ;;  %v2573_v53 = vsel %vm2564_vm13, %v2556_v40, %v2452_v38 }
 0x6de   :  { %7835 = vset.pattern.permute.xlu0 %v13066_v13  ;;  %v2516_v44 = vpop.permute.xlu0 %2515 }
 0x6df   :  { %7838 = vset.pattern.permute.xlu1 %v13068_v18  ;;  %2631 = vperm.xlu0 %7835, %v8172_v3   ;;  %v8178_v33 = vpop.eup %8177  ;;  %v2590_v0 = vsel %vm2581_vm14, %v2573_v53, %v2516_v44 }
 0x6e0   :  { %2875 = vperm.xlu1 %7838, %v8174_v61   ;;  %v8180_v3 = vpop.eup %8179  ;;  %8183 = vrcp.f32 %v2590_v0 }
 0x6e2   :  { %v8182_v47 = vpop.eup %8181  ;;  %v10555_v49 = vpop.permute.xlu0 %2463 }
 0x6e3   :  { %7837 = vset.pattern.permute.xlu0 %v13070_v7 }
 0x6e4   :  { %7839 = vset.pattern.permute.xlu1 %v13066_v13  ;;  %2795 = vperm.xlu0 %7837, %v8174_v61  }
 0x6e5   :  { %2621 = vperm.xlu1 %7839, %v8174_v61   ;;  %v2458_v61 = vpop.permute.xlu1 %2457 }
 0x6e6   :  { %v2576_v16 = vsel %vm2564_vm13, %v2559_v30, %v2458_v61  ;;  %v10561_v54 = vpop.permute.xlu0 %2527 }
 0x6e8   :  { %2807 = vperm.xlu0 %7837, %v8176_v52  }
 0x6e9   :  { %7840 = vset.pattern.permute.xlu1 %v13327_v36  ;;  %v2522_v15 = vpop.permute.xlu1 %2521 }
 0x6ea   :  { %2735 = vperm.xlu1 %7840, %v8178_v33   ;;  %v2593_v2 = vsel %vm2581_vm14, %v2576_v16, %v2522_v15  ;;  %v10552_v59 = vpop.eup %8183  ;;  %v2460_v45 = vpop.permute.xlu0 %2459 }
 0x6eb   :  { %8185 = vrcp.f32 %v2593_v2  ;;  %v2577_v32 = vsel %vm2564_vm13, %v2560_v56, %v2460_v45 }
 0x6ec   :  { %2819 = vperm.xlu0 %7837, %v8180_v3   ;;  %8187 = vrcp.f32 %v2592_v23 }
 0x6ed   :  { %v2454_v63 = vpop.permute.xlu1 %2453 }
 0x6ee   :  { %7841 = vset.pattern.permute.xlu1 %v13070_v7  ;;  %v2524_v42 = vpop.permute.xlu0 %2523 }
 0x6ef   :  { %2815 = vperm.xlu1 %7841, %v8178_v33   ;;  %v2594_v55 = vsel %vm2581_vm14, %v2577_v32, %v2524_v42 }
 0x6f0   :  { %7849 = vset.pattern.permute.xlu0 %v13066_v13 }
 0x6f1   :  { %2651 = vperm.xlu0 %7849, %v8180_v3   ;;  %v2518_v34 = vpop.permute.xlu1 %2517 }
 0x6f3   :  { %7842 = vset.pattern.permute.xlu1 %v13068_v18 }
 0x6f4   :  { %2895 = vperm.xlu1 %7842, %v8178_v33  }
 0x6f5   :  { %7850 = vset.pattern.permute.xlu0 %v13327_v36  ;;  %v10568_v21 = vpop.eup %8185  ;;  %v2466_v57 = vpop.permute.xlu1 %2465 }
 0x6f6   :  { %2731 = vperm.xlu0 %7850, %v8182_v47  }
 0x6f8   :  { %7843 = vset.pattern.permute.xlu1 %v13066_v13 }
 0x6f9   :  { %2646 = vperm.xlu1 %7843, %v8178_v33   ;;  %v2530_v11 = vpop.permute.xlu1 %2529  ;;  %v8188_v33 = vpop.eup %8187 }
 0x6fa   :  { %7852 = vset.pattern.permute.xlu0 %v13068_v18 }
 0x6fb   :  { %2891 = vperm.xlu0 %7852, %v8182_v47  }
 0x6fd   :  { %7844 = vset.pattern.permute.xlu1 %v13327_v36  ;;  %v2462_v44 = vpop.permute.xlu1 %2461 }
 0x6fe   :  { %2727 = vperm.xlu1 %7844, %v8176_v52  }
 0x6ff   :  { %7853 = vset.pattern.permute.xlu0 %v13066_v13 }
 0x700   :  { %2641 = vperm.xlu0 %7853, %v8182_v47  }
 0x702   :  { %7845 = vset.pattern.permute.xlu1 %v13068_v18 }
 0x703   :  { %2887 = vperm.xlu1 %7845, %v8176_v52  }
 0x704   :  { %7858 = vset.pattern.permute.xlu0 %v13327_v36 }
 0x705   :  { %2743 = vperm.xlu0 %7858, %v10552_v59  }
 0x707   :  { %7846 = vset.pattern.permute.xlu1 %v13066_v13 }
 0x708   :  { %2636 = vperm.xlu1 %7846, %v8176_v52   ;;  %v2574_v52 = vsel %vm2564_vm13, %v2557_v39, %v2454_v63 }
 0x709   :  { %7860 = vset.pattern.permute.xlu0 %v13068_v18  ;;  %v2591_v9 = vsel %vm2581_vm14, %v2574_v52, %v2518_v34 }
 0x70a   :  { %2903 = vperm.xlu0 %7860, %v10552_v59   ;;  %8189 = vrcp.f32 %v2591_v9 }
 0x70b   :  { %8191 = vrcp.f32 %v2594_v55 }
 0x70c   :  { %7847 = vset.pattern.permute.xlu1 %v13327_v36 }
 0x70d   :  { %2739 = vperm.xlu1 %7847, %v8180_v3  }
 0x70e   :  { %7862 = vset.pattern.permute.xlu0 %v13327_v36 }
 0x70f   :  { %2755 = vperm.xlu0 %7862, %v10568_v21  }
 0x711   :  { %7848 = vset.pattern.permute.xlu1 %v13068_v18 }
 0x712   :  { %2899 = vperm.xlu1 %7848, %v8180_v3   ;;  %v2563_v3 = vsel %vm2547_vm12, %v10471_v6, %v10475_v20  ;;  %v2561_v20 = vsel %vm2547_vm12, %v10479_v22, %v10484_v4  ;;  %v2562_v22 = vsel %vm2547_vm12, %v10465_v28, %v10469_v24  ;;  %v13328_v28 = vmov 6  }
 0x713   :  { %7864 = vset.pattern.permute.xlu0 %v13068_v18  ;;  %v2580_v46 = vsel %vm2564_vm13, %v2563_v3, %v2466_v57  ;;  %v2578_v40 = vsel %vm2564_vm13, %v2561_v20, %v2462_v44  ;;  %v2579_v61 = vsel %vm2564_vm13, %v2562_v22, %v10555_v49 }
 0x714   :  { %2915 = vperm.xlu0 %7864, %v10568_v21   ;;  %v8190_v38 = vpop.eup %8189  ;;  %v2597_v12 = vsel %vm2581_vm14, %v2580_v46, %v2530_v11  ;;  %v2596_v15 = vsel %vm2581_vm14, %v2579_v61, %v10561_v54  ;;  %v8009_v46 = vld [vmem:[#allocation15 + $0x8] sm:$0xff]  }
 0x715   :  { %8193 = vrcp.f32 %v2597_v12  ;;  %v10602_v6 = vpop.eup %8191  ;;  %v8010_v12 = vld [vmem:[#allocation17 + $0x8] sm:$0xff]  }
 0x716   :  { %7851 = vset.pattern.permute.xlu1 %v13070_v7 }
 0x717   :  { %2811 = vperm.xlu1 %7851, %v8182_v47   ;;  %v2526_v47 = vpop.permute.xlu1 %2525 }
 0x718   :  { %7865 = vset.pattern.permute.xlu0 %v13066_v13  ;;  %v2595_v53 = vsel %vm2581_vm14, %v2578_v40, %v2526_v47  ;;  %v13329_v47 = vmov 4   ;;  %v8012_v40 = vld [vmem:[#allocation17 + $0x10] sm:$0xff]  }
 0x719   :  { %2671 = vperm.xlu0 %7865, %v10568_v21   ;;  %8195 = vrcp.f32 %v2595_v53 }
 0x71a   :  { %8197 = vrcp.f32 %v2596_v15  ;;  %v8013_v15 = vld [vmem:[#allocation15 + $0x18] sm:$0xff]  }
 0x71b   :  { %7854 = vset.pattern.permute.xlu1 %v13327_v36 }
 0x71c   :  { %2751 = vperm.xlu1 %7854, %v8188_v33  }
 0x71d   :  { %7867 = vset.pattern.permute.xlu0 %v13070_v7 }
 0x71e   :  { %2827 = vperm.xlu0 %7867, %v8190_v38  }
 0x71f   :  { %v10609_v0 = vpop.eup %8193 }
 0x720   :  { %7855 = vset.pattern.permute.xlu1 %v13070_v7 }
 0x721   :  { %2831 = vperm.xlu1 %7855, %v8188_v33  }
 0x722   :  { %7869 = vset.pattern.permute.xlu0 %v13066_v13 }
 0x723   :  { %2661 = vperm.xlu0 %7869, %v8190_v38   ;;  %v10617_v4 = vpop.eup %8195 }
 0x725   :  { %7856 = vset.pattern.permute.xlu1 %v13068_v18 }
 0x726   :  { %2911 = vperm.xlu1 %7856, %v8188_v33  }
 0x727   :  { %7875 = vset.pattern.permute.xlu0 %v13070_v7 }
 0x728   :  { %2839 = vperm.xlu0 %7875, %v10602_v6  }
 0x72a   :  { %7857 = vset.pattern.permute.xlu1 %v13066_v13 }
 0x72b   :  { %2666 = vperm.xlu1 %7857, %v8188_v33   ;;  %v8008_v33 = vld [vmem:[#allocation17] sm:$0xff]  }
 0x72c   :  { %2851 = vperm.xlu0 %7875, %v10609_v0   ;;  %7476 = vmatprep.subr.bf16.mxu0 %v8008_v33 }
 0x72d   :  { %7477 = vmatpush3.bf16.msra.mxu0 %v8008_v33  ;;  %v13334_v33 = vld [vmem:[#allocation33_spill] sm:$0xff] }
 0x72e   :  { %7478 = vmatprep.subr.bf16.mxu0 %v8010_v12 }
 0x72f   :  { %7859 = vset.pattern.permute.xlu1 %v13070_v7 }
 0x730   :  { %2823 = vperm.xlu1 %7859, %v10552_v59   ;;  %7880 = vset.pattern.permute.xlu0 %v13066_v13 }
 0x731   :  { %2691 = vperm.xlu0 %7880, %v10609_v0   ;;  %7479 = vmatpush3.bf16.msra.mxu0 %v8010_v12 }
 0x732   :  { %7480 = vmatprep.subr.bf16.mxu0 %v8012_v40 }
 0x734   :  { %7861 = vset.pattern.permute.xlu1 %v13066_v13 }
 0x735   :  { %2656 = vperm.xlu1 %7861, %v10552_v59   ;;  %7881 = vset.pattern.permute.xlu0 %v13327_v36  ;;  %v8198_v59 = vpop.eup %8197 }
 0x736   :  { %2763 = vperm.xlu0 %7881, %v10617_v4   ;;  %7481 = vmatpush3.bf16.msra.mxu0 %v8012_v40  ;;  %v13336_v40 = vld [vmem:[#allocation70_spill] sm:$0xff] }
 0x739   :  { %7863 = vset.pattern.permute.xlu1 %v13070_v7 }
 0x73a   :  { %2835 = vperm.xlu1 %7863, %v10568_v21   ;;  %7883 = vset.pattern.permute.xlu0 %v13068_v18 }
 0x73b   :  { %2923 = vperm.xlu0 %7883, %v10617_v4  }
 0x73d   :  { %v10633_v30 = vpop.permute.xlu1 %2719 }
 0x73e   :  { %7866 = vset.pattern.permute.xlu1 %v13327_v36  ;;  %v2776_v3 = vmul.f32 %v10109_v26, %v10633_v30  ;;  %v8015_v30 = vld [vmem:[#allocation15 + $0x20] sm:$0xff]  }
 0x73f   :  { %2747 = vperm.xlu1 %7866, %v8190_v38   ;;  %7884 = vset.pattern.permute.xlu0 %v13066_v13 }
 0x740   :  { %2681 = vperm.xlu0 %7884, %v10617_v4  }
 0x742   :  { %v10638_v24 = vpop.permute.xlu1 %2799 }
 0x743   :  { %7868 = vset.pattern.permute.xlu1 %v13068_v18  ;;  %v2856_v20 = vmul.f32 %v10297_v29, %v10638_v24 }
 0x744   :  { %2907 = vperm.xlu1 %7868, %v8190_v38   ;;  %7887 = vset.pattern.permute.xlu0 %v13328_v28 }
 0x745   :  { %v10642_v16 = vpop.permute.xlu0 %2711 }
 0x746   :  { %v2774_v29 = vmul.f32 %v10642_v16, %v10113_v50 }
 0x747   :  { %v10644_v2 = vpop.permute.xlu1 %2879 }
 0x748   :  { %7870 = vset.pattern.permute.xlu1 %v13327_v36  ;;  %v2936_v53 = vmul.f32 %v10309_v60, %v10644_v2  ;;  %v8014_v60 = vld [vmem:[#allocation17 + $0x18] sm:$0xff]   ;;  %v8016_v2 = vld [vmem:[#allocation17 + $0x20] sm:$0xff]  }
 0x749   :  { %2767 = vperm.xlu1 %7870, %v8198_v59   ;;  %7482 = vmatprep.subr.bf16.mxu0 %v8014_v60 }
 0x74a   :  { %v10647_v49 = vpop.permute.xlu0 %2871  ;;  %7483 = vmatpush3.bf16.msra.mxu0 %v8014_v60 }
 0x74b   :  { %v2934_v50 = vmul.f32 %v10647_v49, %v10313_v58  ;;  %7484 = vmatprep.subr.bf16.mxu0 %v8016_v2 }
 0x74c   :  { %v10649_v63 = vpop.permute.xlu1 %2626 }
 0x74d   :  { %7871 = vset.pattern.permute.xlu1 %v13070_v7 }
 0x74e   :  { %2847 = vperm.xlu1 %7871, %v8198_v59   ;;  %7485 = vmatpush3.bf16.msra.mxu0 %v8016_v2  ;;  %v13339_v2 = vld [vmem:[#allocation78_spill] sm:$0xff] }
 0x74f   :  { %v10652_v54 = vpop.permute.xlu0 %2616 }
 0x751   :  { %v10654_v5 = vpop.permute.xlu1 %2791 }
 0x752   :  { %7872 = vset.pattern.permute.xlu1 %v13068_v18  ;;  %v2854_v24 = vmul.f32 %v10654_v5, %v10301_v1  ;;  %v8019_v5 = vld [vmem:[#allocation15 + $0x30] sm:$0xff]  }
 0x753   :  { %2927 = vperm.xlu1 %7872, %v8198_v59  }
 0x754   :  { %v2724_v51 = vpop.permute.xlu0 %2723 }
 0x755   :  { %v2777_v34 = vmul.f32 %v10115_v31, %v2724_v51  ;;  %v2804_v21 = vpop.permute.xlu1 %2803 }
 0x756   :  { %v2857_v39 = vmul.f32 %v10303_v17, %v2804_v21  ;;  %v8018_v21 = vld [vmem:[#allocation17 + $0x28] sm:$0xff]  }
 0x757   :  { %7873 = vset.pattern.permute.xlu1 %v13066_v13  ;;  %2972 = vrot.lane.b32.xlu0 %v2777_v34, %s8746_s12  ;;  %v8017_v34 = vld [vmem:[#allocation15 + $0x28] sm:$0xff]  }
 0x758   :  { %2686 = vperm.xlu1 %7873, %v8198_v59   ;;  %7486 = vmatprep.subr.bf16.mxu0 %v8018_v21 }
 0x759   :  { %v2884_v23 = vpop.permute.xlu0 %2883  ;;  %7487 = vmatpush3.bf16.msra.mxu0 %v8018_v21  ;;  %v13341_v21 = vld [vmem:[#allocation41_spill] sm:$0xff] }
 0x75a   :  { %v2716_v52 = vpop.permute.xlu1 %2715  ;;  %v2937_v9 = vmul.f32 %v10317_v37, %v2884_v23 }
 0x75b   :  { %3036 = vrot.lane.b32.xlu0 %v2857_v39, %s8731_s30  ;;  %v2775_v57 = vmul.f32 %v2716_v52, %v10119_v48  ;;  %v8020_v39 = vld [vmem:[#allocation17 + $0x30] sm:$0xff]   ;;  %v8022_v52 = vld [vmem:[#allocation17 + $0x38] sm:$0xff]  }
 0x75c   :  { %7874 = vset.pattern.permute.xlu1 %v13327_v36  ;;  %7488 = vmatprep.subr.bf16.mxu0 %v8020_v39 }
 0x75d   :  { %2759 = vperm.xlu1 %7874, %v10602_v6   ;;  %7489 = vmatpush3.bf16.msra.mxu0 %v8020_v39 }
 0x75e   :  { %v10665_v45 = vpop.permute.xlu0 %2631  ;;  %7490 = vmatprep.subr.bf16.mxu0 %v8022_v52 }
 0x75f   :  { %v2876_v31 = vpop.permute.xlu1 %2875  ;;  %3100 = vrot.lane.b32.xlu0 %v2937_v9, %s8745_s11 }
 0x760   :  { %v2935_v37 = vmul.f32 %v2876_v31, %v10319_v41  ;;  %v8007_v41 = vld [vmem:[#allocation15] sm:$0xff]  }
 0x761   :  { %7876 = vset.pattern.permute.xlu1 %v13068_v18  ;;  %7444 = vmatprep.subr.bf16.mxu1 %v8007_v41 }
 0x762   :  { %2919 = vperm.xlu1 %7876, %v10602_v6   ;;  %7445 = vmatpush3.bf16.msra.mxu1 %v8007_v41  ;;  %v13333_v41 = vld [vmem:[#allocation35_spill] sm:$0xff] }
 0x763   :  { %2968 = vrot.lane.b32.xlu0 %v2775_v57, %s8746_s12  ;;  %v2796_v17 = vpop.permute.xlu0 %2795  ;;  %7446 = vmatprep.subr.bf16.mxu1 %v8009_v46 }
 0x764   :  { %v2855_v42 = vmul.f32 %v2796_v17, %v10307_v14  ;;  %v10673_v56 = vpop.permute.xlu1 %2621  ;;  %7491 = vmatpush3.bf16.msra.mxu0 %v8022_v52 }
 0x766   :  { %7877 = vset.pattern.permute.xlu1 %v13066_v13  ;;  %7447 = vmatpush3.bf16.msra.mxu1 %v8009_v46 }
 0x767   :  { %2676 = vperm.xlu1 %7877, %v10602_v6   ;;  %3032 = vrot.lane.b32.xlu0 %v2855_v42, %s8731_s30  ;;  %v10686_v14 = vpop.permute.xlu0 %2807  ;;  %v8011_v6 = vld [vmem:[#allocation15 + $0x10] sm:$0xff]  }
 0x768   :  { %7448 = vmatprep.subr.bf16.mxu1 %v8011_v6  ;;  %v13330_v42 = vld [vmem:[#allocation69_spill] sm:$0xff] }
 0x769   :  { %v10679_v48 = vpop.permute.xlu1 %2735 }
 0x76a   :  { %7449 = vmatpush3.bf16.msra.mxu1 %v8011_v6  ;;  %v2780_v1 = vmul.f32 %v10203_v35, %v10679_v48  ;;  %v8021_v35 = vld [vmem:[#allocation15 + $0x38] sm:$0xff]  }
 0x76b   :  { %7878 = vset.pattern.permute.xlu1 %v13327_v36  ;;  %3096 = vrot.lane.b32.xlu0 %v2935_v37, %s8745_s11  ;;  %v2820_v55 = vpop.permute.xlu0 %2819  ;;  %v13331_v48 = vld [vmem:[#allocation51_spill] sm:$0xff] }
 0x76c   :  { %2771 = vperm.xlu1 %7878, %v10609_v0   ;;  %7450 = vmatprep.subr.bf16.mxu1 %v8013_v15  ;;  %v2861_v58 = vmul.f32 %v10329_v62, %v2820_v55 }
 0x76e   :  { %v10684_v11 = vpop.permute.xlu1 %2815  ;;  %7451 = vmatpush3.bf16.msra.mxu1 %v8013_v15  ;;  %v13338_v15 = vld [vmem:[#allocation67_spill] sm:$0xff] }
 0x76f   :  { %7452 = vmatprep.subr.bf16.mxu1 %v8015_v30  ;;  %v2860_v23 = vmul.f32 %v10323_v25, %v10684_v11 }
 0x770   :  { %7879 = vset.pattern.permute.xlu1 %v13068_v18  ;;  %v10699_v44 = vpop.permute.xlu0 %2651 }
 0x771   :  { %2931 = vperm.xlu1 %7879, %v10609_v0  }
 0x772   :  { %7453 = vmatpush3.bf16.msra.mxu1 %v8015_v30 }
 0x773   :  { %v10690_v32 = vpop.permute.xlu1 %2895  ;;  %7454 = vmatprep.subr.bf16.mxu1 %v8017_v34 }
 0x774   :  { %v2940_v31 = vmul.f32 %v10335_v43, %v10690_v32  ;;  %v13332_v32 = vld [vmem:[#allocation73_spill] sm:$0xff] }
 0x775   :  { %7882 = vset.pattern.permute.xlu1 %v13070_v7  ;;  %v2732_v0 = vpop.permute.xlu0 %2731 }
 0x776   :  { %2843 = vperm.xlu1 %7882, %v10617_v4   ;;  %7455 = vmatpush3.bf16.msra.mxu1 %v8017_v34  ;;  %v2779_v25 = vmul.f32 %v2732_v0, %v10217_v27  ;;  %v2858_v27 = vmul.f32 %v10686_v14, %v13331_v48  ;;  %v13335_v14 = vld [vmem:[#allocation52_spill] sm:$0xff] }
 0x777   :  { %7456 = vmatprep.subr.bf16.mxu1 %v8019_v5 }
 0x778   :  { %v10696_v38 = vpop.permute.xlu1 %2646 }
 0x77a   :  { %2970 = vrot.lane.b32.xlu1 %v2776_v3, %s8746_s12  ;;  %v10715_v22 = vpop.permute.xlu0 %2891  ;;  %7457 = vmatpush3.bf16.msra.mxu1 %v8019_v5 }
 0x77b   :  { %7885 = vset.pattern.permute.xlu1 %v13329_v47  ;;  %7458 = vmatprep.subr.bf16.mxu1 %v8021_v35  ;;  %v2939_v55 = vmul.f32 %v10715_v22, %v13332_v32  ;;  %v13348_v32 = vld [vmem:[#allocation63_spill] sm:$0xff] }
 0x77d   :  { %v10704_v26 = vpop.permute.xlu1 %2727 }
 0x77e   :  { %3034 = vrot.lane.b32.xlu1 %v2856_v20, %s8731_s30  ;;  %7459 = vmatpush3.bf16.msra.mxu1 %v8021_v35 }
 0x77f   :  { %v10724_v59 = vpop.permute.xlu0 %2641 }
 0x782   :  { %v10709_v4 = vpop.permute.xlu1 %2887  ;;  %3098 = vrot.lane.b32.xlu1 %v2936_v53, %s8745_s11 }
 0x786   :  { %2966 = vrot.lane.b32.xlu1 %v2774_v29, %s8746_s12 }
 0x787   :  { %v10717_v61 = vpop.permute.xlu1 %2636 }
 0x78a   :  { %3030 = vrot.lane.b32.xlu1 %v2854_v24, %s8731_s30 }
 0x78c   :  { %v2740_v16 = vpop.permute.xlu1 %2739 }
 0x78d   :  { %v2781_v51 = vmul.f32 %v10213_v10, %v2740_v16  ;;  %v2744_v10 = vpop.permute.xlu0 %2743 }
 0x78e   :  { %3094 = vrot.lane.b32.xlu1 %v2934_v50, %s8745_s11  ;;  %v2782_v60 = vmul.f32 %v2744_v10, %v13338_v15  ;;  %v13343_v10 = vld [vmem:[#allocation64_spill] sm:$0xff] }
 0x78f   :  { %2980 = vrot.lane.b32.xlu0 %v2781_v51, %s8746_s12  ;;  %v13340_v51 = vld [vmem:[#allocation42_spill] sm:$0xff] }
 0x791   :  { %v2900_v49 = vpop.permute.xlu1 %2899  ;;  %v2904_v57 = vpop.permute.xlu0 %2903 }
 0x792   :  { %2978 = vrot.lane.b32.xlu1 %v2780_v1, %s8746_s12  ;;  %v2941_v9 = vmul.f32 %v10341_v8, %v2900_v49  ;;  %v2778_v8 = vmul.f32 %v10704_v26, %v10209_v19  ;;  %v2938_v19 = vmul.f32 %v10709_v4, %v13333_v41  ;;  %v13337_v4 = vld [vmem:[#allocation66_spill] sm:$0xff]  ;;  %v2942_v1 = vmul.f32 %v2904_v57, %v13341_v21  ;;  %v13345_v57 = vld [vmem:[#allocation79_spill] sm:$0xff] }
 0x793   :  { %3044 = vrot.lane.b32.xlu0 %v2861_v58, %s8731_s30  ;;  %v13342_v49 = vld [vmem:[#allocation90_spill] sm:$0xff] }
 0x795   :  { %v2756_v43 = vpop.permute.xlu0 %2755 }
 0x796   :  { %v2812_v62 = vpop.permute.xlu1 %2811  ;;  %3042 = vrot.lane.b32.xlu1 %v2860_v23, %s8731_s30  ;;  %v2785_v3 = vmul.f32 %v13334_v33, %v2756_v43  ;;  %v13347_v43 = vld [vmem:[#allocation45_spill] sm:$0xff] }
 0x797   :  { %3108 = vrot.lane.b32.xlu0 %v2941_v9, %s8745_s11  ;;  %v2859_v37 = vmul.f32 %v2812_v62, %v13330_v42  ;;  %v13344_v9 = vld [vmem:[#allocation32_spill] sm:$0xff] }
 0x799   :  { %v2916_v46 = vpop.permute.xlu0 %2915 }
 0x79a   :  { %3106 = vrot.lane.b32.xlu1 %v2940_v31, %s8745_s11  ;;  %v2945_v5 = vmul.f32 %v13342_v49, %v2916_v46  ;;  %v13349_v46 = vld [vmem:[#allocation82_spill] sm:$0xff] }
 0x79b   :  { %v2752_v17 = vpop.permute.xlu1 %2751  ;;  %2976 = vrot.lane.b32.xlu0 %v2779_v25, %s8746_s12 }
 0x79c   :  { %v2784_v20 = vmul.f32 %v13335_v14, %v2752_v17 }
 0x79d   :  { %v10764_v6 = vpop.permute.xlu0 %2671 }
 0x79e   :  { %2974 = vrot.lane.b32.xlu1 %v2778_v8, %s8746_s12  ;;  %v13346_v8 = vld [vmem:[#allocation61_spill] sm:$0xff] }
 0x79f   :  { %3040 = vrot.lane.b32.xlu0 %v2859_v37, %s8731_s30 }
 0x7a0   :  { %v2832_v11 = vpop.permute.xlu1 %2831 }
 0x7a1   :  { %v2864_v53 = vmul.f32 %v13336_v40, %v2832_v11  ;;  %v2828_v22 = vpop.permute.xlu0 %2827 }
 0x7a2   :  { %3038 = vrot.lane.b32.xlu1 %v2858_v27, %s8731_s30  ;;  %v2863_v62 = vmul.f32 %v2828_v22, %v13344_v9 }
 0x7a3   :  { %3104 = vrot.lane.b32.xlu0 %v2939_v55, %s8745_s11 }
 0x7a5   :  { %v2912_v12 = vpop.permute.xlu1 %2911  ;;  %v10774_v24 = vpop.permute.xlu0 %2661 }
 0x7a6   :  { %3102 = vrot.lane.b32.xlu1 %v2938_v19, %s8745_s11  ;;  %v2944_v29 = vmul.f32 %v13337_v4, %v2912_v12  ;;  %v13351_v4 = vld [vmem:[#allocation91_spill] sm:$0xff] }
 0x7a7   :  { %2988 = vrot.lane.b32.xlu0 %v2785_v3, %s8746_s12 }
 0x7a9   :  { %v2840_v58 = vpop.permute.xlu0 %2839 }
 0x7aa   :  { %v10761_v26 = vpop.permute.xlu1 %2666  ;;  %2986 = vrot.lane.b32.xlu1 %v2784_v20, %s8746_s12  ;;  %v13350_v20 = vld [vmem:[#allocation34_spill] sm:$0xff] }
 0x7ab   :  { %v2866_v40 = vmul.f32 %v2840_v58, %v13350_v20 }
 0x7ad   :  { %v2852_v35 = vpop.permute.xlu0 %2851 }
 0x7ae   :  { %3050 = vrot.lane.b32.xlu1 %v2864_v53, %s8731_s30 }
 0x7af   :  { %v2824_v0 = vpop.permute.xlu1 %2823 }
 0x7b0   :  { %v2862_v50 = vmul.f32 %v2824_v0, %v13339_v2  ;;  %v13352_v2 = vld [vmem:[#allocation48_spill] sm:$0xff] }
 0x7b1   :  { %v10788_v25 = vpop.permute.xlu0 %2691 }
 0x7b2   :  { %3114 = vrot.lane.b32.xlu1 %v2944_v29, %s8745_s11 }
 0x7b4   :  { %v10771_v30 = vpop.permute.xlu1 %2656 }
 0x7b5   :  { %v2764_v27 = vpop.permute.xlu0 %2763 }
 0x7b6   :  { %2982 = vrot.lane.b32.xlu1 %v2782_v60, %s8746_s12 }
 0x7b9   :  { %v2836_v16 = vpop.permute.xlu1 %2835 }
 0x7ba   :  { %v2865_v34 = vmul.f32 %v13340_v51, %v2836_v16  ;;  %3046 = vrot.lane.b32.xlu1 %v2862_v50, %s8731_s30  ;;  %v2924_v41 = vpop.permute.xlu0 %2923  ;;  %v13353_v16 = vld [vmem:[#allocation39_spill] sm:$0xff] }
 0x7bb   :  { %v2869_v51 = vmul.f32 %v13353_v16, %v2852_v35 }
 0x7bc   :  { %3052 = vrot.lane.b32.xlu0 %v2865_v34, %s8731_s30 }
 0x7be   :  { %v2748_v39 = vpop.permute.xlu1 %2747  ;;  %3110 = vrot.lane.b32.xlu1 %v2942_v1, %s8745_s11  ;;  %v13354_v1 = vld [vmem:[#allocation92_spill] sm:$0xff] }
 0x7bf   :  { %v2783_v23 = vmul.f32 %v2748_v39, %v13343_v10  ;;  %v10800_v33 = vpop.permute.xlu0 %2681  ;;  %v13355_v39 = vld [vmem:[#allocation72_spill] sm:$0xff] }
 0x7c0   :  { %3116 = vrot.lane.b32.xlu0 %v2945_v5, %s8745_s11  ;;  %v2787_v10 = vmul.f32 %v2764_v27, %v13355_v39 }
 0x7c3   :  { %v2908_v52 = vpop.permute.xlu1 %2907 }
 0x7c4   :  { %2984 = vrot.lane.b32.xlu0 %v2783_v23, %s8746_s12  ;;  %v2943_v42 = vmul.f32 %v2908_v52, %v13346_v8  ;;  %v13356_v52 = vld [vmem:[#allocation49_spill] sm:$0xff] }
 0x7c5   :  { %v2697_v9 = vmul.f32 %v13356_v52, %v10665_v45  ;;  %v13359_v45 = vld [vmem:[#allocation93_spill] sm:$0xff] }
 0x7c6   :  { %v2947_v27 = vmul.f32 %v2924_v41, %v13359_v45 }
 0x7c8   :  { %v2768_v31 = vpop.permute.xlu1 %2767  ;;  %3048 = vrot.lane.b32.xlu0 %v2863_v62, %s8731_s30  ;;  %v13357_v62 = vld [vmem:[#allocation89_spill] sm:$0xff] }
 0x7c9   :  { %v2788_v17 = vmul.f32 %v13345_v57, %v2768_v31  ;;  %v2973_v14 = vpop.permute.xlu0 %2972 }
 0x7ca   :  { %v3145_v35 = vsel %vm321_vm0, %v2697_v9, %v2973_v14 }
 0x7cb   :  { %2994 = vrot.lane.b32.xlu1 %v2788_v17, %s8746_s12 }
 0x7cc   :  { %3112 = vrot.lane.b32.xlu0 %v2943_v42, %s8745_s11  ;;  %v13358_v42 = vld [vmem:[#allocation53_spill] sm:$0xff] }
 0x7cd   :  { %v2848_v37 = vpop.permute.xlu1 %2847  ;;  %v3037_v0 = vpop.permute.xlu0 %3036 }
 0x7ce   :  { %v2868_v48 = vmul.f32 %v13347_v43, %v2848_v37  ;;  %v3161_v57 = vsel %vm499_vm1, %v3145_v35, %v3037_v0  ;;  %v2696_v37 = vmul.f32 %v13358_v42, %v10649_v63  ;;  %v10825_v43 = vld [vmem:[#allocation14] ss:$0 sm:$0xff] }
 0x7d0   :  { %3058 = vrot.lane.b32.xlu1 %v2868_v48, %s8731_s30 }
 0x7d1   :  { %v3101_v15 = vpop.permute.xlu0 %3100 }
 0x7d2   :  { %v2928_v11 = vpop.permute.xlu1 %2927  ;;  %v3178_v48 = vsel %vm3174_vm15, %v3161_v57, %v3101_v15  ;;  %v13363_v57 = vld [vmem:[#allocation37_spill] sm:$0xff] }
 0x7d3   :  { %v2948_v55 = vmul.f32 %v13348_v32, %v2928_v11  ;;  %v3201_v32 = vadd.f32 %v10825_v43, %v3178_v48 }
 0x7d5   :  { %3122 = vrot.lane.b32.xlu1 %v2948_v55, %s8745_s11  ;;  %v2969_v21 = vpop.permute.xlu0 %2968  ;;  %v3217_v14 = vmax.f32 %v3201_v32, 0.0 }
 0x7d7   :  { %v10798_v19 = vpop.permute.xlu1 %2686 }
 0x7d9   :  { %v3033_v5 = vpop.permute.xlu0 %3032 }
 0x7dc   :  { %v2760_v3 = vpop.permute.xlu1 %2759 }
 0x7dd   :  { %v2786_v12 = vmul.f32 %v2760_v3, %v13349_v46  ;;  %v3097_v17 = vpop.permute.xlu0 %3096 }
 0x7df   :  { %2990 = vrot.lane.b32.xlu1 %v2786_v12, %s8746_s12 }
 0x7e1   :  { %v2920_v53 = vpop.permute.xlu1 %2919 }
 0x7e2   :  { %v2946_v29 = vmul.f32 %v2920_v53, %v13351_v4  ;;  %v13360_v53 = vld [vmem:[#allocation40_spill] sm:$0xff] }
 0x7e3   :  { %3054 = vrot.lane.b32.xlu1 %v2866_v40, %s8731_s30  ;;  %v2695_v41 = vmul.f32 %v10673_v56, %v13360_v53  ;;  %v13365_v53 = vld [vmem:[#allocation56_spill] sm:$0xff] }
 0x7e6   :  { %v10807_v22 = vpop.permute.xlu1 %2676 }
 0x7e7   :  { %3118 = vrot.lane.b32.xlu1 %v2946_v29, %s8745_s11  ;;  %v3143_v29 = vsel %vm321_vm0, %v2695_v41, %v2969_v21  ;;  %v2698_v41 = vmul.f32 %v10717_v61, %v13365_v53  ;;  %v13366_v61 = vld [vmem:[#allocation38_spill] sm:$0xff] }
 0x7e8   :  { %v3159_v15 = vsel %vm499_vm1, %v3143_v29, %v3033_v5 }
 0x7e9   :  { %v3176_v16 = vsel %vm3174_vm15, %v3159_v15, %v3097_v17  ;;  %v2700_v17 = vmul.f32 %v13363_v57, %v10696_v38  ;;  %v13364_v38 = vld [vmem:[#allocation43_spill] sm:$0xff] }
 0x7eb   :  { %v2772_v60 = vpop.permute.xlu1 %2771 }
 0x7ec   :  { %v2789_v50 = vmul.f32 %v13352_v2, %v2772_v60  ;;  %v13361_v2 = vld [vmem:[#allocation46_spill] sm:$0xff] }
 0x7ee   :  { %2996 = vrot.lane.b32.xlu0 %v2789_v50, %s8746_s12  ;;  %v2694_v50 = vmul.f32 %v10652_v54, %v13361_v2 }
 0x7f0   :  { %v2932_v34 = vpop.permute.xlu1 %2931 }
 0x7f1   :  { %v2949_v58 = vmul.f32 %v13354_v1, %v2932_v34  ;;  %v3199_v34 = vadd.f32 %v10825_v43, %v3176_v16 }
 0x7f2   :  { %3060 = vrot.lane.b32.xlu0 %v2869_v51, %s8731_s30 }
 0x7f3   :  { %v3215_v39 = vmax.f32 %v3199_v34, 0.0 }
 0x7f5   :  { %v2844_v49 = vpop.permute.xlu1 %2843 }
 0x7f6   :  { %3124 = vrot.lane.b32.xlu0 %v2949_v58, %s8745_s11  ;;  %v2867_v31 = vmul.f32 %v2844_v49, %v13357_v62 }
 0x7f9   :  { %v2971_v23 = vpop.permute.xlu1 %2970 }
 0x7fa   :  { %2992 = vrot.lane.b32.xlu0 %v2787_v10, %s8746_s12  ;;  %v3144_v11 = vsel %vm321_vm0, %v2696_v37, %v2971_v23  ;;  %v13362_v23 = vld [vmem:[#allocation47_spill] sm:$0xff] }
 0x7fb   :  { %v2701_v54 = vmul.f32 %v13362_v23, %v10699_v44 }
 0x7fd   :  { %v3035_v8 = vpop.permute.xlu1 %3034 }
 0x7fe   :  { %3056 = vrot.lane.b32.xlu0 %v2867_v31, %s8731_s30  ;;  %v3160_v55 = vsel %vm499_vm1, %v3144_v11, %v3035_v8 }
 0x801   :  { %v3099_v3 = vpop.permute.xlu1 %3098  ;;  %v2981_v46 = vpop.permute.xlu0 %2980 }
 0x802   :  { %v3177_v12 = vsel %vm3174_vm15, %v3160_v55, %v3099_v3  ;;  %3120 = vrot.lane.b32.xlu0 %v2947_v27, %s8745_s11  ;;  %v3149_v35 = vsel %vm321_vm0, %v2701_v54, %v2981_v46  ;;  %v2699_v46 = vmul.f32 %v10724_v59, %v13364_v38 }
 0x803   :  { %v3200_v63 = vadd.f32 %v10825_v43, %v3177_v12 }
 0x805   :  { %v3216_v20 = vmax.f32 %v3200_v63, 0.0  ;;  %v2967_v40 = vpop.permute.xlu1 %2966  ;;  %v3045_v4 = vpop.permute.xlu0 %3044 }
 0x806   :  { %v3142_v51 = vsel %vm321_vm0, %v2694_v50, %v2967_v40  ;;  %v3165_v62 = vsel %vm499_vm1, %v3149_v35, %v3045_v4 }
 0x807   :  { %v3231_v0 = vpack.c.bf16 %v3217_v14, %v3216_v20 }
 0x809   :  { %v3031_v60 = vpop.permute.xlu1 %3030  ;;  %v3109_v58 = vpop.permute.xlu0 %3108 }
 0x80a   :  { %v3158_v1 = vsel %vm499_vm1, %v3142_v51, %v3031_v60  ;;  %v3182_v8 = vsel %vm3174_vm15, %v3165_v62, %v3109_v58 }
 0x80b   :  { %v3205_v44 = vadd.f32 %v10825_v43, %v3182_v8 }
 0x80d   :  { %v3095_v56 = vpop.permute.xlu1 %3094  ;;  %v2977_v52 = vpop.permute.xlu0 %2976  ;;  %v3221_v32 = vmax.f32 %v3205_v44, 0.0 }
 0x80e   :  { %v3175_v49 = vsel %vm3174_vm15, %v3158_v1, %v3095_v56  ;;  %v3147_v14 = vsel %vm321_vm0, %v2699_v46, %v2977_v52  ;;  %v2704_v56 = vmul.f32 %v13366_v61, %v10761_v26 }
 0x80f   :  { %v3198_v21 = vadd.f32 %v10825_v43, %v3175_v49 }
 0x811   :  { %v3214_v5 = vmax.f32 %v3198_v21, 0.0  ;;  %v2979_v10 = vpop.permute.xlu1 %2978  ;;  %v3041_v37 = vpop.permute.xlu0 %3040  ;;  %v13367_v21 = vld [vmem:[#allocation44_spill] sm:$0xff] }
 0x812   :  { %v3148_v42 = vsel %vm321_vm0, %v2700_v17, %v2979_v10  ;;  %v3163_v20 = vsel %vm499_vm1, %v3147_v14, %v3041_v37  ;;  %v13368_v37 = vld [vmem:[#allocation60_spill] sm:$0xff] }
 0x813   :  { %v3230_v9 = vpack.c.bf16 %v3215_v39, %v3214_v5  ;;  %v2705_v39 = vmul.f32 %v13367_v21, %v10764_v6 }
 0x815   :  { %v3043_v31 = vpop.permute.xlu1 %3042  ;;  %7460 = vmatprep.mubr.bf16.mxu1 %v3230_v9  ;;  %7492 = vmatprep.mubr.bf16.mxu0 %v3230_v9  ;;  %v3105_v12 = vpop.permute.xlu0 %3104 }
 0x816   :  { %7461 = vmatmul.mubr.bf16.vlgmr.msra.gmra.mrb[48].mxu1 %v3231_v0  ;;  %7493 = vmatmul.mubr.bf16.vlgmr.msra.gmra.mrb[64].mxu0 %v3231_v0  ;;  %v3164_v48 = vsel %vm499_vm1, %v3148_v42, %v3043_v31  ;;  %v3180_v0 = vsel %vm3174_vm15, %v3163_v20, %v3105_v12 }
 0x817   :  { %v3203_v29 = vadd.f32 %v10825_v43, %v3180_v0 }
 0x819   :  { %v3107_v45 = vpop.permute.xlu1 %3106  ;;  %v3219_v50 = vmax.f32 %v3203_v29, 0.0  ;;  %v2989_v34 = vpop.permute.xlu0 %2988 }
 0x81a   :  { %v3181_v27 = vsel %vm3174_vm15, %v3164_v48, %v3107_v45  ;;  %v3153_v10 = vsel %vm321_vm0, %v2705_v39, %v2989_v34  ;;  %v2702_v48 = vmul.f32 %v10771_v30, %v13368_v37 }
 0x81b   :  { %v3204_v11 = vadd.f32 %v10825_v43, %v3181_v27  ;;  %v13369_v27 = vld [vmem:[#allocation50_spill] sm:$0xff] }
 0x81d   :  { %v3220_v55 = vmax.f32 %v3204_v11, 0.0  ;;  %v2975_v3 = vpop.permute.xlu1 %2974  ;;  %v2703_v11 = vmul.f32 %v10774_v24, %v13369_v27 }
 0x81e   :  { %v3146_v4 = vsel %vm321_vm0, %v2698_v41, %v2975_v3 }
 0x81f   :  { %v3233_v63 = vpack.c.bf16 %v3221_v32, %v3220_v55 }
 0x821   :  { %v3039_v40 = vpop.permute.xlu1 %3038 }
 0x822   :  { %v3162_v15 = vsel %vm499_vm1, %v3146_v4, %v3039_v40 }
 0x825   :  { %v3103_v60 = vpop.permute.xlu1 %3102 }
 0x826   :  { %v3179_v59 = vsel %vm3174_vm15, %v3162_v15, %v3103_v60  ;;  %v13370_v15 = vld [vmem:[#allocation76_spill] sm:$0xff] }
 0x827   :  { %v3202_v2 = vadd.f32 %v10825_v43, %v3179_v59  ;;  %v2708_v60 = vmul.f32 %v13370_v15, %v10798_v19 }
 0x829   :  { %v3218_v16 = vmax.f32 %v3202_v2, 0.0  ;;  %v2987_v51 = vpop.permute.xlu1 %2986 }
 0x82a   :  { %v3152_v5 = vsel %vm321_vm0, %v2704_v56, %v2987_v51  ;;  %v13371_v51 = vld [vmem:[#allocation36_spill] sm:$0xff] }
 0x82b   :  { %v3232_v1 = vpack.c.bf16 %v3219_v50, %v3218_v16  ;;  %v2709_v34 = vmul.f32 %v13371_v51, %v10788_v25 }
 0x82d   :  { %v3051_v58 = vpop.permute.xlu1 %3050  ;;  %7464 = vmatprep.mubr.bf16.mxu1 %v3232_v1  ;;  %7496 = vmatprep.mubr.bf16.mxu0 %v3232_v1 }
 0x82e   :  { %7465 = vmatmul.mubr.bf16.gmra.mrb[52].mxu1 %v3233_v63  ;;  %7497 = vmatmul.mubr.bf16.gmra.mrb[68].mxu0 %v3233_v63  ;;  %v3053_v49 = vpop.permute.xlu0 %3052  ;;  %v3168_v23 = vsel %vm499_vm1, %v3152_v5, %v3051_v58 }
 0x82f   :  { %v3169_v52 = vsel %vm499_vm1, %v3153_v10, %v3053_v49 }
 0x831   :  { %v3115_v54 = vpop.permute.xlu1 %3114 }
 0x832   :  { %v3185_v9 = vsel %vm3174_vm15, %v3168_v23, %v3115_v54  ;;  %v3117_v35 = vpop.permute.xlu0 %3116  ;;  %v13372_v54 = vld [vmem:[#allocation84_spill] sm:$0xff] }
 0x833   :  { %v3208_v26 = vadd.f32 %v10825_v43, %v3185_v9  ;;  %v3186_v62 = vsel %vm3174_vm15, %v3169_v52, %v3117_v35  ;;  %v2706_v25 = vmul.f32 %v10807_v22, %v13372_v54 }
 0x834   :  { %v3209_v31 = vadd.f32 %v10825_v43, %v3186_v62 }
 0x835   :  { %v3224_v57 = vmax.f32 %v3208_v26, 0.0  ;;  %v2983_v6 = vpop.permute.xlu1 %2982 }
 0x836   :  { %v3225_v17 = vmax.f32 %v3209_v31, 0.0  ;;  %v2985_v8 = vpop.permute.xlu0 %2984  ;;  %v3150_v32 = vsel %vm321_vm0, %v2702_v48, %v2983_v6  ;;  %v13373_v31 = vld [vmem:[#allocation75_spill] sm:$0xff] }
 0x837   :  { %v3151_v55 = vsel %vm321_vm0, %v2703_v11, %v2985_v8 }
 0x838   :  { %v3235_v42 = vpack.c.bf16 %v3225_v17, %v3224_v57  ;;  %v2707_v57 = vmul.f32 %v10800_v33, %v13373_v31 }
 0x839   :  { %v3047_v44 = vpop.permute.xlu1 %3046 }
 0x83a   :  { %v3049_v45 = vpop.permute.xlu0 %3048  ;;  %v3166_v3 = vsel %vm499_vm1, %v3150_v32, %v3047_v44 }
 0x83b   :  { %v3167_v46 = vsel %vm499_vm1, %v3151_v55, %v3049_v45 }
 0x83d   :  { %v3111_v38 = vpop.permute.xlu1 %3110 }
 0x83e   :  { %v3183_v12 = vsel %vm3174_vm15, %v3166_v3, %v3111_v38  ;;  %v3113_v63 = vpop.permute.xlu0 %3112 }
 0x83f   :  { %v3206_v14 = vadd.f32 %v10825_v43, %v3183_v12  ;;  %v3184_v30 = vsel %vm3174_vm15, %v3167_v46, %v3113_v63 }
 0x840   :  { %v3207_v20 = vadd.f32 %v10825_v43, %v3184_v30  ;;  %v13375_v30 = vmov 5  }
 0x841   :  { %v3222_v40 = vmax.f32 %v3206_v14, 0.0  ;;  %v2995_v41 = vpop.permute.xlu1 %2994  ;;  %v13374_v14 = vmov 7  }
 0x842   :  { %v3223_v24 = vmax.f32 %v3207_v20, 0.0  ;;  %v3156_v2 = vsel %vm321_vm0, %v2708_v60, %v2995_v41 }
 0x844   :  { %v3234_v53 = vpack.c.bf16 %v3223_v24, %v3222_v40 }
 0x845   :  { %v3059_v0 = vpop.permute.xlu1 %3058 }
 0x846   :  { %7468 = vmatprep.mubr.bf16.mxu1 %v3234_v53  ;;  %7500 = vmatprep.mubr.bf16.mxu0 %v3234_v53  ;;  %v3172_v50 = vsel %vm499_vm1, %v3156_v2, %v3059_v0 }
 0x847   :  { %7469 = vmatmul.mubr.bf16.gmra.mrb[56].mxu1 %v3235_v42  ;;  %7501 = vmatmul.mubr.bf16.gmra.mrb[72].mxu0 %v3235_v42 }
 0x849   :  { %v3123_v4 = vpop.permute.xlu1 %3122 }
 0x84a   :  { %v3189_v1 = vsel %vm3174_vm15, %v3172_v50, %v3123_v4 }
 0x84b   :  { %v3212_v61 = vadd.f32 %v10825_v43, %v3189_v1 }
 0x84d   :  { %v3228_v5 = vmax.f32 %v3212_v61, 0.0 }
 0x851   :  { %v2991_v59 = vpop.permute.xlu1 %2990 }
 0x852   :  { %v3154_v35 = vsel %vm321_vm0, %v2706_v25, %v2991_v59 }
 0x855   :  { %v3055_v56 = vpop.permute.xlu1 %3054 }
 0x856   :  { %v3170_v26 = vsel %vm499_vm1, %v3154_v35, %v3055_v56 }
 0x859   :  { %v3119_v52 = vpop.permute.xlu1 %3118 }
 0x85a   :  { %v3187_v6 = vsel %vm3174_vm15, %v3170_v26, %v3119_v52 }
 0x85b   :  { %v3210_v8 = vadd.f32 %v10825_v43, %v3187_v6 }
 0x85d   :  { %v3226_v48 = vmax.f32 %v3210_v8, 0.0 }
 0x860   :  { %v2997_v29 = vpop.permute.xlu0 %2996 }
 0x861   :  { %v3157_v58 = vsel %vm321_vm0, %v2709_v34, %v2997_v29 }
 0x864   :  { %v3061_v16 = vpop.permute.xlu0 %3060 }
 0x865   :  { %v3173_v49 = vsel %vm499_vm1, %v3157_v58, %v3061_v16 }
 0x868   :  { %v3125_v21 = vpop.permute.xlu0 %3124 }
 0x869   :  { %v3190_v19 = vsel %vm3174_vm15, %v3173_v49, %v3125_v21 }
 0x86a   :  { %v3213_v39 = vadd.f32 %v10825_v43, %v3190_v19 }
 0x86c   :  { %v3229_v10 = vmax.f32 %v3213_v39, 0.0  ;;  %v2993_v23 = vpop.permute.xlu0 %2992 }
 0x86d   :  { %v3155_v17 = vsel %vm321_vm0, %v2707_v57, %v2993_v23 }
 0x86e   :  { %v3237_v9 = vpack.c.bf16 %v3229_v10, %v3228_v5 }
 0x870   :  { %v3057_v62 = vpop.permute.xlu0 %3056 }
 0x871   :  { %v3171_v42 = vsel %vm499_vm1, %v3155_v17, %v3057_v62 }
 0x874   :  { %v3121_v44 = vpop.permute.xlu0 %3120 }
 0x875   :  { %v3188_v22 = vsel %vm3174_vm15, %v3171_v42, %v3121_v44 }
 0x876   :  { %v3211_v37 = vadd.f32 %v10825_v43, %v3188_v22 }
 0x878   :  { %v3227_v45 = vmax.f32 %v3211_v37, 0.0 }
 0x87a   :  { %v3236_v27 = vpack.c.bf16 %v3227_v45, %v3226_v48 }
 0x87c   :  { %7472 = vmatprep.mubr.bf16.mxu1 %v3236_v27  ;;  %7504 = vmatprep.mubr.bf16.mxu0 %v3236_v27 }
 0x87d   :  { %7473 = vmatmul.mubr.bf16.gmra.mrb[60].mxu1 %v3237_v9  ;;  %7505 = vmatmul.mubr.bf16.gmra.mrb[76].mxu0 %v3237_v9 }
 0x8e9   :  { %v7462_v33 = vpop.f32.mrb[48].mxu1  ;;  %v10920_v11 = vpop.f32.mrb[64].mxu0 }
 0x8ea   :  { %4363 = vperm.xlu0 %7887, %v10920_v11   ;;  %3612 = vperm.xlu1 %7885, %v10920_v11   ;;  %v3336_v32 = vpop.f32.mrb[49].mxu1  ;;  %v10924_v55 = vpop.f32.mrb[65].mxu0 }
 0x8eb   :  { %v7463_v3 = vpop.f32.mrb[50].mxu1  ;;  %v10926_v38 = vpop.f32.mrb[66].mxu0 }
 0x8ec   :  { %v10928_v43 = vpack.c.bf16 %v7463_v3, %v7462_v33  ;;  %v3339_v46 = vpop.f32.mrb[51].mxu1  ;;  %v10930_v12 = vpop.f32.mrb[67].mxu0 }
 0x8ed   :  { %v10932_v63 = vpack.c.bf16 %v3339_v46, %v3336_v32 }
 0x8ee   :  { %7888 = vset.pattern.permute.xlu0 %v13374_v14  ;;  %7886 = vset.pattern.permute.xlu1 %v13375_v30  ;;  %v3856_v40 = vsel %vm321_vm0, %v10928_v43, 1065369472 }
 0x8ef   :  { %4736 = vperm.xlu0 %7888, %v10920_v11   ;;  %3982 = vperm.xlu1 %7886, %v10920_v11   ;;  %v3853_v20 = vsel %vm321_vm0, %v10932_v63, 1065369472 }
 0x8f0   :  { %7508 = vmatprep.subr.bf16.mxu1 %v3853_v20 }
 0x8f1   :  { %7509 = vmatpush3.bf16.msra.mxu1 %v3853_v20 }
 0x8f2   :  { %7510 = vmatprep.subr.bf16.mxu1 %v3856_v40 }
 0x8f3   :  { %7890 = vset.pattern.permute.xlu0 %v13375_v30  ;;  %7889 = vset.pattern.permute.xlu1 %v13329_v47 }
 0x8f4   :  { %3974 = vperm.xlu0 %7890, %v10924_v55   ;;  %3602 = vperm.xlu1 %7889, %v10924_v55  }
 0x8f5   :  { %7511 = vmatpush3.bf16.msra.mxu1 %v3856_v40 }
 0x8f8   :  { %7891 = vset.pattern.permute.xlu0 %v13328_v28  ;;  %3617 = vperm.xlu1 %7889, %v10926_v38  }
 0x8f9   :  { %4355 = vperm.xlu0 %7891, %v10924_v55  }
 0x8fc   :  { %7897 = vset.pattern.permute.xlu1 %v13375_v30 }
 0x8fd   :  { %7892 = vset.pattern.permute.xlu0 %v13374_v14  ;;  %3978 = vperm.xlu1 %7897, %v10930_v12  }
 0x8fe   :  { %4728 = vperm.xlu0 %7892, %v10924_v55  }
 0x901   :  { %4963 = vrot.lane.b32.xlu1 %v10932_v63, %s8746_s12  ;;  %v7466_v24 = vpop.f32.mrb[52].mxu1  ;;  %v10955_v53 = vpop.f32.mrb[68].mxu0 }
 0x902   :  { %7893 = vset.pattern.permute.xlu0 %v13375_v30  ;;  %v3352_v41 = vpop.f32.mrb[53].mxu1  ;;  %v10958_v0 = vpop.f32.mrb[69].mxu0  ;;  %7900 = vset.pattern.permute.xlu1 %v13329_v47 }
 0x903   :  { %3986 = vperm.xlu0 %7893, %v10926_v38   ;;  %v7467_v4 = vpop.f32.mrb[54].mxu1  ;;  %v10962_v29 = vpop.f32.mrb[70].mxu0 }
 0x904   :  { %v10964_v15 = vpack.c.bf16 %v7467_v4, %v7466_v24  ;;  %v3355_v60 = vpop.f32.mrb[55].mxu1  ;;  %v10966_v59 = vpop.f32.mrb[71].mxu0 }
 0x905   :  { %v10968_v2 = vpack.c.bf16 %v3355_v60, %v3352_v41  ;;  %3632 = vperm.xlu1 %7900, %v10955_v53  }
 0x906   :  { %13376 = vst [vmem:[#allocation69_spill] sm:$0xff] %v10964_v15  ;;  %v3862_v16 = vsel %vm321_vm0, %v10964_v15, 1065369472 }
 0x907   :  { %7894 = vset.pattern.permute.xlu0 %v13328_v28  ;;  %v3859_v50 = vsel %vm321_vm0, %v10968_v2, 1065369472 }
 0x908   :  { %4367 = vperm.xlu0 %7894, %v10926_v38   ;;  %7512 = vmatprep.subr.bf16.mxu1 %v3859_v50 }
 0x909   :  { %7901 = vset.pattern.permute.xlu1 %v13375_v30  ;;  %7513 = vmatpush3.bf16.msra.mxu1 %v3859_v50 }
 0x90a   :  { %3998 = vperm.xlu1 %7901, %v10955_v53   ;;  %7514 = vmatprep.subr.bf16.mxu1 %v3862_v16 }
 0x90c   :  { %7895 = vset.pattern.permute.xlu0 %v13374_v14 }
 0x90d   :  { %4740 = vperm.xlu0 %7895, %v10926_v38   ;;  %7515 = vmatpush3.bf16.msra.mxu1 %v3862_v16 }
 0x90e   :  { %7904 = vset.pattern.permute.xlu1 %v13329_v47 }
 0x90f   :  { %3622 = vperm.xlu1 %7904, %v10958_v0  }
 0x911   :  { %7896 = vset.pattern.permute.xlu0 %v13329_v47 }
 0x912   :  { %3607 = vperm.xlu0 %7896, %v10930_v12  }
 0x913   :  { %3637 = vperm.xlu1 %7904, %v10962_v29  }
 0x916   :  { %7898 = vset.pattern.permute.xlu0 %v13328_v28 }
 0x917   :  { %4359 = vperm.xlu0 %7898, %v10930_v12   ;;  %7912 = vset.pattern.permute.xlu1 %v13375_v30 }
 0x918   :  { %3994 = vperm.xlu1 %7912, %v10966_v59  }
 0x91a   :  { %v7470_v51 = vpop.f32.mrb[56].mxu1  ;;  %v10990_v34 = vpop.f32.mrb[72].mxu0 }
 0x91b   :  { %7899 = vset.pattern.permute.xlu0 %v13374_v14  ;;  %v3368_v1 = vpop.f32.mrb[57].mxu1  ;;  %v10993_v58 = vpop.f32.mrb[73].mxu0 }
 0x91c   :  { %4732 = vperm.xlu0 %7899, %v10930_v12   ;;  %4221 = vrot.lane.b32.xlu1 %v10968_v2, %s8745_s11  ;;  %v7471_v61 = vpop.f32.mrb[58].mxu1  ;;  %v10998_v56 = vpop.f32.mrb[74].mxu0 }
 0x91d   :  { %v11000_v49 = vpack.c.bf16 %v7471_v61, %v7470_v51  ;;  %v3371_v21 = vpop.f32.mrb[59].mxu1  ;;  %v11002_v19 = vpop.f32.mrb[75].mxu0  ;;  %7915 = vset.pattern.permute.xlu1 %v13329_v47 }
 0x91e   :  { %v11005_v39 = vpack.c.bf16 %v3371_v21, %v3368_v1 }
 0x91f   :  { %13377 = vst [vmem:[#allocation51_spill] sm:$0xff] %v11000_v49  ;;  %v3868_v10 = vsel %vm321_vm0, %v11000_v49, 1065369472 }
 0x920   :  { %13378 = vst [vmem:[#allocation73_spill] sm:$0xff] %v11005_v39  ;;  %4219 = vrot.lane.b32.xlu0 %v10928_v43, %s8745_s11  ;;  %3652 = vperm.xlu1 %7915, %v10990_v34   ;;  %v3865_v5 = vsel %vm321_vm0, %v11005_v39, 1065369472 }
 0x921   :  { %7516 = vmatprep.subr.bf16.mxu1 %v3865_v5  ;;  %7902 = vset.pattern.permute.xlu0 %v13328_v28 }
 0x922   :  { %7517 = vmatpush3.bf16.msra.mxu1 %v3865_v5 }
 0x923   :  { %7518 = vmatprep.subr.bf16.mxu1 %v3868_v10 }
 0x924   :  { %4217 = vrot.lane.b32.xlu0 %v10932_v63, %s8745_s11  ;;  %7916 = vset.pattern.permute.xlu1 %v13375_v30 }
 0x925   :  { %4014 = vperm.xlu1 %7916, %v10990_v34  }
 0x926   :  { %7519 = vmatpush3.bf16.msra.mxu1 %v3868_v10 }
 0x928   :  { %4590 = vrot.lane.b32.xlu0 %v10932_v63, %s8731_s30 }
 0x929   :  { %7919 = vset.pattern.permute.xlu1 %v13329_v47 }
 0x92a   :  { %3642 = vperm.xlu1 %7919, %v10993_v58  }
 0x92c   :  { %4379 = vperm.xlu0 %7902, %v10955_v53  }
 0x92e   :  { %7922 = vset.pattern.permute.xlu1 %v13374_v14 }
 0x92f   :  { %4760 = vperm.xlu1 %7922, %v10993_v58  }
 0x930   :  { %7903 = vset.pattern.permute.xlu0 %v13374_v14 }
 0x931   :  { %4752 = vperm.xlu0 %7903, %v10955_v53  }
 0x933   :  { %7923 = vset.pattern.permute.xlu1 %v13329_v47 }
 0x934   :  { %3657 = vperm.xlu1 %7923, %v10998_v56  }
 0x935   :  { %7905 = vset.pattern.permute.xlu0 %v13375_v30 }
 0x936   :  { %3990 = vperm.xlu0 %7905, %v10958_v0  }
 0x938   :  { %7928 = vset.pattern.permute.xlu1 %v13375_v30 }
 0x939   :  { %4010 = vperm.xlu1 %7928, %v11002_v19  }
 0x93a   :  { %7906 = vset.pattern.permute.xlu0 %v13328_v28 }
 0x93b   :  { %4371 = vperm.xlu0 %7906, %v10958_v0  }
 0x93d   :  { %4227 = vrot.lane.b32.xlu1 %v11000_v49, %s8745_s11 }
 0x93e   :  { %7931 = vset.pattern.permute.xlu1 %v13329_v47 }
 0x93f   :  { %7907 = vset.pattern.permute.xlu0 %v13374_v14 }
 0x940   :  { %4744 = vperm.xlu0 %7907, %v10958_v0  }
 0x941   :  { %4225 = vrot.lane.b32.xlu1 %v11005_v39, %s8745_s11  ;;  %v13400_v39 = vld [vmem:[#allocation55_spill] sm:$0xff] }
 0x944   :  { %7908 = vset.pattern.permute.xlu0 %v13375_v30 }
 0x945   :  { %4002 = vperm.xlu0 %7908, %v10962_v29  }
 0x949   :  { %7909 = vset.pattern.permute.xlu0 %v13328_v28 }
 0x94a   :  { %4383 = vperm.xlu0 %7909, %v10962_v29  }
 0x94e   :  { %7910 = vset.pattern.permute.xlu0 %v13374_v14 }
 0x94f   :  { %4756 = vperm.xlu0 %7910, %v10962_v29  }
 0x950   :  { %v7474_v23 = vpop.f32.mrb[60].mxu1  ;;  %v11049_v54 = vpop.f32.mrb[76].mxu0 }
 0x951   :  { %3672 = vperm.xlu1 %7931, %v11049_v54   ;;  %v3384_v25 = vpop.f32.mrb[61].mxu1  ;;  %v11052_v52 = vpop.f32.mrb[77].mxu0 }
 0x952   :  { %v7475_v9 = vpop.f32.mrb[62].mxu1  ;;  %v11054_v35 = vpop.f32.mrb[78].mxu0 }
 0x953   :  { %v11056_v26 = vpack.c.bf16 %v7475_v9, %v7474_v23  ;;  %7911 = vset.pattern.permute.xlu0 %v13329_v47  ;;  %v3387_v62 = vpop.f32.mrb[63].mxu1  ;;  %v11059_v31 = vpop.f32.mrb[79].mxu0 }
 0x954   :  { %v11061_v57 = vpack.c.bf16 %v3387_v62, %v3384_v25  ;;  %3627 = vperm.xlu0 %7911, %v10966_v59  }
 0x955   :  { %13379 = vst [vmem:[#allocation35_spill] sm:$0xff] %v11056_v26  ;;  %7932 = vset.pattern.permute.xlu1 %v13375_v30  ;;  %v3874_v17 = vsel %vm321_vm0, %v11056_v26, 1065369472 }
 0x956   :  { %13380 = vst [vmem:[#allocation33_spill] sm:$0xff] %v11061_v57  ;;  %4030 = vperm.xlu1 %7932, %v11049_v54   ;;  %v3871_v6 = vsel %vm321_vm0, %v11061_v57, 1065369472 }
 0x957   :  { %7520 = vmatprep.subr.bf16.mxu1 %v3871_v6 }
 0x958   :  { %7913 = vset.pattern.permute.xlu0 %v13328_v28  ;;  %7521 = vmatpush3.bf16.msra.mxu1 %v3871_v6 }
 0x959   :  { %4375 = vperm.xlu0 %7913, %v10966_v59   ;;  %7522 = vmatprep.subr.bf16.mxu1 %v3874_v17 }
 0x95a   :  { %7934 = vset.pattern.permute.xlu1 %v13374_v14 }
 0x95b   :  { %4784 = vperm.xlu1 %7934, %v11049_v54  }
 0x95c   :  { %7523 = vmatpush3.bf16.msra.mxu1 %v3874_v17 }
 0x95d   :  { %7914 = vset.pattern.permute.xlu0 %v13374_v14 }
 0x95e   :  { %4748 = vperm.xlu0 %7914, %v10966_v59  }
 0x95f   :  { %7935 = vset.pattern.permute.xlu1 %v13329_v47 }
 0x960   :  { %3662 = vperm.xlu1 %7935, %v11052_v52  }
 0x962   :  { %4223 = vrot.lane.b32.xlu0 %v10964_v15, %s8745_s11  ;;  %v13407_v15 = vld [vmem:[#allocation57_spill] sm:$0xff] }
 0x963   :  { %7917 = vset.pattern.permute.xlu0 %v13328_v28 }
 0x964   :  { %3677 = vperm.xlu1 %7935, %v11054_v35  }
 0x966   :  { %4395 = vperm.xlu0 %7917, %v10990_v34  }
 0x968   :  { %7940 = vset.pattern.permute.xlu1 %v13328_v28 }
 0x969   :  { %v11084_v8 = vpop.permute.xlu1 %3612  ;;  %4415 = vperm.xlu1 %7940, %v11054_v35   ;;  %v11087_v42 = vpop.permute.xlu0 %4363 }
 0x96a   :  { %7918 = vset.pattern.permute.xlu0 %v13374_v14 }
 0x96b   :  { %4768 = vperm.xlu0 %7918, %v10990_v34  }
 0x96d   :  { %7943 = vset.pattern.permute.xlu1 %v13375_v30 }
 0x96e   :  { %v11092_v44 = vpop.permute.xlu1 %3982  ;;  %4026 = vperm.xlu1 %7943, %v11059_v31   ;;  %v11095_v22 = vpop.permute.xlu0 %4736 }
 0x96f   :  { %7920 = vset.pattern.permute.xlu0 %v13375_v30 }
 0x970   :  { %4006 = vperm.xlu0 %7920, %v10993_v58  }
 0x972   :  { %7945 = vset.pattern.permute.xlu1 %v13374_v14 }
 0x973   :  { %v11100_v37 = vpop.permute.xlu1 %3602  ;;  %4780 = vperm.xlu1 %7945, %v11059_v31   ;;  %v11103_v48 = vpop.permute.xlu0 %3974 }
 0x974   :  { %7921 = vset.pattern.permute.xlu0 %v13328_v28 }
 0x975   :  { %4387 = vperm.xlu0 %7921, %v10993_v58  }
 0x977   :  { %v11107_v45 = vpop.permute.xlu1 %3617  ;;  %4231 = vrot.lane.b32.xlu1 %v11056_v26, %s8745_s11 }
 0x978   :  { %v11111_v27 = vpop.permute.xlu0 %4355 }
 0x979   :  { %7924 = vset.pattern.permute.xlu0 %v13375_v30 }
 0x97a   :  { %4018 = vperm.xlu0 %7924, %v10998_v56  }
 0x97c   :  { %v11115_v33 = vpop.permute.xlu1 %3978 }
 0x97d   :  { %v11117_v32 = vpop.permute.xlu0 %4728 }
 0x97e   :  { %7925 = vset.pattern.permute.xlu0 %v13328_v28 }
 0x97f   :  { %4399 = vperm.xlu0 %7925, %v10998_v56  }
 0x980   :  { %v11123_v46 = vpop.permute.xlu1 %4963 }
 0x982   :  { %v11121_v3 = vpop.permute.xlu0 %3986 }
 0x983   :  { %7926 = vset.pattern.permute.xlu0 %v13374_v14 }
 0x984   :  { %4772 = vperm.xlu0 %7926, %v10998_v56   ;;  %v11130_v20 = vpop.permute.xlu1 %3632 }
 0x987   :  { %v11127_v63 = vpop.permute.xlu0 %4367 }
 0x988   :  { %7927 = vset.pattern.permute.xlu0 %v13329_v47 }
 0x989   :  { %3647 = vperm.xlu0 %7927, %v11002_v19   ;;  %v11137_v24 = vpop.permute.xlu1 %3998 }
 0x98c   :  { %v11133_v40 = vpop.permute.xlu0 %4740 }
 0x98d   :  { %7929 = vset.pattern.permute.xlu0 %v13328_v28 }
 0x98e   :  { %4391 = vperm.xlu0 %7929, %v11002_v19   ;;  %v11143_v4 = vpop.permute.xlu1 %3622 }
 0x991   :  { %v11139_v41 = vpop.permute.xlu0 %3607 }
 0x992   :  { %7930 = vset.pattern.permute.xlu0 %v13374_v14  ;;  %v11149_v50 = vpop.permute.xlu1 %3637 }
 0x993   :  { %4764 = vperm.xlu0 %7930, %v11002_v19  }
 0x996   :  { %v11145_v60 = vpop.permute.xlu0 %4359 }
 0x997   :  { %7933 = vset.pattern.permute.xlu0 %v13328_v28  ;;  %v11156_v1 = vpop.permute.xlu1 %3994 }
 0x998   :  { %4411 = vperm.xlu0 %7933, %v11049_v54  }
 0x99b   :  { %v11151_v16 = vpop.permute.xlu0 %4732  ;;  %v4222_v10 = vpop.permute.xlu1 %4221 }
 0x99c   :  { %7936 = vset.pattern.permute.xlu0 %v13375_v30 }
 0x99d   :  { %4022 = vperm.xlu0 %7936, %v11052_v52  }
 0x99f   :  { %v4220_v51 = vpop.permute.xlu0 %4219  ;;  %v11186_v9 = vpop.permute.xlu1 %3652 }
 0x9a0   :  { %3568 = vxpose.xlu1.b32.start [1/16] (narrow) %v10924_v55, 8  ;;  %v4237_v5 = vsel %vm321_vm0, %v4220_v51, 1065369472 }
 0x9a1   :  { %7937 = vset.pattern.permute.xlu0 %v13328_v28 }
 0x9a2   :  { %4403 = vperm.xlu0 %7937, %v11052_v52  }
 0x9a3   :  { %v4218_v61 = vpop.permute.xlu0 %4217 }
 0x9a4   :  { %3569 = vxpose.xlu1.b32.cont [2/16] (narrow) %v10930_v12, 8  ;;  %v4234_v21 = vsel %vm321_vm0, %v4218_v61, 1065369472  ;;  %v4240_v12 = vsel %vm321_vm0, %v4222_v10, 1065369472 }
 0x9a5   :  { %7540 = vmatprep.subr.bf16.mxu0 %v4234_v21 }
 0x9a6   :  { %7938 = vset.pattern.permute.xlu0 %v13374_v14  ;;  %7541 = vmatpush3.bf16.msra.mxu0 %v4234_v21 }
 0x9a7   :  { %4776 = vperm.xlu0 %7938, %v11052_v52   ;;  %7542 = vmatprep.subr.bf16.mxu0 %v4237_v5  ;;  %v4591_v55 = vpop.permute.xlu0 %4590 }
 0x9a8   :  { %3570 = vxpose.xlu1.b32.cont [3/16] (narrow) %v10920_v11, 8  ;;  %v11167_v23 = vsel %vm321_vm0, %v4591_v55, 1065369472 }
 0x9a9   :  { %13381 = vst [vmem:[#allocation52_spill] sm:$0xff] %v11167_v23  ;;  %7572 = vmatprep.subr.bf16.mxu1 %v11167_v23 }
 0x9aa   :  { %7543 = vmatpush3.bf16.msra.mxu0 %v4237_v5 }
 0x9ab   :  { %7939 = vset.pattern.permute.xlu0 %v13375_v30  ;;  %7544 = vmatprep.subr.bf16.mxu0 %v4240_v12  ;;  %v11172_v25 = vpop.permute.xlu0 %4379 }
 0x9ac   :  { %4034 = vperm.xlu0 %7939, %v11054_v35   ;;  %3571 = vxpose.xlu1.b32.cont [4/16] (narrow) %v10926_v38, 8 }
 0x9ae   :  { %7545 = vmatpush3.bf16.msra.mxu0 %v4240_v12 }
 0x9b0   :  { %7941 = vset.pattern.permute.xlu0 %v13374_v14  ;;  %3572 = vxpose.xlu1.b32.cont [5/16] (narrow) %v10958_v0, 8  ;;  %v11178_v11 = vpop.permute.xlu0 %4752  ;;  %v11194_v14 = vpop.permute.xlu1 %4014 }
 0x9b1   :  { %13382 = vst [vmem:[#allocation70_spill] sm:$0xff] %v11178_v11  ;;  %4788 = vperm.xlu0 %7941, %v11054_v35   ;;  %v13406_v11 = vld [vmem:[#allocation58_spill] sm:$0xff] }
 0x9b4   :  { %3573 = vxpose.xlu1.b32.cont [6/16] (narrow) %v10966_v59, 8 }
 0x9b5   :  { %7942 = vset.pattern.permute.xlu0 %v13329_v47  ;;  %v11183_v30 = vpop.permute.xlu0 %3990 }
 0x9b6   :  { %3667 = vperm.xlu0 %7942, %v11059_v31  }
 0x9b8   :  { %3574 = vxpose.xlu1.b32.cont [7/16] (narrow) %v10955_v53, 8  ;;  %v11202_v53 = vpop.permute.xlu1 %3642 }
 0x9ba   :  { %7944 = vset.pattern.permute.xlu0 %v13328_v28  ;;  %v11190_v38 = vpop.permute.xlu0 %4371 }
 0x9bb   :  { %13383 = vst [vmem:[#allocation66_spill] sm:$0xff] %v11190_v38  ;;  %4407 = vperm.xlu0 %7944, %v11059_v31  }
 0x9bc   :  { %3575 = vxpose.xlu1.b32.cont [8/16] (narrow) %v10962_v29, 8  ;;  %v11208_v0 = vpop.permute.xlu1 %4760 }
 0x9bd   :  { %13385 = vst [vmem:[#allocation78_spill] sm:$0xff] %v11208_v0  ;;  %v13401_v0 = vld [vmem:[#allocation54_spill] sm:$0xff] }
 0x9bf   :  { %4229 = vrot.lane.b32.xlu0 %v11061_v57, %s8745_s11  ;;  %v11198_v47 = vpop.permute.xlu0 %4744 }
 0x9c0   :  { %13384 = vst [vmem:[#allocation67_spill] sm:$0xff] %v11198_v47  ;;  %3576 = vxpose.xlu1.b32.cont [9/16] (narrow) %v10993_v58, 8  ;;  %7951 = vset.pattern.permute.xlu0 %v13070_v7  ;;  %v11215_v62 = vpop.permute.xlu1 %3657 }
 0x9c4   :  { %3577 = vxpose.xlu1.b32.cont [10/16] (narrow) %v11002_v19, 8  ;;  %v11205_v28 = vpop.permute.xlu0 %4002  ;;  %v11221_v19 = vpop.permute.xlu1 %4010 }
 0x9c8   :  { %3578 = vxpose.xlu1.b32.cont [11/16] (narrow) %v10990_v34, 8  ;;  %v4228_v6 = vpop.permute.xlu1 %4227 }
 0x9c9   :  { %v11210_v29 = vpop.permute.xlu0 %4383 }
 0x9ca   :  { %13386 = vst [vmem:[#allocation42_spill] sm:$0xff] %v11210_v29 }
 0x9cc   :  { %3579 = vxpose.xlu1.b32.cont [12/16] (narrow) %v10998_v56, 8  ;;  %v4226_v17 = vpop.permute.xlu1 %4225 }
 0x9ce   :  { %v11213_v59 = vpop.permute.xlu0 %4756 }
 0x9cf   :  { %13387 = vst [vmem:[#allocation41_spill] sm:$0xff] %v11213_v59 }
 0x9d0   :  { %3580 = vxpose.xlu1.b32.cont [13/16] (narrow) %v11052_v52, 8  ;;  %v4246_v52 = vsel %vm321_vm0, %v4226_v17, 1065369472 }
 0x9d3   :  { %v11218_v58 = vpop.permute.xlu0 %3627 }
 0x9d4   :  { %3581 = vxpose.xlu1.b32.cont [14/16] (narrow) %v11059_v31, 8 }
 0x9d8   :  { %3582 = vxpose.xlu1.b32.cont [15/16] (narrow) %v11049_v54, 8  ;;  %v11224_v34 = vpop.permute.xlu0 %4375  ;;  %v4249_v54 = vsel %vm321_vm0, %v4228_v6, 1065369472 }
 0x9dc   :  { %3583 = vxpose.xlu1.b32.end [16/16] (narrow) %v11054_v35, 8  ;;  %v11236_v35 = vpop.permute.xlu1 %3672 }
 0x9dd   :  { %v11227_v56 = vpop.permute.xlu0 %4748 }
 0x9de   :  { %13388 = vst [vmem:[#allocation90_spill] sm:$0xff] %v11227_v56 }
 0x9e0   :  { %v11240_v10 = vpop.permute.xlu1 %4030 }
 0x9e1   :  { %v4224_v51 = vpop.permute.xlu0 %4223 }
 0x9e2   :  { %v4243_v61 = vsel %vm321_vm0, %v4224_v51, 1065369472 }
 0x9e3   :  { %7546 = vmatprep.subr.bf16.mxu0 %v4243_v61 }
 0x9e4   :  { %7547 = vmatpush3.bf16.msra.mxu0 %v4243_v61  ;;  %v11244_v12 = vpop.permute.xlu1 %4784 }
 0x9e5   :  { %7548 = vmatprep.subr.bf16.mxu0 %v4246_v52  ;;  %v11231_v31 = vpop.permute.xlu0 %4395  ;;  %13392 = vst [vmem:[#allocation61_spill] sm:$0xff] %v11244_v12 }
 0x9e6   :  { %13389 = vst [vmem:[#allocation64_spill] sm:$0xff] %v11231_v31  ;;  %v13404_v31 = vsub.s32 1, %v13401_v0 }
 0x9e8   :  { %7549 = vmatpush3.bf16.msra.mxu0 %v4246_v52  ;;  %v11249_v51 = vpop.permute.xlu1 %3662 }
 0x9e9   :  { %7550 = vmatprep.subr.bf16.mxu0 %v4249_v54 }
 0x9ea   :  { %v11234_v21 = vpop.permute.xlu0 %4768 }
 0x9eb   :  { %13390 = vst [vmem:[#allocation32_spill] sm:$0xff] %v11234_v21 }
 0x9ec   :  { %7551 = vmatpush3.bf16.msra.mxu0 %v4249_v54  ;;  %v11255_v52 = vpop.permute.xlu1 %3677 }
 0x9ef   :  { %v11238_v5 = vpop.permute.xlu0 %4006 }
 0x9f0   :  { %v11259_v13 = vpop.permute.xlu1 %4415 }
 0x9f1   :  { %13395 = vst [vmem:[#allocation82_spill] sm:$0xff] %v11259_v13  ;;  %v13402_v13 = vsub.s32 2, %v13401_v0 }
 0x9f4   :  { %v11242_v55 = vpop.permute.xlu0 %4387  ;;  %v11263_v7 = vpop.permute.xlu1 %4026 }
 0x9f5   :  { %13391 = vst [vmem:[#allocation79_spill] sm:$0xff] %v11242_v55 }
 0x9f8   :  { %v11267_v12 = vpop.permute.xlu1 %4780 }
 0x9f9   :  { %v11246_v17 = vpop.permute.xlu0 %4018  ;;  %13398 = vst [vmem:[#allocation48_spill] sm:$0xff] %v11267_v12 }
 0x9fa   :  { %7946 = vset.pattern.permute.xlu1 %v13327_v36 }
 0x9fc   :  { %v11271_v57 = vpop.permute.xlu1 %4231 }
 0x9fe   :  { %v11251_v6 = vpop.permute.xlu0 %4399 }
 0x9ff   :  { %13393 = vst [vmem:[#allocation45_spill] sm:$0xff] %v11251_v6 }
 0xa03   :  { %v11253_v61 = vpop.permute.xlu0 %4772 }
 0xa04   :  { %13394 = vst [vmem:[#allocation63_spill] sm:$0xff] %v11253_v61 }
 0xa08   :  { %v11257_v54 = vpop.permute.xlu0 %3647 }
 0xa0d   :  { %v11261_v18 = vpop.permute.xlu0 %4391 }
 0xa0e   :  { %13396 = vst [vmem:[#allocation34_spill] sm:$0xff] %v11261_v18 }
 0xa12   :  { %v11265_v26 = vpop.permute.xlu0 %4764 }
 0xa13   :  { %13397 = vst [vmem:[#allocation91_spill] sm:$0xff] %v11265_v26 }
 0xa17   :  { %v11269_v36 = vpop.permute.xlu0 %4411 }
 0xa18   :  { %13399 = vst [vmem:[#allocation39_spill] sm:$0xff] %v11269_v36 }
 0xa1c   :  { %v11273_v49 = vpop.permute.xlu0 %4022 }
 0xa20   :  { %v3584_v61 = vpop.trf.xlu1 }
 0xa21   :  { %v11276_v21 = vrot.slane %v3584_v61, %v13400_v39  ;;  %v11280_v6 = vrot.slane %v3584_v61, %v13402_v13  ;;  %v11282_v18 = vpop.permute.xlu0 %4403  ;;  %v11292_v23 = vrot.slane %v3584_v61, %v13404_v31 }
 0xa22   :  { %13403 = vst [vmem:[#allocation92_spill] sm:$0xff] %v11282_v18 }
 0xa23   :  { %v3684_v26 = vadd.f32 %v11276_v21, %v11100_v37  ;;  %v3685_v36 = vadd.f32 %v11276_v21, %v11139_v41  ;;  %v3686_v12 = vadd.f32 %v11276_v21, %v11084_v8  ;;  %v4423_v39 = vadd.f32 %v11280_v6, %v11145_v60 }
 0xa24   :  { %v3687_v18 = vadd.f32 %v11276_v21, %v11107_v45  ;;  %v4424_v37 = vadd.f32 %v11280_v6, %v11087_v42  ;;  %v4041_v42 = vadd.f32 %v11292_v23, %v11103_v48 }
 0xa25   :  { %vm3700_vm2 = vcmp.gt.f32.partialorder %v3684_v26, 0.0  ;;  %v3716_v13 = vmul.f32 0.2, %v3684_v26  ;;  %vm3701_vm3 = vcmp.gt.f32.partialorder %v3685_v36, 0.0  ;;  %v3717_v41 = vmul.f32 0.2, %v3685_v36 }
 0xa26   :  { %v11300_v55 = vpop.permute.xlu0 %4776  ;;  %vm3702_vm4 = vcmp.gt.f32.partialorder %v3686_v12, 0.0  ;;  %v3718_v8 = vmul.f32 0.2, %v3686_v12  ;;  %vm4439_vm5 = vcmp.gt.f32.partialorder %v4423_v39, 0.0  ;;  %v4455_v31 = vmul.f32 0.2, %v4423_v39 }
 0xa27   :  { %13405 = vst [vmem:[#allocation72_spill] sm:$0xff] %v11300_v55  ;;  %v3732_v59 = vsel %vm3700_vm2, %v3684_v26, %v3716_v13  ;;  %v3733_v60 = vsel %vm3701_vm3, %v3685_v36, %v3717_v41  ;;  %vm3703_vm6 = vcmp.gt.f32.partialorder %v3687_v18, 0.0  ;;  %v3719_v29 = vmul.f32 0.2, %v3687_v18 }
 0xa28   :  { %v11303_v56 = vadd.f32 %v3732_v59, %v13406_v11  ;;  %v11306_v47 = vadd.f32 %v3733_v60, %v13407_v15  ;;  %v3734_v45 = vsel %vm3702_vm4, %v3686_v12, %v3718_v8  ;;  %v4471_v55 = vsel %vm4439_vm5, %v4423_v39, %v4455_v31  ;;  %v13409_v12 = vld [vmem:[#allocation59_spill] sm:$0xff] }
 0xa29   :  { %v4456_v38 = vmul.f32 0.2, %v4424_v37  ;;  %v13408_v26 = vsub.s32 3, %v13401_v0  ;;  %vm4440_vm7 = vcmp.gt.f32.partialorder %v4424_v37, 0.0  ;;  %v4425_v59 = vadd.f32 %v11280_v6, %v11127_v63 }
 0xa2a   :  { %3764 = vmax.xlane.f32.xlu1 %v11303_v56  ;;  %3766 = vmax.xlane.f32.xlu0 %v11306_v47  ;;  %v11321_v48 = vadd.f32 %v3734_v45, %v13409_v12  ;;  %v11324_v39 = vadd.f32 %v4471_v55, %v13407_v15  ;;  %v3735_v41 = vsel %vm3703_vm6, %v3687_v18, %v3719_v29  ;;  %v4073_v8 = vmul.f32 0.2, %v4041_v42  ;;  %v13412_v55 = vld [vmem:[#allocation62_spill] sm:$0xff] }
 0xa2b   :  { %v11313_v13 = vrot.slane %v3584_v61, %v13408_v26  ;;  %v11316_v36 = vpop.permute.xlu0 %4034  ;;  %v4042_v0 = vadd.f32 %v11292_v23, %v11115_v33  ;;  %v4472_v61 = vsel %vm4440_vm7, %v4424_v37, %v4456_v38  ;;  %vm4057_vm8 = vcmp.gt.f32.partialorder %v4041_v42, 0.0 }
 0xa2c   :  { %13410 = vst [vmem:[#allocation49_spill] sm:$0xff] %v11324_v39  ;;  %v4457_v31 = vmul.f32 0.2, %v4425_v59  ;;  %vm4441_vm9 = vcmp.gt.f32.partialorder %v4425_v59, 0.0  ;;  %v11335_v45 = vadd.f32 %v3735_v41, %v13412_v55  ;;  %v11338_v18 = vadd.f32 %v4472_v61, %v13409_v12 }
 0xa2d   :  { %v4795_v63 = vadd.f32 %v11313_v13, %v11117_v32  ;;  %v4089_v33 = vsel %vm4057_vm8, %v4041_v42, %v4073_v8  ;;  %v4074_v29 = vmul.f32 0.2, %v4042_v0  ;;  %v4043_v38 = vadd.f32 %v11292_v23, %v11092_v44 }
 0xa2e   :  { %3768 = vmax.xlane.f32.xlu1 %v11321_v48  ;;  %4504 = vmax.xlane.f32.xlu0 %v11324_v39  ;;  %13413 = vst [vmem:[#allocation53_spill] sm:$0xff] %v11338_v18  ;;  %v4473_v37 = vsel %vm4441_vm9, %v4425_v59, %v4457_v31  ;;  %vm4058_vm10 = vcmp.gt.f32.partialorder %v4042_v0, 0.0  ;;  %v4796_v32 = vadd.f32 %v11313_v13, %v11151_v16 }
 0xa2f   :  { %v4827_v26 = vmul.f32 0.2, %v4795_v63  ;;  %vm4811_vm11 = vcmp.gt.f32.partialorder %v4795_v63, 0.0  ;;  %v11347_v41 = vadd.f32 %v4089_v33, %v13406_v11  ;;  %v11352_v42 = vadd.f32 %v4473_v37, %v13412_v55 }
 0xa30   :  { %v11332_v60 = vpop.permute.xlu0 %4788  ;;  %v4090_v44 = vsel %vm4058_vm10, %v4042_v0, %v4074_v29  ;;  %v4075_v8 = vmul.f32 0.2, %v4043_v38  ;;  %v4044_v59 = vadd.f32 %v11292_v23, %v11121_v3  ;;  %vm4059_vm2 = vcmp.gt.f32.partialorder %v4043_v38, 0.0 }
 0xa31   :  { %13411 = vst [vmem:[#allocation89_spill] sm:$0xff] %v11332_v60  ;;  %13414 = vst [vmem:[#allocation93_spill] sm:$0xff] %v11352_v42  ;;  %v4843_v31 = vsel %vm4811_vm11, %v4795_v63, %v4827_v26  ;;  %v4828_v16 = vmul.f32 0.2, %v4796_v32  ;;  %vm4812_vm3 = vcmp.gt.f32.partialorder %v4796_v32, 0.0  ;;  %v11361_v33 = vadd.f32 %v4090_v44, %v13407_v15 }
 0xa32   :  { %3770 = vmax.xlane.f32.xlu1 %v11335_v45  ;;  %4506 = vmax.xlane.f32.xlu0 %v11338_v18  ;;  %v4047_v18 = vadd.f32 %v11292_v23, %v11137_v24  ;;  %v11364_v0 = vadd.f32 %v4843_v31, %v13406_v11  ;;  %v4091_v29 = vsel %vm4059_vm2, %v4043_v38, %v4075_v8  ;;  %v4076_v37 = vmul.f32 0.2, %v4044_v59 }
 0xa33   :  { %v4422_v3 = vadd.f32 %v11280_v6, %v11111_v27  ;;  %v4844_v26 = vsel %vm4812_vm3, %v4796_v32, %v4828_v16  ;;  %vm4060_vm4 = vcmp.gt.f32.partialorder %v4044_v59, 0.0  ;;  %v11375_v44 = vadd.f32 %v4091_v29, %v13409_v12 }
 0xa34   :  { %13415 = vst [vmem:[#allocation40_spill] sm:$0xff] %v11364_v0  ;;  %v4079_v24 = vmul.f32 0.2, %v4047_v18  ;;  %vm4063_vm5 = vcmp.gt.f32.partialorder %v4047_v18, 0.0  ;;  %v11378_v38 = vadd.f32 %v4844_v26, %v13407_v15  ;;  %v4092_v27 = vsel %vm4060_vm4, %v4044_v59, %v4076_v37  ;;  %v13418_v37 = vld [vmem:[#allocation65_spill] sm:$0xff] }
 0xa35   :  { %v11349_v61 = vpop.permute.xlu0 %3667  ;;  %v4454_v8 = vmul.f32 0.2, %v4422_v3  ;;  %v3690_v31 = vadd.f32 %v11276_v21, %v11130_v20  ;;  %vm4438_vm6 = vcmp.gt.f32.partialorder %v4422_v3, 0.0  ;;  %v11388_v59 = vadd.f32 %v4092_v27, %v13412_v55 }
 0xa36   :  { %4121 = vmax.xlane.f32.xlu1 %v11347_v41  ;;  %4508 = vmax.xlane.f32.xlu0 %v11352_v42  ;;  %v4045_v42 = vadd.f32 %v11292_v23, %v11183_v30  ;;  %13417 = vst [vmem:[#allocation47_spill] sm:$0xff] %v11378_v38  ;;  %v4095_v16 = vsel %vm4063_vm5, %v4047_v18, %v4079_v24  ;;  %v4255_v20 = vsel %vm321_vm0, %v11271_v57, 1065369472 }
 0xa37   :  { %v11393_v18 = vadd.f32 %v4095_v16, %v13418_v37  ;;  %v4470_v26 = vsel %vm4438_vm6, %v4422_v3, %v4454_v8  ;;  %v3722_v24 = vmul.f32 0.2, %v3690_v31  ;;  %vm3706_vm8 = vcmp.gt.f32.partialorder %v3690_v31, 0.0 }
 0xa38   :  { %v4077_v30 = vmul.f32 0.2, %v4045_v42  ;;  %vm4061_vm7 = vcmp.gt.f32.partialorder %v4045_v42, 0.0  ;;  %v4048_v27 = vadd.f32 %v11292_v23, %v11205_v28  ;;  %v11402_v57 = vadd.f32 %v4470_v26, %v13406_v11 }
 0xa39   :  { %v11406_v3 = vsel %vm321_vm0, %v11123_v46, 1065369472  ;;  %v3689_v46 = vadd.f32 %v11276_v21, %v11218_v58  ;;  %v4046_v58 = vadd.f32 %v11292_v23, %v11156_v1  ;;  %v3694_v1 = vadd.f32 %v11276_v21, %v11186_v9 }
 0xa3a   :  { %4123 = vmax.xlane.f32.xlu1 %v11361_v33  ;;  %v11369_v63 = vpop.permute.xlu0 %4407  ;;  %4875 = vmax.xlane.f32.xlu0 %v11364_v0  ;;  %13419 = vst [vmem:[#allocation37_spill] sm:$0xff] %v11402_v57  ;;  %vm4064_vm11 = vcmp.gt.f32.partialorder %v4048_v27, 0.0  ;;  %v4051_v9 = vadd.f32 %v11292_v23, %v11194_v14  ;;  %v4049_v14 = vadd.f32 %v11292_v23, %v11238_v5 }
 0xa3b   :  { %13416 = vst [vmem:[#allocation46_spill] sm:$0xff] %v11369_v63  ;;  %v3691_v63 = vadd.f32 %v11276_v21, %v11149_v50  ;;  %v3688_v50 = vadd.f32 %v11276_v21, %v11143_v4  ;;  %v13420_v4 = vld [vmem:[#allocation81_spill] sm:$0xff]  ;;  %vm3705_vm3 = vcmp.gt.f32.partialorder %v3689_v46, 0.0  ;;  %vm4062_vm5 = vcmp.gt.f32.partialorder %v4046_v58, 0.0 }
 0xa3c   :  { %v4052_v5 = vadd.f32 %v11292_v23, %v11246_v17  ;;  %v4050_v17 = vadd.f32 %v11292_v23, %v11221_v19  ;;  %v3696_v19 = vadd.f32 %v11276_v21, %v11249_v51  ;;  %v3699_v51 = vadd.f32 %v11276_v21, %v11255_v52 }
 0xa3d   :  { %v3723_v15 = vmul.f32 0.2, %v3691_v63  ;;  %vm3707_vm9 = vcmp.gt.f32.partialorder %v3691_v63, 0.0  ;;  %v3720_v16 = vmul.f32 0.2, %v3688_v50  ;;  %vm3704_vm10 = vcmp.gt.f32.partialorder %v3688_v50, 0.0 }
 0xa3e   :  { %4125 = vmax.xlane.f32.xlu1 %v11375_v44  ;;  %v4230_v32 = vpop.permute.xlu0 %4229  ;;  %4877 = vmax.xlane.f32.xlu0 %v11378_v38 }
 0xa3f   :  { %v4252_v29 = vsel %vm321_vm0, %v4230_v32, 1065369472  ;;  %v4093_v32 = vsel %vm4061_vm7, %v4045_v42, %v4077_v30  ;;  %v3738_v42 = vsel %vm3706_vm8, %v3690_v31, %v3722_v24  ;;  %v3692_v30 = vadd.f32 %v11276_v21, %v11202_v53  ;;  %v13421_v31 = vld [vmem:[#allocation68_spill] sm:$0xff] }
 0xa40   :  { %7552 = vmatprep.subr.bf16.mxu0 %v4252_v29  ;;  %v11409_v8 = vadd.f32 %v4093_v32, %v13420_v4  ;;  %v3739_v28 = vsel %vm3707_vm9, %v3691_v63, %v3723_v15  ;;  %v3736_v53 = vsel %vm3704_vm10, %v3688_v50, %v3720_v16  ;;  %v3695_v32 = vadd.f32 %v11276_v21, %v11215_v62 }
 0xa41   :  { %7553 = vmatpush3.bf16.msra.mxu0 %v4252_v29  ;;  %v4080_v29 = vmul.f32 0.2, %v4048_v27  ;;  %v11422_v26 = vadd.f32 %v3739_v28, %v13421_v31  ;;  %v3724_v24 = vmul.f32 0.2, %v3692_v30  ;;  %vm3708_vm2 = vcmp.gt.f32.partialorder %v3692_v30, 0.0 }
 0xa42   :  { %4127 = vmax.xlane.f32.xlu1 %v11388_v59  ;;  %7554 = vmatprep.subr.bf16.mxu0 %v4255_v20  ;;  %v3721_v63 = vmul.f32 0.2, %v3689_v46  ;;  %v3727_v28 = vmul.f32 0.2, %v3695_v32  ;;  %v3693_v62 = vadd.f32 %v11276_v21, %v11257_v54  ;;  %vm3711_vm4 = vcmp.gt.f32.partialorder %v3695_v32, 0.0 }
 0xa43   :  { %4133 = vmax.xlane.f32.xlu0 %v11393_v18  ;;  %v4096_v15 = vsel %vm4064_vm11, %v4048_v27, %v4080_v29  ;;  %v3740_v16 = vsel %vm3708_vm2, %v3692_v30, %v3724_v24  ;;  %v4078_v29 = vmul.f32 0.2, %v4046_v58  ;;  %v3698_v54 = vadd.f32 %v11276_v21, %v11236_v35 }
 0xa44   :  { %v11434_v50 = vadd.f32 %v4096_v15, %v13421_v31  ;;  %v3737_v27 = vsel %vm3705_vm3, %v3689_v46, %v3721_v63  ;;  %v13423_v15 = vld [vmem:[#allocation71_spill] sm:$0xff]  ;;  %v3743_v24 = vsel %vm3711_vm4, %v3695_v32, %v3727_v28  ;;  %v3725_v60 = vmul.f32 0.2, %v3693_v62 }
 0xa45   :  { %7555 = vmatpush3.bf16.msra.mxu0 %v4255_v20  ;;  %v11419_v20 = vadd.f32 %v3738_v42, %v13418_v37  ;;  %v11431_v42 = vadd.f32 %v3736_v53, %v13420_v4  ;;  %v13422_v53 = vld [vmem:[#allocation86_spill] sm:$0xff]  ;;  %v11446_v30 = vadd.f32 %v3737_v27, %v13423_v15  ;;  %v4094_v46 = vsel %vm4062_vm5, %v4046_v58, %v4078_v29 }
 0xa46   :  { %4502 = vmax.xlane.f32.xlu1 %v11402_v57  ;;  %7604 = vmatprep.subr.bf16.mxu0 %v11406_v3  ;;  %v11443_v11 = vadd.f32 %v3740_v16, %v13422_v53  ;;  %v3726_v63 = vmul.f32 0.2, %v3694_v1  ;;  %vm3709_vm6 = vcmp.gt.f32.partialorder %v3693_v62, 0.0  ;;  %vm3710_vm7 = vcmp.gt.f32.partialorder %v3694_v1, 0.0  ;;  %v13424_v16 = vld [vmem:[#allocation77_spill] sm:$0xff] }
 0xa47   :  { %4129 = vmax.xlane.f32.xlu0 %v11409_v8  ;;  %v11455_v39 = vadd.f32 %v3743_v24, %v13424_v16  ;;  %v11458_v32 = vadd.f32 %v4094_v46, %v13423_v15  ;;  %v3741_v28 = vsel %vm3709_vm6, %v3693_v62, %v3725_v60  ;;  %v3730_v27 = vmul.f32 0.2, %v3698_v54  ;;  %v13425_v24 = vld [vmem:[#allocation80_spill] sm:$0xff]  ;;  %v13426_v46 = vld [vmem:[#allocation74_spill] sm:$0xff] }
 0xa48   :  { %v4055_v35 = vadd.f32 %v11292_v23, %v11240_v10  ;;  %v3742_v58 = vsel %vm3710_vm7, %v3694_v1, %v3726_v63  ;;  %v4083_v29 = vmul.f32 0.2, %v4051_v9  ;;  %vm3714_vm8 = vcmp.gt.f32.partialorder %v3698_v54, 0.0 }
 0xa49   :  { %vm4067_vm9 = vcmp.gt.f32.partialorder %v4051_v9, 0.0  ;;  %v11467_v57 = vadd.f32 %v3741_v28, %v13425_v24  ;;  %v11470_v60 = vadd.f32 %v3742_v58, %v13426_v46  ;;  %v3746_v62 = vsel %vm3714_vm8, %v3698_v54, %v3730_v27  ;;  %v13427_v28 = vld [vmem:[#allocation83_spill] sm:$0xff] }
 0xa4a   :  { %3776 = vmax.xlane.f32.xlu1 %v11419_v20  ;;  %v4087_v38 = vmul.f32 0.2, %v4055_v35  ;;  %v4053_v10 = vadd.f32 %v11292_v23, %v11273_v49  ;;  %v4099_v1 = vsel %vm4067_vm9, %v4051_v9, %v4083_v29  ;;  %v4081_v63 = vmul.f32 0.2, %v4049_v14 }
 0xa4b   :  { %3778 = vmax.xlane.f32.xlu0 %v11422_v26  ;;  %vm4071_vm10 = vcmp.gt.f32.partialorder %v4055_v35, 0.0  ;;  %vm4065_vm11 = vcmp.gt.f32.partialorder %v4049_v14, 0.0  ;;  %v11479_v0 = vadd.f32 %v3746_v62, %v13427_v28  ;;  %v11482_v54 = vadd.f32 %v4099_v1, %v13426_v46 }
 0xa4c   :  { %v4103_v27 = vsel %vm4071_vm10, %v4055_v35, %v4087_v38  ;;  %v4085_v58 = vmul.f32 0.2, %v4053_v10  ;;  %v4054_v49 = vadd.f32 %v11292_v23, %v11263_v7  ;;  %v4097_v9 = vsel %vm4065_vm11, %v4049_v14, %v4081_v63 }
 0xa4d   :  { %13428 = vst [vmem:[#allocation43_spill] sm:$0xff] %v11479_v0  ;;  %v4084_v29 = vmul.f32 0.2, %v4052_v5  ;;  %vm4069_vm2 = vcmp.gt.f32.partialorder %v4053_v10, 0.0  ;;  %vm4068_vm3 = vcmp.gt.f32.partialorder %v4052_v5, 0.0  ;;  %v11491_v62 = vadd.f32 %v4103_v27, %v13427_v28  ;;  %v13429_v27 = vld [vmem:[#allocation88_spill] sm:$0xff] }
 0xa4e   :  { %3772 = vmax.xlane.f32.xlu1 %v11431_v42  ;;  %v11494_v38 = vadd.f32 %v4097_v9, %v13422_v53  ;;  %v4101_v35 = vsel %vm4069_vm2, %v4053_v10, %v4085_v58  ;;  %v4086_v1 = vmul.f32 0.2, %v4054_v49  ;;  %v4797_v7 = vadd.f32 %v11313_v13, %v11095_v22 }
 0xa4f   :  { %4135 = vmax.xlane.f32.xlu0 %v11434_v50  ;;  %v4100_v14 = vsel %vm4068_vm3, %v4052_v5, %v4084_v29  ;;  %v4082_v63 = vmul.f32 0.2, %v4050_v17  ;;  %vm4070_vm4 = vcmp.gt.f32.partialorder %v4054_v49, 0.0  ;;  %vm4066_vm5 = vcmp.gt.f32.partialorder %v4050_v17, 0.0 }
 0xa50   :  { %v11503_v28 = vadd.f32 %v4101_v35, %v13429_v27  ;;  %v11506_v10 = vadd.f32 %v4100_v14, %v13424_v16  ;;  %v4102_v58 = vsel %vm4070_vm4, %v4054_v49, %v4086_v1  ;;  %v4829_v9 = vmul.f32 0.2, %v4797_v7  ;;  %v13430_v35 = vld [vmem:[#allocation87_spill] sm:$0xff] }
 0xa51   :  { %v4427_v22 = vadd.f32 %v11280_v6, %v11224_v34  ;;  %v4098_v5 = vsel %vm4066_vm5, %v4050_v17, %v4082_v63  ;;  %v3728_v29 = vmul.f32 0.2, %v3696_v19  ;;  %vm4813_vm6 = vcmp.gt.f32.partialorder %v4797_v7, 0.0 }
 0xa52   :  { %3780 = vmax.xlane.f32.xlu1 %v11443_v11  ;;  %vm3712_vm7 = vcmp.gt.f32.partialorder %v3696_v19, 0.0  ;;  %v11518_v49 = vadd.f32 %v4098_v5, %v13425_v24  ;;  %v4845_v1 = vsel %vm4813_vm6, %v4797_v7, %v4829_v9  ;;  %v4056_v34 = vadd.f32 %v11292_v23, %v11316_v36 }
 0xa53   :  { %3774 = vmax.xlane.f32.xlu0 %v11446_v30  ;;  %v4459_v14 = vmul.f32 0.2, %v4427_v22  ;;  %v3744_v17 = vsel %vm3712_vm7, %v3696_v19, %v3728_v29  ;;  %v3731_v63 = vmul.f32 0.2, %v3699_v51  ;;  %vm4443_vm8 = vcmp.gt.f32.partialorder %v4427_v22, 0.0  ;;  %v13433_v19 = vld [vmem:[#allocation85_spill] sm:$0xff] }
 0xa54   :  { %vm3715_vm9 = vcmp.gt.f32.partialorder %v3699_v51, 0.0  ;;  %v11525_v52 = vadd.f32 %v4845_v1, %v13409_v12  ;;  %v4088_v7 = vmul.f32 0.2, %v4056_v34  ;;  %v3697_v9 = vadd.f32 %v11276_v21, %v11349_v61 }
 0xa55   :  { %v4475_v5 = vsel %vm4443_vm8, %v4427_v22, %v4459_v14  ;;  %v3747_v23 = vsel %vm3715_vm9, %v3699_v51, %v3731_v63  ;;  %vm4072_vm10 = vcmp.gt.f32.partialorder %v4056_v34, 0.0  ;;  %v4798_v14 = vadd.f32 %v11313_v13, %v11133_v40 }
 0xa56   :  { %3786 = vmax.xlane.f32.xlu1 %v11455_v39  ;;  %13431 = vst [vmem:[#allocation56_spill] sm:$0xff] %v11525_v52  ;;  %v11535_v36 = vadd.f32 %v4475_v5, %v13423_v15  ;;  %v11538_v29 = vadd.f32 %v3747_v23, %v13433_v19  ;;  %v3729_v1 = vmul.f32 0.2, %v3697_v9  ;;  %v4104_v22 = vsel %vm4072_vm10, %v4056_v34, %v4088_v7  ;;  %v13436_v23 = vld [vmem:[#allocation66_spill] sm:$0xff] }
 0xa57   :  { %4131 = vmax.xlane.f32.xlu0 %v11458_v32  ;;  %vm3713_vm11 = vcmp.gt.f32.partialorder %v3697_v9, 0.0  ;;  %v11545_v21 = vadd.f32 %v4104_v22, %v13433_v19  ;;  %v4830_v51 = vmul.f32 0.2, %v4798_v14  ;;  %vm4814_vm2 = vcmp.gt.f32.partialorder %v4798_v14, 0.0 }
 0xa58   :  { %13432 = vst [vmem:[#allocation38_spill] sm:$0xff] %v11535_v36  ;;  %v3745_v61 = vsel %vm3713_vm11, %v3697_v9, %v3729_v1  ;;  %v4428_v40 = vadd.f32 %v11280_v6, %v11172_v25  ;;  %v4426_v1 = vadd.f32 %v11280_v6, %v13436_v23 }
 0xa59   :  { %v4846_v63 = vsel %vm4814_vm2, %v4798_v14, %v4830_v51  ;;  %v13437_v14 = vld [vmem:[#allocation42_spill] sm:$0xff] }
 0xa5a   :  { %3782 = vmax.xlane.f32.xlu1 %v11467_v57  ;;  %v11553_v34 = vadd.f32 %v4846_v63, %v13412_v55  ;;  %v4460_v5 = vmul.f32 0.2, %v4428_v40  ;;  %vm4444_vm3 = vcmp.gt.f32.partialorder %v4428_v40, 0.0  ;;  %v4458_v22 = vmul.f32 0.2, %v4426_v1 }
 0xa5b   :  { %3784 = vmax.xlane.f32.xlu0 %v11470_v60  ;;  %vm4442_vm4 = vcmp.gt.f32.partialorder %v4426_v1, 0.0 }
 0xa5c   :  { %13434 = vst [vmem:[#allocation44_spill] sm:$0xff] %v11553_v34  ;;  %v4476_v7 = vsel %vm4444_vm3, %v4428_v40, %v4460_v5 }
 0xa5d   :  { %v11567_v9 = vadd.f32 %v4476_v7, %v13418_v37  ;;  %v13439_v7 = vld [vmem:[#allocation69_spill] sm:$0xff] }
 0xa5e   :  { %3792 = vmax.xlane.f32.xlu1 %v11479_v0  ;;  %v11515_v0 = vadd.f32 %v4102_v58, %v13430_v35  ;;  %v11528_v58 = vadd.f32 %v3744_v17, %v13429_v27  ;;  %v11549_v17 = vadd.f32 %v3745_v61, %v13430_v35  ;;  %v4474_v61 = vsel %vm4442_vm4, %v4426_v1, %v4458_v22 }
 0xa5f   :  { %4141 = vmax.xlane.f32.xlu0 %v11482_v54  ;;  %13435 = vst [vmem:[#allocation60_spill] sm:$0xff] %v11567_v9  ;;  %v11581_v12 = vadd.f32 %v4474_v61, %v13420_v4 }
 0xa62   :  { %4149 = vmax.xlane.f32.xlu1 %v11491_v62 }
 0xa63   :  { %4137 = vmax.xlane.f32.xlu0 %v11494_v38 }
 0xa66   :  { %4145 = vmax.xlane.f32.xlu1 %v11503_v28 }
 0xa67   :  { %4143 = vmax.xlane.f32.xlu0 %v11506_v10 }
 0xa6a   :  { %4147 = vmax.xlane.f32.xlu1 %v11515_v0 }
 0xa6b   :  { %4139 = vmax.xlane.f32.xlu0 %v11518_v49 }
 0xa6e   :  { %4879 = vmax.xlane.f32.xlu1 %v11525_v52 }
 0xa6f   :  { %3788 = vmax.xlane.f32.xlu0 %v11528_v58 }
 0xa72   :  { %4512 = vmax.xlane.f32.xlu1 %v11535_v36 }
 0xa73   :  { %3794 = vmax.xlane.f32.xlu0 %v11538_v29 }
 0xa77   :  { %4151 = vmax.xlane.f32.xlu0 %v11545_v21 }
 0xa7b   :  { %3790 = vmax.xlane.f32.xlu0 %v11549_v17 }
 0xa7f   :  { %4881 = vmax.xlane.f32.xlu0 %v11553_v34  ;;  %v13440_v34 = vld [vmem:[#allocation90_spill] sm:$0xff] }
 0xa83   :  { %4967 = vrot.lane.b32.xlu1 %v10968_v2, %s8746_s12 }
 0xa95   :  { %4592 = vrot.lane.b32.xlu0 %v10928_v43, %s8731_s30 }
 0xa99   :  { %4965 = vrot.lane.b32.xlu0 %v10928_v43, %s8746_s12  ;;  %v4429_v43 = vadd.f32 %v11280_v6, %v13437_v14 }
 0xa9b   :  { %v4461_v51 = vmul.f32 0.2, %v4429_v43  ;;  %vm4445_vm5 = vcmp.gt.f32.partialorder %v4429_v43, 0.0 }
 0xa9d   :  { %4594 = vrot.lane.b32.xlu0 %v10968_v2, %s8731_s30  ;;  %v13438_v2 = vld [vmem:[#allocation67_spill] sm:$0xff]  ;;  %v4477_v1 = vsel %vm4445_vm5, %v4429_v43, %v4461_v51  ;;  %v13442_v51 = vld [vmem:[#allocation70_spill] sm:$0xff] }
 0xa9e   :  { %v4799_v63 = vadd.f32 %v11313_v13, %v13438_v2  ;;  %v4800_v2 = vadd.f32 %v11313_v13, %v13440_v34 }
 0xaa0   :  { %v4831_v22 = vmul.f32 0.2, %v4799_v63  ;;  %vm4815_vm6 = vcmp.gt.f32.partialorder %v4799_v63, 0.0  ;;  %v4832_v43 = vmul.f32 0.2, %v4800_v2  ;;  %vm4816_vm7 = vcmp.gt.f32.partialorder %v4800_v2, 0.0 }
 0xaa7   :  { %4514 = vmax.xlane.f32.xlu1 %v11567_v9 }
 0xab7   :  { %v3765_v25 = vpop.xlane.xlu1 %3764  ;;  %v3767_v5 = vpop.xlane.xlu0 %3766 }
 0xab8   :  { %v3796_v40 = vsub.f32 %v11303_v56, %v3765_v25  ;;  %4969 = vrot.lane.b32.xlu1 %v13439_v7, %s8746_s12  ;;  %v3797_v23 = vsub.f32 %v11306_v47, %v3767_v5  ;;  %v11590_v47 = vadd.f32 %v4477_v1, %v13421_v31  ;;  %v4847_v5 = vsel %vm4815_vm6, %v4799_v63, %v4831_v22  ;;  %v13444_v63 = vld [vmem:[#allocation41_spill] sm:$0xff] }
 0xab9   :  { %v11599_v34 = vadd.f32 %v4847_v5, %v13420_v4  ;;  %v4848_v1 = vsel %vm4816_vm7, %v4800_v2, %v4832_v43  ;;  %v4802_v22 = vadd.f32 %v11313_v13, %v13444_v63 }
 0xaba   :  { %v3812_v55 = vmul.f32 1.442695, %v3796_v40  ;;  %v3814_v14 = vmul.f32 1.442695, %v3797_v23  ;;  %13441 = vst [vmem:[#allocation50_spill] sm:$0xff] %v11590_v47  ;;  %v4801_v23 = vadd.f32 %v11313_v13, %v13442_v51 }
 0xabb   :  { %v3769_v52 = vpop.xlane.xlu1 %3768  ;;  %v11587_v25 = vpop.xlane.xlu0 %4504  ;;  %13443 = vst [vmem:[#allocation76_spill] sm:$0xff] %v11599_v34  ;;  %v4834_v43 = vmul.f32 0.2, %v4802_v22  ;;  %vm4818_vm9 = vcmp.gt.f32.partialorder %v4802_v22, 0.0 }
 0xabc   :  { %8199 = vpow2.f32 %v3812_v55  ;;  %v3798_v56 = vsub.f32 %v11321_v48, %v3769_v52  ;;  %4510 = vmax.xlane.f32.xlu0 %v11581_v12  ;;  %vm4817_vm8 = vcmp.gt.f32.partialorder %v4801_v23, 0.0 }
 0xabd   :  { %8201 = vpow2.f32 %v3814_v14 }
 0xabe   :  { %v3816_v61 = vmul.f32 1.442695, %v3798_v56  ;;  %v4833_v56 = vmul.f32 0.2, %v4801_v23 }
 0xabf   :  { %v3771_v40 = vpop.xlane.xlu1 %3770  ;;  %v11596_v48 = vpop.xlane.xlu0 %4506 }
 0xac0   :  { %v3799_v55 = vsub.f32 %v11335_v45, %v3771_v40  ;;  %4516 = vmax.xlane.f32.xlu0 %v11590_v47  ;;  %8203 = vpow2.f32 %v3816_v61  ;;  %v4849_v2 = vsel %vm4817_vm8, %v4801_v23, %v4833_v56 }
 0xac1   :  { %v11615_v63 = vadd.f32 %v4849_v2, %v13418_v37  ;;  %v13448_v2 = vld [vmem:[#allocation79_spill] sm:$0xff] }
 0xac2   :  { %v3818_v52 = vmul.f32 1.442695, %v3799_v55  ;;  %v11608_v55 = vadd.f32 %v4848_v1, %v13423_v15  ;;  %v4850_v15 = vsel %vm4818_vm9, %v4802_v22, %v4834_v43 }
 0xac3   :  { %v4122_v14 = vpop.xlane.xlu1 %4121  ;;  %v11605_v45 = vpop.xlane.xlu0 %4508  ;;  %13446 = vst [vmem:[#allocation84_spill] sm:$0xff] %v11615_v63 }
 0xac4   :  { %8205 = vpow2.f32 %v3818_v52  ;;  %v4153_v51 = vsub.f32 %v11347_v41, %v4122_v14  ;;  %4883 = vmax.xlane.f32.xlu0 %v11599_v34  ;;  %13445 = vst [vmem:[#allocation36_spill] sm:$0xff] %v11608_v55 }
 0xac6   :  { %v8200_v40 = vpop.eup %8199  ;;  %v4169_v61 = vmul.f32 1.442695, %v4153_v51  ;;  %v11622_v51 = vadd.f32 %v4850_v15, %v13421_v31 }
 0xac7   :  { %v8202_v5 = vpop.eup %8201  ;;  %v4124_v4 = vpop.xlane.xlu1 %4123 }
 0xac8   :  { %v4154_v9 = vsub.f32 %v11361_v33, %v4124_v4  ;;  %4885 = vmax.xlane.f32.xlu0 %v11608_v55  ;;  %v11612_v52 = vpop.xlane.xlu0 %4875  ;;  %v3844_v41 = vpack.c.bf16 %v8202_v5, %v8200_v40  ;;  %8207 = vpow2.f32 %v4169_v61  ;;  %13447 = vst [vmem:[#allocation75_spill] sm:$0xff] %v11622_v51  ;;  %v4430_v61 = vadd.f32 %v11280_v6, %v13448_v2  ;;  %v13453_v55 = vld [vmem:[#allocation78_spill] sm:$0xff] }
 0xaca   :  { %v4171_v14 = vmul.f32 1.442695, %v4154_v9  ;;  %7524 = vmatprep.mubr.bf16.mxu1 %v3844_v41  ;;  %v8204_v4 = vpop.eup %8203  ;;  %v13449_v41 = vld [vmem:[#allocation52_spill] sm:$0xff]  ;;  %v4462_v15 = vmul.f32 0.2, %v4430_v61  ;;  %vm4446_vm10 = vcmp.gt.f32.partialorder %v4430_v61, 0.0 }
 0xacb   :  { %v4126_v1 = vpop.xlane.xlu1 %4125 }
 0xacc   :  { %8209 = vpow2.f32 %v4171_v14  ;;  %v4155_v23 = vsub.f32 %v11375_v44, %v4126_v1  ;;  %4887 = vmax.xlane.f32.xlu0 %v11615_v63  ;;  %v11619_v33 = vpop.xlane.xlu0 %4877  ;;  %v13450_v1 = vld [vmem:[#allocation64_spill] sm:$0xff] }
 0xace   :  { %v8206_v56 = vpop.eup %8205  ;;  %v4173_v9 = vmul.f32 1.442695, %v4155_v23  ;;  %v4432_v23 = vadd.f32 %v11280_v6, %v13450_v1 }
 0xacf   :  { %v4128_v40 = vpop.xlane.xlu1 %4127  ;;  %v3845_v5 = vpack.c.bf16 %v8206_v56, %v8204_v4 }
 0xad0   :  { %v4156_v22 = vsub.f32 %v11388_v59, %v4128_v40  ;;  %4889 = vmax.xlane.f32.xlu0 %v11622_v51  ;;  %v4134_v44 = vpop.xlane.xlu0 %4133  ;;  %8211 = vpow2.f32 %v4173_v9  ;;  %v13451_v59 = vld [vmem:[#allocation45_spill] sm:$0xff]  ;;  %v4464_v37 = vmul.f32 0.2, %v4432_v23  ;;  %vm4448_vm11 = vcmp.gt.f32.partialorder %v4432_v23, 0.0 }
 0xad1   :  { %7525 = vmatmul.mubr.bf16.vlgmr.msra.gmra.mrb[64].mxu1 %v3845_v5  ;;  %v4433_v40 = vadd.f32 %v11280_v6, %v13451_v59  ;;  %v4803_v59 = vadd.f32 %v11313_v13, %v13453_v55 }
 0xad2   :  { %v4175_v43 = vmul.f32 1.442695, %v4156_v22  ;;  %7573 = vmatpush3.bf16.msra.mxu1 %v13449_v41  ;;  %v8208_v56 = vpop.eup %8207  ;;  %v4478_v22 = vsel %vm4446_vm10, %v4430_v61, %v4462_v15  ;;  %v4480_v34 = vsel %vm4448_vm11, %v4432_v23, %v4464_v37 }
 0xad3   :  { %v11629_v14 = vpop.xlane.xlu1 %4502  ;;  %v11637_v51 = vadd.f32 %v4478_v22, %v13422_v53  ;;  %vm4449_vm2 = vcmp.gt.f32.partialorder %v4433_v40, 0.0  ;;  %vm4819_vm3 = vcmp.gt.f32.partialorder %v4803_v59, 0.0 }
 0xad4   :  { %8213 = vpow2.f32 %v4175_v43  ;;  %v4130_v4 = vpop.xlane.xlu0 %4129  ;;  %v4465_v43 = vmul.f32 0.2, %v4433_v40 }
 0xad5   :  { %13452 = vst [vmem:[#allocation54_spill] sm:$0xff] %v11637_v51  ;;  %v4157_v23 = vsub.f32 %v11409_v8, %v4130_v4 }
 0xad6   :  { %v8210_v2 = vpop.eup %8209  ;;  %v4481_v37 = vsel %vm4449_vm2, %v4433_v40, %v4465_v43 }
 0xad7   :  { %v3777_v31 = vpop.xlane.xlu1 %3776  ;;  %v4201_v5 = vpack.c.bf16 %v8210_v2, %v8208_v56  ;;  %v13454_v2 = vld [vmem:[#allocation91_spill] sm:$0xff] }
 0xad8   :  { %v3779_v41 = vpop.xlane.xlu0 %3778  ;;  %v3802_v9 = vsub.f32 %v11419_v20, %v3777_v31  ;;  %v4804_v20 = vadd.f32 %v11313_v13, %v13454_v2 }
 0xad9   :  { %7556 = vmatprep.mubr.bf16.mxu0 %v4201_v5  ;;  %v3803_v1 = vsub.f32 %v11422_v26, %v3779_v41  ;;  %v4159_v5 = vsub.f32 %v11393_v18, %v4134_v44  ;;  %v11648_v26 = vadd.f32 %v4480_v34, %v13426_v46  ;;  %v11655_v34 = vadd.f32 %v4481_v37, %v13424_v16  ;;  %v13455_v44 = vld [vmem:[#allocation32_spill] sm:$0xff] }
 0xada   :  { %v8212_v56 = vpop.eup %8211  ;;  %v3824_v22 = vmul.f32 1.442695, %v3802_v9  ;;  %v4805_v8 = vadd.f32 %v11313_v13, %v13455_v44  ;;  %v4177_v9 = vmul.f32 1.442695, %v4157_v23  ;;  %vm4820_vm4 = vcmp.gt.f32.partialorder %v4804_v20, 0.0 }
 0xadb   :  { %v3773_v63 = vpop.xlane.xlu1 %3772  ;;  %v3826_v55 = vmul.f32 1.442695, %v3803_v1  ;;  %v4181_v4 = vmul.f32 1.442695, %v4159_v5 }
 0xadc   :  { %v3800_v61 = vsub.f32 %v11431_v42, %v3773_v63  ;;  %v4136_v15 = vpop.xlane.xlu0 %4135  ;;  %4518 = vmax.xlane.f32.xlu1 %v11637_v51  ;;  %v4835_v63 = vmul.f32 0.2, %v4803_v59  ;;  %8215 = vpow2.f32 %v3824_v22  ;;  %vm4821_vm5 = vcmp.gt.f32.partialorder %v4805_v8, 0.0  ;;  %v13456_v22 = vld [vmem:[#allocation73_spill] sm:$0xff] }
 0xadd   :  { %v4160_v51 = vsub.f32 %v11434_v50, %v4136_v15  ;;  %v4836_v50 = vmul.f32 0.2, %v4804_v20  ;;  %8217 = vpow2.f32 %v3826_v55 }
 0xade   :  { %v8214_v31 = vpop.eup %8213  ;;  %v3820_v47 = vmul.f32 1.442695, %v3800_v61  ;;  %v4851_v61 = vsel %vm4819_vm3, %v4803_v59, %v4835_v63  ;;  %v4837_v59 = vmul.f32 0.2, %v4805_v8 }
 0xadf   :  { %v3781_v41 = vpop.xlane.xlu1 %3780  ;;  %v4202_v42 = vpack.c.bf16 %v8214_v31, %v8212_v56  ;;  %v4852_v2 = vsel %vm4820_vm4, %v4804_v20, %v4836_v50 }
 0xae0   :  { %v3775_v36 = vpop.xlane.xlu0 %3774  ;;  %4522 = vmax.xlane.f32.xlu1 %v11648_v26  ;;  %v3804_v40 = vsub.f32 %v11443_v11, %v3781_v41  ;;  %8219 = vpow2.f32 %v3820_v47  ;;  %v11675_v37 = vadd.f32 %v4852_v2, %v13425_v24 }
 0xae1   :  { %v3801_v18 = vsub.f32 %v11446_v30, %v3775_v36  ;;  %7557 = vmatmul.mubr.bf16.vlgmr.msra.gmra.mrb[80].mxu0 %v4202_v42  ;;  %v4183_v30 = vmul.f32 1.442695, %v4160_v51 }
 0xae2   :  { %7605 = vmatpush3.bf16.msra.mxu0 %v11406_v3  ;;  %v3828_v11 = vmul.f32 1.442695, %v3804_v40  ;;  %v11667_v3 = vadd.f32 %v4851_v61, %v13422_v53 }
 0xae3   :  { %v3822_v43 = vmul.f32 1.442695, %v3801_v18  ;;  %v3787_v1 = vpop.xlane.xlu1 %3786 }
 0xae4   :  { %v3807_v36 = vsub.f32 %v11455_v39, %v3787_v1  ;;  %v4132_v15 = vpop.xlane.xlu0 %4131  ;;  %4524 = vmax.xlane.f32.xlu1 %v11655_v34 }
 0xae5   :  { %8221 = vpow2.f32 %v3822_v43  ;;  %v4158_v56 = vsub.f32 %v11458_v32, %v4132_v15 }
 0xae6   :  { %8223 = vpow2.f32 %v4181_v4  ;;  %4596 = vrot.lane.b32.xlu0 %v13439_v7, %s8731_s30  ;;  %v3834_v47 = vmul.f32 1.442695, %v3807_v36  ;;  %v8216_v55 = vpop.eup %8215 }
 0xae7   :  { %8225 = vpow2.f32 %v4177_v9  ;;  %v4179_v51 = vmul.f32 1.442695, %v4158_v56  ;;  %v3783_v39 = vpop.xlane.xlu1 %3782  ;;  %v8218_v42 = vpop.eup %8217 }
 0xae8   :  { %8227 = vpow2.f32 %v4183_v30  ;;  %v3805_v31 = vsub.f32 %v11467_v57, %v3783_v39  ;;  %v3785_v5 = vpop.xlane.xlu0 %3784  ;;  %4891 = vmax.xlane.f32.xlu1 %v11667_v3  ;;  %v4853_v57 = vsel %vm4821_vm5, %v4805_v8, %v4837_v59  ;;  %v3847_v8 = vpack.c.bf16 %v8218_v42, %v8216_v55 }
 0xae9   :  { %8229 = vpow2.f32 %v4179_v51  ;;  %v3806_v32 = vsub.f32 %v11470_v60, %v3785_v5  ;;  %v11681_v63 = vadd.f32 %v4853_v57, %v13426_v46 }
 0xaea   :  { %8231 = vpow2.f32 %v3828_v11  ;;  %v3830_v7 = vmul.f32 1.442695, %v3805_v31  ;;  %4598 = vrot.lane.b32.xlu0 %v13456_v22, %s8731_s30  ;;  %v8220_v60 = vpop.eup %8219 }
 0xaeb   :  { %8233 = vpow2.f32 %v3834_v47  ;;  %v3832_v20 = vmul.f32 1.442695, %v3806_v32  ;;  %v11677_v23 = vpop.xlane.xlu1 %3792 }
 0xaec   :  { %8235 = vpow2.f32 %v3830_v7  ;;  %v4142_v41 = vpop.xlane.xlu0 %4141  ;;  %4893 = vmax.xlane.f32.xlu1 %v11675_v37 }
 0xaed   :  { %8237 = vpow2.f32 %v3832_v20  ;;  %v4163_v39 = vsub.f32 %v11482_v54, %v4142_v41 }
 0xaef   :  { %v8222_v18 = vpop.eup %8221  ;;  %v4150_v44 = vpop.xlane.xlu1 %4149 }
 0xaf0   :  { %v8224_v4 = vpop.eup %8223  ;;  %v4138_v40 = vpop.xlane.xlu0 %4137  ;;  %4895 = vmax.xlane.f32.xlu1 %v11681_v63  ;;  %v3846_v50 = vpack.c.bf16 %v8222_v18, %v8220_v60  ;;  %v13457_v18 = vld [vmem:[#allocation34_spill] sm:$0xff] }
 0xaf1   :  { %v8226_v9 = vpop.eup %8225  ;;  %v4161_v1 = vsub.f32 %v11494_v38, %v4138_v40 }
 0xaf2   :  { %v8228_v43 = vpop.eup %8227  ;;  %7528 = vmatprep.mubr.bf16.mxu1 %v3846_v50 }
 0xaf3   :  { %v8230_v61 = vpop.eup %8229  ;;  %7529 = vmatmul.mubr.bf16.gmra.mrb[68].mxu1 %v3847_v8  ;;  %v4146_v30 = vpop.xlane.xlu1 %4145  ;;  %v4204_v47 = vpack.c.bf16 %v8228_v43, %v8224_v4  ;;  %v4185_v2 = vmul.f32 1.442695, %v4161_v1  ;;  %v4167_v8 = vsub.f32 %v11491_v62, %v4150_v44  ;;  %v13460_v1 = vld [vmem:[#allocation51_spill] sm:$0xff] }
 0xaf4   :  { %v8232_v36 = vpop.eup %8231  ;;  %v4144_v15 = vpop.xlane.xlu0 %4143  ;;  %v4203_v56 = vpack.c.bf16 %v8230_v61, %v8226_v9  ;;  %v4165_v5 = vsub.f32 %v11503_v28, %v4146_v30  ;;  %v4431_v28 = vadd.f32 %v11280_v6, %v13457_v18  ;;  %v13461_v30 = vld [vmem:[#allocation37_spill] sm:$0xff] }
 0xaf5   :  { %v8234_v11 = vpop.eup %8233  ;;  %v4164_v59 = vsub.f32 %v11506_v10, %v4144_v15  ;;  %v4189_v10 = vmul.f32 1.442695, %v4163_v39  ;;  %8239 = vpow2.f32 %v4185_v2 }
 0xaf6   :  { %v8236_v51 = vpop.eup %8235  ;;  %7560 = vmatprep.mubr.bf16.mxu0 %v4203_v56  ;;  %v4193_v54 = vmul.f32 1.442695, %v4165_v5  ;;  %v4463_v9 = vmul.f32 0.2, %v4431_v28  ;;  %vm4447_vm6 = vcmp.gt.f32.partialorder %v4431_v28, 0.0  ;;  %v13463_v5 = vld [vmem:[#allocation49_spill] sm:$0xff] }
 0xaf7   :  { %v8238_v31 = vpop.eup %8237  ;;  %v4191_v38 = vmul.f32 1.442695, %v4164_v59  ;;  %7561 = vmatmul.mubr.bf16.gmra.mrb[84].mxu0 %v4204_v47  ;;  %v4148_v32 = vpop.xlane.xlu1 %4147  ;;  %v3848_v7 = vpack.c.bf16 %v8236_v51, %v8232_v36  ;;  %v4534_v36 = vsub.f32 %v13461_v30, %v11629_v14  ;;  %v4197_v59 = vmul.f32 1.442695, %v4167_v8  ;;  %v13462_v14 = vld [vmem:[#allocation43_spill] sm:$0xff] }
 0xaf8   :  { %v4166_v20 = vsub.f32 %v11515_v0, %v4148_v32  ;;  %v4140_v57 = vpop.xlane.xlu0 %4139  ;;  %v3849_v55 = vpack.c.bf16 %v8234_v11, %v8238_v31  ;;  %v13458_v0 = vld [vmem:[#allocation40_spill] sm:$0xff]  ;;  %v4479_v56 = vsel %vm4447_vm6, %v4431_v28, %v4463_v9  ;;  %v3810_v2 = vsub.f32 %v13462_v14, %v11677_v23 }
 0xaf9   :  { %v4162_v42 = vsub.f32 %v11518_v49, %v4140_v57  ;;  %7532 = vmatprep.mubr.bf16.mxu1 %v3848_v7  ;;  %8241 = vpow2.f32 %v4191_v38  ;;  %v4907_v40 = vsub.f32 %v13458_v0, %v11612_v52  ;;  %v13459_v49 = vld [vmem:[#allocation47_spill] sm:$0xff]  ;;  %v4550_v39 = vmul.f32 1.442695, %v4534_v36  ;;  %v13465_v14 = vld [vmem:[#allocation92_spill] sm:$0xff] }
 0xafa   :  { %v4195_v60 = vmul.f32 1.442695, %v4166_v20  ;;  %v4908_v50 = vsub.f32 %v13459_v49, %v11619_v33 }
 0xafb   :  { %v4187_v41 = vmul.f32 1.442695, %v4162_v42  ;;  %7533 = vmatmul.mubr.bf16.gmra.mrb[72].mxu1 %v3849_v55  ;;  %v4923_v61 = vmul.f32 1.442695, %v4907_v40  ;;  %v11713_v7 = vpop.xlane.xlu1 %4879 }
 0xafc   :  { %8243 = vpow2.f32 %v4195_v60  ;;  %v3789_v4 = vpop.xlane.xlu0 %3788  ;;  %v4925_v15 = vmul.f32 1.442695, %v4908_v50  ;;  %v3840_v60 = vmul.f32 1.442695, %v3810_v2  ;;  %v4434_v2 = vadd.f32 %v11280_v6, %v13465_v14 }
 0xafd   :  { %8245 = vpow2.f32 %v4187_v41  ;;  %v3808_v52 = vsub.f32 %v11528_v58, %v3789_v4  ;;  %v11709_v58 = vadd.f32 %v4479_v56, %v13425_v24 }
 0xafe   :  { %8247 = vpow2.f32 %v4189_v10  ;;  %v13464_v10 = vld [vmem:[#allocation33_spill] sm:$0xff]  ;;  %vm4450_vm7 = vcmp.gt.f32.partialorder %v4434_v2, 0.0 }
 0xaff   :  { %8249 = vpow2.f32 %v4193_v54  ;;  %v8240_v11 = vpop.eup %8239  ;;  %v3836_v38 = vmul.f32 1.442695, %v3808_v52 }
 0xb00   :  { %v3795_v43 = vpop.xlane.xlu0 %3794  ;;  %8251 = vpow2.f32 %v4923_v61 }
 0xb01   :  { %4600 = vrot.lane.b32.xlu1 %v13460_v1, %s8731_s30  ;;  %v3811_v33 = vsub.f32 %v11538_v29, %v3795_v43  ;;  %v4535_v29 = vsub.f32 %v13463_v5, %v11587_v25  ;;  %8253 = vpow2.f32 %v4925_v15  ;;  %v13466_v5 = vld [vmem:[#allocation82_spill] sm:$0xff] }
 0xb02   :  { %8255 = vpow2.f32 %v4197_v59 }
 0xb03   :  { %v8242_v51 = vpop.eup %8241  ;;  %v3842_v20 = vmul.f32 1.442695, %v3811_v33  ;;  %v4552_v41 = vmul.f32 1.442695, %v4535_v29  ;;  %v4437_v29 = vadd.f32 %v11280_v6, %v13466_v5 }
 0xb04   :  { %v4152_v47 = vpop.xlane.xlu0 %4151 }
 0xb05   :  { %v4168_v62 = vsub.f32 %v11545_v21, %v4152_v47  ;;  %4973 = vrot.lane.b32.xlu1 %v13460_v1, %s8746_s12  ;;  %vm4453_vm8 = vcmp.gt.f32.partialorder %v4437_v29, 0.0 }
 0xb06   :  { %v8244_v44 = vpop.eup %8243 }
 0xb07   :  { %v8246_v31 = vpop.eup %8245  ;;  %v4199_v32 = vmul.f32 1.442695, %v4168_v62 }
 0xb08   :  { %v8248_v21 = vpop.eup %8247  ;;  %v3791_v57 = vpop.xlane.xlu0 %3790  ;;  %v4205_v55 = vpack.c.bf16 %v8246_v31, %v8240_v11  ;;  %v4466_v31 = vmul.f32 0.2, %v4434_v2 }
 0xb09   :  { %v8250_v42 = vpop.eup %8249  ;;  %8257 = vpow2.f32 %v4199_v32  ;;  %v3809_v23 = vsub.f32 %v11549_v17, %v3791_v57  ;;  %4520 = vmax.xlane.f32.xlu0 %v11709_v58  ;;  %4602 = vrot.lane.b32.xlu1 %v13464_v10, %s8731_s30  ;;  %v4206_v25 = vpack.c.bf16 %v8242_v51, %v8248_v21  ;;  %v11721_v17 = vpop.xlane.xlu1 %4512 }
 0xb0a   :  { %8259 = vpow2.f32 %v4550_v39  ;;  %7564 = vmatprep.mubr.bf16.mxu0 %v4205_v55  ;;  %v4207_v54 = vpack.c.bf16 %v8244_v44, %v8250_v42  ;;  %v8252_v4 = vpop.eup %8251  ;;  %v4482_v21 = vsel %vm4450_vm7, %v4434_v2, %v4466_v31 }
 0xb0b   :  { %8261 = vpow2.f32 %v3836_v38  ;;  %v3838_v18 = vmul.f32 1.442695, %v3809_v23  ;;  %7565 = vmatmul.mubr.bf16.gmra.mrb[88].mxu0 %v4206_v25  ;;  %v8254_v40 = vpop.eup %8253  ;;  %v13467_v38 = vld [vmem:[#allocation72_spill] sm:$0xff]  ;;  %v11736_v57 = vadd.f32 %v4482_v21, %v13429_v27 }
 0xb0c   :  { %8263 = vpow2.f32 %v3842_v20  ;;  %7568 = vmatprep.mubr.bf16.mxu0 %v4207_v54  ;;  %v11719_v28 = vpop.xlane.xlu0 %4881  ;;  %v8256_v50 = vpop.eup %8255  ;;  %v4955_v15 = vpack.c.bf16 %v8254_v40, %v8252_v4  ;;  %v4807_v32 = vadd.f32 %v11313_v13, %v13467_v38  ;;  %v4469_v20 = vmul.f32 0.2, %v4437_v29  ;;  %v13470_v4 = vld [vmem:[#allocation63_spill] sm:$0xff] }
 0xb0d   :  { %8265 = vpow2.f32 %v3838_v18  ;;  %v4968_v43 = vpop.permute.xlu1 %4967 }
 0xb0e   :  { %8267 = vpow2.f32 %v3840_v60  ;;  %v4986_v11 = vsel %vm321_vm0, %v4968_v43, 1065369472  ;;  %v4839_v55 = vmul.f32 0.2, %v4807_v32  ;;  %v4485_v42 = vsel %vm4453_vm8, %v4437_v29, %v4469_v20  ;;  %v13474_v29 = vld [vmem:[#allocation35_spill] sm:$0xff] }
 0xb0f   :  { %8269 = vpow2.f32 %v4552_v41  ;;  %vm4823_vm9 = vcmp.gt.f32.partialorder %v4807_v32, 0.0  ;;  %v11742_v25 = vadd.f32 %v4485_v42, %v13433_v19  ;;  %v13469_v41 = vld [vmem:[#allocation61_spill] sm:$0xff] }
 0xb10   :  { %v4593_v0 = vpop.permute.xlu0 %4592  ;;  %v4855_v60 = vsel %vm4823_vm9, %v4807_v32, %v4839_v55  ;;  %v4809_v18 = vadd.f32 %v11313_v13, %v13469_v41 }
 0xb11   :  { %v4610_v49 = vsel %vm321_vm0, %v4593_v0, 1065369472  ;;  %v4806_v0 = vadd.f32 %v11313_v13, %v13470_v4  ;;  %v11750_v40 = vadd.f32 %v4855_v60, %v13429_v27  ;;  %v13475_v60 = vld [vmem:[#allocation39_spill] sm:$0xff] }
 0xb12   :  { %7574 = vmatprep.subr.bf16.mxu1 %v4610_v49  ;;  %v4841_v43 = vmul.f32 0.2, %v4809_v18  ;;  %vm4825_vm11 = vcmp.gt.f32.partialorder %v4809_v18, 0.0 }
 0xb13   :  { %v8258_v9 = vpop.eup %8257  ;;  %7575 = vmatpush3.bf16.msra.mxu1 %v4610_v49  ;;  %v13471_v49 = vld [vmem:[#allocation89_spill] sm:$0xff]  ;;  %vm4822_vm2 = vcmp.gt.f32.partialorder %v4806_v0, 0.0 }
 0xb14   :  { %v8260_v8 = vpop.eup %8259  ;;  %v4966_v1 = vpop.permute.xlu0 %4965  ;;  %v4208_v61 = vpack.c.bf16 %v8258_v9, %v8256_v50  ;;  %v4810_v50 = vadd.f32 %v11313_v13, %v13471_v49 }
 0xb15   :  { %v8262_v30 = vpop.eup %8261  ;;  %v4983_v36 = vsel %vm321_vm0, %v4966_v1, 1065369472  ;;  %v13472_v1 = vld [vmem:[#allocation46_spill] sm:$0xff] }
 0xb16   :  { %v8264_v52 = vpop.eup %8263  ;;  %7569 = vmatmul.mubr.bf16.gmra.mrb[92].mxu0 %v4208_v61  ;;  %7606 = vmatprep.subr.bf16.mxu0 %v4983_v36  ;;  %v4435_v61 = vadd.f32 %v11280_v6, %v13472_v1  ;;  %vm4826_vm3 = vcmp.gt.f32.partialorder %v4810_v50, 0.0 }
 0xb17   :  { %v8266_v56 = vpop.eup %8265  ;;  %7607 = vmatpush3.bf16.msra.mxu0 %v4983_v36  ;;  %7620 = vmatprep.mubr.bf16.mxu0 %v4955_v15  ;;  %v4842_v15 = vmul.f32 0.2, %v4810_v50 }
 0xb18   :  { %v8268_v59 = vpop.eup %8267  ;;  %7608 = vmatprep.subr.bf16.mxu0 %v4986_v11  ;;  %v4595_v33 = vpop.permute.xlu0 %4594  ;;  %v3850_v47 = vpack.c.bf16 %v8266_v56, %v8262_v30  ;;  %v4838_v30 = vmul.f32 0.2, %v4806_v0  ;;  %v4857_v56 = vsel %vm4825_vm11, %v4809_v18, %v4841_v43  ;;  %vm4451_vm4 = vcmp.gt.f32.partialorder %v4435_v61, 0.0 }
 0xb19   :  { %v8270_v51 = vpop.eup %8269  ;;  %v4613_v62 = vsel %vm321_vm0, %v4595_v33, 1065369472  ;;  %v3851_v44 = vpack.c.bf16 %v8264_v52, %v8268_v59  ;;  %v13473_v33 = vld [vmem:[#allocation83_spill] sm:$0xff] }
 0xb1a   :  { %7536 = vmatprep.mubr.bf16.mxu1 %v3850_v47  ;;  %7576 = vmatprep.subr.bf16.mxu1 %v4613_v62  ;;  %v4582_v39 = vpack.c.bf16 %v8270_v51, %v8260_v8  ;;  %v4854_v59 = vsel %vm4822_vm2, %v4806_v0, %v4838_v30  ;;  %v11765_v47 = vadd.f32 %v4857_v56, %v13473_v33 }
 0xb1b   :  { %7537 = vmatmul.mubr.bf16.gmra.mrb[76].mxu1 %v3851_v44  ;;  %7609 = vmatpush3.bf16.msra.mxu0 %v4986_v11  ;;  %v11768_v51 = vadd.f32 %v4854_v59, %v13424_v16 }
 0xb1c   :  { %7577 = vmatpush3.bf16.msra.mxu1 %v4613_v62  ;;  %7588 = vmatprep.mubr.bf16.mxu1 %v4582_v39  ;;  %v4858_v62 = vsel %vm4826_vm3, %v4810_v50, %v4842_v15 }
 0xb1d   :  { %v11773_v39 = vadd.f32 %v4858_v62, %v13433_v19 }
 0xb1f   :  { %4971 = vrot.lane.b32.xlu0 %v13456_v22, %s8746_s12  ;;  %v13468_v22 = vld [vmem:[#allocation48_spill] sm:$0xff] }
 0xb20   :  { %v4808_v23 = vadd.f32 %v11313_v13, %v13468_v22  ;;  %v4467_v13 = vmul.f32 0.2, %v4435_v61 }
 0xb22   :  { %v4840_v54 = vmul.f32 0.2, %v4808_v23  ;;  %vm4824_vm10 = vcmp.gt.f32.partialorder %v4808_v23, 0.0  ;;  %v4483_v44 = vsel %vm4451_vm4, %v4435_v61, %v4467_v13 }
 0xb23   :  { %v11776_v14 = vadd.f32 %v4483_v44, %v13430_v35 }
 0xb24   :  { %v4856_v8 = vsel %vm4824_vm10, %v4808_v23, %v4840_v54  ;;  %v4436_v54 = vadd.f32 %v11280_v6, %v13475_v60 }
 0xb25   :  { %v11760_v36 = vadd.f32 %v4856_v8, %v13430_v35 }
 0xb26   :  { %v4468_v41 = vmul.f32 0.2, %v4436_v54  ;;  %vm4452_vm5 = vcmp.gt.f32.partialorder %v4436_v54, 0.0 }
 0xb28   :  { %v4484_v4 = vsel %vm4452_vm5, %v4436_v54, %v4468_v41  ;;  %v13480_v54 = vld [vmem:[#allocation93_spill] sm:$0xff] }
 0xb29   :  { %v11809_v49 = vadd.f32 %v4484_v4, %v13473_v33  ;;  %v4537_v41 = vsub.f32 %v13480_v54, %v11605_v45 }
 0xb2d   :  { %4526 = vmax.xlane.f32.xlu1 %v11736_v57 }
 0xb31   :  { %4532 = vmax.xlane.f32.xlu1 %v11742_v25 }
 0xb34   :  { %v11754_v9 = vpop.xlane.xlu1 %4514 }
 0xb35   :  { %4899 = vmax.xlane.f32.xlu1 %v11750_v40 }
 0xb38   :  { %v4970_v52 = vpop.permute.xlu1 %4969 }
 0xb39   :  { %4901 = vmax.xlane.f32.xlu1 %v11760_v36  ;;  %v4989_v11 = vsel %vm321_vm0, %v4970_v52, 1065369472 }
 0xb3a   :  { %7610 = vmatprep.subr.bf16.mxu0 %v4989_v11 }
 0xb3b   :  { %7611 = vmatpush3.bf16.msra.mxu0 %v4989_v11 }
 0xb3d   :  { %4903 = vmax.xlane.f32.xlu1 %v11765_v47 }
 0xb3e   :  { %4897 = vmax.xlane.f32.xlu0 %v11768_v51 }
 0xb41   :  { %4905 = vmax.xlane.f32.xlu1 %v11773_v39 }
 0xb42   :  { %4528 = vmax.xlane.f32.xlu0 %v11776_v14 }
 0xb49   :  { %v11780_v2 = vpop.xlane.xlu0 %4510 }
 0xb4d   :  { %v11782_v31 = vpop.xlane.xlu0 %4516 }
 0xb51   :  { %v11784_v5 = vpop.xlane.xlu0 %4883 }
 0xb52   :  { %4604 = vrot.lane.b32.xlu1 %v13474_v29, %s8731_s30 }
 0xb55   :  { %v11788_v38 = vpop.xlane.xlu0 %4885 }
 0xb58   :  { %4975 = vrot.lane.b32.xlu0 %v13464_v10, %s8746_s12 }
 0xb59   :  { %v11792_v32 = vpop.xlane.xlu0 %4887 }
 0xb5d   :  { %v11794_v21 = vpop.xlane.xlu0 %4889 }
 0xb61   :  { %v4597_v20 = vpop.permute.xlu0 %4596 }
 0xb62   :  { %v4616_v55 = vsel %vm321_vm0, %v4597_v20, 1065369472 }
 0xb63   :  { %7578 = vmatprep.subr.bf16.mxu1 %v4616_v55 }
 0xb64   :  { %7579 = vmatpush3.bf16.msra.mxu1 %v4616_v55 }
 0xb65   :  { %v4599_v42 = vpop.permute.xlu0 %4598 }
 0xb66   :  { %v4619_v22 = vsel %vm321_vm0, %v4599_v42, 1065369472 }
 0xb67   :  { %7580 = vmatprep.subr.bf16.mxu1 %v4619_v22 }
 0xb68   :  { %7581 = vmatpush3.bf16.msra.mxu1 %v4619_v22 }
 0xb69   :  { %v11798_v23 = vpop.xlane.xlu1 %4518 }
 0xb6d   :  { %v11802_v10 = vpop.xlane.xlu1 %4522 }
 0xb6e   :  { %v4544_v46 = vsub.f32 %v11648_v26, %v11802_v10 }
 0xb70   :  { %v4570_v10 = vmul.f32 1.442695, %v4544_v46 }
 0xb71   :  { %v11804_v18 = vpop.xlane.xlu1 %4524 }
 0xb75   :  { %v11806_v0 = vpop.xlane.xlu1 %4891 }
 0xb77   :  { %4530 = vmax.xlane.f32.xlu0 %v11809_v49 }
 0xb79   :  { %v11812_v50 = vpop.xlane.xlu1 %4893 }
 0xb7d   :  { %v11814_v8 = vpop.xlane.xlu1 %4895 }
 0xb81   :  { %v4601_v43 = vpop.permute.xlu1 %4600 }
 0xb82   :  { %v4622_v6 = vsel %vm321_vm0, %v4601_v43, 1065369472  ;;  %v4538_v43 = vsub.f32 %v11581_v12, %v11780_v2 }
 0xb83   :  { %7582 = vmatprep.subr.bf16.mxu1 %v4622_v6 }
 0xb84   :  { %7583 = vmatpush3.bf16.msra.mxu1 %v4622_v6  ;;  %v13481_v6 = vld [vmem:[#allocation53_spill] sm:$0xff]  ;;  %v4558_v19 = vmul.f32 1.442695, %v4538_v43 }
 0xb85   :  { %v4974_v1 = vpop.permute.xlu1 %4973 }
 0xb86   :  { %v4995_v13 = vsel %vm321_vm0, %v4974_v1, 1065369472  ;;  %v4536_v1 = vsub.f32 %v13481_v6, %v11596_v48 }
 0xb88   :  { %v4554_v54 = vmul.f32 1.442695, %v4536_v1 }
 0xb89   :  { %v4603_v61 = vpop.permute.xlu1 %4602 }
 0xb8a   :  { %v4625_v30 = vsel %vm321_vm0, %v4603_v61, 1065369472  ;;  %v13482_v61 = vld [vmem:[#allocation38_spill] sm:$0xff] }
 0xb8b   :  { %7584 = vmatprep.subr.bf16.mxu1 %v4625_v30 }
 0xb8c   :  { %7585 = vmatpush3.bf16.msra.mxu1 %v4625_v30  ;;  %v4539_v30 = vsub.f32 %v13482_v61, %v11721_v17  ;;  %v13487_v17 = vld [vmem:[#allocation50_spill] sm:$0xff] }
 0xb8d   :  { %4977 = vrot.lane.b32.xlu0 %v13474_v29, %s8746_s12  ;;  %v4541_v2 = vsub.f32 %v13487_v17, %v11782_v31  ;;  %v13490_v31 = vld [vmem:[#allocation54_spill] sm:$0xff] }
 0xb8e   :  { %v4560_v12 = vmul.f32 1.442695, %v4539_v30  ;;  %v13488_v30 = vld [vmem:[#allocation60_spill] sm:$0xff]  ;;  %v4542_v17 = vsub.f32 %v13490_v31, %v11798_v23 }
 0xb90   :  { %v4566_v23 = vmul.f32 1.442695, %v4542_v17 }
 0xb96   :  { %v4521_v15 = vpop.xlane.xlu0 %4520 }
 0xb97   :  { %v4543_v6 = vsub.f32 %v11709_v58, %v4521_v15  ;;  %v4564_v58 = vmul.f32 1.442695, %v4541_v2  ;;  %v4545_v2 = vsub.f32 %v11655_v34, %v11804_v18 }
 0xb99   :  { %v4572_v18 = vmul.f32 1.442695, %v4545_v2 }
 0xb9a   :  { %v4972_v52 = vpop.permute.xlu0 %4971 }
 0xb9b   :  { %v4992_v56 = vsel %vm321_vm0, %v4972_v52, 1065369472  ;;  %v4556_v52 = vmul.f32 1.442695, %v4537_v41 }
 0xb9c   :  { %7612 = vmatprep.subr.bf16.mxu0 %v4992_v56 }
 0xb9d   :  { %7613 = vmatpush3.bf16.msra.mxu0 %v4992_v56  ;;  %8271 = vpow2.f32 %v4556_v52  ;;  %v4540_v52 = vsub.f32 %v13488_v30, %v11754_v9 }
 0xb9e   :  { %7614 = vmatprep.subr.bf16.mxu0 %v4995_v13  ;;  %8273 = vpow2.f32 %v4558_v19 }
 0xb9f   :  { %8275 = vpow2.f32 %v4554_v54  ;;  %v4568_v54 = vmul.f32 1.442695, %v4543_v6  ;;  %v4562_v30 = vmul.f32 1.442695, %v4540_v52 }
 0xba0   :  { %8277 = vpow2.f32 %v4560_v12 }
 0xba1   :  { %7615 = vmatpush3.bf16.msra.mxu0 %v4995_v13  ;;  %8279 = vpow2.f32 %v4564_v58 }
 0xba2   :  { %8281 = vpow2.f32 %v4568_v54 }
 0xba3   :  { %8283 = vpow2.f32 %v4562_v30 }
 0xba4   :  { %v11822_v11 = vpop.f32.mrb[64].mxu1  ;;  %8285 = vpow2.f32 %v4566_v23 }
 0xba5   :  { %13476 = vst [vmem:[#allocation66_spill] sm:$0xff] %v11822_v11  ;;  %5120 = vrot.lane.b32.xlu1 %v11822_v11, %s8745_s11  ;;  %v11826_v59 = vpop.f32.mrb[65].mxu1  ;;  %8287 = vpow2.f32 %v4572_v18 }
 0xba6   :  { %13477 = vst [vmem:[#allocation42_spill] sm:$0xff] %v11826_v59  ;;  %v11828_v62 = vpop.f32.mrb[66].mxu1 }
 0xba7   :  { %13478 = vst [vmem:[#allocation67_spill] sm:$0xff] %v11828_v62  ;;  %5122 = vrot.lane.b32.xlu0 %v11828_v62, %s8745_s11  ;;  %v11832_v44 = vpop.f32.mrb[67].mxu1  ;;  %v8272_v17 = vpop.eup %8271 }
 0xba8   :  { %13479 = vst [vmem:[#allocation69_spill] sm:$0xff] %v11832_v44 }
 0xbb4   :  { %v11834_v29 = vpop.f32.mrb[80].mxu0 }
 0xbb5   :  { %v11836_v20 = vpop.f32.mrb[81].mxu0  ;;  %5184 = vrot.lane.b32.xlu1 %v11834_v29, %s8748_s23 }
 0xbb6   :  { %v11840_v55 = vpop.f32.mrb[82].mxu0 }
 0xbb7   :  { %v11842_v42 = vpop.f32.mrb[83].mxu0  ;;  %5186 = vrot.lane.b32.xlu0 %v11840_v55, %s8748_s23 }
 0xbb9   :  { %5116 = vrot.lane.b32.xlu1 %v11826_v59, %s8745_s11 }
 0xbba   :  { %v11848_v22 = vpop.xlane.xlu1 %4526 }
 0xbbb   :  { %5182 = vrot.lane.b32.xlu0 %v11842_v42, %s8748_s23  ;;  %v4546_v34 = vsub.f32 %v11736_v57, %v11848_v22 }
 0xbbd   :  { %5180 = vrot.lane.b32.xlu1 %v11836_v20, %s8748_s23  ;;  %v4574_v23 = vmul.f32 1.442695, %v4546_v34 }
 0xbbe   :  { %v11854_v60 = vpop.xlane.xlu1 %4532 }
 0xbc1   :  { %5118 = vrot.lane.b32.xlu1 %v11832_v44, %s8745_s11 }
 0xbc2   :  { %v11860_v4 = vpop.xlane.xlu1 %4899 }
 0xbc6   :  { %v11868_v56 = vpop.f32.mrb[68].mxu1  ;;  %v11870_v13 = vpop.xlane.xlu1 %4901 }
 0xbc7   :  { %13483 = vst [vmem:[#allocation90_spill] sm:$0xff] %v11868_v56  ;;  %5128 = vrot.lane.b32.xlu1 %v11868_v56, %s8745_s11  ;;  %v11874_v45 = vpop.f32.mrb[69].mxu1 }
 0xbc8   :  { %13484 = vst [vmem:[#allocation70_spill] sm:$0xff] %v11874_v45  ;;  %v11876_v35 = vpop.f32.mrb[70].mxu1 }
 0xbc9   :  { %13485 = vst [vmem:[#allocation41_spill] sm:$0xff] %v11876_v35  ;;  %5130 = vrot.lane.b32.xlu0 %v11876_v35, %s8745_s11  ;;  %v11880_v48 = vpop.f32.mrb[71].mxu1 }
 0xbca   :  { %13486 = vst [vmem:[#allocation79_spill] sm:$0xff] %v11880_v48  ;;  %v11884_v41 = vpop.f32.mrb[84].mxu0  ;;  %v11886_v43 = vpop.xlane.xlu1 %4903 }
 0xbcb   :  { %5192 = vrot.lane.b32.xlu1 %v11884_v41, %s8748_s23  ;;  %v11891_v1 = vpop.f32.mrb[85].mxu0  ;;  %v11893_v61 = vpop.xlane.xlu0 %4897 }
 0xbcc   :  { %v11897_v27 = vpop.f32.mrb[86].mxu0 }
 0xbcd   :  { %13489 = vst [vmem:[#allocation52_spill] sm:$0xff] %v11897_v27  ;;  %5194 = vrot.lane.b32.xlu0 %v11897_v27, %s8748_s23  ;;  %v11903_v19 = vpop.f32.mrb[87].mxu0 }
 0xbce   :  { %13491 = vst [vmem:[#allocation64_spill] sm:$0xff] %v11903_v19  ;;  %v11905_v15 = vpop.f32.mrb[72].mxu1  ;;  %v11907_v33 = vpop.xlane.xlu1 %4905 }
 0xbcf   :  { %13492 = vst [vmem:[#allocation45_spill] sm:$0xff] %v11905_v15  ;;  %5124 = vrot.lane.b32.xlu1 %v11874_v45, %s8745_s11  ;;  %v11911_v9 = vpop.f32.mrb[73].mxu1  ;;  %v4529_v12 = vpop.xlane.xlu0 %4528 }
 0xbd0   :  { %13493 = vst [vmem:[#allocation78_spill] sm:$0xff] %v11911_v9  ;;  %v11913_v24 = vpop.f32.mrb[74].mxu1  ;;  %v4547_v16 = vsub.f32 %v11776_v14, %v4529_v12 }
 0xbd1   :  { %13494 = vst [vmem:[#allocation91_spill] sm:$0xff] %v11913_v24  ;;  %5126 = vrot.lane.b32.xlu0 %v11880_v48, %s8745_s11  ;;  %v11917_v31 = vpop.f32.mrb[75].mxu1  ;;  %v8274_v48 = vpop.eup %8273 }
 0xbd2   :  { %13495 = vst [vmem:[#allocation32_spill] sm:$0xff] %v11917_v31  ;;  %v4605_v6 = vpop.permute.xlu1 %4604  ;;  %v8276_v14 = vpop.eup %8275  ;;  %v4576_v12 = vmul.f32 1.442695, %v4547_v16 }
 0xbd3   :  { %5188 = vrot.lane.b32.xlu1 %v11891_v1, %s8748_s23  ;;  %v4976_v52 = vpop.permute.xlu0 %4975  ;;  %v4628_v53 = vsel %vm321_vm0, %v4605_v6, 1065369472  ;;  %v8278_v54 = vpop.eup %8277  ;;  %v4583_v26 = vpack.c.bf16 %v8272_v17, %v8276_v14 }
 0xbd4   :  { %7586 = vmatprep.subr.bf16.mxu1 %v4628_v53  ;;  %v4998_v58 = vsel %vm321_vm0, %v4976_v52, 1065369472  ;;  %v4584_v30 = vpack.c.bf16 %v8278_v54, %v8274_v48  ;;  %8289 = vpow2.f32 %v4576_v12  ;;  %v8280_v57 = vpop.eup %8279 }
 0xbd5   :  { %5190 = vrot.lane.b32.xlu0 %v11903_v19, %s8748_s23  ;;  %7616 = vmatprep.subr.bf16.mxu0 %v4998_v58  ;;  %8291 = vpow2.f32 %v4570_v10 }
 0xbd6   :  { %7587 = vmatpush3.bf16.msra.mxu1 %v4628_v53  ;;  %7617 = vmatpush3.bf16.msra.mxu0 %v4998_v58  ;;  %v8282_v53 = vpop.eup %8281  ;;  %8293 = vpow2.f32 %v4574_v23 }
 0xbd7   :  { %5136 = vrot.lane.b32.xlu1 %v11905_v15, %s8745_s11  ;;  %v8284_v22 = vpop.eup %8283 }
 0xbd8   :  { %v8286_v2 = vpop.eup %8285  ;;  %v4585_v48 = vpack.c.bf16 %v8280_v57, %v8284_v22 }
 0xbd9   :  { %5138 = vrot.lane.b32.xlu0 %v11913_v24, %s8745_s11  ;;  %7589 = vmatmul.mubr.bf16.vlgmr.msra.gmra.mrb[80].mxu1 %v4583_v26  ;;  %v4586_v52 = vpack.c.bf16 %v8282_v53, %v8286_v2  ;;  %v8288_v58 = vpop.eup %8287 }
 0xbda   :  { %7592 = vmatprep.mubr.bf16.mxu1 %v4584_v30 }
 0xbde   :  { %v11936_v16 = vpop.f32.mrb[88].mxu0  ;;  %v8290_v34 = vpop.eup %8289 }
 0xbdf   :  { %13496 = vst [vmem:[#allocation73_spill] sm:$0xff] %v11936_v16  ;;  %5200 = vrot.lane.b32.xlu1 %v11936_v16, %s8748_s23  ;;  %v11940_v46 = vpop.f32.mrb[89].mxu0  ;;  %v8292_v14 = vpop.eup %8291 }
 0xbe0   :  { %13497 = vst [vmem:[#allocation34_spill] sm:$0xff] %v11940_v46  ;;  %v11942_v6 = vpop.f32.mrb[90].mxu0  ;;  %v8294_v18 = vpop.eup %8293  ;;  %v4587_v54 = vpack.c.bf16 %v8288_v58, %v8292_v14  ;;  %v13509_v58 = vld [vmem:[#allocation36_spill] sm:$0xff] }
 0xbe1   :  { %13498 = vst [vmem:[#allocation40_spill] sm:$0xff] %v11942_v6  ;;  %5202 = vrot.lane.b32.xlu0 %v11942_v6, %s8748_s23  ;;  %v11946_v17 = vpop.f32.mrb[91].mxu0  ;;  %7593 = vmatmul.mubr.bf16.gmra.mrb[84].mxu1 %v4585_v48  ;;  %v4588_v12 = vpack.c.bf16 %v8290_v34, %v8294_v18  ;;  %v13508_v48 = vld [vmem:[#allocation44_spill] sm:$0xff]  ;;  %v4912_v34 = vsub.f32 %v13509_v58, %v11788_v38 }
 0xbe2   :  { %13499 = vst [vmem:[#allocation47_spill] sm:$0xff] %v11946_v17  ;;  %7596 = vmatprep.mubr.bf16.mxu1 %v4586_v52  ;;  %v4910_v52 = vsub.f32 %v13508_v48, %v11719_v28  ;;  %v13510_v14 = vld [vmem:[#allocation56_spill] sm:$0xff] }
 0xbe3   :  { %5132 = vrot.lane.b32.xlu1 %v11911_v9, %s8745_s11  ;;  %v4909_v18 = vsub.f32 %v13510_v14, %v11713_v7  ;;  %v4933_v28 = vmul.f32 1.442695, %v4912_v34  ;;  %v13513_v7 = vld [vmem:[#allocation75_spill] sm:$0xff] }
 0xbe4   :  { %v4914_v58 = vsub.f32 %v13513_v7, %v11794_v21 }
 0xbe5   :  { %5134 = vrot.lane.b32.xlu0 %v11917_v31, %s8745_s11  ;;  %v4927_v48 = vmul.f32 1.442695, %v4909_v18 }
 0xbe6   :  { %v4937_v14 = vmul.f32 1.442695, %v4914_v58 }
 0xbe7   :  { %5196 = vrot.lane.b32.xlu1 %v11940_v46, %s8748_s23 }
 0xbe9   :  { %5198 = vrot.lane.b32.xlu0 %v11946_v17, %s8748_s23  ;;  %v11956_v26 = vpop.f32.mrb[92].mxu0  ;;  %7597 = vmatmul.mubr.bf16.gmra.mrb[88].mxu1 %v4587_v54  ;;  %v13511_v54 = vld [vmem:[#allocation76_spill] sm:$0xff] }
 0xbea   :  { %13500 = vst [vmem:[#allocation51_spill] sm:$0xff] %v11956_v26  ;;  %v11958_v10 = vpop.f32.mrb[93].mxu0  ;;  %7600 = vmatprep.mubr.bf16.mxu1 %v4588_v12  ;;  %v4911_v12 = vsub.f32 %v13511_v54, %v11784_v5  ;;  %v4916_v5 = vsub.f32 %v11675_v37, %v11812_v50  ;;  %v4918_v37 = vsub.f32 %v11768_v51, %v11893_v61 }
 0xbeb   :  { %13501 = vst [vmem:[#allocation37_spill] sm:$0xff] %v11958_v10  ;;  %v11960_v30 = vpop.f32.mrb[94].mxu0  ;;  %v4920_v50 = vsub.f32 %v11760_v36, %v11870_v13 }
 0xbec   :  { %13502 = vst [vmem:[#allocation43_spill] sm:$0xff] %v11960_v30  ;;  %v11962_v23 = vpop.f32.mrb[95].mxu0  ;;  %v4931_v38 = vmul.f32 1.442695, %v4911_v12  ;;  %v4919_v12 = vsub.f32 %v11750_v40, %v11860_v4  ;;  %v4945_v61 = vmul.f32 1.442695, %v4918_v37  ;;  %v4921_v4 = vsub.f32 %v11765_v47, %v11886_v43 }
 0xbed   :  { %13503 = vst [vmem:[#allocation49_spill] sm:$0xff] %v11962_v23 }
 0xbee   :  { %v11964_v57 = vpop.f32.mrb[76].mxu1  ;;  %v4947_v7 = vmul.f32 1.442695, %v4919_v12 }
 0xbef   :  { %13504 = vst [vmem:[#allocation33_spill] sm:$0xff] %v11964_v57  ;;  %5144 = vrot.lane.b32.xlu1 %v11964_v57, %s8745_s11  ;;  %v11968_v53 = vpop.f32.mrb[77].mxu1  ;;  %v4929_v57 = vmul.f32 1.442695, %v4910_v52  ;;  %v4549_v52 = vsub.f32 %v11742_v25, %v11854_v60 }
 0xbf0   :  { %13505 = vst [vmem:[#allocation92_spill] sm:$0xff] %v11968_v53  ;;  %v11970_v22 = vpop.f32.mrb[78].mxu1 }
 0xbf1   :  { %13506 = vst [vmem:[#allocation82_spill] sm:$0xff] %v11970_v22  ;;  %5146 = vrot.lane.b32.xlu0 %v11970_v22, %s8745_s11  ;;  %v11974_v2 = vpop.f32.mrb[79].mxu1  ;;  %8295 = vpow2.f32 %v4929_v57  ;;  %v4580_v18 = vmul.f32 1.442695, %v4549_v52 }
 0xbf2   :  { %13507 = vst [vmem:[#allocation72_spill] sm:$0xff] %v11974_v2  ;;  %8297 = vpow2.f32 %v4933_v28 }
 0xbf3   :  { %5208 = vrot.lane.b32.xlu1 %v11956_v26, %s8748_s23  ;;  %8299 = vpow2.f32 %v4927_v48  ;;  %v4949_v48 = vmul.f32 1.442695, %v4920_v50 }
 0xbf4   :  { %8301 = vpow2.f32 %v4931_v38 }
 0xbf5   :  { %5210 = vrot.lane.b32.xlu0 %v11960_v30, %s8748_s23 }
 0xbf7   :  { %5140 = vrot.lane.b32.xlu1 %v11968_v53, %s8745_s11  ;;  %v13512_v53 = vld [vmem:[#allocation84_spill] sm:$0xff] }
 0xbf8   :  { %v4913_v31 = vsub.f32 %v13512_v53, %v11792_v32  ;;  %v4915_v32 = vsub.f32 %v11667_v3, %v11806_v0  ;;  %v4941_v53 = vmul.f32 1.442695, %v4916_v5  ;;  %v4917_v3 = vsub.f32 %v11681_v63, %v11814_v8 }
 0xbf9   :  { %5142 = vrot.lane.b32.xlu0 %v11974_v2, %s8745_s11  ;;  %v4922_v8 = vsub.f32 %v11773_v39, %v11907_v33 }
 0xbfa   :  { %v4935_v34 = vmul.f32 1.442695, %v4913_v31  ;;  %v4939_v57 = vmul.f32 1.442695, %v4915_v32  ;;  %v4943_v13 = vmul.f32 1.442695, %v4917_v3 }
 0xbfb   :  { %5204 = vrot.lane.b32.xlu1 %v11958_v10, %s8748_s23  ;;  %v8296_v31 = vpop.eup %8295 }
 0xbfc   :  { %8303 = vpow2.f32 %v4935_v34  ;;  %v4953_v34 = vmul.f32 1.442695, %v4922_v8 }
 0xbfd   :  { %5206 = vrot.lane.b32.xlu0 %v11962_v23, %s8748_s23  ;;  %8305 = vpow2.f32 %v4937_v14 }
 0xbfe   :  { %8307 = vpow2.f32 %v4941_v53 }
 0xbff   :  { %8309 = vpow2.f32 %v4580_v18  ;;  %v4951_v18 = vmul.f32 1.442695, %v4921_v4 }
 0xc04   :  { %v4531_v54 = vpop.xlane.xlu0 %4530 }
 0xc05   :  { %v4548_v21 = vsub.f32 %v11809_v49, %v4531_v54  ;;  %v8298_v49 = vpop.eup %8297 }
 0xc06   :  { %v8300_v51 = vpop.eup %8299 }
 0xc07   :  { %v4578_v25 = vmul.f32 1.442695, %v4548_v21  ;;  %v8302_v28 = vpop.eup %8301  ;;  %v4956_v36 = vpack.c.bf16 %v8296_v31, %v8300_v51 }
 0xc08   :  { %v4978_v60 = vpop.permute.xlu0 %4977  ;;  %v4957_v38 = vpack.c.bf16 %v8298_v49, %v8302_v28  ;;  %v8304_v63 = vpop.eup %8303 }
 0xc09   :  { %8311 = vpow2.f32 %v4578_v25  ;;  %v5001_v0 = vsel %vm321_vm0, %v4978_v60, 1065369472  ;;  %v8306_v58 = vpop.eup %8305 }
 0xc0a   :  { %8313 = vpow2.f32 %v4939_v57  ;;  %7618 = vmatprep.subr.bf16.mxu0 %v5001_v0  ;;  %v8308_v40 = vpop.eup %8307  ;;  %v4958_v53 = vpack.c.bf16 %v8306_v58, %v8304_v63 }
 0xc0b   :  { %7619 = vmatpush3.bf16.msra.mxu0 %v5001_v0  ;;  %8315 = vpow2.f32 %v4945_v61  ;;  %v8310_v5 = vpop.eup %8309 }
 0xc0c   :  { %8317 = vpow2.f32 %v4949_v48 }
 0xc0d   :  { %8319 = vpow2.f32 %v4943_v13 }
 0xc0e   :  { %7621 = vmatmul.mubr.bf16.vlgmr.msra.gmra.mrb[96].mxu0 %v4956_v36  ;;  %8321 = vpow2.f32 %v4947_v7 }
 0xc0f   :  { %7624 = vmatprep.mubr.bf16.mxu0 %v4957_v38  ;;  %8323 = vpow2.f32 %v4953_v34 }
 0xc10   :  { %8325 = vpow2.f32 %v4951_v18 }
 0xc13   :  { %v8312_v52 = vpop.eup %8311 }
 0xc14   :  { %v8314_v14 = vpop.eup %8313  ;;  %v4589_v32 = vpack.c.bf16 %v8310_v5, %v8312_v52 }
 0xc15   :  { %v4959_v54 = vpack.c.bf16 %v8308_v40, %v8314_v14  ;;  %v8316_v33 = vpop.eup %8315 }
 0xc16   :  { %7601 = vmatmul.mubr.bf16.gmra.mrb[92].mxu1 %v4589_v32  ;;  %7625 = vmatmul.mubr.bf16.gmra.mrb[100].mxu0 %v4958_v53  ;;  %v8318_v39 = vpop.eup %8317 }
 0xc17   :  { %7628 = vmatprep.mubr.bf16.mxu0 %v4959_v54  ;;  %v8320_v21 = vpop.eup %8319  ;;  %v12090_v18 = vpop.permute.xlu1 %5120 }
 0xc18   :  { %v8322_v57 = vpop.eup %8321  ;;  %v4960_v37 = vpack.c.bf16 %v8316_v33, %v8320_v21 }
 0xc19   :  { %v4961_v47 = vpack.c.bf16 %v8318_v39, %v8322_v57  ;;  %v8324_v43 = vpop.eup %8323 }
 0xc1a   :  { %v8326_v25 = vpop.eup %8325 }
 0xc1b   :  { %v4962_v50 = vpack.c.bf16 %v8324_v43, %v8326_v25 }
 0xc1e   :  { %7629 = vmatmul.mubr.bf16.gmra.mrb[104].mxu0 %v4960_v37 }
 0xc1f   :  { %7632 = vmatprep.mubr.bf16.mxu0 %v4961_v47 }
 0xc26   :  { %7633 = vmatmul.mubr.bf16.gmra.mrb[108].mxu0 %v4962_v50  ;;  %v5123_v50 = vpop.permute.xlu0 %5122 }
 0xc27   :  { %v5185_v21 = vpop.permute.xlu1 %5184 }
 0xc2a   :  { %v5187_v15 = vpop.permute.xlu0 %5186 }
 0xc2b   :  { %v5117_v43 = vpop.permute.xlu1 %5116 }
 0xc2e   :  { %v5183_v35 = vpop.permute.xlu0 %5182 }
 0xc2f   :  { %v5181_v9 = vpop.permute.xlu1 %5180 }
 0xc33   :  { %v5119_v45 = vpop.permute.xlu1 %5118 }
 0xc39   :  { %v12134_v56 = vpop.permute.xlu1 %5128 }
 0xc3b   :  { %v12138_v44 = vpop.permute.xlu0 %5130 }
 0xc3d   :  { %v12144_v59 = vpop.permute.xlu1 %5192 }
 0xc3f   :  { %v12148_v62 = vpop.permute.xlu0 %5194 }
 0xc41   :  { %v12154_v11 = vpop.permute.xlu1 %5124 }
 0xc43   :  { %v12158_v22 = vpop.permute.xlu0 %5126 }
 0xc45   :  { %v12162_v2 = vpop.permute.xlu1 %5188 }
 0xc49   :  { %v12166_v24 = vpop.permute.xlu1 %5136 }
 0xcac   :  { %v12020_v60 = vpop.f32.mrb[80].mxu1 }
 0xcad   :  { %5248 = vrot.lane.b32.xlu1 %v12020_v60, %s8749_s25  ;;  %v12024_v31 = vpop.f32.mrb[81].mxu1 }
 0xcae   :  { %v12026_v3 = vpop.f32.mrb[82].mxu1 }
 0xcaf   :  { %5250 = vrot.lane.b32.xlu0 %v12026_v3, %s8749_s25  ;;  %v12030_v0 = vpop.f32.mrb[83].mxu1 }
 0xcb4   :  { %v12032_v49 = vpop.f32.mrb[84].mxu1 }
 0xcb5   :  { %v12034_v12 = vpop.f32.mrb[85].mxu1 }
 0xcb6   :  { %v12036_v51 = vpop.f32.mrb[86].mxu1 }
 0xcb7   :  { %13514 = vst [vmem:[#allocation48_spill] sm:$0xff] %v12036_v51  ;;  %v12038_v61 = vpop.f32.mrb[87].mxu1 }
 0xcb8   :  { %13515 = vst [vmem:[#allocation61_spill] sm:$0xff] %v12038_v61 }
 0xcbc   :  { %v12040_v28 = vpop.f32.mrb[88].mxu1 }
 0xcbd   :  { %13516 = vst [vmem:[#allocation63_spill] sm:$0xff] %v12040_v28  ;;  %v12042_v48 = vpop.f32.mrb[89].mxu1 }
 0xcbe   :  { %13517 = vst [vmem:[#allocation89_spill] sm:$0xff] %v12042_v48  ;;  %v12044_v36 = vpop.f32.mrb[90].mxu1 }
 0xcbf   :  { %13518 = vst [vmem:[#allocation46_spill] sm:$0xff] %v12044_v36  ;;  %v12046_v13 = vpop.f32.mrb[91].mxu1 }
 0xcc0   :  { %13519 = vst [vmem:[#allocation35_spill] sm:$0xff] %v12046_v13 }
 0xce1   :  { %v12048_v38 = vpop.f32.mrb[96].mxu0 }
 0xce2   :  { %5312 = vrot.lane.b32.xlu1 %v12048_v38, %s8751_s27  ;;  %v12052_v7 = vpop.f32.mrb[97].mxu0 }
 0xce3   :  { %v12054_v63 = vpop.f32.mrb[98].mxu0 }
 0xce4   :  { %5314 = vrot.lane.b32.xlu0 %v12054_v63, %s8751_s27  ;;  %v12058_v8 = vpop.f32.mrb[99].mxu0 }
 0xce6   :  { %5244 = vrot.lane.b32.xlu1 %v12024_v31, %s8749_s25 }
 0xce8   :  { %5246 = vrot.lane.b32.xlu0 %v12030_v0, %s8749_s25 }
 0xce9   :  { %v12064_v58 = vpop.f32.mrb[92].mxu1  ;;  %v12066_v40 = vpop.f32.mrb[100].mxu0 }
 0xcea   :  { %13520 = vst [vmem:[#allocation39_spill] sm:$0xff] %v12064_v58  ;;  %v12068_v4 = vpop.f32.mrb[93].mxu1  ;;  %5308 = vrot.lane.b32.xlu1 %v12052_v7, %s8751_s27  ;;  %v12072_v5 = vpop.f32.mrb[101].mxu0 }
 0xceb   :  { %13521 = vst [vmem:[#allocation93_spill] sm:$0xff] %v12068_v4  ;;  %v12074_v52 = vpop.f32.mrb[94].mxu1  ;;  %v12076_v34 = vpop.f32.mrb[102].mxu0 }
 0xcec   :  { %13522 = vst [vmem:[#allocation53_spill] sm:$0xff] %v12074_v52  ;;  %13523 = vst [vmem:[#allocation38_spill] sm:$0xff] %v12076_v34  ;;  %v12078_v14 = vpop.f32.mrb[95].mxu1  ;;  %5310 = vrot.lane.b32.xlu0 %v12058_v8, %s8751_s27  ;;  %v12082_v32 = vpop.f32.mrb[103].mxu0 }
 0xced   :  { %13524 = vst [vmem:[#allocation50_spill] sm:$0xff] %v12078_v14  ;;  %13525 = vst [vmem:[#allocation60_spill] sm:$0xff] %v12082_v32 }
 0xcee   :  { %5256 = vrot.lane.b32.xlu1 %v12032_v49, %s8749_s25 }
 0xcf0   :  { %5258 = vrot.lane.b32.xlu0 %v12036_v51, %s8749_s25  ;;  %v5359_v51 = vsel %vm2547_vm12, %v5123_v50, %v5187_v15  ;;  %v13536_v50 = vmov 0  }
 0xcf1   :  { %v12088_v53 = vpop.f32.mrb[104].mxu0 }
 0xcf2   :  { %13526 = vst [vmem:[#allocation54_spill] sm:$0xff] %v12088_v53  ;;  %5320 = vrot.lane.b32.xlu1 %v12066_v40, %s8751_s27  ;;  %v12094_v54 = vpop.f32.mrb[105].mxu0 }
 0xcf3   :  { %13527 = vst [vmem:[#allocation44_spill] sm:$0xff] %v12094_v54  ;;  %v12096_v33 = vpop.f32.mrb[106].mxu0 }
 0xcf4   :  { %13528 = vst [vmem:[#allocation36_spill] sm:$0xff] %v12096_v33  ;;  %5322 = vrot.lane.b32.xlu0 %v12076_v34, %s8751_s27  ;;  %v12100_v39 = vpop.f32.mrb[107].mxu0 }
 0xcf5   :  { %13529 = vst [vmem:[#allocation56_spill] sm:$0xff] %v12100_v39 }
 0xcf6   :  { %5252 = vrot.lane.b32.xlu1 %v12034_v12, %s8749_s25 }
 0xcf8   :  { %5254 = vrot.lane.b32.xlu0 %v12038_v61, %s8749_s25 }
 0xcf9   :  { %v12106_v57 = vpop.f32.mrb[108].mxu0 }
 0xcfa   :  { %13530 = vst [vmem:[#allocation76_spill] sm:$0xff] %v12106_v57  ;;  %5316 = vrot.lane.b32.xlu1 %v12072_v5, %s8751_s27  ;;  %v12110_v37 = vpop.f32.mrb[109].mxu0 }
 0xcfb   :  { %13531 = vst [vmem:[#allocation84_spill] sm:$0xff] %v12110_v37  ;;  %v12112_v47 = vpop.f32.mrb[110].mxu0 }
 0xcfc   :  { %13532 = vst [vmem:[#allocation75_spill] sm:$0xff] %v12112_v47  ;;  %5318 = vrot.lane.b32.xlu0 %v12082_v32, %s8751_s27  ;;  %v12116_v25 = vpop.f32.mrb[111].mxu0 }
 0xcfd   :  { %13533 = vst [vmem:[#allocation94_spill] sm:$0xff] %v12116_v25 }
 0xcfe   :  { %5264 = vrot.lane.b32.xlu1 %v12040_v28, %s8749_s25  ;;  %v5356_v28 = vsel %vm2547_vm12, %v5117_v43, %v5181_v9 }
 0xd00   :  { %5266 = vrot.lane.b32.xlu0 %v12044_v36, %s8749_s25 }
 0xd02   :  { %5328 = vrot.lane.b32.xlu1 %v12088_v53, %s8751_s27 }
 0xd04   :  { %5330 = vrot.lane.b32.xlu0 %v12096_v33, %s8751_s27 }
 0xd06   :  { %5260 = vrot.lane.b32.xlu1 %v12042_v48, %s8749_s25 }
 0xd08   :  { %5262 = vrot.lane.b32.xlu0 %v12046_v13, %s8749_s25 }
 0xd0a   :  { %5324 = vrot.lane.b32.xlu1 %v12094_v54, %s8751_s27  ;;  %v5358_v54 = vsel %vm2547_vm12, %v12090_v18, %v5185_v21  ;;  %v13534_v21 = vmov 2  }
 0xd0c   :  { %5326 = vrot.lane.b32.xlu0 %v12100_v39, %s8751_s27 }
 0xd0e   :  { %5272 = vrot.lane.b32.xlu1 %v12064_v58, %s8749_s25 }
 0xd10   :  { %5274 = vrot.lane.b32.xlu0 %v12074_v52, %s8749_s25 }
 0xd12   :  { %5336 = vrot.lane.b32.xlu1 %v12106_v57, %s8751_s27  ;;  %v12170_v57 = vpop.permute.xlu1 %5200 }
 0xd14   :  { %5338 = vrot.lane.b32.xlu0 %v12112_v47, %s8751_s27  ;;  %v12164_v47 = vpop.permute.xlu0 %5190 }
 0xd16   :  { %5268 = vrot.lane.b32.xlu1 %v12068_v4, %s8749_s25  ;;  %v12174_v52 = vpop.permute.xlu1 %5132 }
 0xd18   :  { %5270 = vrot.lane.b32.xlu0 %v12078_v14, %s8749_s25  ;;  %v12168_v23 = vpop.permute.xlu0 %5138 }
 0xd1a   :  { %5332 = vrot.lane.b32.xlu1 %v12110_v37, %s8751_s27  ;;  %v12178_v4 = vpop.permute.xlu1 %5196 }
 0xd1c   :  { %5334 = vrot.lane.b32.xlu0 %v12116_v25, %s8751_s27  ;;  %v12172_v14 = vpop.permute.xlu0 %5202 }
 0xd1e   :  { %v12182_v25 = vpop.permute.xlu1 %5144 }
 0xd20   :  { %v12176_v37 = vpop.permute.xlu0 %5134 }
 0xd22   :  { %v12186_v10 = vpop.permute.xlu1 %5208 }
 0xd24   :  { %v12180_v30 = vpop.permute.xlu0 %5198 }
 0xd26   :  { %v12190_v58 = vpop.permute.xlu1 %5140 }
 0xd28   :  { %v12184_v39 = vpop.permute.xlu0 %5146 }
 0xd2a   :  { %v12194_v26 = vpop.permute.xlu1 %5204 }
 0xd2c   :  { %v12188_v13 = vpop.permute.xlu0 %5210 }
 0xd2e   :  { %v5249_v36 = vpop.permute.xlu1 %5248 }
 0xd2f   :  { %v5374_v32 = vsel %vm2564_vm13, %v5358_v54, %v5249_v36 }
 0xd30   :  { %v12192_v17 = vpop.permute.xlu0 %5142 }
 0xd34   :  { %v12196_v33 = vpop.permute.xlu0 %5206 }
 0xd38   :  { %v5251_v6 = vpop.permute.xlu0 %5250 }
 0xd39   :  { %v5375_v18 = vsel %vm2564_vm13, %v5359_v51, %v5251_v6  ;;  %v13535_v51 = vmov 3  }
 0xd54   :  { %v5313_v48 = vpop.permute.xlu1 %5312 }
 0xd55   :  { %v5390_v46 = vsel %vm2581_vm14, %v5374_v32, %v5313_v48  ;;  %v5357_v32 = vsel %vm2547_vm12, %v5119_v45, %v5183_v35  ;;  %v5362_v35 = vsel %vm2547_vm12, %v12134_v56, %v12144_v59 }
 0xd56   :  { %8327 = vrcp.f32 %v5390_v46  ;;  %v5315_v61 = vpop.permute.xlu0 %5314 }
 0xd57   :  { %v5391_v54 = vsel %vm2581_vm14, %v5375_v18, %v5315_v61  ;;  %v5360_v18 = vsel %vm2547_vm12, %v12154_v11, %v12162_v2 }
 0xd58   :  { %v5245_v53 = vpop.permute.xlu1 %5244 }
 0xd59   :  { %v5372_v34 = vsel %vm2564_vm13, %v5356_v28, %v5245_v53 }
 0xd5a   :  { %v5247_v19 = vpop.permute.xlu0 %5246 }
 0xd5b   :  { %v5373_v28 = vsel %vm2564_vm13, %v5357_v32, %v5247_v19  ;;  %v13537_v32 = vmov 1  }
 0xd5c   :  { %v5309_v16 = vpop.permute.xlu1 %5308 }
 0xd5d   :  { %v5388_v27 = vsel %vm2581_vm14, %v5372_v34, %v5309_v16 }
 0xd5e   :  { %8329 = vrcp.f32 %v5388_v27  ;;  %v5311_v36 = vpop.permute.xlu0 %5310 }
 0xd5f   :  { %8331 = vrcp.f32 %v5391_v54  ;;  %v5389_v53 = vsel %vm2581_vm14, %v5373_v28, %v5311_v36 }
 0xd60   :  { %v8328_v48 = vpop.eup %8327  ;;  %v5257_v46 = vpop.permute.xlu1 %5256  ;;  %8333 = vrcp.f32 %v5389_v53 }
 0xd61   :  { %5525 = vperm.xlu1 %7946, %v8328_v48   ;;  %v5378_v19 = vsel %vm2564_vm13, %v5362_v35, %v5257_v46 }
 0xd62   :  { %v5259_v9 = vpop.permute.xlu0 %5258 }
 0xd64   :  { %v5321_v15 = vpop.permute.xlu1 %5320 }
 0xd65   :  { %7947 = vset.pattern.permute.xlu1 %v13534_v21  ;;  %v5394_v34 = vsel %vm2581_vm14, %v5378_v19, %v5321_v15  ;;  %v5361_v19 = vsel %vm2547_vm12, %v12158_v22, %v12164_v47 }
 0xd66   :  { %5605 = vperm.xlu1 %7947, %v8328_v48   ;;  %v5323_v16 = vpop.permute.xlu0 %5322  ;;  %8335 = vrcp.f32 %v5394_v34 }
 0xd68   :  { %v8330_v27 = vpop.eup %8329  ;;  %v5253_v6 = vpop.permute.xlu1 %5252 }
 0xd69   :  { %5597 = vperm.xlu0 %7951, %v8330_v27   ;;  %v12216_v45 = vpop.eup %8331  ;;  %v5376_v56 = vsel %vm2564_vm13, %v5360_v18, %v5253_v6 }
 0xd6a   :  { %7948 = vset.pattern.permute.xlu1 %v13535_v51  ;;  %v5255_v43 = vpop.permute.xlu0 %5254  ;;  %v12225_v59 = vpop.eup %8333 }
 0xd6b   :  { %5685 = vperm.xlu1 %7948, %v8328_v48  }
 0xd6c   :  { %v5317_v61 = vpop.permute.xlu1 %5316 }
 0xd6d   :  { %5609 = vperm.xlu0 %7951, %v12216_v45   ;;  %v5392_v54 = vsel %vm2581_vm14, %v5376_v56, %v5317_v61  ;;  %v5366_v61 = vsel %vm2547_vm12, %v12166_v24, %v12170_v57  ;;  %v5364_v24 = vsel %vm2547_vm12, %v12174_v52, %v12178_v4 }
 0xd6e   :  { %v5319_v46 = vpop.permute.xlu0 %5318  ;;  %8337 = vrcp.f32 %v5392_v54 }
 0xd6f   :  { %7949 = vset.pattern.permute.xlu1 %v13536_v50 }
 0xd70   :  { %5432 = vperm.xlu1 %7949, %v8328_v48   ;;  %v5265_v36 = vpop.permute.xlu1 %5264  ;;  %v12235_v2 = vpop.eup %8335  ;;  %v5363_v48 = vsel %vm2547_vm12, %v12138_v44, %v12148_v62  ;;  %v5377_v62 = vsel %vm2564_vm13, %v5361_v19, %v5255_v43  ;;  %v5368_v19 = vsel %vm2547_vm12, %v12190_v58, %v12194_v26 }
 0xd71   :  { %7958 = vset.pattern.permute.xlu0 %v13535_v51  ;;  %v5379_v53 = vsel %vm2564_vm13, %v5363_v48, %v5259_v9  ;;  %v5393_v9 = vsel %vm2581_vm14, %v5377_v62, %v5319_v46  ;;  %v5382_v22 = vsel %vm2564_vm13, %v5366_v61, %v5265_v36  ;;  %v5367_v46 = vsel %vm2547_vm12, %v12168_v23, %v12172_v14 }
 0xd72   :  { %5681 = vperm.xlu0 %7958, %v12225_v59   ;;  %v5267_v28 = vpop.permute.xlu0 %5266  ;;  %v5395_v15 = vsel %vm2581_vm14, %v5379_v53, %v5323_v16 }
 0xd73   :  { %8339 = vrcp.f32 %v5395_v15  ;;  %v5365_v15 = vsel %vm2547_vm12, %v12176_v37, %v12180_v30 }
 0xd74   :  { %7950 = vset.pattern.permute.xlu1 %v13537_v32  ;;  %v5329_v11 = vpop.permute.xlu1 %5328  ;;  %8341 = vrcp.f32 %v5393_v9 }
 0xd75   :  { %5517 = vperm.xlu1 %7950, %v8330_v27   ;;  %v5398_v47 = vsel %vm2581_vm14, %v5382_v22, %v5329_v11 }
 0xd76   :  { %7959 = vset.pattern.permute.xlu0 %v13536_v50  ;;  %v5331_v44 = vpop.permute.xlu0 %5330  ;;  %8343 = vrcp.f32 %v5398_v47 }
 0xd77   :  { %5427 = vperm.xlu0 %7959, %v12225_v59  }
 0xd78   :  { %v5261_v6 = vpop.permute.xlu1 %5260  ;;  %v12244_v35 = vpop.eup %8337 }
 0xd79   :  { %7952 = vset.pattern.permute.xlu1 %v13535_v51  ;;  %v5380_v43 = vsel %vm2564_vm13, %v5364_v24, %v5261_v6 }
 0xd7a   :  { %5677 = vperm.xlu1 %7952, %v8330_v27  }
 0xd7b   :  { %5452 = vperm.xlu0 %7959, %v12235_v2  }
 0xd7c   :  { %v5325_v16 = vpop.permute.xlu1 %5324 }
 0xd7d   :  { %v12263_v34 = vpop.eup %8339  ;;  %v5396_v18 = vsel %vm2581_vm14, %v5380_v43, %v5325_v16 }
 0xd7e   :  { %7953 = vset.pattern.permute.xlu1 %v13536_v50  ;;  %v12276_v36 = vpop.eup %8341  ;;  %8345 = vrcp.f32 %v5396_v18 }
 0xd7f   :  { %5422 = vperm.xlu1 %7953, %v8330_v27   ;;  %7964 = vset.pattern.permute.xlu0 %v13535_v51  ;;  %v5263_v27 = vpop.permute.xlu0 %5262 }
 0xd80   :  { %5693 = vperm.xlu0 %7964, %v12244_v35   ;;  %v12268_v57 = vpop.permute.xlu1 %5272  ;;  %v12282_v54 = vpop.eup %8343  ;;  %v5381_v14 = vsel %vm2564_vm13, %v5365_v15, %v5263_v27 }
 0xd83   :  { %7954 = vset.pattern.permute.xlu1 %v13537_v32  ;;  %v5327_v56 = vpop.permute.xlu0 %5326 }
 0xd84   :  { %5529 = vperm.xlu1 %7954, %v12216_v45   ;;  %7965 = vset.pattern.permute.xlu0 %v13536_v50  ;;  %v5337_v4 = vpop.permute.xlu1 %5336 }
 0xd85   :  { %5442 = vperm.xlu0 %7965, %v12244_v35  }
 0xd87   :  { %v5275_v52 = vpop.permute.xlu0 %5274 }
 0xd88   :  { %7955 = vset.pattern.permute.xlu1 %v13535_v51  ;;  %v5269_v48 = vpop.permute.xlu1 %5268  ;;  %v12293_v53 = vpop.eup %8345 }
 0xd89   :  { %5689 = vperm.xlu1 %7955, %v12216_v45   ;;  %7966 = vset.pattern.permute.xlu0 %v13535_v51  ;;  %v5384_v30 = vsel %vm2564_vm13, %v5368_v19, %v5269_v48 }
 0xd8a   :  { %5705 = vperm.xlu0 %7966, %v12263_v34  }
 0xd8b   :  { %v5339_v23 = vpop.permute.xlu0 %5338 }
 0xd8c   :  { %v5333_v6 = vpop.permute.xlu1 %5332 }
 0xd8d   :  { %7956 = vset.pattern.permute.xlu1 %v13536_v50  ;;  %v5400_v62 = vsel %vm2581_vm14, %v5384_v30, %v5333_v6 }
 0xd8e   :  { %5437 = vperm.xlu1 %7956, %v12216_v45   ;;  %7969 = vset.pattern.permute.xlu0 %v13534_v21  ;;  %v5383_v45 = vsel %vm2564_vm13, %v5367_v46, %v5267_v28  ;;  %v5397_v28 = vsel %vm2581_vm14, %v5381_v14, %v5327_v56 }
 0xd8f   :  { %5617 = vperm.xlu0 %7969, %v12276_v36   ;;  %v5399_v11 = vsel %vm2581_vm14, %v5383_v45, %v5331_v44  ;;  %v5271_v37 = vpop.permute.xlu0 %5270  ;;  %v5371_v44 = vsel %vm2547_vm12, %v12184_v39, %v12188_v13  ;;  %v5369_v13 = vsel %vm2547_vm12, %v12192_v17, %v12196_v33  ;;  %v5370_v17 = vsel %vm2547_vm12, %v12182_v25, %v12186_v10 }
 0xd90   :  { %8347 = vrcp.f32 %v5399_v11  ;;  %v5387_v26 = vsel %vm2564_vm13, %v5371_v44, %v5275_v52  ;;  %v5385_v39 = vsel %vm2564_vm13, %v5369_v13, %v5271_v37  ;;  %v5386_v47 = vsel %vm2564_vm13, %v5370_v17, %v12268_v57  ;;  %v8026_v13 = vld [vmem:[#allocation21 + $0x8] sm:$0xff]  }
 0xd91   :  { %8349 = vrcp.f32 %v5397_v28  ;;  %v5403_v9 = vsel %vm2581_vm14, %v5387_v26, %v5339_v23  ;;  %v5402_v27 = vsel %vm2581_vm14, %v5386_v47, %v5337_v4  ;;  %v8030_v47 = vld [vmem:[#allocation21 + $0x18] sm:$0xff]  }
 0xd92   :  { %7957 = vset.pattern.permute.xlu1 %v13534_v21  ;;  %8351 = vrcp.f32 %v5400_v62 }
 0xd93   :  { %5601 = vperm.xlu1 %7957, %v12225_v59   ;;  %7975 = vset.pattern.permute.xlu0 %v13536_v50  ;;  %v5335_v16 = vpop.permute.xlu0 %5334  ;;  %8353 = vrcp.f32 %v5403_v9  ;;  %v8023_v9 = vld [vmem:[#allocation20] sm:$0xff]  }
 0xd94   :  { %5472 = vperm.xlu0 %7975, %v12282_v54   ;;  %v5401_v22 = vsel %vm2581_vm14, %v5385_v39, %v5335_v16  ;;  %v8025_v16 = vld [vmem:[#allocation20 + $0x8] sm:$0xff]   ;;  %7636 = vmatprep.subr.bf16.mxu1 %v8023_v9 }
 0xd95   :  { %8355 = vrcp.f32 %v5401_v22  ;;  %7637 = vmatpush3.bf16.msra.mxu1 %v8023_v9  ;;  %v8028_v22 = vld [vmem:[#allocation21 + $0x10] sm:$0xff]  }
 0xd96   :  { %8357 = vrcp.f32 %v5402_v27  ;;  %7638 = vmatprep.subr.bf16.mxu1 %v8025_v16  ;;  %v8031_v27 = vld [vmem:[#allocation20 + $0x20] sm:$0xff]  }
 0xd97   :  { %7960 = vset.pattern.permute.xlu1 %v13537_v32 }
 0xd98   :  { %5541 = vperm.xlu1 %7960, %v12235_v2   ;;  %7977 = vset.pattern.permute.xlu0 %v13534_v21 }
 0xd99   :  { %5629 = vperm.xlu0 %7977, %v12293_v53   ;;  %7639 = vmatpush3.bf16.msra.mxu1 %v8025_v16 }
 0xd9a   :  { %v12317_v58 = vpop.eup %8347 }
 0xd9b   :  { %v8350_v61 = vpop.eup %8349 }
 0xd9c   :  { %7961 = vset.pattern.permute.xlu1 %v13534_v21 }
 0xd9d   :  { %5621 = vperm.xlu1 %7961, %v12235_v2   ;;  %7979 = vset.pattern.permute.xlu0 %v13536_v50 }
 0xd9e   :  { %5462 = vperm.xlu0 %7979, %v12293_v53  }
 0xda1   :  { %7962 = vset.pattern.permute.xlu1 %v13535_v51 }
 0xda2   :  { %5701 = vperm.xlu1 %7962, %v12235_v2   ;;  %7981 = vset.pattern.permute.xlu0 %v13534_v21  ;;  %v12331_v2 = vpop.eup %8351 }
 0xda3   :  { %5641 = vperm.xlu0 %7981, %v12317_v58   ;;  %v12338_v33 = vpop.eup %8353 }
 0xda4   :  { %v12346_v24 = vpop.eup %8355 }
 0xda5   :  { %v8358_v10 = vpop.eup %8357 }
 0xda6   :  { %7963 = vset.pattern.permute.xlu1 %v13534_v21 }
 0xda7   :  { %5613 = vperm.xlu1 %7963, %v12244_v35   ;;  %7984 = vset.pattern.permute.xlu0 %v13535_v51 }
 0xda8   :  { %5713 = vperm.xlu0 %7984, %v8350_v61  }
 0xdab   :  { %5625 = vperm.xlu1 %7963, %v12263_v34  }
 0xdac   :  { %5725 = vperm.xlu0 %7984, %v12331_v2  }
 0xdaf   :  { %7967 = vset.pattern.permute.xlu1 %v13536_v50 }
 0xdb0   :  { %5457 = vperm.xlu1 %7967, %v12263_v34   ;;  %5737 = vperm.xlu0 %7984, %v12338_v33  }
 0xdb4   :  { %7968 = vset.pattern.permute.xlu1 %v13537_v32  ;;  %7991 = vset.pattern.permute.xlu0 %v13534_v21 }
 0xdb5   :  { %5537 = vperm.xlu1 %7968, %v12276_v36   ;;  %5649 = vperm.xlu0 %7991, %v12346_v24  }
 0xdb9   :  { %7970 = vset.pattern.permute.xlu1 %v13535_v51  ;;  %7994 = vset.pattern.permute.xlu0 %v13536_v50 }
 0xdba   :  { %5697 = vperm.xlu1 %7970, %v12276_v36   ;;  %5482 = vperm.xlu0 %7994, %v12331_v2  }
 0xdbe   :  { %7971 = vset.pattern.permute.xlu1 %v13536_v50  ;;  %5492 = vperm.xlu0 %7994, %v8358_v10  }
 0xdbf   :  { %5447 = vperm.xlu1 %7971, %v12276_v36  }
 0xdc2   :  { %7995 = vset.pattern.permute.xlu0 %v13537_v32 }
 0xdc3   :  { %7972 = vset.pattern.permute.xlu1 %v13537_v32  ;;  %5521 = vperm.xlu0 %7995, %v12225_v59  }
 0xdc4   :  { %5557 = vperm.xlu1 %7972, %v12282_v54  }
 0xdc7   :  { %5533 = vperm.xlu0 %7995, %v12244_v35  }
 0xdc8   :  { %7973 = vset.pattern.permute.xlu1 %v13534_v21 }
 0xdc9   :  { %5637 = vperm.xlu1 %7973, %v12282_v54  }
 0xdcb   :  { %5545 = vperm.xlu0 %7995, %v12263_v34  }
 0xdcd   :  { %7974 = vset.pattern.permute.xlu1 %v13535_v51 }
 0xdce   :  { %5717 = vperm.xlu1 %7974, %v12282_v54  }
 0xdcf   :  { %5553 = vperm.xlu0 %7995, %v8350_v61  }
 0xdd2   :  { %7976 = vset.pattern.permute.xlu1 %v13537_v32 }
 0xdd3   :  { %5549 = vperm.xlu1 %7976, %v12293_v53   ;;  %5565 = vperm.xlu0 %7995, %v12331_v2  }
 0xdd7   :  { %7978 = vset.pattern.permute.xlu1 %v13535_v51  ;;  %5577 = vperm.xlu0 %7995, %v12338_v33  }
 0xdd8   :  { %5709 = vperm.xlu1 %7978, %v12293_v53  }
 0xddc   :  { %7980 = vset.pattern.permute.xlu1 %v13537_v32 }
 0xddd   :  { %5561 = vperm.xlu1 %7980, %v12317_v58  }
 0xde0   :  { %v5526_v25 = vpop.permute.xlu1 %5525 }
 0xde1   :  { %v5582_v59 = vmul.f32 %v11834_v29, %v5526_v25  ;;  %7982 = vset.pattern.permute.xlu1 %v13535_v51 }
 0xde2   :  { %5721 = vperm.xlu1 %7982, %v12317_v58  }
 0xde3   :  { %5776 = vrot.lane.b32.xlu0 %v5582_v59, %s8746_s12  ;;  %v8033_v59 = vld [vmem:[#allocation20 + $0x28] sm:$0xff]  }
 0xde5   :  { %v5606_v35 = vpop.permute.xlu1 %5605 }
 0xde6   :  { %v5662_v34 = vmul.f32 %v12020_v60, %v5606_v35  ;;  %7983 = vset.pattern.permute.xlu1 %v13534_v21  ;;  %v8034_v35 = vld [vmem:[#allocation21 + $0x28] sm:$0xff]  }
 0xde7   :  { %5633 = vperm.xlu1 %7983, %v8350_v61  }
 0xde8   :  { %5840 = vrot.lane.b32.xlu0 %v5662_v34, %s8731_s30  ;;  %v5598_v57 = vpop.permute.xlu0 %5597 }
 0xde9   :  { %v5660_v52 = vmul.f32 %v5598_v57, %v12024_v31 }
 0xdea   :  { %v5686_v43 = vpop.permute.xlu1 %5685 }
 0xdeb   :  { %v5742_v18 = vmul.f32 %v12048_v38, %v5686_v43  ;;  %7985 = vset.pattern.permute.xlu1 %v13536_v50 }
 0xdec   :  { %5467 = vperm.xlu1 %7985, %v8350_v61   ;;  %v5610_v29 = vpop.permute.xlu0 %5609 }
 0xded   :  { %5904 = vrot.lane.b32.xlu0 %v5742_v18, %s8745_s11 }
 0xdef   :  { %v12386_v56 = vpop.permute.xlu1 %5432 }
 0xdf0   :  { %7986 = vset.pattern.permute.xlu1 %v13537_v32 }
 0xdf1   :  { %5573 = vperm.xlu1 %7986, %v8358_v10   ;;  %v12389_v60 = vpop.permute.xlu0 %5681 }
 0xdf4   :  { %v5518_v36 = vpop.permute.xlu1 %5517 }
 0xdf5   :  { %v5580_v4 = vmul.f32 %v5518_v36, %v11836_v20  ;;  %7987 = vset.pattern.permute.xlu1 %v13534_v21  ;;  %v8035_v36 = vld [vmem:[#allocation20 + $0x30] sm:$0xff]  }
 0xdf6   :  { %5653 = vperm.xlu1 %7987, %v8358_v10   ;;  %v12393_v38 = vpop.permute.xlu0 %5427 }
 0xdf7   :  { %5772 = vrot.lane.b32.xlu0 %v5580_v4, %s8746_s12  ;;  %v8036_v4 = vld [vmem:[#allocation21 + $0x30] sm:$0xff]  }
 0xdf9   :  { %v5678_v54 = vpop.permute.xlu1 %5677 }
 0xdfa   :  { %7988 = vset.pattern.permute.xlu1 %v13535_v51  ;;  %v12398_v46 = vpop.permute.xlu0 %5452  ;;  %v5740_v45 = vmul.f32 %v5678_v54, %v12052_v7 }
 0xdfb   :  { %5733 = vperm.xlu1 %7988, %v8358_v10   ;;  %5836 = vrot.lane.b32.xlu0 %v5660_v52, %s8731_s30 }
 0xdfe   :  { %v12402_v20 = vpop.permute.xlu1 %5422 }
 0xdff   :  { %7989 = vset.pattern.permute.xlu1 %v13534_v21  ;;  %5900 = vrot.lane.b32.xlu0 %v5740_v45, %s8745_s11  ;;  %v12406_v11 = vpop.permute.xlu0 %5693 }
 0xe00   :  { %5645 = vperm.xlu1 %7989, %v12331_v2  }
 0xe03   :  { %v5530_v31 = vpop.permute.xlu1 %5529 }
 0xe04   :  { %5657 = vperm.xlu1 %7989, %v12338_v33   ;;  %v12410_v48 = vpop.permute.xlu0 %5442  ;;  %v5583_v30 = vmul.f32 %v11840_v55, %v5530_v31  ;;  %v8037_v31 = vld [vmem:[#allocation20 + $0x38] sm:$0xff]  }
 0xe08   :  { %v5690_v53 = vpop.permute.xlu1 %5689  ;;  %7990 = vset.pattern.permute.xlu1 %v13537_v32 }
 0xe09   :  { %5569 = vperm.xlu1 %7990, %v12346_v24   ;;  %v12414_v7 = vpop.permute.xlu0 %5705  ;;  %v5743_v55 = vmul.f32 %v12054_v63, %v5690_v53  ;;  %v8027_v63 = vld [vmem:[#allocation20 + $0x10] sm:$0xff]   ;;  %v8038_v53 = vld [vmem:[#allocation21 + $0x38] sm:$0xff]  }
 0xe0a   :  { %7640 = vmatprep.subr.bf16.mxu1 %v8027_v63 }
 0xe0b   :  { %7641 = vmatpush3.bf16.msra.mxu1 %v8027_v63  ;;  %v13546_v63 = vld [vmem:[#allocation34_spill] sm:$0xff] }
 0xe0d   :  { %v12416_v15 = vpop.permute.xlu1 %5437  ;;  %7992 = vset.pattern.permute.xlu1 %v13535_v51 }
 0xe0e   :  { %5729 = vperm.xlu1 %7992, %v12346_v24   ;;  %v12420_v21 = vpop.permute.xlu0 %5617 }
 0xe12   :  { %v12422_v23 = vpop.permute.xlu1 %5601  ;;  %7993 = vset.pattern.permute.xlu1 %v13536_v50 }
 0xe13   :  { %5477 = vperm.xlu1 %7993, %v12317_v58   ;;  %v12426_v14 = vpop.permute.xlu0 %5472  ;;  %v5661_v54 = vmul.f32 %v12422_v23, %v12030_v0  ;;  %v5744_v23 = vmul.f32 %v12406_v11, %v12072_v5  ;;  %v13542_v5 = vld [vmem:[#allocation63_spill] sm:$0xff] }
 0xe17   :  { %v5542_v28 = vpop.permute.xlu1 %5541  ;;  %5487 = vperm.xlu1 %7993, %v12346_v24   ;;  %v8032_v24 = vld [vmem:[#allocation21 + $0x20] sm:$0xff]  }
 0xe18   :  { %v5586_v6 = vmul.f32 %v11884_v41, %v5542_v28  ;;  %v12430_v19 = vpop.permute.xlu0 %5629  ;;  %v5663_v41 = vmul.f32 %v12026_v3, %v5610_v29  ;;  %v5741_v28 = vmul.f32 %v12389_v60, %v12058_v8 }
 0xe1a   :  { %5784 = vrot.lane.b32.xlu0 %v5586_v6, %s8746_s12 }
 0xe1b   :  { %5497 = vperm.xlu1 %7993, %v12338_v33   ;;  %v8029_v33 = vld [vmem:[#allocation20 + $0x18] sm:$0xff]  }
 0xe1c   :  { %v5622_v51 = vpop.permute.xlu1 %5621  ;;  %7642 = vmatprep.subr.bf16.mxu1 %v8029_v33 }
 0xe1d   :  { %v5666_v50 = vmul.f32 %v12032_v49, %v5622_v51  ;;  %v12436_v37 = vpop.permute.xlu0 %5462  ;;  %7643 = vmatpush3.bf16.msra.mxu1 %v8029_v33  ;;  %v13538_v51 = vld [vmem:[#allocation52_spill] sm:$0xff] }
 0xe1e   :  { %7644 = vmatprep.subr.bf16.mxu1 %v8031_v27 }
 0xe1f   :  { %5778 = vrot.lane.b32.xlu1 %v5583_v30, %s8746_s12  ;;  %5848 = vrot.lane.b32.xlu0 %v5666_v50, %s8731_s30  ;;  %v13540_v50 = vld [vmem:[#allocation73_spill] sm:$0xff] }
 0xe20   :  { %7996 = vset.pattern.permute.xlu1 %v13537_v32 }
 0xe21   :  { %v5702_v62 = vpop.permute.xlu1 %5701  ;;  %7645 = vmatpush3.bf16.msra.mxu1 %v8031_v27  ;;  %v13548_v27 = vld [vmem:[#allocation60_spill] sm:$0xff] }
 0xe22   :  { %v5746_v44 = vmul.f32 %v12066_v40, %v5702_v62  ;;  %v12443_v26 = vpop.permute.xlu0 %5641  ;;  %v8024_v40 = vld [vmem:[#allocation21] sm:$0xff]   ;;  %7646 = vmatprep.subr.bf16.mxu1 %v8033_v59  ;;  %v13541_v62 = vld [vmem:[#allocation38_spill] sm:$0xff] }
 0xe23   :  { %5842 = vrot.lane.b32.xlu1 %v5663_v41, %s8731_s30  ;;  %7668 = vmatprep.subr.bf16.mxu0 %v8024_v40 }
 0xe24   :  { %5912 = vrot.lane.b32.xlu0 %v5746_v44, %s8745_s11  ;;  %7669 = vmatpush3.bf16.msra.mxu0 %v8024_v40  ;;  %v5747_v44 = vmul.f32 %v13541_v62, %v12414_v7 }
 0xe25   :  { %7670 = vmatprep.subr.bf16.mxu0 %v8026_v13  ;;  %7647 = vmatpush3.bf16.msra.mxu1 %v8033_v59 }
 0xe26   :  { %v12448_v49 = vpop.permute.xlu1 %5613  ;;  %7648 = vmatprep.subr.bf16.mxu1 %v8035_v36 }
 0xe27   :  { %5906 = vrot.lane.b32.xlu1 %v5743_v55, %s8745_s11  ;;  %v12451_v58 = vpop.permute.xlu0 %5713  ;;  %v5664_v6 = vmul.f32 %v12448_v49, %v12034_v12  ;;  %v13539_v12 = vld [vmem:[#allocation48_spill] sm:$0xff] }
 0xe28   :  { %7671 = vmatpush3.bf16.msra.mxu0 %v8026_v13  ;;  %v13543_v49 = vld [vmem:[#allocation64_spill] sm:$0xff]  ;;  %v13545_v13 = vld [vmem:[#allocation61_spill] sm:$0xff] }
 0xe29   :  { %7672 = vmatprep.subr.bf16.mxu0 %v8028_v22  ;;  %7649 = vmatpush3.bf16.msra.mxu1 %v8035_v36  ;;  %v5665_v7 = vmul.f32 %v12420_v21, %v13545_v13 }
 0xe2a   :  { %v12453_v32 = vpop.permute.xlu1 %5625  ;;  %7650 = vmatprep.subr.bf16.mxu1 %v8037_v31 }
 0xe2b   :  { %v12455_v3 = vpop.permute.xlu0 %5725  ;;  %v5667_v60 = vmul.f32 %v13539_v12, %v12453_v32  ;;  %v13544_v32 = vld [vmem:[#allocation54_spill] sm:$0xff]  ;;  %v13558_v12 = vld [vmem:[#allocation56_spill] sm:$0xff] }
 0xe2c   :  { %7673 = vmatpush3.bf16.msra.mxu0 %v8028_v22 }
 0xe2d   :  { %7674 = vmatprep.subr.bf16.mxu0 %v8030_v47  ;;  %7651 = vmatpush3.bf16.msra.mxu1 %v8037_v31 }
 0xe2f   :  { %v12457_v39 = vpop.permute.xlu1 %5457  ;;  %v12459_v61 = vpop.permute.xlu0 %5737 }
 0xe30   :  { %7675 = vmatpush3.bf16.msra.mxu0 %v8030_v47  ;;  %v13547_v47 = vld [vmem:[#allocation89_spill] sm:$0xff] }
 0xe31   :  { %7676 = vmatprep.subr.bf16.mxu0 %v8032_v24 }
 0xe34   :  { %v12461_v2 = vpop.permute.xlu1 %5537  ;;  %v12463_v17 = vpop.permute.xlu0 %5649  ;;  %7677 = vmatpush3.bf16.msra.mxu0 %v8032_v24 }
 0xe35   :  { %7678 = vmatprep.subr.bf16.mxu0 %v8034_v35  ;;  %v5585_v9 = vmul.f32 %v12461_v2, %v13543_v49  ;;  %v5668_v2 = vmul.f32 %v12430_v19, %v13547_v47  ;;  %v13561_v49 = vld [vmem:[#allocation84_spill] sm:$0xff] }
 0xe38   :  { %7679 = vmatpush3.bf16.msra.mxu0 %v8034_v35  ;;  %v13549_v35 = vld [vmem:[#allocation44_spill] sm:$0xff] }
 0xe39   :  { %v12465_v10 = vpop.permute.xlu1 %5697  ;;  %v12467_v25 = vpop.permute.xlu0 %5482  ;;  %7680 = vmatprep.subr.bf16.mxu0 %v8036_v4 }
 0xe3a   :  { %v5745_v24 = vmul.f32 %v12465_v10, %v13548_v27  ;;  %v13552_v10 = vld [vmem:[#allocation36_spill] sm:$0xff]  ;;  %v13566_v27 = vld [vmem:[#allocation94_spill] sm:$0xff] }
 0xe3c   :  { %7681 = vmatpush3.bf16.msra.mxu0 %v8036_v4 }
 0xe3d   :  { %v12469_v34 = vpop.permute.xlu0 %5492  ;;  %7682 = vmatprep.subr.bf16.mxu0 %v8038_v53 }
 0xe3e   :  { %v12471_v57 = vpop.permute.xlu1 %5447 }
 0xe40   :  { %7683 = vmatpush3.bf16.msra.mxu0 %v8038_v53  ;;  %v13554_v53 = vld [vmem:[#allocation47_spill] sm:$0xff] }
 0xe42   :  { %v5522_v43 = vpop.permute.xlu0 %5521 }
 0xe43   :  { %v5581_v18 = vmul.f32 %v5522_v43, %v11842_v42  ;;  %v5558_v29 = vpop.permute.xlu1 %5557  ;;  %v13550_v43 = vld [vmem:[#allocation40_spill] sm:$0xff] }
 0xe44   :  { %v5590_v41 = vmul.f32 %v13540_v50, %v5558_v29  ;;  %v13551_v29 = vld [vmem:[#allocation46_spill] sm:$0xff] }
 0xe45   :  { %5774 = vrot.lane.b32.xlu1 %v5581_v18, %s8746_s12  ;;  %v5671_v36 = vmul.f32 %v13551_v29, %v12443_v26 }
 0xe46   :  { %v5534_v52 = vpop.permute.xlu0 %5533 }
 0xe47   :  { %v5584_v45 = vmul.f32 %v5534_v52, %v11891_v1 }
 0xe48   :  { %v5638_v42 = vpop.permute.xlu1 %5637 }
 0xe49   :  { %5838 = vrot.lane.b32.xlu1 %v5661_v54, %s8731_s30  ;;  %5780 = vrot.lane.b32.xlu0 %v5584_v45, %s8746_s12  ;;  %v5670_v11 = vmul.f32 %v13542_v5, %v5638_v42  ;;  %v13553_v45 = vld [vmem:[#allocation51_spill] sm:$0xff]  ;;  %v13560_v5 = vld [vmem:[#allocation93_spill] sm:$0xff] }
 0xe4a   :  { %v5546_v1 = vpop.permute.xlu0 %5545 }
 0xe4b   :  { %v5587_v30 = vmul.f32 %v13538_v51, %v5546_v1  ;;  %v13557_v51 = vld [vmem:[#allocation37_spill] sm:$0xff] }
 0xe4d   :  { %v5718_v0 = vpop.permute.xlu1 %5717  ;;  %5902 = vrot.lane.b32.xlu1 %v5741_v28, %s8745_s11  ;;  %5844 = vrot.lane.b32.xlu0 %v5664_v6, %s8731_s30  ;;  %v13555_v6 = vld [vmem:[#allocation39_spill] sm:$0xff] }
 0xe4e   :  { %v5750_v40 = vmul.f32 %v13544_v32, %v5718_v0  ;;  %v5554_v52 = vpop.permute.xlu0 %5553  ;;  %v13556_v0 = vld [vmem:[#allocation35_spill] sm:$0xff]  ;;  %v13562_v32 = vld [vmem:[#allocation53_spill] sm:$0xff] }
 0xe4f   :  { %v5589_v42 = vmul.f32 %v5554_v52, %v13554_v53  ;;  %v13571_v53 = vld [vmem:[#allocation66_spill] sm:$0xff] }
 0xe51   :  { %5908 = vrot.lane.b32.xlu0 %v5744_v23, %s8745_s11  ;;  %5786 = vrot.lane.b32.xlu1 %v5587_v30, %s8746_s12 }
 0xe52   :  { %v5550_v8 = vpop.permute.xlu1 %5549  ;;  %v5566_v26 = vpop.permute.xlu0 %5565 }
 0xe53   :  { %v5588_v22 = vmul.f32 %v5550_v8, %v13546_v63  ;;  %v5592_v30 = vmul.f32 %v5566_v26, %v13557_v51 }
 0xe55   :  { %5792 = vrot.lane.b32.xlu0 %v5590_v41, %s8746_s12  ;;  %5850 = vrot.lane.b32.xlu1 %v5667_v60, %s8731_s30  ;;  %v5749_v60 = vmul.f32 %v12451_v58, %v13558_v12  ;;  %v13559_v41 = vld [vmem:[#allocation43_spill] sm:$0xff] }
 0xe56   :  { %v5578_v50 = vpop.permute.xlu0 %5577 }
 0xe57   :  { %v5710_v55 = vpop.permute.xlu1 %5709  ;;  %v5595_v62 = vmul.f32 %v13559_v41, %v5578_v50 }
 0xe58   :  { %v5748_v21 = vmul.f32 %v5710_v55, %v13549_v35  ;;  %v13567_v35 = vld [vmem:[#allocation91_spill] sm:$0xff] }
 0xe59   :  { %5856 = vrot.lane.b32.xlu0 %v5670_v11, %s8731_s30  ;;  %5914 = vrot.lane.b32.xlu1 %v5747_v44, %s8745_s11 }
 0xe5c   :  { %v5562_v16 = vpop.permute.xlu1 %5561 }
 0xe5d   :  { %5920 = vrot.lane.b32.xlu0 %v5750_v40, %s8745_s11  ;;  %5782 = vrot.lane.b32.xlu1 %v5585_v9, %s8746_s12  ;;  %v5591_v18 = vmul.f32 %v13550_v43, %v5562_v16  ;;  %v5752_v9 = vmul.f32 %v12455_v3, %v13561_v49  ;;  %v13563_v40 = vld [vmem:[#allocation76_spill] sm:$0xff]  ;;  %v13568_v43 = vld [vmem:[#allocation75_spill] sm:$0xff] }
 0xe61   :  { %v5722_v33 = vpop.permute.xlu1 %5721  ;;  %5788 = vrot.lane.b32.xlu0 %v5588_v22, %s8746_s12  ;;  %5846 = vrot.lane.b32.xlu1 %v5665_v7, %s8731_s30  ;;  %v13564_v7 = vld [vmem:[#allocation49_spill] sm:$0xff]  ;;  %v5777_v22 = vpop.permute.xlu0 %5776 }
 0xe62   :  { %v5751_v4 = vmul.f32 %v13552_v10, %v5722_v33  ;;  %v13565_v33 = vld [vmem:[#allocation50_spill] sm:$0xff]  ;;  %v13569_v10 = vld [vmem:[#allocation72_spill] sm:$0xff] }
 0xe63   :  { %v5673_v47 = vmul.f32 %v12463_v17, %v13565_v33 }
 0xe65   :  { %5852 = vrot.lane.b32.xlu0 %v5668_v2, %s8731_s30  ;;  %5910 = vrot.lane.b32.xlu1 %v5745_v24, %s8745_s11  ;;  %v5841_v2 = vpop.permute.xlu0 %5840 }
 0xe66   :  { %v5634_v59 = vpop.permute.xlu1 %5633 }
 0xe67   :  { %v5669_v23 = vmul.f32 %v5634_v59, %v13556_v0 }
 0xe69   :  { %5916 = vrot.lane.b32.xlu0 %v5748_v21, %s8745_s11  ;;  %5794 = vrot.lane.b32.xlu1 %v5591_v18, %s8746_s12  ;;  %v5755_v18 = vmul.f32 %v13568_v43, %v12459_v61 }
 0xe6b   :  { %v12523_v19 = vpop.permute.xlu1 %5467 }
 0xe6d   :  { %5858 = vrot.lane.b32.xlu1 %v5671_v36, %s8731_s30  ;;  %v5905_v36 = vpop.permute.xlu0 %5904 }
 0xe70   :  { %v5574_v54 = vpop.permute.xlu1 %5573 }
 0xe71   :  { %v5594_v31 = vmul.f32 %v13553_v45, %v5574_v54  ;;  %5922 = vrot.lane.b32.xlu1 %v5751_v4, %s8745_s11  ;;  %v5773_v52 = vpop.permute.xlu0 %5772  ;;  %v13570_v54 = vld [vmem:[#allocation82_spill] sm:$0xff] }
 0xe73   :  { %5800 = vrot.lane.b32.xlu0 %v5594_v31, %s8746_s12 }
 0xe75   :  { %v5654_v28 = vpop.permute.xlu1 %5653  ;;  %5790 = vrot.lane.b32.xlu1 %v5589_v42, %s8746_s12  ;;  %v5502_v42 = vmul.f32 %v13571_v53, %v12386_v56  ;;  %v5837_v26 = vpop.permute.xlu0 %5836 }
 0xe76   :  { %v5674_v1 = vmul.f32 %v13555_v6, %v5654_v28 }
 0xe77   :  { %v5950_v28 = vsel %vm321_vm0, %v5502_v42, %v5777_v22 }
 0xe78   :  { %5864 = vrot.lane.b32.xlu0 %v5674_v1, %s8731_s30  ;;  %v5966_v61 = vsel %vm499_vm1, %v5950_v28, %v5841_v2  ;;  %v13572_v1 = vld [vmem:[#allocation67_spill] sm:$0xff] }
 0xe79   :  { %5854 = vrot.lane.b32.xlu1 %v5669_v23, %s8731_s30  ;;  %v5503_v0 = vmul.f32 %v13572_v1, %v12416_v15  ;;  %v12577_v23 = vld [vmem:[#allocation18] ss:$0 sm:$0xff]  ;;  %v5982_v51 = vsel %vm3174_vm15, %v5966_v61, %v5905_v36 }
 0xe7a   :  { %v5734_v8 = vpop.permute.xlu1 %5733 }
 0xe7b   :  { %v5754_v16 = vmul.f32 %v13563_v40, %v5734_v8  ;;  %v6005_v8 = vadd.f32 %v12577_v23, %v5982_v51 }
 0xe7c   :  { %5796 = vrot.lane.b32.xlu0 %v5592_v30, %s8746_s12 }
 0xe7d   :  { %5918 = vrot.lane.b32.xlu1 %v5749_v60, %s8745_s11  ;;  %v5901_v60 = vpop.permute.xlu0 %5900 }
 0xe7f   :  { %v5646_v44 = vpop.permute.xlu1 %5645 }
 0xe80   :  { %v5672_v11 = vmul.f32 %v5646_v44, %v13560_v5 }
 0xe81   :  { %5802 = vrot.lane.b32.xlu1 %v5595_v62, %s8746_s12  ;;  %v6021_v62 = vmax.f32 %v6005_v8, 0.0 }
 0xe82   :  { %5860 = vrot.lane.b32.xlu0 %v5672_v11, %s8731_s30 }
 0xe83   :  { %v5658_v55 = vpop.permute.xlu1 %5657 }
 0xe84   :  { %v5675_v58 = vmul.f32 %v13562_v32, %v5658_v55 }
 0xe86   :  { %5924 = vrot.lane.b32.xlu0 %v5752_v9, %s8745_s11  ;;  %5866 = vrot.lane.b32.xlu1 %v5675_v58, %s8731_s30  ;;  %v13573_v9 = vld [vmem:[#allocation42_spill] sm:$0xff] }
 0xe87   :  { %v5500_v32 = vmul.f32 %v12402_v20, %v13573_v9 }
 0xe88   :  { %v5570_v13 = vpop.permute.xlu1 %5569 }
 0xe89   :  { %v5593_v63 = vmul.f32 %v5570_v13, %v13564_v7  ;;  %v5948_v58 = vsel %vm321_vm0, %v5500_v32, %v5773_v52  ;;  %v13574_v7 = vld [vmem:[#allocation69_spill] sm:$0xff] }
 0xe8a   :  { %5928 = vrot.lane.b32.xlu0 %v5754_v16, %s8745_s11  ;;  %v5964_v40 = vsel %vm499_vm1, %v5948_v58, %v5837_v26 }
 0xe8b   :  { %5798 = vrot.lane.b32.xlu1 %v5593_v63, %s8746_s12  ;;  %v5501_v63 = vmul.f32 %v12393_v38, %v13574_v7  ;;  %v5980_v22 = vsel %vm3174_vm15, %v5964_v40, %v5901_v60  ;;  %v13575_v38 = vld [vmem:[#allocation90_spill] sm:$0xff]  ;;  %v13579_v7 = vld [vmem:[#allocation45_spill] sm:$0xff] }
 0xe8c   :  { %v5785_v5 = vpop.permute.xlu0 %5784 }
 0xe8d   :  { %v5730_v3 = vpop.permute.xlu1 %5729 }
 0xe8e   :  { %v5753_v24 = vmul.f32 %v5730_v3, %v13566_v27 }
 0xe8f   :  { %5862 = vrot.lane.b32.xlu1 %v5673_v47, %s8731_s30  ;;  %v6003_v47 = vadd.f32 %v12577_v23, %v5980_v22  ;;  %s8755_s30 = smov 127  }
 0xe91   :  { %v5849_v11 = vpop.permute.xlu0 %5848 }
 0xe92   :  { %v5478_v59 = vpop.permute.xlu1 %5477 }
 0xe93   :  { %v12559_v21 = vmul.f32 %v13567_v35, %v5478_v59  ;;  %5926 = vrot.lane.b32.xlu1 %v5753_v24, %s8745_s11  ;;  %v6019_v59 = vmax.f32 %v6003_v47, 0.0 }
 0xe96   :  { %v5488_v29 = vpop.permute.xlu1 %5487  ;;  %v5913_v55 = vpop.permute.xlu0 %5912 }
 0xe97   :  { %v12565_v4 = vmul.f32 %v5488_v29, %v13569_v10  ;;  %5930 = vrot.lane.b32.xlu1 %v5755_v18, %s8745_s11  ;;  %v5506_v29 = vmul.f32 %v13575_v38, %v12398_v46 }
 0xe99   :  { %v5954_v10 = vsel %vm321_vm0, %v5506_v29, %v5785_v5 }
 0xe9a   :  { %v5498_v17 = vpop.permute.xlu1 %5497 }
 0xe9b   :  { %v12569_v45 = vmul.f32 %v13570_v54, %v5498_v17  ;;  %v5970_v17 = vsel %vm499_vm1, %v5954_v10, %v5849_v11  ;;  %v13580_v10 = vld [vmem:[#allocation78_spill] sm:$0xff] }
 0xe9c   :  { %v5986_v42 = vsel %vm3174_vm15, %v5970_v17, %v5913_v55  ;;  %v5508_v17 = vmul.f32 %v12436_v37, %v13580_v10 }
 0xe9d   :  { %v6009_v46 = vadd.f32 %v12577_v23, %v5986_v42 }
 0xe9e   :  { %v5779_v31 = vpop.permute.xlu1 %5778 }
 0xe9f   :  { %v5951_v30 = vsel %vm321_vm0, %v5503_v0, %v5779_v31  ;;  %v13576_v31 = vld [vmem:[#allocation41_spill] sm:$0xff]  ;;  %v6025_v51 = vmax.f32 %v6009_v46, 0.0 }
 0xea0   :  { %v5507_v53 = vmul.f32 %v13576_v31, %v12457_v39  ;;  %v13577_v39 = vld [vmem:[#allocation70_spill] sm:$0xff] }
 0xea2   :  { %v5843_v6 = vpop.permute.xlu1 %5842 }
 0xea3   :  { %v5967_v12 = vsel %vm499_vm1, %v5951_v30, %v5843_v6 }
 0xea6   :  { %v5907_v56 = vpop.permute.xlu1 %5906 }
 0xea7   :  { %v5983_v50 = vsel %vm3174_vm15, %v5967_v12, %v5907_v56  ;;  %v5504_v12 = vmul.f32 %v12410_v48, %v13577_v39 }
 0xea8   :  { %v6006_v41 = vadd.f32 %v12577_v23, %v5983_v50 }
 0xeaa   :  { %v6022_v44 = vmax.f32 %v6006_v41, 0.0 }
 0xeac   :  { %v6036_v15 = vpack.c.bf16 %v6022_v44, %v6021_v62  ;;  %v13578_v44 = vld [vmem:[#allocation79_spill] sm:$0xff] }
 0xead   :  { %v5505_v5 = vmul.f32 %v12471_v57, %v13578_v44  ;;  %v5510_v57 = vmul.f32 %v13579_v7, %v12426_v14 }
 0xeb7   :  { %v5775_v49 = vpop.permute.xlu1 %5774 }
 0xeb8   :  { %v5949_v33 = vsel %vm321_vm0, %v5501_v63, %v5775_v49 }
 0xebb   :  { %v5839_v16 = vpop.permute.xlu1 %5838  ;;  %v5781_v13 = vpop.permute.xlu0 %5780 }
 0xebc   :  { %v5965_v3 = vsel %vm499_vm1, %v5949_v33, %v5839_v16  ;;  %v5952_v50 = vsel %vm321_vm0, %v5504_v12, %v5781_v13 }
 0xebf   :  { %v5903_v2 = vpop.permute.xlu1 %5902  ;;  %v5845_v27 = vpop.permute.xlu0 %5844 }
 0xec0   :  { %v5981_v20 = vsel %vm3174_vm15, %v5965_v3, %v5903_v2  ;;  %v5968_v41 = vsel %vm499_vm1, %v5952_v50, %v5845_v27 }
 0xec1   :  { %v6004_v24 = vadd.f32 %v12577_v23, %v5981_v20 }
 0xec3   :  { %v6020_v35 = vmax.f32 %v6004_v24, 0.0  ;;  %v5787_v43 = vpop.permute.xlu1 %5786  ;;  %v5909_v18 = vpop.permute.xlu0 %5908 }
 0xec4   :  { %v5955_v28 = vsel %vm321_vm0, %v5507_v53, %v5787_v43  ;;  %v13581_v53 = vld [vmem:[#allocation32_spill] sm:$0xff] }
 0xec5   :  { %v6035_v36 = vpack.c.bf16 %v6020_v35, %v6019_v59  ;;  %v5509_v42 = vmul.f32 %v12523_v19, %v13581_v53 }
 0xec7   :  { %v5851_v52 = vpop.permute.xlu1 %5850  ;;  %7652 = vmatprep.mubr.bf16.mxu1 %v6035_v36  ;;  %7684 = vmatprep.mubr.bf16.mxu0 %v6035_v36  ;;  %v5793_v54 = vpop.permute.xlu0 %5792 }
 0xec8   :  { %7653 = vmatmul.mubr.bf16.vlgmr.msra.gmra.mrb[96].mxu1 %v6036_v15  ;;  %7685 = vmatmul.mubr.bf16.vlgmr.msra.gmra.mrb[112].mxu0 %v6036_v15  ;;  %v5971_v26 = vsel %vm499_vm1, %v5955_v28, %v5851_v52  ;;  %v5984_v15 = vsel %vm3174_vm15, %v5968_v41, %v5909_v18  ;;  %v5958_v33 = vsel %vm321_vm0, %v5510_v57, %v5793_v54  ;;  %v13582_v41 = vld [vmem:[#allocation92_spill] sm:$0xff] }
 0xec9   :  { %v6007_v55 = vadd.f32 %v12577_v23, %v5984_v15 }
 0xecb   :  { %v5915_v61 = vpop.permute.xlu1 %5914  ;;  %v5857_v6 = vpop.permute.xlu0 %5856  ;;  %v6023_v40 = vmax.f32 %v6007_v55, 0.0 }
 0xecc   :  { %v5987_v1 = vsel %vm3174_vm15, %v5971_v26, %v5915_v61  ;;  %v5974_v47 = vsel %vm499_vm1, %v5958_v33, %v5857_v6 }
 0xecd   :  { %v6010_v0 = vadd.f32 %v12577_v23, %v5987_v1 }
 0xecf   :  { %v6026_v30 = vmax.f32 %v6010_v0, 0.0  ;;  %v5783_v8 = vpop.permute.xlu1 %5782  ;;  %v5921_v56 = vpop.permute.xlu0 %5920 }
 0xed0   :  { %v5953_v11 = vsel %vm321_vm0, %v5505_v5, %v5783_v8  ;;  %v5990_v2 = vsel %vm3174_vm15, %v5974_v47, %v5921_v56 }
 0xed1   :  { %v6038_v60 = vpack.c.bf16 %v6026_v30, %v6025_v51  ;;  %v6013_v20 = vadd.f32 %v12577_v23, %v5990_v2 }
 0xed3   :  { %v5847_v62 = vpop.permute.xlu1 %5846  ;;  %v5789_v9 = vpop.permute.xlu0 %5788  ;;  %v6029_v18 = vmax.f32 %v6013_v20, 0.0 }
 0xed4   :  { %v5969_v49 = vsel %vm499_vm1, %v5953_v11, %v5847_v62  ;;  %v5512_v62 = vmul.f32 %v12467_v25, %v13582_v41  ;;  %v13583_v11 = vld [vmem:[#allocation33_spill] sm:$0xff] }
 0xed5   :  { %v5514_v55 = vmul.f32 %v13583_v11, %v12469_v34 }
 0xed7   :  { %v5911_v48 = vpop.permute.xlu1 %5910  ;;  %v5853_v63 = vpop.permute.xlu0 %5852 }
 0xed8   :  { %v5985_v32 = vsel %vm3174_vm15, %v5969_v49, %v5911_v48 }
 0xed9   :  { %v6008_v58 = vadd.f32 %v12577_v23, %v5985_v32 }
 0xedb   :  { %v6024_v16 = vmax.f32 %v6008_v58, 0.0  ;;  %v5795_v13 = vpop.permute.xlu1 %5794  ;;  %v5917_v24 = vpop.permute.xlu0 %5916 }
 0xedc   :  { %v5959_v27 = vsel %vm321_vm0, %v12559_v21, %v5795_v13  ;;  %v5956_v21 = vsel %vm321_vm0, %v5508_v17, %v5789_v9 }
 0xedd   :  { %v6037_v22 = vpack.c.bf16 %v6024_v16, %v6023_v40  ;;  %v5972_v54 = vsel %vm499_vm1, %v5956_v21, %v5853_v63 }
 0xede   :  { %v5988_v28 = vsel %vm3174_vm15, %v5972_v54, %v5917_v24 }
 0xedf   :  { %v5859_v3 = vpop.permute.xlu1 %5858  ;;  %7656 = vmatprep.mubr.bf16.mxu1 %v6037_v22  ;;  %7688 = vmatprep.mubr.bf16.mxu0 %v6037_v22  ;;  %v6011_v61 = vadd.f32 %v12577_v23, %v5988_v28 }
 0xee0   :  { %7657 = vmatmul.mubr.bf16.gmra.mrb[100].mxu1 %v6038_v60  ;;  %7689 = vmatmul.mubr.bf16.gmra.mrb[116].mxu0 %v6038_v60  ;;  %v5975_v14 = vsel %vm499_vm1, %v5959_v27, %v5859_v3 }
 0xee1   :  { %v6027_v51 = vmax.f32 %v6011_v61, 0.0 }
 0xee3   :  { %v5923_v59 = vpop.permute.xlu1 %5922 }
 0xee4   :  { %v5991_v35 = vsel %vm3174_vm15, %v5975_v14, %v5923_v59 }
 0xee5   :  { %v6014_v43 = vadd.f32 %v12577_v23, %v5991_v35  ;;  %v5801_v29 = vpop.permute.xlu0 %5800 }
 0xee6   :  { %v5962_v48 = vsel %vm321_vm0, %v5514_v55, %v5801_v29 }
 0xee7   :  { %v6030_v38 = vmax.f32 %v6014_v43, 0.0  ;;  %v5791_v36 = vpop.permute.xlu1 %5790 }
 0xee8   :  { %v5957_v26 = vsel %vm321_vm0, %v5509_v42, %v5791_v36 }
 0xee9   :  { %v6040_v52 = vpack.c.bf16 %v6030_v38, %v6029_v18 }
 0xeea   :  { %v5865_v46 = vpop.permute.xlu0 %5864 }
 0xeeb   :  { %v5855_v31 = vpop.permute.xlu1 %5854  ;;  %v5978_v58 = vsel %vm499_vm1, %v5962_v48, %v5865_v46 }
 0xeec   :  { %v5973_v6 = vsel %vm499_vm1, %v5957_v26, %v5855_v31 }
 0xeee   :  { %v5797_v30 = vpop.permute.xlu0 %5796 }
 0xeef   :  { %v5919_v1 = vpop.permute.xlu1 %5918  ;;  %v5960_v44 = vsel %vm321_vm0, %v5512_v62, %v5797_v30 }
 0xef0   :  { %v5989_v37 = vsel %vm3174_vm15, %v5973_v6, %v5919_v1 }
 0xef1   :  { %v6012_v0 = vadd.f32 %v12577_v23, %v5989_v37 }
 0xef3   :  { %v6028_v8 = vmax.f32 %v6012_v0, 0.0  ;;  %v5803_v39 = vpop.permute.xlu1 %5802 }
 0xef4   :  { %v5861_v19 = vpop.permute.xlu0 %5860  ;;  %v5963_v57 = vsel %vm321_vm0, %v12569_v45, %v5803_v39 }
 0xef5   :  { %v6039_v12 = vpack.c.bf16 %v6028_v8, %v6027_v51  ;;  %v5976_v5 = vsel %vm499_vm1, %v5960_v44, %v5861_v19 }
 0xef7   :  { %7660 = vmatprep.mubr.bf16.mxu1 %v6039_v12  ;;  %7692 = vmatprep.mubr.bf16.mxu0 %v6039_v12 }
 0xef8   :  { %v5867_v56 = vpop.permute.xlu1 %5866  ;;  %7661 = vmatmul.mubr.bf16.gmra.mrb[104].mxu1 %v6040_v52  ;;  %7693 = vmatmul.mubr.bf16.gmra.mrb[120].mxu0 %v6040_v52  ;;  %v5925_v60 = vpop.permute.xlu0 %5924 }
 0xef9   :  { %v5992_v49 = vsel %vm3174_vm15, %v5976_v5, %v5925_v60  ;;  %v5979_v63 = vsel %vm499_vm1, %v5963_v57, %v5867_v56 }
 0xefa   :  { %v6015_v25 = vadd.f32 %v12577_v23, %v5992_v49 }
 0xefc   :  { %v5929_v9 = vpop.permute.xlu0 %5928  ;;  %v6031_v22 = vmax.f32 %v6015_v25, 0.0 }
 0xefd   :  { %v5799_v50 = vpop.permute.xlu1 %5798  ;;  %v5994_v13 = vsel %vm3174_vm15, %v5978_v58, %v5929_v9 }
 0xefe   :  { %v5961_v32 = vsel %vm321_vm0, %v12565_v4, %v5799_v50  ;;  %v6017_v4 = vadd.f32 %v12577_v23, %v5994_v13 }
 0xf00   :  { %v6033_v20 = vmax.f32 %v6017_v4, 0.0 }
 0xf01   :  { %v5863_v15 = vpop.permute.xlu1 %5862 }
 0xf02   :  { %v5977_v40 = vsel %vm499_vm1, %v5961_v32, %v5863_v15 }
 0xf05   :  { %v5927_v16 = vpop.permute.xlu1 %5926 }
 0xf06   :  { %v5993_v7 = vsel %vm3174_vm15, %v5977_v40, %v5927_v16 }
 0xf07   :  { %v6016_v34 = vadd.f32 %v12577_v23, %v5993_v7 }
 0xf09   :  { %v6032_v33 = vmax.f32 %v6016_v34, 0.0  ;;  %v5931_v47 = vpop.permute.xlu1 %5930 }
 0xf0a   :  { %v5995_v3 = vsel %vm3174_vm15, %v5979_v63, %v5931_v47  ;;  %v13584_v47 = vld [vmem:[#allocation55_spill] sm:$0xff] }
 0xf0b   :  { %v6018_v2 = vadd.f32 %v12577_v23, %v5995_v3  ;;  %v6041_v27 = vpack.c.bf16 %v6032_v33, %v6031_v22 }
 0xf0d   :  { %v6034_v24 = vmax.f32 %v6018_v2, 0.0  ;;  %7664 = vmatprep.mubr.bf16.mxu1 %v6041_v27  ;;  %7696 = vmatprep.mubr.bf16.mxu0 %v6041_v27 }
 0xf0f   :  { %v6042_v14 = vpack.c.bf16 %v6034_v24, %v6033_v20 }
 0xf11   :  { %7665 = vmatmul.mubr.bf16.gmra.mrb[108].mxu1 %v6042_v14  ;;  %7697 = vmatmul.mubr.bf16.gmra.mrb[124].mxu0 %v6042_v14 }
 0xf9b   :  { %v7654_v45 = vpop.f32.mrb[96].mxu1  ;;  %v12666_v59 = vpop.f32.mrb[112].mxu0 }
 0xf9c   :  { %6417 = vperm.xlu1 %7996, %v12666_v59   ;;  %v6141_v35 = vpop.f32.mrb[97].mxu1  ;;  %v12669_v43 = vpop.f32.mrb[113].mxu0 }
 0xf9d   :  { %6407 = vperm.xlu0 %7995, %v12669_v43   ;;  %v7655_v18 = vpop.f32.mrb[98].mxu1  ;;  %v12672_v23 = vpop.f32.mrb[114].mxu0 }
 0xf9e   :  { %v6366_v38 = vpack.c.bf16 %v7655_v18, %v7654_v45  ;;  %v6144_v29 = vpop.f32.mrb[99].mxu1  ;;  %v12674_v36 = vpop.f32.mrb[115].mxu0 }
 0xf9f   :  { %v6365_v10 = vpack.c.bf16 %v6144_v29, %v6141_v35 }
 0xfa0   :  { %6412 = vperm.xlu1 %7996, %v12674_v36   ;;  %v6661_v52 = vsel %vm2547_vm12, %v6366_v38, 1065369472 }
 0xfa1   :  { %6422 = vperm.xlu0 %7995, %v12672_v23   ;;  %v6658_v17 = vsel %vm2547_vm12, %v6365_v10, 1065369472 }
 0xfa2   :  { %7700 = vmatprep.subr.bf16.mxu1 %v6658_v17 }
 0xfa3   :  { %7701 = vmatpush3.bf16.msra.mxu1 %v6658_v17 }
 0xfa4   :  { %7702 = vmatprep.subr.bf16.mxu1 %v6661_v52 }
 0xfa7   :  { %7703 = vmatpush3.bf16.msra.mxu1 %v6661_v52 }
 0xfb3   :  { %v7658_v21 = vpop.f32.mrb[100].mxu1  ;;  %v12680_v54 = vpop.f32.mrb[116].mxu0 }
 0xfb4   :  { %6437 = vperm.xlu1 %7996, %v12680_v54   ;;  %v6157_v31 = vpop.f32.mrb[101].mxu1  ;;  %v6318_v53 = vpop.f32.mrb[117].mxu0 }
 0xfb5   :  { %v7659_v42 = vpop.f32.mrb[102].mxu1  ;;  %v7691_v28 = vpop.f32.mrb[118].mxu0 }
 0xfb6   :  { %v6368_v46 = vpack.c.bf16 %v7659_v42, %v7658_v21  ;;  %6442 = vperm.xlu0 %7995, %v7691_v28   ;;  %v6160_v26 = vpop.f32.mrb[103].mxu1  ;;  %v6321_v61 = vpop.f32.mrb[119].mxu0 }
 0xfb7   :  { %v6367_v6 = vpack.c.bf16 %v6160_v26, %v6157_v31  ;;  %v13588_v26 = vld [vmem:[#allocation62_spill] sm:$0xff] }
 0xfb8   :  { %6427 = vperm.xlu1 %7996, %v6318_v53   ;;  %v6667_v37 = vsel %vm2547_vm12, %v6368_v46, 1065369472 }
 0xfb9   :  { %v6664_v1 = vsel %vm2547_vm12, %v6367_v6, 1065369472 }
 0xfba   :  { %6432 = vperm.xlu0 %7995, %v6321_v61   ;;  %7704 = vmatprep.subr.bf16.mxu1 %v6664_v1 }
 0xfbb   :  { %7705 = vmatpush3.bf16.msra.mxu1 %v6664_v1 }
 0xfbc   :  { %7706 = vmatprep.subr.bf16.mxu1 %v6667_v37 }
 0xfbf   :  { %7707 = vmatpush3.bf16.msra.mxu1 %v6667_v37 }
 0xfcb   :  { %v7662_v0 = vpop.f32.mrb[104].mxu1  ;;  %v7694_v51 = vpop.f32.mrb[120].mxu0 }
 0xfcc   :  { %6457 = vperm.xlu1 %7996, %v7694_v51   ;;  %v6173_v30 = vpop.f32.mrb[105].mxu1  ;;  %v6334_v8 = vpop.f32.mrb[121].mxu0 }
 0xfcd   :  { %v7663_v39 = vpop.f32.mrb[106].mxu1  ;;  %v7695_v12 = vpop.f32.mrb[122].mxu0 }
 0xfce   :  { %v6370_v19 = vpack.c.bf16 %v7663_v39, %v7662_v0  ;;  %6462 = vperm.xlu0 %7995, %v7695_v12   ;;  %v6176_v56 = vpop.f32.mrb[107].mxu1  ;;  %v6337_v60 = vpop.f32.mrb[123].mxu0 }
 0xfcf   :  { %v6369_v50 = vpack.c.bf16 %v6176_v56, %v6173_v30 }
 0xfd0   :  { %6447 = vperm.xlu1 %7996, %v6334_v8   ;;  %v6673_v62 = vsel %vm2547_vm12, %v6370_v19, 1065369472  ;;  %v13590_v19 = vld [vmem:[#allocation81_spill] sm:$0xff] }
 0xfd1   :  { %v6670_v41 = vsel %vm2547_vm12, %v6369_v50, 1065369472 }
 0xfd2   :  { %6452 = vperm.xlu0 %7995, %v6337_v60   ;;  %7708 = vmatprep.subr.bf16.mxu1 %v6670_v41 }
 0xfd3   :  { %7709 = vmatpush3.bf16.msra.mxu1 %v6670_v41 }
 0xfd4   :  { %7710 = vmatprep.subr.bf16.mxu1 %v6673_v62 }
 0xfd7   :  { %7711 = vmatpush3.bf16.msra.mxu1 %v6673_v62  ;;  %v13591_v62 = vld [vmem:[#allocation68_spill] sm:$0xff] }
 0xfe4   :  { %v7666_v44 = vpop.f32.mrb[108].mxu1  ;;  %v7698_v5 = vpop.f32.mrb[124].mxu0 }
 0xfe5   :  { %6477 = vperm.xlu1 %7996, %v7698_v5   ;;  %v6189_v15 = vpop.f32.mrb[109].mxu1  ;;  %v6350_v11 = vpop.f32.mrb[125].mxu0 }
 0xfe6   :  { %v7667_v55 = vpop.f32.mrb[110].mxu1  ;;  %v7699_v49 = vpop.f32.mrb[126].mxu0 }
 0xfe7   :  { %v6372_v9 = vpack.c.bf16 %v7667_v55, %v7666_v44  ;;  %6482 = vperm.xlu0 %7995, %v7699_v49   ;;  %v6192_v48 = vpop.f32.mrb[111].mxu1  ;;  %v6353_v32 = vpop.f32.mrb[127].mxu0 }
 0xfe8   :  { %v6371_v58 = vpack.c.bf16 %v6192_v48, %v6189_v15 }
 0xfe9   :  { %6467 = vperm.xlu1 %7996, %v6350_v11   ;;  %v6679_v40 = vsel %vm2547_vm12, %v6372_v9, 1065369472 }
 0xfea   :  { %v6676_v25 = vsel %vm2547_vm12, %v6371_v58, 1065369472 }
 0xfeb   :  { %6472 = vperm.xlu0 %7995, %v6353_v32   ;;  %7712 = vmatprep.subr.bf16.mxu1 %v6676_v25 }
 0xfec   :  { %7713 = vmatpush3.bf16.msra.mxu1 %v6676_v25 }
 0xfed   :  { %7714 = vmatprep.subr.bf16.mxu1 %v6679_v40 }
 0xff0   :  { %7715 = vmatpush3.bf16.msra.mxu1 %v6679_v40  ;;  %v13593_v40 = vld [vmem:[#allocation74_spill] sm:$0xff] }
0x1012   :  { %6373 = vxpose.xlu1.b32.start [1/16] (narrow) %v12669_v43, 8  ;;  %v13585_v43 = vld [vmem:[#allocation58_spill] sm:$0xff] }
0x1016   :  { %6374 = vxpose.xlu1.b32.cont [2/16] (narrow) %v12674_v36, 8  ;;  %v13586_v36 = vld [vmem:[#allocation57_spill] sm:$0xff] }
0x101a   :  { %6375 = vxpose.xlu1.b32.cont [3/16] (narrow) %v12666_v59, 8 }
0x101b   :  { %v6418_v16 = vpop.permute.xlu1 %6417 }
0x101c   :  { %v6408_v2 = vpop.permute.xlu0 %6407 }
0x101e   :  { %6376 = vxpose.xlu1.b32.cont [4/16] (narrow) %v12672_v23, 8 }
0x101f   :  { %v6413_v13 = vpop.permute.xlu1 %6412 }
0x1020   :  { %v6423_v35 = vpop.permute.xlu0 %6422 }
0x1022   :  { %6377 = vxpose.xlu1.b32.cont [5/16] (narrow) %v6318_v53, 8 }
0x1026   :  { %6378 = vxpose.xlu1.b32.cont [6/16] (narrow) %v6321_v61, 8 }
0x102a   :  { %6379 = vxpose.xlu1.b32.cont [7/16] (narrow) %v12680_v54, 8  ;;  %v13587_v54 = vld [vmem:[#allocation59_spill] sm:$0xff] }
0x102e   :  { %6380 = vxpose.xlu1.b32.cont [8/16] (narrow) %v7691_v28, 8 }
0x1032   :  { %6381 = vxpose.xlu1.b32.cont [9/16] (narrow) %v6334_v8, 8 }
0x1033   :  { %v6438_v7 = vpop.permute.xlu1 %6437 }
0x1035   :  { %v6443_v46 = vpop.permute.xlu0 %6442 }
0x1036   :  { %6382 = vxpose.xlu1.b32.cont [10/16] (narrow) %v6337_v60, 8 }
0x1037   :  { %v6428_v34 = vpop.permute.xlu1 %6427 }
0x1039   :  { %v6433_v0 = vpop.permute.xlu0 %6432 }
0x103a   :  { %6383 = vxpose.xlu1.b32.cont [11/16] (narrow) %v7694_v51, 8  ;;  %v13589_v51 = vld [vmem:[#allocation65_spill] sm:$0xff] }
0x103e   :  { %6384 = vxpose.xlu1.b32.cont [12/16] (narrow) %v7695_v12, 8 }
0x1042   :  { %6385 = vxpose.xlu1.b32.cont [13/16] (narrow) %v6350_v11, 8 }
0x1046   :  { %6386 = vxpose.xlu1.b32.cont [14/16] (narrow) %v6353_v32, 8 }
0x104a   :  { %6387 = vxpose.xlu1.b32.cont [15/16] (narrow) %v7698_v5, 8 }
0x104b   :  { %v6458_v57 = vpop.permute.xlu1 %6457 }
0x104d   :  { %v6463_v55 = vpop.permute.xlu0 %6462 }
0x104e   :  { %6388 = vxpose.xlu1.b32.end [16/16] (narrow) %v7699_v49, 8  ;;  %v13592_v49 = vld [vmem:[#allocation71_spill] sm:$0xff] }
0x104f   :  { %v6448_v63 = vpop.permute.xlu1 %6447 }
0x1051   :  { %v6453_v25 = vpop.permute.xlu0 %6452 }
0x1064   :  { %v12694_v22 = vpop.permute.xlu1 %6477 }
0x1068   :  { %v12696_v4 = vpop.permute.xlu1 %6467 }
0x1092   :  { %v6389_v33 = vpop.trf.xlu1 }
0x1093   :  { %v12699_v3 = vrot.slane %v6389_v33, %v13584_v47 }
0x1095   :  { %v6489_v27 = vadd.f32 %v12699_v3, %v6408_v2  ;;  %v6490_v20 = vadd.f32 %v12699_v3, %v6413_v13  ;;  %v6491_v45 = vadd.f32 %v12699_v3, %v6418_v16  ;;  %v6492_v29 = vadd.f32 %v12699_v3, %v6423_v35 }
0x1096   :  { %v6495_v21 = vadd.f32 %v12699_v3, %v6438_v7  ;;  %v6493_v28 = vadd.f32 %v12699_v3, %v6428_v34  ;;  %v6496_v37 = vadd.f32 %v12699_v3, %v6443_v46  ;;  %v6494_v12 = vadd.f32 %v12699_v3, %v6433_v0  ;;  %v13599_v46 = vld [vmem:[#allocation87_spill] sm:$0xff] }
0x1097   :  { %vm6505_vm0 = vcmp.gt.f32.partialorder %v6489_v27, 0.0  ;;  %v6521_v24 = vmul.f32 0.2, %v6489_v27  ;;  %v6522_v14 = vmul.f32 0.2, %v6490_v20  ;;  %vm6506_vm1 = vcmp.gt.f32.partialorder %v6490_v20, 0.0 }
0x1098   :  { %v6523_v38 = vmul.f32 0.2, %v6491_v45  ;;  %vm6507_vm13 = vcmp.gt.f32.partialorder %v6491_v45, 0.0  ;;  %v6524_v52 = vmul.f32 0.2, %v6492_v29  ;;  %vm6508_vm14 = vcmp.gt.f32.partialorder %v6492_v29, 0.0 }
0x1099   :  { %v6537_v59 = vsel %vm6505_vm0, %v6489_v27, %v6521_v24  ;;  %v6538_v23 = vsel %vm6506_vm1, %v6490_v20, %v6522_v14  ;;  %v6527_v42 = vmul.f32 0.2, %v6495_v21  ;;  %vm6511_vm15 = vcmp.gt.f32.partialorder %v6495_v21, 0.0  ;;  %v6483_v27 = vpop.permute.xlu0 %6482  ;;  %v13595_v20 = vld [vmem:[#allocation77_spill] sm:$0xff] }
0x109a   :  { %v12705_v18 = vadd.f32 %v6537_v59, %v13585_v43  ;;  %v12710_v10 = vadd.f32 %v6538_v23, %v13586_v36  ;;  %v6539_v17 = vsel %vm6507_vm13, %v6491_v45, %v6523_v38  ;;  %v6540_v53 = vsel %vm6508_vm14, %v6492_v29, %v6524_v52  ;;  %v13596_v43 = vld [vmem:[#allocation80_spill] sm:$0xff]  ;;  %v13597_v36 = vld [vmem:[#allocation83_spill] sm:$0xff] }
0x109b   :  { %v12715_v31 = vadd.f32 %v6539_v17, %v13587_v54  ;;  %v12720_v61 = vadd.f32 %v6540_v53, %v13588_v26  ;;  %v6543_v6 = vsel %vm6511_vm15, %v6495_v21, %v6527_v42  ;;  %v6525_v1 = vmul.f32 0.2, %v6493_v28  ;;  %v13598_v54 = vld [vmem:[#allocation88_spill] sm:$0xff] }
0x109c   :  { %6569 = vmax.xlane.f32.xlu0 %v12705_v18  ;;  %vm6509_vm6 = vcmp.gt.f32.partialorder %v6493_v28, 0.0  ;;  %v12725_v30 = vadd.f32 %v6543_v6, %v13589_v51  ;;  %v6528_v39 = vmul.f32 0.2, %v6496_v37  ;;  %vm6512_vm7 = vcmp.gt.f32.partialorder %v6496_v37, 0.0 }
0x109d   :  { %v6541_v8 = vsel %vm6509_vm6, %v6493_v28, %v6525_v1  ;;  %v6526_v50 = vmul.f32 0.2, %v6494_v12  ;;  %v6499_v41 = vadd.f32 %v12699_v3, %v6458_v57  ;;  %vm6510_vm8 = vcmp.gt.f32.partialorder %v6494_v12, 0.0  ;;  %v13594_v57 = vld [vmem:[#allocation86_spill] sm:$0xff]  ;;  %v6473_v35 = vpop.permute.xlu0 %6472  ;;  %v13600_v1 = vld [vmem:[#allocation85_spill] sm:$0xff] }
0x109e   :  { %v12730_v56 = vadd.f32 %v6541_v8, %v13590_v19  ;;  %v6544_v60 = vsel %vm6512_vm7, %v6496_v37, %v6528_v39  ;;  %v6497_v11 = vadd.f32 %v12699_v3, %v6448_v63  ;;  %v6500_v58 = vadd.f32 %v12699_v3, %v6463_v55 }
0x109f   :  { %v12735_v44 = vadd.f32 %v6544_v60, %v13591_v62  ;;  %v6542_v5 = vsel %vm6510_vm8, %v6494_v12, %v6526_v50  ;;  %v6531_v15 = vmul.f32 0.2, %v6499_v41  ;;  %vm6515_vm9 = vcmp.gt.f32.partialorder %v6499_v41, 0.0 }
0x10a0   :  { %6571 = vmax.xlane.f32.xlu0 %v12710_v10  ;;  %v12740_v9 = vadd.f32 %v6542_v5, %v13592_v49  ;;  %v6529_v32 = vmul.f32 0.2, %v6497_v11  ;;  %vm6513_vm10 = vcmp.gt.f32.partialorder %v6497_v11, 0.0  ;;  %v6532_v7 = vmul.f32 0.2, %v6500_v58 }
0x10a1   :  { %v6547_v48 = vsel %vm6515_vm9, %v6499_v41, %v6531_v15  ;;  %v6498_v34 = vadd.f32 %v12699_v3, %v6453_v25  ;;  %vm6516_vm11 = vcmp.gt.f32.partialorder %v6500_v58, 0.0  ;;  %v6503_v2 = vadd.f32 %v12699_v3, %v12694_v22 }
0x10a2   :  { %v12745_v16 = vadd.f32 %v6547_v48, %v13593_v40  ;;  %v6545_v13 = vsel %vm6513_vm10, %v6497_v11, %v6529_v32  ;;  %v6548_v33 = vsel %vm6516_vm11, %v6500_v58, %v6532_v7  ;;  %v6501_v59 = vadd.f32 %v12699_v3, %v12696_v4 }
0x10a3   :  { %v12750_v63 = vadd.f32 %v6545_v13, %v13594_v57  ;;  %v6530_v47 = vmul.f32 0.2, %v6498_v34  ;;  %vm6514_vm2 = vcmp.gt.f32.partialorder %v6498_v34, 0.0  ;;  %v12756_v24 = vadd.f32 %v6548_v33, %v13595_v20 }
0x10a4   :  { %6573 = vmax.xlane.f32.xlu0 %v12715_v31  ;;  %v6535_v45 = vmul.f32 0.2, %v6503_v2  ;;  %vm6519_vm3 = vcmp.gt.f32.partialorder %v6503_v2, 0.0  ;;  %v6533_v38 = vmul.f32 0.2, %v6501_v59  ;;  %v6502_v29 = vadd.f32 %v12699_v3, %v6473_v35 }
0x10a5   :  { %v6546_v14 = vsel %vm6514_vm2, %v6498_v34, %v6530_v47  ;;  %vm6517_vm4 = vcmp.gt.f32.partialorder %v6501_v59, 0.0  ;;  %v6504_v4 = vadd.f32 %v12699_v3, %v6483_v27 }
0x10a6   :  { %v12762_v23 = vadd.f32 %v6546_v14, %v13596_v43  ;;  %v6551_v22 = vsel %vm6519_vm3, %v6503_v2, %v6535_v45  ;;  %v6549_v52 = vsel %vm6517_vm4, %v6501_v59, %v6533_v38  ;;  %v6534_v21 = vmul.f32 0.2, %v6502_v29 }
0x10a7   :  { %v12767_v17 = vadd.f32 %v6551_v22, %v13597_v36  ;;  %vm6518_vm5 = vcmp.gt.f32.partialorder %v6502_v29, 0.0  ;;  %v12772_v53 = vadd.f32 %v6549_v52, %v13598_v54  ;;  %v6536_v28 = vmul.f32 0.2, %v6504_v4 }
0x10a8   :  { %6575 = vmax.xlane.f32.xlu0 %v12720_v61  ;;  %v6550_v42 = vsel %vm6518_vm5, %v6502_v29, %v6534_v21  ;;  %vm6520_vm0 = vcmp.gt.f32.partialorder %v6504_v4, 0.0 }
0x10a9   :  { %v12776_v26 = vadd.f32 %v6550_v42, %v13599_v46  ;;  %v6552_v6 = vsel %vm6520_vm0, %v6504_v4, %v6536_v28 }
0x10aa   :  { %v12780_v37 = vadd.f32 %v6552_v6, %v13600_v1 }
0x10ac   :  { %6581 = vmax.xlane.f32.xlu0 %v12725_v30 }
0x10b0   :  { %6577 = vmax.xlane.f32.xlu0 %v12730_v56 }
0x10b4   :  { %6583 = vmax.xlane.f32.xlu0 %v12735_v44 }
0x10b8   :  { %6579 = vmax.xlane.f32.xlu0 %v12740_v9 }
0x10bc   :  { %6589 = vmax.xlane.f32.xlu0 %v12745_v16 }
0x10c0   :  { %6585 = vmax.xlane.f32.xlu0 %v12750_v63 }
0x10c4   :  { %6591 = vmax.xlane.f32.xlu0 %v12756_v24 }
0x10c8   :  { %6587 = vmax.xlane.f32.xlu0 %v12762_v23 }
0x10cc   :  { %6597 = vmax.xlane.f32.xlu0 %v12767_v17 }
0x10d0   :  { %6593 = vmax.xlane.f32.xlu0 %v12772_v53 }
0x10d4   :  { %6595 = vmax.xlane.f32.xlu0 %v12776_v26 }
0x10d8   :  { %6599 = vmax.xlane.f32.xlu0 %v12780_v37 }
0x1129   :  { %v6570_v3 = vpop.xlane.xlu0 %6569 }
0x112a   :  { %v6601_v0 = vsub.f32 %v12705_v18, %v6570_v3 }
0x112c   :  { %v6617_v51 = vmul.f32 1.442695, %v6601_v0 }
0x112d   :  { %v6572_v8 = vpop.xlane.xlu0 %6571 }
0x112e   :  { %v6602_v39 = vsub.f32 %v12710_v10, %v6572_v8  ;;  %8359 = vpow2.f32 %v6617_v51 }
0x1130   :  { %v6619_v12 = vmul.f32 1.442695, %v6602_v39 }
0x1131   :  { %v6574_v19 = vpop.xlane.xlu0 %6573 }
0x1132   :  { %8361 = vpow2.f32 %v6619_v12  ;;  %v6603_v60 = vsub.f32 %v12715_v31, %v6574_v19 }
0x1134   :  { %v6621_v50 = vmul.f32 1.442695, %v6603_v60 }
0x1135   :  { %v6576_v41 = vpop.xlane.xlu0 %6575 }
0x1136   :  { %v6604_v62 = vsub.f32 %v12720_v61, %v6576_v41  ;;  %8363 = vpow2.f32 %v6621_v50 }
0x1138   :  { %v6623_v5 = vmul.f32 1.442695, %v6604_v62  ;;  %v8360_v11 = vpop.eup %8359 }
0x1139   :  { %v6582_v15 = vpop.xlane.xlu0 %6581 }
0x113a   :  { %8365 = vpow2.f32 %v6623_v5  ;;  %v6607_v31 = vsub.f32 %v12725_v30, %v6582_v15 }
0x113c   :  { %v8362_v18 = vpop.eup %8361  ;;  %v6629_v57 = vmul.f32 1.442695, %v6607_v31 }
0x113d   :  { %v6578_v55 = vpop.xlane.xlu0 %6577  ;;  %v6649_v49 = vpack.c.bf16 %v8362_v18, %v8360_v11 }
0x113e   :  { %v6605_v10 = vsub.f32 %v12730_v56, %v6578_v55 }
0x113f   :  { %7716 = vmatprep.mubr.bf16.mxu1 %v6649_v49 }
0x1140   :  { %v8364_v58 = vpop.eup %8363  ;;  %v6625_v40 = vmul.f32 1.442695, %v6605_v10 }
0x1141   :  { %v6584_v48 = vpop.xlane.xlu0 %6583 }
0x1142   :  { %v6608_v32 = vsub.f32 %v12735_v44, %v6584_v48  ;;  %8367 = vpow2.f32 %v6625_v40 }
0x1144   :  { %v8366_v25 = vpop.eup %8365  ;;  %v6631_v61 = vmul.f32 1.442695, %v6608_v32 }
0x1145   :  { %v6580_v13 = vpop.xlane.xlu0 %6579  ;;  %v6650_v7 = vpack.c.bf16 %v8366_v25, %v8364_v58 }
0x1146   :  { %v6606_v34 = vsub.f32 %v12740_v9, %v6580_v13  ;;  %8369 = vpow2.f32 %v6631_v61 }
0x1147   :  { %7717 = vmatmul.mubr.bf16.vlgmr.msra.gmra.mrb[112].mxu1 %v6650_v7 }
0x1148   :  { %v6627_v33 = vmul.f32 1.442695, %v6606_v34 }
0x1149   :  { %v6590_v47 = vpop.xlane.xlu0 %6589 }
0x114a   :  { %8371 = vpow2.f32 %v6627_v33  ;;  %v6611_v14 = vsub.f32 %v12745_v16, %v6590_v47 }
0x114b   :  { %8373 = vpow2.f32 %v6629_v57 }
0x114c   :  { %v8368_v30 = vpop.eup %8367  ;;  %v6637_v36 = vmul.f32 1.442695, %v6611_v14 }
0x114d   :  { %v6586_v56 = vpop.xlane.xlu0 %6585 }
0x114e   :  { %v6609_v44 = vsub.f32 %v12750_v63, %v6586_v56 }
0x1150   :  { %v8370_v20 = vpop.eup %8369  ;;  %v6633_v9 = vmul.f32 1.442695, %v6609_v44 }
0x1151   :  { %v6592_v2 = vpop.xlane.xlu0 %6591 }
0x1152   :  { %v6612_v27 = vsub.f32 %v12756_v24, %v6592_v2  ;;  %8375 = vpow2.f32 %v6633_v9 }
0x1154   :  { %v8372_v45 = vpop.eup %8371  ;;  %v6639_v35 = vmul.f32 1.442695, %v6612_v27 }
0x1155   :  { %v8374_v59 = vpop.eup %8373  ;;  %v6588_v43 = vpop.xlane.xlu0 %6587  ;;  %v6651_v22 = vpack.c.bf16 %v8372_v45, %v8368_v30 }
0x1156   :  { %v6610_v38 = vsub.f32 %v12762_v23, %v6588_v43  ;;  %v6652_v29 = vpack.c.bf16 %v8370_v20, %v8374_v59  ;;  %8377 = vpow2.f32 %v6639_v35  ;;  %v12863_v59 = vld [vmem:[#allocation2] ss:$0 sm:$0xff] }
0x1157   :  { %7720 = vmatprep.mubr.bf16.mxu1 %v6651_v22 }
0x1158   :  { %v6635_v63 = vmul.f32 1.442695, %v6610_v38  ;;  %7721 = vmatmul.mubr.bf16.gmra.mrb[116].mxu1 %v6652_v29 }
0x1159   :  { %v6598_v52 = vpop.xlane.xlu0 %6597 }
0x115a   :  { %8379 = vpow2.f32 %v6635_v63  ;;  %v6615_v21 = vsub.f32 %v12767_v17, %v6598_v52 }
0x115b   :  { %8381 = vpow2.f32 %v6637_v36 }
0x115c   :  { %v8376_v42 = vpop.eup %8375  ;;  %v6645_v3 = vmul.f32 1.442695, %v6615_v21 }
0x115d   :  { %v6594_v24 = vpop.xlane.xlu0 %6593 }
0x115e   :  { %v6613_v16 = vsub.f32 %v12772_v53, %v6594_v24 }
0x1160   :  { %v6641_v4 = vmul.f32 1.442695, %v6613_v16  ;;  %v8378_v28 = vpop.eup %8377 }
0x1161   :  { %v6596_v54 = vpop.xlane.xlu0 %6595 }
0x1162   :  { %v6614_v23 = vsub.f32 %v12776_v26, %v6596_v54  ;;  %8383 = vpow2.f32 %v6641_v4 }
0x1164   :  { %v8380_v46 = vpop.eup %8379  ;;  %v6643_v6 = vmul.f32 1.442695, %v6614_v23 }
0x1165   :  { %v8382_v1 = vpop.eup %8381  ;;  %v6600_v0 = vpop.xlane.xlu0 %6599  ;;  %v6653_v51 = vpack.c.bf16 %v8380_v46, %v8376_v42 }
0x1166   :  { %8385 = vpow2.f32 %v6643_v6  ;;  %v6616_v8 = vsub.f32 %v12780_v37, %v6600_v0  ;;  %v6654_v39 = vpack.c.bf16 %v8378_v28, %v8382_v1 }
0x1167   :  { %7724 = vmatprep.mubr.bf16.mxu1 %v6653_v51  ;;  %8387 = vpow2.f32 %v6645_v3 }
0x1168   :  { %v6647_v53 = vmul.f32 1.442695, %v6616_v8  ;;  %7725 = vmatmul.mubr.bf16.gmra.mrb[120].mxu1 %v6654_v39 }
0x116a   :  { %8389 = vpow2.f32 %v6647_v53 }
0x116c   :  { %v8384_v17 = vpop.eup %8383 }
0x1170   :  { %v8386_v12 = vpop.eup %8385 }
0x1171   :  { %v6655_v26 = vpack.c.bf16 %v8386_v12, %v8384_v17  ;;  %v8388_v19 = vpop.eup %8387 }
0x1173   :  { %7728 = vmatprep.mubr.bf16.mxu1 %v6655_v26 }
0x1174   :  { %v8390_v60 = vpop.eup %8389 }
0x1175   :  { %v6656_v50 = vpack.c.bf16 %v8390_v60, %v8388_v19 }
0x1177   :  { %7729 = vmatmul.mubr.bf16.gmra.mrb[124].mxu1 %v6656_v50 }
0x121a   :  { %v12799_v41 = vpop.f32.mrb[112].mxu1 }
0x121b   :  { %8391 = vrcp.f32 %v12799_v41  ;;  %v12802_v62 = vpop.f32.mrb[113].mxu1 }
0x121c   :  { %v12804_v37 = vpop.f32.mrb[114].mxu1 }
0x121d   :  { %v12806_v5 = vpop.f32.mrb[115].mxu1 }
0x121e   :  { %8393 = vrcp.f32 %v12806_v5 }
0x121f   :  { %8395 = vrcp.f32 %v12802_v62 }
0x1220   :  { %8397 = vrcp.f32 %v12804_v37 }
0x1225   :  { %v8392_v15 = vpop.eup %8391 }
0x1226   :  { %6814 = vrot.lane.b32.xlu0 %v8392_v15, %s8755_s30 }
0x1228   :  { %v8394_v11 = vpop.eup %8393 }
0x1229   :  { %v8396_v18 = vpop.eup %8395  ;;  %6812 = vrot.lane.b32.xlu1 %v8394_v11, %s8755_s30 }
0x122a   :  { %6810 = vrot.lane.b32.xlu0 %v8396_v18, %s8755_s30  ;;  %v8398_v10 = vpop.eup %8397 }
0x122b   :  { %v12814_v55 = vpop.f32.mrb[116].mxu1 }
0x122c   :  { %8399 = vrcp.f32 %v12814_v55  ;;  %v12817_v49 = vpop.f32.mrb[117].mxu1 }
0x122d   :  { %8401 = vrcp.f32 %v12817_v49  ;;  %v12820_v48 = vpop.f32.mrb[118].mxu1 }
0x122e   :  { %6816 = vrot.lane.b32.xlu0 %v8398_v10, %s8755_s30  ;;  %v12823_v32 = vpop.f32.mrb[119].mxu1  ;;  %8403 = vrcp.f32 %v12820_v48 }
0x122f   :  { %8405 = vrcp.f32 %v12823_v32 }
0x1236   :  { %v8400_v58 = vpop.eup %8399 }
0x1237   :  { %v8402_v31 = vpop.eup %8401  ;;  %6822 = vrot.lane.b32.xlu1 %v8400_v58, %s8755_s30 }
0x1238   :  { %6818 = vrot.lane.b32.xlu0 %v8402_v31, %s8755_s30  ;;  %v8404_v25 = vpop.eup %8403 }
0x1239   :  { %v8406_v34 = vpop.eup %8405 }
0x123b   :  { %v12829_v40 = vpop.f32.mrb[120].mxu1 }
0x123c   :  { %8407 = vrcp.f32 %v12829_v40  ;;  %6824 = vrot.lane.b32.xlu0 %v8404_v25, %s8755_s30  ;;  %v12833_v61 = vpop.f32.mrb[121].mxu1 }
0x123d   :  { %v12835_v13 = vpop.f32.mrb[122].mxu1 }
0x123e   :  { %8409 = vrcp.f32 %v12835_v13  ;;  %v12838_v7 = vpop.f32.mrb[123].mxu1 }
0x123f   :  { %8411 = vrcp.f32 %v12833_v61 }
0x1240   :  { %6820 = vrot.lane.b32.xlu0 %v8406_v34, %s8755_s30  ;;  %8413 = vrcp.f32 %v12838_v7 }
0x1246   :  { %v8408_v57 = vpop.eup %8407 }
0x1247   :  { %6830 = vrot.lane.b32.xlu1 %v8408_v57, %s8755_s30 }
0x1248   :  { %v8410_v33 = vpop.eup %8409 }
0x1249   :  { %6832 = vrot.lane.b32.xlu0 %v8410_v33, %s8755_s30  ;;  %v8412_v47 = vpop.eup %8411 }
0x124a   :  { %v12845_v56 = vpop.f32.mrb[124].mxu1  ;;  %v8414_v2 = vpop.eup %8413 }
0x124b   :  { %6826 = vrot.lane.b32.xlu1 %v8412_v47, %s8755_s30  ;;  %v12848_v44 = vpop.f32.mrb[125].mxu1 }
0x124c   :  { %8415 = vrcp.f32 %v12848_v44  ;;  %v12851_v30 = vpop.f32.mrb[126].mxu1 }
0x124d   :  { %6828 = vrot.lane.b32.xlu0 %v8414_v2, %s8755_s30  ;;  %v12854_v27 = vpop.f32.mrb[127].mxu1 }
0x124e   :  { %8417 = vrcp.f32 %v12854_v27 }
0x124f   :  { %8419 = vrcp.f32 %v12845_v56 }
0x1250   :  { %8421 = vrcp.f32 %v12851_v30 }
0x1256   :  { %v8416_v20 = vpop.eup %8415 }
0x1257   :  { %6834 = vrot.lane.b32.xlu1 %v8416_v20, %s8755_s30 }
0x1258   :  { %v8418_v14 = vpop.eup %8417 }
0x1259   :  { %6836 = vrot.lane.b32.xlu0 %v8418_v14, %s8755_s30  ;;  %v8420_v45 = vpop.eup %8419 }
0x125a   :  { %v8422_v9 = vpop.eup %8421 }
0x125b   :  { %6838 = vrot.lane.b32.xlu1 %v8420_v45, %s8755_s30 }
0x125d   :  { %6840 = vrot.lane.b32.xlu0 %v8422_v9, %s8755_s30 }
0x1298   :  { %v6815_v35 = vpop.permute.xlu0 %6814 }
0x1299   :  { %v6860_v43 = vmul.f32 %v12799_v41, %v6815_v35 }
0x129b   :  { %v6883_v22 = vadd.f32 %v12863_v59, %v6860_v43  ;;  %v6813_v38 = vpop.permute.xlu1 %6812 }
0x129c   :  { %v6859_v29 = vmul.f32 %v6813_v38, %v12806_v5  ;;  %v6811_v36 = vpop.permute.xlu0 %6810 }
0x129d   :  { %6899 = vst.msk [vmem:[#allocation23 + $0x10] sm:$0xff] %vm2547_vm12, %v6883_v22  ;;  %v6858_v63 = vmul.f32 %v6811_v36, %v12802_v62 }
0x129e   :  { %v6882_v52 = vadd.f32 %v12863_v59, %v6859_v29 }
0x129f   :  { %v6881_v24 = vadd.f32 %v12863_v59, %v6858_v63 }
0x12a0   :  { %6898 = vst.msk [vmem:[#allocation23 + $0x8] sm:$0xff] %vm2547_vm12, %v6882_v52  ;;  %v6817_v16 = vpop.permute.xlu0 %6816 }
0x12a1   :  { %6897 = vst.msk [vmem:[#allocation23] sm:$0xff] %vm2547_vm12, %v6881_v24  ;;  %v6861_v21 = vmul.f32 %v12804_v37, %v6817_v16 }
0x12a3   :  { %v6884_v4 = vadd.f32 %v12863_v59, %v6861_v21 }
0x12a5   :  { %6900 = vst.msk [vmem:[#allocation23 + $0x18] sm:$0xff] %vm2547_vm12, %v6884_v4 }
0x12a9   :  { %v6823_v54 = vpop.permute.xlu1 %6822 }
0x12aa   :  { %v6864_v42 = vmul.f32 %v12814_v55, %v6823_v54  ;;  %v6819_v23 = vpop.permute.xlu0 %6818 }
0x12ab   :  { %v6862_v28 = vmul.f32 %v6819_v23, %v12817_v49 }
0x12ac   :  { %v6887_v46 = vadd.f32 %v12863_v59, %v6864_v42 }
0x12ad   :  { %v6885_v6 = vadd.f32 %v12863_v59, %v6862_v28 }
0x12ae   :  { %6903 = vst.msk [vmem:[#allocation23 + $0x30] sm:$0xff] %vm2547_vm12, %v6887_v46  ;;  %v6825_v1 = vpop.permute.xlu0 %6824 }
0x12af   :  { %6901 = vst.msk [vmem:[#allocation23 + $0x20] sm:$0xff] %vm2547_vm12, %v6885_v6  ;;  %v6865_v3 = vmul.f32 %v12820_v48, %v6825_v1 }
0x12b1   :  { %v6888_v0 = vadd.f32 %v12863_v59, %v6865_v3 }
0x12b2   :  { %v6821_v51 = vpop.permute.xlu0 %6820 }
0x12b3   :  { %6904 = vst.msk [vmem:[#allocation23 + $0x38] sm:$0xff] %vm2547_vm12, %v6888_v0  ;;  %v6863_v8 = vmul.f32 %v6821_v51, %v12823_v32 }
0x12b5   :  { %v6886_v39 = vadd.f32 %v12863_v59, %v6863_v8 }
0x12b7   :  { %6902 = vst.msk [vmem:[#allocation23 + $0x28] sm:$0xff] %vm2547_vm12, %v6886_v39 }
0x12b9   :  { %v6831_v53 = vpop.permute.xlu1 %6830 }
0x12ba   :  { %v6868_v17 = vmul.f32 %v12829_v40, %v6831_v53 }
0x12bb   :  { %v6833_v12 = vpop.permute.xlu0 %6832 }
0x12bc   :  { %v6891_v26 = vadd.f32 %v12863_v59, %v6868_v17  ;;  %v6869_v19 = vmul.f32 %v12835_v13, %v6833_v12 }
0x12bd   :  { %v6827_v60 = vpop.permute.xlu1 %6826 }
0x12be   :  { %6907 = vst.msk [vmem:[#allocation23 + $0x50] sm:$0xff] %vm2547_vm12, %v6891_v26  ;;  %v6892_v50 = vadd.f32 %v12863_v59, %v6869_v19  ;;  %v6866_v41 = vmul.f32 %v6827_v60, %v12833_v61 }
0x12bf   :  { %v6829_v62 = vpop.permute.xlu0 %6828 }
0x12c0   :  { %6908 = vst.msk [vmem:[#allocation23 + $0x58] sm:$0xff] %vm2547_vm12, %v6892_v50  ;;  %v6889_v37 = vadd.f32 %v12863_v59, %v6866_v41  ;;  %v6867_v5 = vmul.f32 %v6829_v62, %v12838_v7 }
0x12c2   :  { %6905 = vst.msk [vmem:[#allocation23 + $0x40] sm:$0xff] %vm2547_vm12, %v6889_v37  ;;  %v6890_v15 = vadd.f32 %v12863_v59, %v6867_v5 }
0x12c4   :  { %6906 = vst.msk [vmem:[#allocation23 + $0x48] sm:$0xff] %vm2547_vm12, %v6890_v15 }
0x12c9   :  { %v6835_v11 = vpop.permute.xlu1 %6834 }
0x12ca   :  { %v6870_v18 = vmul.f32 %v6835_v11, %v12848_v44 }
0x12cb   :  { %v6837_v55 = vpop.permute.xlu0 %6836 }
0x12cc   :  { %v6893_v49 = vadd.f32 %v12863_v59, %v6870_v18  ;;  %v6871_v10 = vmul.f32 %v6837_v55, %v12854_v27 }
0x12cd   :  { %v6839_v48 = vpop.permute.xlu1 %6838 }
0x12ce   :  { %6909 = vst.msk [vmem:[#allocation23 + $0x60] sm:$0xff] %vm2547_vm12, %v6893_v49  ;;  %v6894_v32 = vadd.f32 %v12863_v59, %v6871_v10  ;;  %v6872_v58 = vmul.f32 %v12845_v56, %v6839_v48 }
0x12cf   :  { %v6841_v31 = vpop.permute.xlu0 %6840 }
0x12d0   :  { %6910 = vst.msk [vmem:[#allocation23 + $0x68] sm:$0xff] %vm2547_vm12, %v6894_v32  ;;  %v6895_v25 = vadd.f32 %v12863_v59, %v6872_v58  ;;  %v6873_v40 = vmul.f32 %v12851_v30, %v6841_v31 }
0x12d2   :  { %6911 = vst.msk [vmem:[#allocation23 + $0x70] sm:$0xff] %vm2547_vm12, %v6895_v25  ;;  %v6896_v61 = vadd.f32 %v12863_v59, %v6873_v40 }
0x12d4   :  { %6912 = vst.msk [vmem:[#allocation23 + $0x78] sm:$0xff] %vm2547_vm12, %v6896_v61 }
0x12d5   :  { %8698 = shalt.err (!%p8695_p2)
}
0x12d6   :  { %s8699_s15 = scalar_lea.hbm %s12941_s13, 2048 }
0x12d7   :  { %p8700_p3 = scmp.ne.s32.totalorder %s12941_s13, %s8699_s15  ;;  %p8703_p4 = scmp.lt.u32.totalorder %s8699_s15, %s12941_s13 }
0x12d9   :  { %p8705_p5 = pnand %p8703_p4, %p8700_p3 }
0x12db   :  { %8708 = shalt.err (!%p8705_p5)
}
0x12dc   :  { %6924 = dma.vmem_to_hbm [thread:$0]  %s6919_s19, 2048, %s12941_s13, [#allocation5], %s8727_s21, %s8727_s21, %s8728_s22  }
0x12dd   :  { %8723 = dma.done.wait [#allocation5], 2048  }
0x12de   :  { %8724 = vsyncadd [#allocation5], 4294965248 }
0x12df   :  { %6928 = vsyncpa [#allocation4], 1 }
0x12e0   :  { %6929 = vsyncpa [#allocation7], 1 }
0x12e1   :  { %6930 = vsyncpa [#allocation10], 1 }
0x12e2   :  { %6931 = vsyncpa [#allocation13], 1 }
0x12e3   :  { %6932 = vsyncpa [#allocation16], 1 }
0x12e4   :  { %6933 = vsyncpa [#allocation19], 1 }
0x12e5   :  { %6934 = vsyncpa [#allocation22], 1 }
0x12e6   :  { %6935 = vsyncpa [#allocation5], 1 }

</bundles_post_ra>
